<compile_context>
chip_gen: v7x
topology: tpu7x:2x2x1
jax: 0.10.0
libtpu: 0.0.40
codegen_flags: <defaults>
</compile_context>

<pallas_src>
import functools

import jax
import jax.numpy as jnp
from jax import lax
from jax.experimental import pallas as pl
from jax.experimental.pallas import tpu as pltpu


# bf16 MXU operands (f32 accumulation / gate math stays f32). Set to
# jnp.float32 for bit-exact-ish comparisons on v5e.
MATMUL_DTYPE = jnp.bfloat16

LANE = 128


def _round_up(x, m):
    return (x + m - 1) // m * m


def _sublane_for(dtype):
    # bf16 native tile is (16, 128); f32 is (8, 128).
    return 16 if jnp.dtype(dtype).itemsize == 2 else 8


def _vmem_limit_bytes():
    """Per-generation scoped VMEM budget (None -> compiler default)."""
    try:
        kind = jax.devices()[0].device_kind.lower()
    except Exception:
        return None
    if "v7" in kind:
        return 48 * 1024 * 1024        # 64 MiB physical per TC
    if "v6" in kind or "v5" in kind:
        return 96 * 1024 * 1024        # 128 MiB physical
    return None


def _pick_batch_block(Bp, sublane):
    """Largest sublane-multiple divisor of Bp, capped at 64 rows, forcing
    >=2 blocks when possible so the parallel batch axis can span 2 TCs."""
    cap = 64
    if Bp >= 2 * sublane:
        cap = min(cap, Bp // 2)
    best = sublane
    b = sublane
    while b <= Bp:
        if Bp % b == 0 and b <= cap:
            best = b
        b += sublane
    return best


def _choose_t_blk(T, b_blk, Dp, Hp, L, Op, budget_bytes, mm_itemsize):
    """Largest T chunk whose per-chunk VMEM (x double-buffer + g_scr +
    seq_scr) plus fixed cost (weights, h/c state, out) fits the budget."""
    per_t = b_blk * (2 * Dp * mm_itemsize      # x chunk, double-buffered
                     + 4 * Hp * 4              # g_scr (f32)
                     + Hp * mm_itemsize)       # seq_scr (matmul dtype)
    fixed = (Dp * 4 * Hp * mm_itemsize                       # wih layer 0
             + max(L - 1, 1) * Hp * 4 * Hp * mm_itemsize     # wih layers 1..
             + L * Hp * 4 * Hp * mm_itemsize                 # whh
             + L * 4 * Hp * 4                                # biases (f32)
             + Hp * Op * mm_itemsize + Op * 4                # fc
             + 2 * L * b_blk * Hp * 4                        # h/c state
             + 2 * b_blk * Op * 4)                           # out buffers
    avail = budget_bytes - fixed - (4 << 20)                 # headroom
    t_cap = max(1, avail // per_t)
    return int(max(1, min(T, t_cap, 256)))


# ---------------------------------------------------------------------------
# Fused kernel: all LSTM layers + FC head
# ---------------------------------------------------------------------------
def _fused_lstm_fc_kernel(x_ref, wih0_ref, wihr_ref, whh_ref, b_ref,
                          wfc_ref, bfc_ref, out_ref,
                          h_scr, c_scr, g_scr, seq_scr,
                          *, hidden_pad, num_layers, t_blk, seq_len, unroll):
    """One (batch block, T chunk) grid step.

    x_ref    : (t_blk, b_blk, Dp)   time-major input chunk (matmul dtype)
    wih0_ref : (Dp, 4*Hp)           layer-0 W_ih^T, gate order [i,f,o,g]
    wihr_ref : (max(L-1,1), Hp, 4*Hp) W_ih^T of layers 1..L-1
    whh_ref  : (L, Hp, 4*Hp)        W_hh^T
    b_ref    : (L, 1, 4*Hp)         b_ih + b_hh (f32)
    wfc_ref  : (Hp, Op), bfc_ref: (1, Op)
    out_ref  : (b_blk, Op) f32      FC output (written at the last T chunk)
    h_scr/c_scr : (L, b_blk, Hp) f32  recurrent state, persists across chunks
    g_scr    : (t_blk, b_blk, 4*Hp) f32  hoisted input-projection gates
    seq_scr  : (t_blk, b_blk, Hp)   hidden sequence of the current layer
    """
    Hp = hidden_pad
    tt = pl.program_id(1)

    @pl.when(tt == 0)
    def _():
        h_scr[...] = jnp.zeros_like(h_scr)
        c_scr[...] = jnp.zeros_like(c_scr)

    tb, B, D = x_ref.shape
    needs_mask = (seq_len % t_blk) != 0   # static

    for layer in range(num_layers):
        # ---- hoisted input projection: one MXU GEMM for the whole chunk ----
        if layer == 0:
            xin = x_ref[...].reshape(t_blk * B, D)
            wih = wih0_ref[...]
        else:
            xin = seq_scr[...].reshape(t_blk * B, Hp)
            wih = wihr_ref[layer - 1]
        g_scr[...] = (jnp.dot(xin, wih, preferred_element_type=jnp.float32)
                      + b_ref[layer]).reshape(t_blk, B, 4 * Hp)

        whh = whh_ref[layer]                 # hoisted weight read
        is_last_layer = layer == num_layers - 1

        def step(t, carry, whh=whh, is_last_layer=is_last_layer):
            h, c = carry                     # live in vregs, no scratch RT
            gates = g_scr[t] + jnp.dot(h.astype(whh.dtype), whh,
                                       preferred_element_type=jnp.float32)
            # gate order [i, f, o, g]: one sigmoid over a contiguous slab
            sig = jax.nn.sigmoid(gates[:, :3 * Hp])
            i_g = sig[:, 0 * Hp:1 * Hp]
            f_g = sig[:, 1 * Hp:2 * Hp]
            o_g = sig[:, 2 * Hp:3 * Hp]
            g_g = jnp.tanh(gates[:, 3 * Hp:])
            c_new = f_g * c + i_g * g_g
            h_new = o_g * jnp.tanh(c_new)
            if needs_mask:
                valid = (tt * t_blk + t) < seq_len
                c_new = jnp.where(valid, c_new, c)
                h_new = jnp.where(valid, h_new, h)
            if not is_last_layer:
                seq_scr[t] = h_new.astype(seq_scr.dtype)
            return (h_new, c_new)

        h_fin, c_fin = lax.fori_loop(0, t_blk, step,
                                     (h_scr[layer], c_scr[layer]),
                                     unroll=unroll)
        h_scr[layer] = h_fin
        c_scr[layer] = c_fin

    # fused FC head on the final timestep's hidden state of the last layer
    @pl.when(tt == pl.num_programs(1) - 1)
    def _():
        h_last = h_scr[num_layers - 1].astype(wfc_ref.dtype)
        out_ref[...] = (jnp.dot(h_last, wfc_ref[...],
                                preferred_element_type=jnp.float32)
                        + bfc_ref[...]).astype(out_ref.dtype)


# ---------------------------------------------------------------------------
# pallas_call wrapper
# ---------------------------------------------------------------------------
def _forward_impl(prepared, x, single_buffer_weights):
    dims = prepared["dims"]
    B, T, D = x.shape
    Hp, Dp, Op, L = dims["Hp"], dims["Dp"], dims["Op"], dims["L"]
    mm_dtype = prepared["wih0"].dtype
    mm_itemsize = jnp.dtype(mm_dtype).itemsize
    sublane = _sublane_for(mm_dtype)

    Bp = _round_up(max(B, sublane), sublane)
    b_blk = _pick_batch_block(Bp, sublane)

    vmem_limit = _vmem_limit_bytes()
    budget = vmem_limit if vmem_limit is not None else 32 * 1024 * 1024
    t_blk = _choose_t_blk(T, b_blk, Dp, Hp, L, Op, budget, mm_itemsize)
    n_t = pl.cdiv(T, t_blk)
    T_pad = n_t * t_blk
    unroll = max(1, min(8, t_blk))

    # Time-major + pad + cast.  The transpose fuses into the pad/cast copy
    # that is needed anyway, so it does not add an extra HBM round trip.
    x_tm = jnp.transpose(x, (1, 0, 2))
    x_tm = jnp.pad(x_tm, ((0, T_pad - T), (0, Bp - B),
                          (0, Dp - D))).astype(mm_dtype)

    Lr = max(L - 1, 1)

    def const_spec(shape):
        # grid-invariant inputs: single-buffer to save VMEM (no point
        # double-buffering a block whose index never changes)
        idx = (lambda bb, tt: (0, 0)) if len(shape) == 2 else \
              (lambda bb, tt: (0, 0, 0))
        if single_buffer_weights:
            return pl.BlockSpec(shape, idx, pipeline_mode=pl.Buffered(1))
        return pl.BlockSpec(shape, idx)

    kernel = functools.partial(
        _fused_lstm_fc_kernel, hidden_pad=Hp, num_layers=L,
        t_blk=t_blk, seq_len=T, unroll=unroll)

    grid = (Bp // b_blk, n_t)

    out = pl.pallas_call(
        kernel,
        out_shape=jax.ShapeDtypeStruct((Bp, Op), jnp.float32),
        grid_spec=pltpu.PrefetchScalarGridSpec(
            num_scalar_prefetch=0,
            grid=grid,
            in_specs=[
                pl.BlockSpec((t_blk, b_blk, Dp), lambda bb, tt: (tt, bb, 0)),
                const_spec((Dp, 4 * Hp)),        # wih layer 0
                const_spec((Lr, Hp, 4 * Hp)),    # wih layers 1..L-1
                const_spec((L, Hp, 4 * Hp)),     # whh
                const_spec((L, 1, 4 * Hp)),      # fused biases
                const_spec((Hp, Op)),            # fc weight
                const_spec((1, Op)),             # fc bias
            ],
            out_specs=pl.BlockSpec((b_blk, Op), lambda bb, tt: (bb, 0)),
            scratch_shapes=[
                pltpu.VMEM((L, b_blk, Hp), jnp.float32),             # h state
                pltpu.VMEM((L, b_blk, Hp), jnp.float32),             # c state
                pltpu.VMEM((t_blk, b_blk, 4 * Hp), jnp.float32),     # gates
                pltpu.VMEM((t_blk if L > 1 else 1, b_blk, Hp),
                           mm_dtype),                                # seq buf
            ],
        ),
        compiler_params=pltpu.CompilerParams(
            dimension_semantics=("parallel", "arbitrary"),
            vmem_limit_bytes=vmem_limit,
        ),
    )(x_tm, prepared["wih0"], prepared["wih_rest"], prepared["whh"],
      prepared["b"], prepared["wfc"], prepared["bfc"])

    return out[:B, :dims["O"]]


def lstm_model_forward(prepared, x):
    """x: (B, T, input_size) -> (B, output_size), matching the PyTorch module."""
    try:
        return _forward_impl(prepared, x, single_buffer_weights=True)
    except Exception:
        # Fallback for Pallas versions that reject pl.Buffered(1) on
        # pallas_call BlockSpecs: identical kernel, default double-buffering.
        return _forward_impl(prepared, x, single_buffer_weights=False)


# ---------------------------------------------------------------------------
# Parameter construction (deterministic, PyTorch-style uniform init)
# ---------------------------------------------------------------------------
def init_lstm_model_params(key, input_size, hidden_size, num_layers,
                           output_size=1):
    params = {"layers": []}
    bound = 1.0 / jnp.sqrt(hidden_size)
    for layer in range(num_layers):
        d_in = input_size if layer == 0 else hidden_size
        key, k1, k2, k3, k4 = jax.random.split(key, 5)
        w_ih = jax.random.uniform(k1, (4 * hidden_size, d_in),
                                  minval=-bound, maxval=bound, dtype=jnp.float32)
        w_hh = jax.random.uniform(k2, (4 * hidden_size, hidden_size),
                                  minval=-bound, maxval=bound, dtype=jnp.float32)
        b_ih = jax.random.uniform(k3, (4 * hidden_size,),
                                  minval=-bound, maxval=bound, dtype=jnp.float32)
        b_hh = jax.random.uniform(k4, (4 * hidden_size,),
                                  minval=-bound, maxval=bound, dtype=jnp.float32)
        params["layers"].append(dict(w_ih=w_ih, w_hh=w_hh, b_ih=b_ih, b_hh=b_hh))
    key, k5, k6 = jax.random.split(key, 3)
    fc_bound = 1.0 / jnp.sqrt(hidden_size)
    params["fc_w"] = jax.random.uniform(k5, (output_size, hidden_size),
                                        minval=-fc_bound, maxval=fc_bound,
                                        dtype=jnp.float32)
    params["fc_b"] = jax.random.uniform(k6, (output_size,),
                                        minval=-fc_bound, maxval=fc_bound,
                                        dtype=jnp.float32)
    return params


def prepare_params(params, input_size, hidden_size, output_size,
                   matmul_dtype=MATMUL_DTYPE):
    """One-time re-layout: transpose, fuse biases, reorder gates to
    [i, f, o, g], pad gates to lane-dense 128-multiple blocks, pad feature
    dims, stack layers, cast matmul operands to bf16."""
    H = hidden_size
    Hp = _round_up(H, LANE)
    Dp = _round_up(input_size, LANE)
    Op = _round_up(output_size, LANE)
    L = len(params["layers"])
    perm = jnp.array([0, 1, 3, 2])   # PyTorch [i,f,g,o] -> kernel [i,f,o,g]

    def pack_gates(w, d_in, d_in_pad):
        w4 = w.reshape(4, H, d_in)[perm]
        w4 = jnp.pad(w4, ((0, 0), (0, Hp - H), (0, d_in_pad - d_in)))
        return jnp.transpose(w4, (2, 0, 1)).reshape(d_in_pad, 4 * Hp)

    def pack_bias(lp):
        b = (lp["b_ih"] + lp["b_hh"]).reshape(4, H)[perm]
        return jnp.pad(b, ((0, 0), (0, Hp - H))).reshape(1, 4 * Hp)

    wih0 = pack_gates(params["layers"][0]["w_ih"], input_size,
                      Dp).astype(matmul_dtype)
    if L > 1:
        wih_rest = jnp.stack([pack_gates(lp["w_ih"], H, Hp)
                              for lp in params["layers"][1:]]).astype(matmul_dtype)
    else:
        wih_rest = jnp.zeros((1, Hp, 4 * Hp), matmul_dtype)  # dummy, never read
    whh = jnp.stack([pack_gates(lp["w_hh"], H, Hp)
                     for lp in params["layers"]]).astype(matmul_dtype)
    bias = jnp.stack([pack_bias(lp)
                      for lp in params["layers"]]).astype(jnp.float32)

    wfc = jnp.pad(params["fc_w"].T, ((0, Hp - H), (0, Op - output_size)))
    bfc = jnp.pad(params["fc_b"], (0, Op - output_size)).reshape(1, Op)
    return dict(wih0=wih0, wih_rest=wih_rest, whh=whh, b=bias,
                wfc=wfc.astype(matmul_dtype),
                bfc=bfc.astype(jnp.float32),
                dims=dict(D=input_size, Dp=Dp, H=H, Hp=Hp,
                          O=output_size, Op=Op, L=L))


# ---------------------------------------------------------------------------
# Pure-JAX reference (for correctness check)
# ---------------------------------------------------------------------------
def lstm_model_reference(params, x, hidden_size):
    B, T, _ = x.shape
    H = hidden_size
    seq = x
    for lp in params["layers"]:
        h = jnp.zeros((B, H), jnp.float32)
        c = jnp.zeros((B, H), jnp.float32)
        outs = []
        for t in range(T):
            gates = (seq[:, t, :] @ lp["w_ih"].T + lp["b_ih"]
                     + h @ lp["w_hh"].T + lp["b_hh"])
            i_g = jax.nn.sigmoid(gates[:, 0 * H:1 * H])
            f_g = jax.nn.sigmoid(gates[:, 1 * H:2 * H])
            g_g = jnp.tanh(gates[:, 2 * H:3 * H])
            o_g = jax.nn.sigmoid(gates[:, 3 * H:4 * H])
            c = f_g * c + i_g * g_g
            h = o_g * jnp.tanh(c)
            outs.append(h)
        seq = jnp.stack(outs, axis=1)
    return seq[:, -1, :] @ params["fc_w"].T + params["fc_b"]


# ---------------------------------------------------------------------------
if __name__ == "__main__":
    B, T = 2, 8
    input_size, hidden_size, num_layers, output_size = 16, 32, 2, 1

    key = jax.random.PRNGKey(0)
    key, kx, kp = jax.random.split(key, 3)
    x = jax.random.normal(kx, (B, T, input_size), dtype=jnp.float32)
    params = init_lstm_model_params(kp, input_size, hidden_size, num_layers,
                                    output_size)
    prepared = prepare_params(params, input_size, hidden_size, output_size)

    out = lstm_model_forward(prepared, x)
    out = jax.block_until_ready(out)

    ref = lstm_model_reference(params, x, hidden_size)
    assert out.shape == (B, output_size), out.shape
    err = float(jnp.max(jnp.abs(out - ref)))
    # bf16 MXU operands: loose tolerance (use MATMUL_DTYPE=float32 for tight).
    assert err < 5e-2, (err, out, ref)

    print("KERNEL_OK")
</pallas_src>

<mosaic_0001>
module attributes {stable_mosaic.version = 11 : i64} {
  func.func @_fused_lstm_fc_kernel(%arg0: i32, %arg1: i32, %arg2: memref<8x16x128xbf16, #tpu.memory_space<vmem>>, %arg3: memref<128x512xbf16, #tpu.memory_space<vmem>>, %arg4: memref<1x128x512xbf16, #tpu.memory_space<vmem>>, %arg5: memref<2x128x512xbf16, #tpu.memory_space<vmem>>, %arg6: memref<2x1x512xf32, #tpu.memory_space<vmem>>, %arg7: memref<128x128xbf16, #tpu.memory_space<vmem>>, %arg8: memref<1x128xf32, #tpu.memory_space<vmem>>, %arg9: memref<16x128xf32, #tpu.memory_space<vmem>>, %arg10: memref<2x16x128xf32, #tpu.memory_space<vmem>>, %arg11: memref<2x16x128xf32, #tpu.memory_space<vmem>>, %arg12: memref<8x16x512xf32, #tpu.memory_space<vmem>>, %arg13: memref<8x16x128xbf16, #tpu.memory_space<vmem>>) attributes {dimension_semantics = [#tpu.dimension_semantics<parallel>, #tpu.dimension_semantics<arbitrary>], iteration_bounds = array<i64: 1, 1>, scalar_prefetch = 0 : i64, scratch_operands = 4 : i64, tpu.core_type = #tpu.core_type<tc>, window_params = [{transform_indices = @transform_0, window_bounds = array<i64: 8, 16, 128>}, {pipeline_mode = #tpu.pipeline_mode<synchronous>, transform_indices = @transform_1, window_bounds = array<i64: 128, 512>}, {pipeline_mode = #tpu.pipeline_mode<synchronous>, transform_indices = @transform_2, window_bounds = array<i64: 1, 128, 512>}, {pipeline_mode = #tpu.pipeline_mode<synchronous>, transform_indices = @transform_3, window_bounds = array<i64: 2, 128, 512>}, {pipeline_mode = #tpu.pipeline_mode<synchronous>, transform_indices = @transform_4, window_bounds = array<i64: 2, 1, 512>}, {pipeline_mode = #tpu.pipeline_mode<synchronous>, transform_indices = @transform_5, window_bounds = array<i64: 128, 128>}, {pipeline_mode = #tpu.pipeline_mode<synchronous>, transform_indices = @transform_6, window_bounds = array<i64: 1, 128>}, {transform_indices = @transform_7, window_bounds = array<i64: 16, 128>}]} {
    %c0_i32 = arith.constant 0 : i32
    %0 = arith.cmpi eq, %arg1, %c0_i32 : i32
    %1 = arith.extui %0 : i1 to i32
    %c0_i32_0 = arith.constant 0 : i32
    %2 = arith.cmpi ne, %1, %c0_i32_0 : i32
    scf.if %2 {
      %cst_145 = arith.constant 0.000000e+00 : f32
      %443 = vector.broadcast %cst_145 : f32 to vector<2x16x128xf32>
      %c0_146 = arith.constant 0 : index
      %c0_147 = arith.constant 0 : index
      %c0_148 = arith.constant 0 : index
      %444 = vector.load %arg10[%c0_146, %c0_147, %c0_148] : memref<2x16x128xf32, #tpu.memory_space<vmem>>, vector<2x16x128xf32>
      tpu.vector_store %arg10[%c0_146, %c0_147, %c0_148], %443 {strides = array<i32>} : memref<2x16x128xf32, #tpu.memory_space<vmem>>, vector<2x16x128xf32>,
      %cst_149 = arith.constant 0.000000e+00 : f32
      %445 = vector.broadcast %cst_149 : f32 to vector<2x16x128xf32>
      %c0_150 = arith.constant 0 : index
      %c0_151 = arith.constant 0 : index
      %c0_152 = arith.constant 0 : index
      %446 = vector.load %arg11[%c0_150, %c0_151, %c0_152] : memref<2x16x128xf32, #tpu.memory_space<vmem>>, vector<2x16x128xf32>
      tpu.vector_store %arg11[%c0_150, %c0_151, %c0_152], %445 {strides = array<i32>} : memref<2x16x128xf32, #tpu.memory_space<vmem>>, vector<2x16x128xf32>,
    } else {
    }
    %c0 = arith.constant 0 : index
    %c0_1 = arith.constant 0 : index
    %c0_2 = arith.constant 0 : index
    %3 = vector.load %arg2[%c0, %c0_1, %c0_2] : memref<8x16x128xbf16, #tpu.memory_space<vmem>>, vector<8x16x128xbf16>
    %4 = vector.shape_cast %3 : vector<8x16x128xbf16> to vector<128x128xbf16>
    %c0_3 = arith.constant 0 : index
    %c0_4 = arith.constant 0 : index
    %5 = vector.load %arg3[%c0_3, %c0_4] : memref<128x512xbf16, #tpu.memory_space<vmem>>, vector<128x512xbf16>
    %cst = arith.constant dense<0.000000e+00> : vector<128x512xf32>
    %6 = tpu.matmul %4, %5, %cst {dimension_numbers = #tpu.dot_dimension_numbers<[1], [0], [0], [1], [0, 0, 1, 1], [], []>} : vector<128x128xbf16>, vector<128x512xbf16>, vector<128x512xf32> -> vector<128x512xf32>
    %c0_5 = arith.constant 0 : index
    %c0_6 = arith.constant 0 : index
    %c0_7 = arith.constant 0 : index
    %7 = vector.load %arg6[%c0_5, %c0_6, %c0_7] : memref<2x1x512xf32, #tpu.memory_space<vmem>>, vector<1x1x512xf32>
    %8 = vector.shape_cast %7 : vector<1x1x512xf32> to vector<1x512xf32>
    %9 = vector.broadcast %8 : vector<1x512xf32> to vector<128x512xf32>
    %10 = arith.addf %6, %9 : vector<128x512xf32>
    %11 = vector.shape_cast %10 : vector<128x512xf32> to vector<8x16x512xf32>
    %c0_8 = arith.constant 0 : index
    %c0_9 = arith.constant 0 : index
    %c0_10 = arith.constant 0 : index
    %12 = vector.load %arg12[%c0_8, %c0_9, %c0_10] : memref<8x16x512xf32, #tpu.memory_space<vmem>>, vector<8x16x512xf32>
    tpu.vector_store %arg12[%c0_8, %c0_9, %c0_10], %11 {strides = array<i32>} : memref<8x16x512xf32, #tpu.memory_space<vmem>>, vector<8x16x512xf32>,
    %c0_11 = arith.constant 0 : index
    %c0_12 = arith.constant 0 : index
    %c0_13 = arith.constant 0 : index
    %13 = vector.load %arg5[%c0_11, %c0_12, %c0_13] : memref<2x128x512xbf16, #tpu.memory_space<vmem>>, vector<1x128x512xbf16>
    %14 = vector.shape_cast %13 : vector<1x128x512xbf16> to vector<128x512xbf16>
    %c0_14 = arith.constant 0 : index
    %c0_15 = arith.constant 0 : index
    %c0_16 = arith.constant 0 : index
    %15 = vector.load %arg10[%c0_14, %c0_15, %c0_16] : memref<2x16x128xf32, #tpu.memory_space<vmem>>, vector<1x16x128xf32>
    %16 = vector.shape_cast %15 : vector<1x16x128xf32> to vector<16x128xf32>
    %c0_17 = arith.constant 0 : index
    %c0_18 = arith.constant 0 : index
    %c0_19 = arith.constant 0 : index
    %17 = vector.load %arg11[%c0_17, %c0_18, %c0_19] : memref<2x16x128xf32, #tpu.memory_space<vmem>>, vector<1x16x128xf32>
    %18 = vector.shape_cast %17 : vector<1x16x128xf32> to vector<16x128xf32>
    %c0_i32_20 = arith.constant 0 : i32
    %19 = arith.index_cast %c0_i32_20 : i32 to index
    %c0_21 = arith.constant 0 : index
    %c0_22 = arith.constant 0 : index
    %20 = vector.load %arg12[%19, %c0_21, %c0_22] : memref<8x16x512xf32, #tpu.memory_space<vmem>>, vector<1x16x512xf32>
    %21 = vector.shape_cast %20 : vector<1x16x512xf32> to vector<16x512xf32>
    %22 = arith.truncf %16 : vector<16x128xf32> to vector<16x128xbf16>
    %cst_23 = arith.constant dense<0.000000e+00> : vector<16x512xf32>
    %23 = tpu.matmul %22, %14, %cst_23 {dimension_numbers = #tpu.dot_dimension_numbers<[1], [0], [0], [1], [0, 0, 1, 1], [], []>} : vector<16x128xbf16>, vector<128x512xbf16>, vector<16x512xf32> -> vector<16x512xf32>
    %24 = arith.addf %21, %23 : vector<16x512xf32>
    %25 = vector.extract_strided_slice %24 {offsets = [0, 0], sizes = [16, 384], strides = [1, 1]} : vector<16x512xf32> to vector<16x384xf32>
    %26 = arith.negf %25 : vector<16x384xf32>
    %27 = math.exp %26 : vector<16x384xf32>
    %cst_24 = arith.constant 1.000000e+00 : f32
    %28 = vector.broadcast %cst_24 : f32 to vector<16x384xf32>
    %29 = arith.addf %28, %27 : vector<16x384xf32>
    %30 = arith.divf %28, %29 : vector<16x384xf32>
    %31 = vector.extract_strided_slice %30 {offsets = [0, 0], sizes = [16, 128], strides = [1, 1]} : vector<16x384xf32> to vector<16x128xf32>
    %32 = vector.extract_strided_slice %30 {offsets = [0, 128], sizes = [16, 128], strides = [1, 1]} : vector<16x384xf32> to vector<16x128xf32>
    %33 = vector.extract_strided_slice %30 {offsets = [0, 256], sizes = [16, 128], strides = [1, 1]} : vector<16x384xf32> to vector<16x128xf32>
    %34 = vector.extract_strided_slice %24 {offsets = [0, 384], sizes = [16, 128], strides = [1, 1]} : vector<16x512xf32> to vector<16x128xf32>
    %35 = math.tanh %34 : vector<16x128xf32>
    %36 = arith.mulf %32, %18 : vector<16x128xf32>
    %37 = arith.mulf %31, %35 : vector<16x128xf32>
    %38 = arith.addf %36, %37 : vector<16x128xf32>
    %39 = math.tanh %38 : vector<16x128xf32>
    %40 = arith.mulf %33, %39 : vector<16x128xf32>
    %41 = arith.truncf %40 : vector<16x128xf32> to vector<16x128xbf16>
    %42 = arith.index_cast %c0_i32_20 : i32 to index
    %c0_25 = arith.constant 0 : index
    %c0_26 = arith.constant 0 : index
    %43 = vector.load %arg13[%42, %c0_25, %c0_26] : memref<8x16x128xbf16, #tpu.memory_space<vmem>>, vector<1x16x128xbf16>
    %44 = vector.shape_cast %43 : vector<1x16x128xbf16> to vector<16x128xbf16>
    %45 = vector.shape_cast %41 : vector<16x128xbf16> to vector<1x16x128xbf16>
    tpu.vector_store %arg13[%42, %c0_25, %c0_26], %45 {strides = array<i32>} : memref<8x16x128xbf16, #tpu.memory_space<vmem>>, vector<1x16x128xbf16>,
    %c1_i32 = arith.constant 1 : i32
    %46 = arith.index_cast %c1_i32 : i32 to index
    %c0_27 = arith.constant 0 : index
    %c0_28 = arith.constant 0 : index
    %47 = vector.load %arg12[%46, %c0_27, %c0_28] : memref<8x16x512xf32, #tpu.memory_space<vmem>>, vector<1x16x512xf32>
    %48 = vector.shape_cast %47 : vector<1x16x512xf32> to vector<16x512xf32>
    %49 = arith.truncf %40 : vector<16x128xf32> to vector<16x128xbf16>
    %cst_29 = arith.constant dense<0.000000e+00> : vector<16x512xf32>
    %50 = tpu.matmul %49, %14, %cst_29 {dimension_numbers = #tpu.dot_dimension_numbers<[1], [0], [0], [1], [0, 0, 1, 1], [], []>} : vector<16x128xbf16>, vector<128x512xbf16>, vector<16x512xf32> -> vector<16x512xf32>
    %51 = arith.addf %48, %50 : vector<16x512xf32>
    %52 = vector.extract_strided_slice %51 {offsets = [0, 0], sizes = [16, 384], strides = [1, 1]} : vector<16x512xf32> to vector<16x384xf32>
    %53 = arith.negf %52 : vector<16x384xf32>
    %54 = math.exp %53 : vector<16x384xf32>
    %cst_30 = arith.constant 1.000000e+00 : f32
    %55 = vector.broadcast %cst_30 : f32 to vector<16x384xf32>
    %56 = arith.addf %55, %54 : vector<16x384xf32>
    %57 = arith.divf %55, %56 : vector<16x384xf32>
    %58 = vector.extract_strided_slice %57 {offsets = [0, 0], sizes = [16, 128], strides = [1, 1]} : vector<16x384xf32> to vector<16x128xf32>
    %59 = vector.extract_strided_slice %57 {offsets = [0, 128], sizes = [16, 128], strides = [1, 1]} : vector<16x384xf32> to vector<16x128xf32>
    %60 = vector.extract_strided_slice %57 {offsets = [0, 256], sizes = [16, 128], strides = [1, 1]} : vector<16x384xf32> to vector<16x128xf32>
    %61 = vector.extract_strided_slice %51 {offsets = [0, 384], sizes = [16, 128], strides = [1, 1]} : vector<16x512xf32> to vector<16x128xf32>
    %62 = math.tanh %61 : vector<16x128xf32>
    %63 = arith.mulf %59, %38 : vector<16x128xf32>
    %64 = arith.mulf %58, %62 : vector<16x128xf32>
    %65 = arith.addf %63, %64 : vector<16x128xf32>
    %66 = math.tanh %65 : vector<16x128xf32>
    %67 = arith.mulf %60, %66 : vector<16x128xf32>
    %68 = arith.truncf %67 : vector<16x128xf32> to vector<16x128xbf16>
    %69 = arith.index_cast %c1_i32 : i32 to index
    %c0_31 = arith.constant 0 : index
    %c0_32 = arith.constant 0 : index
    %70 = vector.load %arg13[%69, %c0_31, %c0_32] : memref<8x16x128xbf16, #tpu.memory_space<vmem>>, vector<1x16x128xbf16>
    %71 = vector.shape_cast %70 : vector<1x16x128xbf16> to vector<16x128xbf16>
    %72 = vector.shape_cast %68 : vector<16x128xbf16> to vector<1x16x128xbf16>
    tpu.vector_store %arg13[%69, %c0_31, %c0_32], %72 {strides = array<i32>} : memref<8x16x128xbf16, #tpu.memory_space<vmem>>, vector<1x16x128xbf16>,
    %c2_i32 = arith.constant 2 : i32
    %73 = arith.index_cast %c2_i32 : i32 to index
    %c0_33 = arith.constant 0 : index
    %c0_34 = arith.constant 0 : index
    %74 = vector.load %arg12[%73, %c0_33, %c0_34] : memref<8x16x512xf32, #tpu.memory_space<vmem>>, vector<1x16x512xf32>
    %75 = vector.shape_cast %74 : vector<1x16x512xf32> to vector<16x512xf32>
    %76 = arith.truncf %67 : vector<16x128xf32> to vector<16x128xbf16>
    %cst_35 = arith.constant dense<0.000000e+00> : vector<16x512xf32>
    %77 = tpu.matmul %76, %14, %cst_35 {dimension_numbers = #tpu.dot_dimension_numbers<[1], [0], [0], [1], [0, 0, 1, 1], [], []>} : vector<16x128xbf16>, vector<128x512xbf16>, vector<16x512xf32> -> vector<16x512xf32>
    %78 = arith.addf %75, %77 : vector<16x512xf32>
    %79 = vector.extract_strided_slice %78 {offsets = [0, 0], sizes = [16, 384], strides = [1, 1]} : vector<16x512xf32> to vector<16x384xf32>
    %80 = arith.negf %79 : vector<16x384xf32>
    %81 = math.exp %80 : vector<16x384xf32>
    %cst_36 = arith.constant 1.000000e+00 : f32
    %82 = vector.broadcast %cst_36 : f32 to vector<16x384xf32>
    %83 = arith.addf %82, %81 : vector<16x384xf32>
    %84 = arith.divf %82, %83 : vector<16x384xf32>
    %85 = vector.extract_strided_slice %84 {offsets = [0, 0], sizes = [16, 128], strides = [1, 1]} : vector<16x384xf32> to vector<16x128xf32>
    %86 = vector.extract_strided_slice %84 {offsets = [0, 128], sizes = [16, 128], strides = [1, 1]} : vector<16x384xf32> to vector<16x128xf32>
    %87 = vector.extract_strided_slice %84 {offsets = [0, 256], sizes = [16, 128], strides = [1, 1]} : vector<16x384xf32> to vector<16x128xf32>
    %88 = vector.extract_strided_slice %78 {offsets = [0, 384], sizes = [16, 128], strides = [1, 1]} : vector<16x512xf32> to vector<16x128xf32>
    %89 = math.tanh %88 : vector<16x128xf32>
    %90 = arith.mulf %86, %65 : vector<16x128xf32>
    %91 = arith.mulf %85, %89 : vector<16x128xf32>
    %92 = arith.addf %90, %91 : vector<16x128xf32>
    %93 = math.tanh %92 : vector<16x128xf32>
    %94 = arith.mulf %87, %93 : vector<16x128xf32>
    %95 = arith.truncf %94 : vector<16x128xf32> to vector<16x128xbf16>
    %96 = arith.index_cast %c2_i32 : i32 to index
    %c0_37 = arith.constant 0 : index
    %c0_38 = arith.constant 0 : index
    %97 = vector.load %arg13[%96, %c0_37, %c0_38] : memref<8x16x128xbf16, #tpu.memory_space<vmem>>, vector<1x16x128xbf16>
    %98 = vector.shape_cast %97 : vector<1x16x128xbf16> to vector<16x128xbf16>
    %99 = vector.shape_cast %95 : vector<16x128xbf16> to vector<1x16x128xbf16>
    tpu.vector_store %arg13[%96, %c0_37, %c0_38], %99 {strides = array<i32>} : memref<8x16x128xbf16, #tpu.memory_space<vmem>>, vector<1x16x128xbf16>,
    %c3_i32 = arith.constant 3 : i32
    %100 = arith.index_cast %c3_i32 : i32 to index
    %c0_39 = arith.constant 0 : index
    %c0_40 = arith.constant 0 : index
    %101 = vector.load %arg12[%100, %c0_39, %c0_40] : memref<8x16x512xf32, #tpu.memory_space<vmem>>, vector<1x16x512xf32>
    %102 = vector.shape_cast %101 : vector<1x16x512xf32> to vector<16x512xf32>
    %103 = arith.truncf %94 : vector<16x128xf32> to vector<16x128xbf16>
    %cst_41 = arith.constant dense<0.000000e+00> : vector<16x512xf32>
    %104 = tpu.matmul %103, %14, %cst_41 {dimension_numbers = #tpu.dot_dimension_numbers<[1], [0], [0], [1], [0, 0, 1, 1], [], []>} : vector<16x128xbf16>, vector<128x512xbf16>, vector<16x512xf32> -> vector<16x512xf32>
    %105 = arith.addf %102, %104 : vector<16x512xf32>
    %106 = vector.extract_strided_slice %105 {offsets = [0, 0], sizes = [16, 384], strides = [1, 1]} : vector<16x512xf32> to vector<16x384xf32>
    %107 = arith.negf %106 : vector<16x384xf32>
    %108 = math.exp %107 : vector<16x384xf32>
    %cst_42 = arith.constant 1.000000e+00 : f32
    %109 = vector.broadcast %cst_42 : f32 to vector<16x384xf32>
    %110 = arith.addf %109, %108 : vector<16x384xf32>
    %111 = arith.divf %109, %110 : vector<16x384xf32>
    %112 = vector.extract_strided_slice %111 {offsets = [0, 0], sizes = [16, 128], strides = [1, 1]} : vector<16x384xf32> to vector<16x128xf32>
    %113 = vector.extract_strided_slice %111 {offsets = [0, 128], sizes = [16, 128], strides = [1, 1]} : vector<16x384xf32> to vector<16x128xf32>
    %114 = vector.extract_strided_slice %111 {offsets = [0, 256], sizes = [16, 128], strides = [1, 1]} : vector<16x384xf32> to vector<16x128xf32>
    %115 = vector.extract_strided_slice %105 {offsets = [0, 384], sizes = [16, 128], strides = [1, 1]} : vector<16x512xf32> to vector<16x128xf32>
    %116 = math.tanh %115 : vector<16x128xf32>
    %117 = arith.mulf %113, %92 : vector<16x128xf32>
    %118 = arith.mulf %112, %116 : vector<16x128xf32>
    %119 = arith.addf %117, %118 : vector<16x128xf32>
    %120 = math.tanh %119 : vector<16x128xf32>
    %121 = arith.mulf %114, %120 : vector<16x128xf32>
    %122 = arith.truncf %121 : vector<16x128xf32> to vector<16x128xbf16>
    %123 = arith.index_cast %c3_i32 : i32 to index
    %c0_43 = arith.constant 0 : index
    %c0_44 = arith.constant 0 : index
    %124 = vector.load %arg13[%123, %c0_43, %c0_44] : memref<8x16x128xbf16, #tpu.memory_space<vmem>>, vector<1x16x128xbf16>
    %125 = vector.shape_cast %124 : vector<1x16x128xbf16> to vector<16x128xbf16>
    %126 = vector.shape_cast %122 : vector<16x128xbf16> to vector<1x16x128xbf16>
    tpu.vector_store %arg13[%123, %c0_43, %c0_44], %126 {strides = array<i32>} : memref<8x16x128xbf16, #tpu.memory_space<vmem>>, vector<1x16x128xbf16>,
    %c4_i32 = arith.constant 4 : i32
    %127 = arith.index_cast %c4_i32 : i32 to index
    %c0_45 = arith.constant 0 : index
    %c0_46 = arith.constant 0 : index
    %128 = vector.load %arg12[%127, %c0_45, %c0_46] : memref<8x16x512xf32, #tpu.memory_space<vmem>>, vector<1x16x512xf32>
    %129 = vector.shape_cast %128 : vector<1x16x512xf32> to vector<16x512xf32>
    %130 = arith.truncf %121 : vector<16x128xf32> to vector<16x128xbf16>
    %cst_47 = arith.constant dense<0.000000e+00> : vector<16x512xf32>
    %131 = tpu.matmul %130, %14, %cst_47 {dimension_numbers = #tpu.dot_dimension_numbers<[1], [0], [0], [1], [0, 0, 1, 1], [], []>} : vector<16x128xbf16>, vector<128x512xbf16>, vector<16x512xf32> -> vector<16x512xf32>
    %132 = arith.addf %129, %131 : vector<16x512xf32>
    %133 = vector.extract_strided_slice %132 {offsets = [0, 0], sizes = [16, 384], strides = [1, 1]} : vector<16x512xf32> to vector<16x384xf32>
    %134 = arith.negf %133 : vector<16x384xf32>
    %135 = math.exp %134 : vector<16x384xf32>
    %cst_48 = arith.constant 1.000000e+00 : f32
    %136 = vector.broadcast %cst_48 : f32 to vector<16x384xf32>
    %137 = arith.addf %136, %135 : vector<16x384xf32>
    %138 = arith.divf %136, %137 : vector<16x384xf32>
    %139 = vector.extract_strided_slice %138 {offsets = [0, 0], sizes = [16, 128], strides = [1, 1]} : vector<16x384xf32> to vector<16x128xf32>
    %140 = vector.extract_strided_slice %138 {offsets = [0, 128], sizes = [16, 128], strides = [1, 1]} : vector<16x384xf32> to vector<16x128xf32>
    %141 = vector.extract_strided_slice %138 {offsets = [0, 256], sizes = [16, 128], strides = [1, 1]} : vector<16x384xf32> to vector<16x128xf32>
    %142 = vector.extract_strided_slice %132 {offsets = [0, 384], sizes = [16, 128], strides = [1, 1]} : vector<16x512xf32> to vector<16x128xf32>
    %143 = math.tanh %142 : vector<16x128xf32>
    %144 = arith.mulf %140, %119 : vector<16x128xf32>
    %145 = arith.mulf %139, %143 : vector<16x128xf32>
    %146 = arith.addf %144, %145 : vector<16x128xf32>
    %147 = math.tanh %146 : vector<16x128xf32>
    %148 = arith.mulf %141, %147 : vector<16x128xf32>
    %149 = arith.truncf %148 : vector<16x128xf32> to vector<16x128xbf16>
    %150 = arith.index_cast %c4_i32 : i32 to index
    %c0_49 = arith.constant 0 : index
    %c0_50 = arith.constant 0 : index
    %151 = vector.load %arg13[%150, %c0_49, %c0_50] : memref<8x16x128xbf16, #tpu.memory_space<vmem>>, vector<1x16x128xbf16>
    %152 = vector.shape_cast %151 : vector<1x16x128xbf16> to vector<16x128xbf16>
    %153 = vector.shape_cast %149 : vector<16x128xbf16> to vector<1x16x128xbf16>
    tpu.vector_store %arg13[%150, %c0_49, %c0_50], %153 {strides = array<i32>} : memref<8x16x128xbf16, #tpu.memory_space<vmem>>, vector<1x16x128xbf16>,
    %c5_i32 = arith.constant 5 : i32
    %154 = arith.index_cast %c5_i32 : i32 to index
    %c0_51 = arith.constant 0 : index
    %c0_52 = arith.constant 0 : index
    %155 = vector.load %arg12[%154, %c0_51, %c0_52] : memref<8x16x512xf32, #tpu.memory_space<vmem>>, vector<1x16x512xf32>
    %156 = vector.shape_cast %155 : vector<1x16x512xf32> to vector<16x512xf32>
    %157 = arith.truncf %148 : vector<16x128xf32> to vector<16x128xbf16>
    %cst_53 = arith.constant dense<0.000000e+00> : vector<16x512xf32>
    %158 = tpu.matmul %157, %14, %cst_53 {dimension_numbers = #tpu.dot_dimension_numbers<[1], [0], [0], [1], [0, 0, 1, 1], [], []>} : vector<16x128xbf16>, vector<128x512xbf16>, vector<16x512xf32> -> vector<16x512xf32>
    %159 = arith.addf %156, %158 : vector<16x512xf32>
    %160 = vector.extract_strided_slice %159 {offsets = [0, 0], sizes = [16, 384], strides = [1, 1]} : vector<16x512xf32> to vector<16x384xf32>
    %161 = arith.negf %160 : vector<16x384xf32>
    %162 = math.exp %161 : vector<16x384xf32>
    %cst_54 = arith.constant 1.000000e+00 : f32
    %163 = vector.broadcast %cst_54 : f32 to vector<16x384xf32>
    %164 = arith.addf %163, %162 : vector<16x384xf32>
    %165 = arith.divf %163, %164 : vector<16x384xf32>
    %166 = vector.extract_strided_slice %165 {offsets = [0, 0], sizes = [16, 128], strides = [1, 1]} : vector<16x384xf32> to vector<16x128xf32>
    %167 = vector.extract_strided_slice %165 {offsets = [0, 128], sizes = [16, 128], strides = [1, 1]} : vector<16x384xf32> to vector<16x128xf32>
    %168 = vector.extract_strided_slice %165 {offsets = [0, 256], sizes = [16, 128], strides = [1, 1]} : vector<16x384xf32> to vector<16x128xf32>
    %169 = vector.extract_strided_slice %159 {offsets = [0, 384], sizes = [16, 128], strides = [1, 1]} : vector<16x512xf32> to vector<16x128xf32>
    %170 = math.tanh %169 : vector<16x128xf32>
    %171 = arith.mulf %167, %146 : vector<16x128xf32>
    %172 = arith.mulf %166, %170 : vector<16x128xf32>
    %173 = arith.addf %171, %172 : vector<16x128xf32>
    %174 = math.tanh %173 : vector<16x128xf32>
    %175 = arith.mulf %168, %174 : vector<16x128xf32>
    %176 = arith.truncf %175 : vector<16x128xf32> to vector<16x128xbf16>
    %177 = arith.index_cast %c5_i32 : i32 to index
    %c0_55 = arith.constant 0 : index
    %c0_56 = arith.constant 0 : index
    %178 = vector.load %arg13[%177, %c0_55, %c0_56] : memref<8x16x128xbf16, #tpu.memory_space<vmem>>, vector<1x16x128xbf16>
    %179 = vector.shape_cast %178 : vector<1x16x128xbf16> to vector<16x128xbf16>
    %180 = vector.shape_cast %176 : vector<16x128xbf16> to vector<1x16x128xbf16>
    tpu.vector_store %arg13[%177, %c0_55, %c0_56], %180 {strides = array<i32>} : memref<8x16x128xbf16, #tpu.memory_space<vmem>>, vector<1x16x128xbf16>,
    %c6_i32 = arith.constant 6 : i32
    %181 = arith.index_cast %c6_i32 : i32 to index
    %c0_57 = arith.constant 0 : index
    %c0_58 = arith.constant 0 : index
    %182 = vector.load %arg12[%181, %c0_57, %c0_58] : memref<8x16x512xf32, #tpu.memory_space<vmem>>, vector<1x16x512xf32>
    %183 = vector.shape_cast %182 : vector<1x16x512xf32> to vector<16x512xf32>
    %184 = arith.truncf %175 : vector<16x128xf32> to vector<16x128xbf16>
    %cst_59 = arith.constant dense<0.000000e+00> : vector<16x512xf32>
    %185 = tpu.matmul %184, %14, %cst_59 {dimension_numbers = #tpu.dot_dimension_numbers<[1], [0], [0], [1], [0, 0, 1, 1], [], []>} : vector<16x128xbf16>, vector<128x512xbf16>, vector<16x512xf32> -> vector<16x512xf32>
    %186 = arith.addf %183, %185 : vector<16x512xf32>
    %187 = vector.extract_strided_slice %186 {offsets = [0, 0], sizes = [16, 384], strides = [1, 1]} : vector<16x512xf32> to vector<16x384xf32>
    %188 = arith.negf %187 : vector<16x384xf32>
    %189 = math.exp %188 : vector<16x384xf32>
    %cst_60 = arith.constant 1.000000e+00 : f32
    %190 = vector.broadcast %cst_60 : f32 to vector<16x384xf32>
    %191 = arith.addf %190, %189 : vector<16x384xf32>
    %192 = arith.divf %190, %191 : vector<16x384xf32>
    %193 = vector.extract_strided_slice %192 {offsets = [0, 0], sizes = [16, 128], strides = [1, 1]} : vector<16x384xf32> to vector<16x128xf32>
    %194 = vector.extract_strided_slice %192 {offsets = [0, 128], sizes = [16, 128], strides = [1, 1]} : vector<16x384xf32> to vector<16x128xf32>
    %195 = vector.extract_strided_slice %192 {offsets = [0, 256], sizes = [16, 128], strides = [1, 1]} : vector<16x384xf32> to vector<16x128xf32>
    %196 = vector.extract_strided_slice %186 {offsets = [0, 384], sizes = [16, 128], strides = [1, 1]} : vector<16x512xf32> to vector<16x128xf32>
    %197 = math.tanh %196 : vector<16x128xf32>
    %198 = arith.mulf %194, %173 : vector<16x128xf32>
    %199 = arith.mulf %193, %197 : vector<16x128xf32>
    %200 = arith.addf %198, %199 : vector<16x128xf32>
    %201 = math.tanh %200 : vector<16x128xf32>
    %202 = arith.mulf %195, %201 : vector<16x128xf32>
    %203 = arith.truncf %202 : vector<16x128xf32> to vector<16x128xbf16>
    %204 = arith.index_cast %c6_i32 : i32 to index
    %c0_61 = arith.constant 0 : index
    %c0_62 = arith.constant 0 : index
    %205 = vector.load %arg13[%204, %c0_61, %c0_62] : memref<8x16x128xbf16, #tpu.memory_space<vmem>>, vector<1x16x128xbf16>
    %206 = vector.shape_cast %205 : vector<1x16x128xbf16> to vector<16x128xbf16>
    %207 = vector.shape_cast %203 : vector<16x128xbf16> to vector<1x16x128xbf16>
    tpu.vector_store %arg13[%204, %c0_61, %c0_62], %207 {strides = array<i32>} : memref<8x16x128xbf16, #tpu.memory_space<vmem>>, vector<1x16x128xbf16>,
    %c7_i32 = arith.constant 7 : i32
    %208 = arith.index_cast %c7_i32 : i32 to index
    %c0_63 = arith.constant 0 : index
    %c0_64 = arith.constant 0 : index
    %209 = vector.load %arg12[%208, %c0_63, %c0_64] : memref<8x16x512xf32, #tpu.memory_space<vmem>>, vector<1x16x512xf32>
    %210 = vector.shape_cast %209 : vector<1x16x512xf32> to vector<16x512xf32>
    %211 = arith.truncf %202 : vector<16x128xf32> to vector<16x128xbf16>
    %cst_65 = arith.constant dense<0.000000e+00> : vector<16x512xf32>
    %212 = tpu.matmul %211, %14, %cst_65 {dimension_numbers = #tpu.dot_dimension_numbers<[1], [0], [0], [1], [0, 0, 1, 1], [], []>} : vector<16x128xbf16>, vector<128x512xbf16>, vector<16x512xf32> -> vector<16x512xf32>
    %213 = arith.addf %210, %212 : vector<16x512xf32>
    %214 = vector.extract_strided_slice %213 {offsets = [0, 0], sizes = [16, 384], strides = [1, 1]} : vector<16x512xf32> to vector<16x384xf32>
    %215 = arith.negf %214 : vector<16x384xf32>
    %216 = math.exp %215 : vector<16x384xf32>
    %cst_66 = arith.constant 1.000000e+00 : f32
    %217 = vector.broadcast %cst_66 : f32 to vector<16x384xf32>
    %218 = arith.addf %217, %216 : vector<16x384xf32>
    %219 = arith.divf %217, %218 : vector<16x384xf32>
    %220 = vector.extract_strided_slice %219 {offsets = [0, 0], sizes = [16, 128], strides = [1, 1]} : vector<16x384xf32> to vector<16x128xf32>
    %221 = vector.extract_strided_slice %219 {offsets = [0, 128], sizes = [16, 128], strides = [1, 1]} : vector<16x384xf32> to vector<16x128xf32>
    %222 = vector.extract_strided_slice %219 {offsets = [0, 256], sizes = [16, 128], strides = [1, 1]} : vector<16x384xf32> to vector<16x128xf32>
    %223 = vector.extract_strided_slice %213 {offsets = [0, 384], sizes = [16, 128], strides = [1, 1]} : vector<16x512xf32> to vector<16x128xf32>
    %224 = math.tanh %223 : vector<16x128xf32>
    %225 = arith.mulf %221, %200 : vector<16x128xf32>
    %226 = arith.mulf %220, %224 : vector<16x128xf32>
    %227 = arith.addf %225, %226 : vector<16x128xf32>
    %228 = math.tanh %227 : vector<16x128xf32>
    %229 = arith.mulf %222, %228 : vector<16x128xf32>
    %230 = arith.truncf %229 : vector<16x128xf32> to vector<16x128xbf16>
    %231 = arith.index_cast %c7_i32 : i32 to index
    %c0_67 = arith.constant 0 : index
    %c0_68 = arith.constant 0 : index
    %232 = vector.load %arg13[%231, %c0_67, %c0_68] : memref<8x16x128xbf16, #tpu.memory_space<vmem>>, vector<1x16x128xbf16>
    %233 = vector.shape_cast %232 : vector<1x16x128xbf16> to vector<16x128xbf16>
    %234 = vector.shape_cast %230 : vector<16x128xbf16> to vector<1x16x128xbf16>
    tpu.vector_store %arg13[%231, %c0_67, %c0_68], %234 {strides = array<i32>} : memref<8x16x128xbf16, #tpu.memory_space<vmem>>, vector<1x16x128xbf16>,
    %c8_i32 = arith.constant 8 : i32
    %c0_69 = arith.constant 0 : index
    %c0_70 = arith.constant 0 : index
    %c0_71 = arith.constant 0 : index
    %235 = vector.load %arg10[%c0_69, %c0_70, %c0_71] : memref<2x16x128xf32, #tpu.memory_space<vmem>>, vector<1x16x128xf32>
    %236 = vector.shape_cast %235 : vector<1x16x128xf32> to vector<16x128xf32>
    %237 = vector.shape_cast %229 : vector<16x128xf32> to vector<1x16x128xf32>
    tpu.vector_store %arg10[%c0_69, %c0_70, %c0_71], %237 {strides = array<i32>} : memref<2x16x128xf32, #tpu.memory_space<vmem>>, vector<1x16x128xf32>,
    %c0_72 = arith.constant 0 : index
    %c0_73 = arith.constant 0 : index
    %c0_74 = arith.constant 0 : index
    %238 = vector.load %arg11[%c0_72, %c0_73, %c0_74] : memref<2x16x128xf32, #tpu.memory_space<vmem>>, vector<1x16x128xf32>
    %239 = vector.shape_cast %238 : vector<1x16x128xf32> to vector<16x128xf32>
    %240 = vector.shape_cast %227 : vector<16x128xf32> to vector<1x16x128xf32>
    tpu.vector_store %arg11[%c0_72, %c0_73, %c0_74], %240 {strides = array<i32>} : memref<2x16x128xf32, #tpu.memory_space<vmem>>, vector<1x16x128xf32>,
    %c0_75 = arith.constant 0 : index
    %c0_76 = arith.constant 0 : index
    %c0_77 = arith.constant 0 : index
    %241 = vector.load %arg13[%c0_75, %c0_76, %c0_77] : memref<8x16x128xbf16, #tpu.memory_space<vmem>>, vector<8x16x128xbf16>
    %242 = vector.shape_cast %241 : vector<8x16x128xbf16> to vector<128x128xbf16>
    %c0_78 = arith.constant 0 : index
    %c0_79 = arith.constant 0 : index
    %c0_80 = arith.constant 0 : index
    %243 = vector.load %arg4[%c0_78, %c0_79, %c0_80] : memref<1x128x512xbf16, #tpu.memory_space<vmem>>, vector<1x128x512xbf16>
    %244 = vector.shape_cast %243 : vector<1x128x512xbf16> to vector<128x512xbf16>
    %cst_81 = arith.constant dense<0.000000e+00> : vector<128x512xf32>
    %245 = tpu.matmul %242, %244, %cst_81 {dimension_numbers = #tpu.dot_dimension_numbers<[1], [0], [0], [1], [0, 0, 1, 1], [], []>} : vector<128x128xbf16>, vector<128x512xbf16>, vector<128x512xf32> -> vector<128x512xf32>
    %c1 = arith.constant 1 : index
    %c0_82 = arith.constant 0 : index
    %c0_83 = arith.constant 0 : index
    %246 = vector.load %arg6[%c1, %c0_82, %c0_83] : memref<2x1x512xf32, #tpu.memory_space<vmem>>, vector<1x1x512xf32>
    %247 = vector.shape_cast %246 : vector<1x1x512xf32> to vector<1x512xf32>
    %248 = vector.broadcast %247 : vector<1x512xf32> to vector<128x512xf32>
    %249 = arith.addf %245, %248 : vector<128x512xf32>
    %250 = vector.shape_cast %249 : vector<128x512xf32> to vector<8x16x512xf32>
    %c0_84 = arith.constant 0 : index
    %c0_85 = arith.constant 0 : index
    %c0_86 = arith.constant 0 : index
    %251 = vector.load %arg12[%c0_84, %c0_85, %c0_86] : memref<8x16x512xf32, #tpu.memory_space<vmem>>, vector<8x16x512xf32>
    tpu.vector_store %arg12[%c0_84, %c0_85, %c0_86], %250 {strides = array<i32>} : memref<8x16x512xf32, #tpu.memory_space<vmem>>, vector<8x16x512xf32>,
    %c1_87 = arith.constant 1 : index
    %c0_88 = arith.constant 0 : index
    %c0_89 = arith.constant 0 : index
    %252 = vector.load %arg5[%c1_87, %c0_88, %c0_89] : memref<2x128x512xbf16, #tpu.memory_space<vmem>>, vector<1x128x512xbf16>
    %253 = vector.shape_cast %252 : vector<1x128x512xbf16> to vector<128x512xbf16>
    %c1_90 = arith.constant 1 : index
    %c0_91 = arith.constant 0 : index
    %c0_92 = arith.constant 0 : index
    %254 = vector.load %arg10[%c1_90, %c0_91, %c0_92] : memref<2x16x128xf32, #tpu.memory_space<vmem>>, vector<1x16x128xf32>
    %255 = vector.shape_cast %254 : vector<1x16x128xf32> to vector<16x128xf32>
    %c1_93 = arith.constant 1 : index
    %c0_94 = arith.constant 0 : index
    %c0_95 = arith.constant 0 : index
    %256 = vector.load %arg11[%c1_93, %c0_94, %c0_95] : memref<2x16x128xf32, #tpu.memory_space<vmem>>, vector<1x16x128xf32>
    %257 = vector.shape_cast %256 : vector<1x16x128xf32> to vector<16x128xf32>
    %c0_i32_96 = arith.constant 0 : i32
    %258 = arith.index_cast %c0_i32_96 : i32 to index
    %c0_97 = arith.constant 0 : index
    %c0_98 = arith.constant 0 : index
    %259 = vector.load %arg12[%258, %c0_97, %c0_98] : memref<8x16x512xf32, #tpu.memory_space<vmem>>, vector<1x16x512xf32>
    %260 = vector.shape_cast %259 : vector<1x16x512xf32> to vector<16x512xf32>
    %261 = arith.truncf %255 : vector<16x128xf32> to vector<16x128xbf16>
    %cst_99 = arith.constant dense<0.000000e+00> : vector<16x512xf32>
    %262 = tpu.matmul %261, %253, %cst_99 {dimension_numbers = #tpu.dot_dimension_numbers<[1], [0], [0], [1], [0, 0, 1, 1], [], []>} : vector<16x128xbf16>, vector<128x512xbf16>, vector<16x512xf32> -> vector<16x512xf32>
    %263 = arith.addf %260, %262 : vector<16x512xf32>
    %264 = vector.extract_strided_slice %263 {offsets = [0, 0], sizes = [16, 384], strides = [1, 1]} : vector<16x512xf32> to vector<16x384xf32>
    %265 = arith.negf %264 : vector<16x384xf32>
    %266 = math.exp %265 : vector<16x384xf32>
    %cst_100 = arith.constant 1.000000e+00 : f32
    %267 = vector.broadcast %cst_100 : f32 to vector<16x384xf32>
    %268 = arith.addf %267, %266 : vector<16x384xf32>
    %269 = arith.divf %267, %268 : vector<16x384xf32>
    %270 = vector.extract_strided_slice %269 {offsets = [0, 0], sizes = [16, 128], strides = [1, 1]} : vector<16x384xf32> to vector<16x128xf32>
    %271 = vector.extract_strided_slice %269 {offsets = [0, 128], sizes = [16, 128], strides = [1, 1]} : vector<16x384xf32> to vector<16x128xf32>
    %272 = vector.extract_strided_slice %269 {offsets = [0, 256], sizes = [16, 128], strides = [1, 1]} : vector<16x384xf32> to vector<16x128xf32>
    %273 = vector.extract_strided_slice %263 {offsets = [0, 384], sizes = [16, 128], strides = [1, 1]} : vector<16x512xf32> to vector<16x128xf32>
    %274 = math.tanh %273 : vector<16x128xf32>
    %275 = arith.mulf %271, %257 : vector<16x128xf32>
    %276 = arith.mulf %270, %274 : vector<16x128xf32>
    %277 = arith.addf %275, %276 : vector<16x128xf32>
    %278 = math.tanh %277 : vector<16x128xf32>
    %279 = arith.mulf %272, %278 : vector<16x128xf32>
    %c1_i32_101 = arith.constant 1 : i32
    %280 = arith.index_cast %c1_i32_101 : i32 to index
    %c0_102 = arith.constant 0 : index
    %c0_103 = arith.constant 0 : index
    %281 = vector.load %arg12[%280, %c0_102, %c0_103] : memref<8x16x512xf32, #tpu.memory_space<vmem>>, vector<1x16x512xf32>
    %282 = vector.shape_cast %281 : vector<1x16x512xf32> to vector<16x512xf32>
    %283 = arith.truncf %279 : vector<16x128xf32> to vector<16x128xbf16>
    %cst_104 = arith.constant dense<0.000000e+00> : vector<16x512xf32>
    %284 = tpu.matmul %283, %253, %cst_104 {dimension_numbers = #tpu.dot_dimension_numbers<[1], [0], [0], [1], [0, 0, 1, 1], [], []>} : vector<16x128xbf16>, vector<128x512xbf16>, vector<16x512xf32> -> vector<16x512xf32>
    %285 = arith.addf %282, %284 : vector<16x512xf32>
    %286 = vector.extract_strided_slice %285 {offsets = [0, 0], sizes = [16, 384], strides = [1, 1]} : vector<16x512xf32> to vector<16x384xf32>
    %287 = arith.negf %286 : vector<16x384xf32>
    %288 = math.exp %287 : vector<16x384xf32>
    %cst_105 = arith.constant 1.000000e+00 : f32
    %289 = vector.broadcast %cst_105 : f32 to vector<16x384xf32>
    %290 = arith.addf %289, %288 : vector<16x384xf32>
    %291 = arith.divf %289, %290 : vector<16x384xf32>
    %292 = vector.extract_strided_slice %291 {offsets = [0, 0], sizes = [16, 128], strides = [1, 1]} : vector<16x384xf32> to vector<16x128xf32>
    %293 = vector.extract_strided_slice %291 {offsets = [0, 128], sizes = [16, 128], strides = [1, 1]} : vector<16x384xf32> to vector<16x128xf32>
    %294 = vector.extract_strided_slice %291 {offsets = [0, 256], sizes = [16, 128], strides = [1, 1]} : vector<16x384xf32> to vector<16x128xf32>
    %295 = vector.extract_strided_slice %285 {offsets = [0, 384], sizes = [16, 128], strides = [1, 1]} : vector<16x512xf32> to vector<16x128xf32>
    %296 = math.tanh %295 : vector<16x128xf32>
    %297 = arith.mulf %293, %277 : vector<16x128xf32>
    %298 = arith.mulf %292, %296 : vector<16x128xf32>
    %299 = arith.addf %297, %298 : vector<16x128xf32>
    %300 = math.tanh %299 : vector<16x128xf32>
    %301 = arith.mulf %294, %300 : vector<16x128xf32>
    %c2_i32_106 = arith.constant 2 : i32
    %302 = arith.index_cast %c2_i32_106 : i32 to index
    %c0_107 = arith.constant 0 : index
    %c0_108 = arith.constant 0 : index
    %303 = vector.load %arg12[%302, %c0_107, %c0_108] : memref<8x16x512xf32, #tpu.memory_space<vmem>>, vector<1x16x512xf32>
    %304 = vector.shape_cast %303 : vector<1x16x512xf32> to vector<16x512xf32>
    %305 = arith.truncf %301 : vector<16x128xf32> to vector<16x128xbf16>
    %cst_109 = arith.constant dense<0.000000e+00> : vector<16x512xf32>
    %306 = tpu.matmul %305, %253, %cst_109 {dimension_numbers = #tpu.dot_dimension_numbers<[1], [0], [0], [1], [0, 0, 1, 1], [], []>} : vector<16x128xbf16>, vector<128x512xbf16>, vector<16x512xf32> -> vector<16x512xf32>
    %307 = arith.addf %304, %306 : vector<16x512xf32>
    %308 = vector.extract_strided_slice %307 {offsets = [0, 0], sizes = [16, 384], strides = [1, 1]} : vector<16x512xf32> to vector<16x384xf32>
    %309 = arith.negf %308 : vector<16x384xf32>
    %310 = math.exp %309 : vector<16x384xf32>
    %cst_110 = arith.constant 1.000000e+00 : f32
    %311 = vector.broadcast %cst_110 : f32 to vector<16x384xf32>
    %312 = arith.addf %311, %310 : vector<16x384xf32>
    %313 = arith.divf %311, %312 : vector<16x384xf32>
    %314 = vector.extract_strided_slice %313 {offsets = [0, 0], sizes = [16, 128], strides = [1, 1]} : vector<16x384xf32> to vector<16x128xf32>
    %315 = vector.extract_strided_slice %313 {offsets = [0, 128], sizes = [16, 128], strides = [1, 1]} : vector<16x384xf32> to vector<16x128xf32>
    %316 = vector.extract_strided_slice %313 {offsets = [0, 256], sizes = [16, 128], strides = [1, 1]} : vector<16x384xf32> to vector<16x128xf32>
    %317 = vector.extract_strided_slice %307 {offsets = [0, 384], sizes = [16, 128], strides = [1, 1]} : vector<16x512xf32> to vector<16x128xf32>
    %318 = math.tanh %317 : vector<16x128xf32>
    %319 = arith.mulf %315, %299 : vector<16x128xf32>
    %320 = arith.mulf %314, %318 : vector<16x128xf32>
    %321 = arith.addf %319, %320 : vector<16x128xf32>
    %322 = math.tanh %321 : vector<16x128xf32>
    %323 = arith.mulf %316, %322 : vector<16x128xf32>
    %c3_i32_111 = arith.constant 3 : i32
    %324 = arith.index_cast %c3_i32_111 : i32 to index
    %c0_112 = arith.constant 0 : index
    %c0_113 = arith.constant 0 : index
    %325 = vector.load %arg12[%324, %c0_112, %c0_113] : memref<8x16x512xf32, #tpu.memory_space<vmem>>, vector<1x16x512xf32>
    %326 = vector.shape_cast %325 : vector<1x16x512xf32> to vector<16x512xf32>
    %327 = arith.truncf %323 : vector<16x128xf32> to vector<16x128xbf16>
    %cst_114 = arith.constant dense<0.000000e+00> : vector<16x512xf32>
    %328 = tpu.matmul %327, %253, %cst_114 {dimension_numbers = #tpu.dot_dimension_numbers<[1], [0], [0], [1], [0, 0, 1, 1], [], []>} : vector<16x128xbf16>, vector<128x512xbf16>, vector<16x512xf32> -> vector<16x512xf32>
    %329 = arith.addf %326, %328 : vector<16x512xf32>
    %330 = vector.extract_strided_slice %329 {offsets = [0, 0], sizes = [16, 384], strides = [1, 1]} : vector<16x512xf32> to vector<16x384xf32>
    %331 = arith.negf %330 : vector<16x384xf32>
    %332 = math.exp %331 : vector<16x384xf32>
    %cst_115 = arith.constant 1.000000e+00 : f32
    %333 = vector.broadcast %cst_115 : f32 to vector<16x384xf32>
    %334 = arith.addf %333, %332 : vector<16x384xf32>
    %335 = arith.divf %333, %334 : vector<16x384xf32>
    %336 = vector.extract_strided_slice %335 {offsets = [0, 0], sizes = [16, 128], strides = [1, 1]} : vector<16x384xf32> to vector<16x128xf32>
    %337 = vector.extract_strided_slice %335 {offsets = [0, 128], sizes = [16, 128], strides = [1, 1]} : vector<16x384xf32> to vector<16x128xf32>
    %338 = vector.extract_strided_slice %335 {offsets = [0, 256], sizes = [16, 128], strides = [1, 1]} : vector<16x384xf32> to vector<16x128xf32>
    %339 = vector.extract_strided_slice %329 {offsets = [0, 384], sizes = [16, 128], strides = [1, 1]} : vector<16x512xf32> to vector<16x128xf32>
    %340 = math.tanh %339 : vector<16x128xf32>
    %341 = arith.mulf %337, %321 : vector<16x128xf32>
    %342 = arith.mulf %336, %340 : vector<16x128xf32>
    %343 = arith.addf %341, %342 : vector<16x128xf32>
    %344 = math.tanh %343 : vector<16x128xf32>
    %345 = arith.mulf %338, %344 : vector<16x128xf32>
    %c4_i32_116 = arith.constant 4 : i32
    %346 = arith.index_cast %c4_i32_116 : i32 to index
    %c0_117 = arith.constant 0 : index
    %c0_118 = arith.constant 0 : index
    %347 = vector.load %arg12[%346, %c0_117, %c0_118] : memref<8x16x512xf32, #tpu.memory_space<vmem>>, vector<1x16x512xf32>
    %348 = vector.shape_cast %347 : vector<1x16x512xf32> to vector<16x512xf32>
    %349 = arith.truncf %345 : vector<16x128xf32> to vector<16x128xbf16>
    %cst_119 = arith.constant dense<0.000000e+00> : vector<16x512xf32>
    %350 = tpu.matmul %349, %253, %cst_119 {dimension_numbers = #tpu.dot_dimension_numbers<[1], [0], [0], [1], [0, 0, 1, 1], [], []>} : vector<16x128xbf16>, vector<128x512xbf16>, vector<16x512xf32> -> vector<16x512xf32>
    %351 = arith.addf %348, %350 : vector<16x512xf32>
    %352 = vector.extract_strided_slice %351 {offsets = [0, 0], sizes = [16, 384], strides = [1, 1]} : vector<16x512xf32> to vector<16x384xf32>
    %353 = arith.negf %352 : vector<16x384xf32>
    %354 = math.exp %353 : vector<16x384xf32>
    %cst_120 = arith.constant 1.000000e+00 : f32
    %355 = vector.broadcast %cst_120 : f32 to vector<16x384xf32>
    %356 = arith.addf %355, %354 : vector<16x384xf32>
    %357 = arith.divf %355, %356 : vector<16x384xf32>
    %358 = vector.extract_strided_slice %357 {offsets = [0, 0], sizes = [16, 128], strides = [1, 1]} : vector<16x384xf32> to vector<16x128xf32>
    %359 = vector.extract_strided_slice %357 {offsets = [0, 128], sizes = [16, 128], strides = [1, 1]} : vector<16x384xf32> to vector<16x128xf32>
    %360 = vector.extract_strided_slice %357 {offsets = [0, 256], sizes = [16, 128], strides = [1, 1]} : vector<16x384xf32> to vector<16x128xf32>
    %361 = vector.extract_strided_slice %351 {offsets = [0, 384], sizes = [16, 128], strides = [1, 1]} : vector<16x512xf32> to vector<16x128xf32>
    %362 = math.tanh %361 : vector<16x128xf32>
    %363 = arith.mulf %359, %343 : vector<16x128xf32>
    %364 = arith.mulf %358, %362 : vector<16x128xf32>
    %365 = arith.addf %363, %364 : vector<16x128xf32>
    %366 = math.tanh %365 : vector<16x128xf32>
    %367 = arith.mulf %360, %366 : vector<16x128xf32>
    %c5_i32_121 = arith.constant 5 : i32
    %368 = arith.index_cast %c5_i32_121 : i32 to index
    %c0_122 = arith.constant 0 : index
    %c0_123 = arith.constant 0 : index
    %369 = vector.load %arg12[%368, %c0_122, %c0_123] : memref<8x16x512xf32, #tpu.memory_space<vmem>>, vector<1x16x512xf32>
    %370 = vector.shape_cast %369 : vector<1x16x512xf32> to vector<16x512xf32>
    %371 = arith.truncf %367 : vector<16x128xf32> to vector<16x128xbf16>
    %cst_124 = arith.constant dense<0.000000e+00> : vector<16x512xf32>
    %372 = tpu.matmul %371, %253, %cst_124 {dimension_numbers = #tpu.dot_dimension_numbers<[1], [0], [0], [1], [0, 0, 1, 1], [], []>} : vector<16x128xbf16>, vector<128x512xbf16>, vector<16x512xf32> -> vector<16x512xf32>
    %373 = arith.addf %370, %372 : vector<16x512xf32>
    %374 = vector.extract_strided_slice %373 {offsets = [0, 0], sizes = [16, 384], strides = [1, 1]} : vector<16x512xf32> to vector<16x384xf32>
    %375 = arith.negf %374 : vector<16x384xf32>
    %376 = math.exp %375 : vector<16x384xf32>
    %cst_125 = arith.constant 1.000000e+00 : f32
    %377 = vector.broadcast %cst_125 : f32 to vector<16x384xf32>
    %378 = arith.addf %377, %376 : vector<16x384xf32>
    %379 = arith.divf %377, %378 : vector<16x384xf32>
    %380 = vector.extract_strided_slice %379 {offsets = [0, 0], sizes = [16, 128], strides = [1, 1]} : vector<16x384xf32> to vector<16x128xf32>
    %381 = vector.extract_strided_slice %379 {offsets = [0, 128], sizes = [16, 128], strides = [1, 1]} : vector<16x384xf32> to vector<16x128xf32>
    %382 = vector.extract_strided_slice %379 {offsets = [0, 256], sizes = [16, 128], strides = [1, 1]} : vector<16x384xf32> to vector<16x128xf32>
    %383 = vector.extract_strided_slice %373 {offsets = [0, 384], sizes = [16, 128], strides = [1, 1]} : vector<16x512xf32> to vector<16x128xf32>
    %384 = math.tanh %383 : vector<16x128xf32>
    %385 = arith.mulf %381, %365 : vector<16x128xf32>
    %386 = arith.mulf %380, %384 : vector<16x128xf32>
    %387 = arith.addf %385, %386 : vector<16x128xf32>
    %388 = math.tanh %387 : vector<16x128xf32>
    %389 = arith.mulf %382, %388 : vector<16x128xf32>
    %c6_i32_126 = arith.constant 6 : i32
    %390 = arith.index_cast %c6_i32_126 : i32 to index
    %c0_127 = arith.constant 0 : index
    %c0_128 = arith.constant 0 : index
    %391 = vector.load %arg12[%390, %c0_127, %c0_128] : memref<8x16x512xf32, #tpu.memory_space<vmem>>, vector<1x16x512xf32>
    %392 = vector.shape_cast %391 : vector<1x16x512xf32> to vector<16x512xf32>
    %393 = arith.truncf %389 : vector<16x128xf32> to vector<16x128xbf16>
    %cst_129 = arith.constant dense<0.000000e+00> : vector<16x512xf32>
    %394 = tpu.matmul %393, %253, %cst_129 {dimension_numbers = #tpu.dot_dimension_numbers<[1], [0], [0], [1], [0, 0, 1, 1], [], []>} : vector<16x128xbf16>, vector<128x512xbf16>, vector<16x512xf32> -> vector<16x512xf32>
    %395 = arith.addf %392, %394 : vector<16x512xf32>
    %396 = vector.extract_strided_slice %395 {offsets = [0, 0], sizes = [16, 384], strides = [1, 1]} : vector<16x512xf32> to vector<16x384xf32>
    %397 = arith.negf %396 : vector<16x384xf32>
    %398 = math.exp %397 : vector<16x384xf32>
    %cst_130 = arith.constant 1.000000e+00 : f32
    %399 = vector.broadcast %cst_130 : f32 to vector<16x384xf32>
    %400 = arith.addf %399, %398 : vector<16x384xf32>
    %401 = arith.divf %399, %400 : vector<16x384xf32>
    %402 = vector.extract_strided_slice %401 {offsets = [0, 0], sizes = [16, 128], strides = [1, 1]} : vector<16x384xf32> to vector<16x128xf32>
    %403 = vector.extract_strided_slice %401 {offsets = [0, 128], sizes = [16, 128], strides = [1, 1]} : vector<16x384xf32> to vector<16x128xf32>
    %404 = vector.extract_strided_slice %401 {offsets = [0, 256], sizes = [16, 128], strides = [1, 1]} : vector<16x384xf32> to vector<16x128xf32>
    %405 = vector.extract_strided_slice %395 {offsets = [0, 384], sizes = [16, 128], strides = [1, 1]} : vector<16x512xf32> to vector<16x128xf32>
    %406 = math.tanh %405 : vector<16x128xf32>
    %407 = arith.mulf %403, %387 : vector<16x128xf32>
    %408 = arith.mulf %402, %406 : vector<16x128xf32>
    %409 = arith.addf %407, %408 : vector<16x128xf32>
    %410 = math.tanh %409 : vector<16x128xf32>
    %411 = arith.mulf %404, %410 : vector<16x128xf32>
    %c7_i32_131 = arith.constant 7 : i32
    %412 = arith.index_cast %c7_i32_131 : i32 to index
    %c0_132 = arith.constant 0 : index
    %c0_133 = arith.constant 0 : index
    %413 = vector.load %arg12[%412, %c0_132, %c0_133] : memref<8x16x512xf32, #tpu.memory_space<vmem>>, vector<1x16x512xf32>
    %414 = vector.shape_cast %413 : vector<1x16x512xf32> to vector<16x512xf32>
    %415 = arith.truncf %411 : vector<16x128xf32> to vector<16x128xbf16>
    %cst_134 = arith.constant dense<0.000000e+00> : vector<16x512xf32>
    %416 = tpu.matmul %415, %253, %cst_134 {dimension_numbers = #tpu.dot_dimension_numbers<[1], [0], [0], [1], [0, 0, 1, 1], [], []>} : vector<16x128xbf16>, vector<128x512xbf16>, vector<16x512xf32> -> vector<16x512xf32>
    %417 = arith.addf %414, %416 : vector<16x512xf32>
    %418 = vector.extract_strided_slice %417 {offsets = [0, 0], sizes = [16, 384], strides = [1, 1]} : vector<16x512xf32> to vector<16x384xf32>
    %419 = arith.negf %418 : vector<16x384xf32>
    %420 = math.exp %419 : vector<16x384xf32>
    %cst_135 = arith.constant 1.000000e+00 : f32
    %421 = vector.broadcast %cst_135 : f32 to vector<16x384xf32>
    %422 = arith.addf %421, %420 : vector<16x384xf32>
    %423 = arith.divf %421, %422 : vector<16x384xf32>
    %424 = vector.extract_strided_slice %423 {offsets = [0, 0], sizes = [16, 128], strides = [1, 1]} : vector<16x384xf32> to vector<16x128xf32>
    %425 = vector.extract_strided_slice %423 {offsets = [0, 128], sizes = [16, 128], strides = [1, 1]} : vector<16x384xf32> to vector<16x128xf32>
    %426 = vector.extract_strided_slice %423 {offsets = [0, 256], sizes = [16, 128], strides = [1, 1]} : vector<16x384xf32> to vector<16x128xf32>
    %427 = vector.extract_strided_slice %417 {offsets = [0, 384], sizes = [16, 128], strides = [1, 1]} : vector<16x512xf32> to vector<16x128xf32>
    %428 = math.tanh %427 : vector<16x128xf32>
    %429 = arith.mulf %425, %409 : vector<16x128xf32>
    %430 = arith.mulf %424, %428 : vector<16x128xf32>
    %431 = arith.addf %429, %430 : vector<16x128xf32>
    %432 = math.tanh %431 : vector<16x128xf32>
    %433 = arith.mulf %426, %432 : vector<16x128xf32>
    %c8_i32_136 = arith.constant 8 : i32
    %c1_137 = arith.constant 1 : index
    %c0_138 = arith.constant 0 : index
    %c0_139 = arith.constant 0 : index
    %434 = vector.load %arg10[%c1_137, %c0_138, %c0_139] : memref<2x16x128xf32, #tpu.memory_space<vmem>>, vector<1x16x128xf32>
    %435 = vector.shape_cast %434 : vector<1x16x128xf32> to vector<16x128xf32>
    %436 = vector.shape_cast %433 : vector<16x128xf32> to vector<1x16x128xf32>
    tpu.vector_store %arg10[%c1_137, %c0_138, %c0_139], %436 {strides = array<i32>} : memref<2x16x128xf32, #tpu.memory_space<vmem>>, vector<1x16x128xf32>,
    %c1_140 = arith.constant 1 : index
    %c0_141 = arith.constant 0 : index
    %c0_142 = arith.constant 0 : index
    %437 = vector.load %arg11[%c1_140, %c0_141, %c0_142] : memref<2x16x128xf32, #tpu.memory_space<vmem>>, vector<1x16x128xf32>
    %438 = vector.shape_cast %437 : vector<1x16x128xf32> to vector<16x128xf32>
    %439 = vector.shape_cast %431 : vector<16x128xf32> to vector<1x16x128xf32>
    tpu.vector_store %arg11[%c1_140, %c0_141, %c0_142], %439 {strides = array<i32>} : memref<2x16x128xf32, #tpu.memory_space<vmem>>, vector<1x16x128xf32>,
    %c0_i32_143 = arith.constant 0 : i32
    %440 = arith.cmpi eq, %arg1, %c0_i32_143 : i32
    %441 = arith.extui %440 : i1 to i32
    %c0_i32_144 = arith.constant 0 : i32
    %442 = arith.cmpi ne, %441, %c0_i32_144 : i32
    scf.if %442 {
      %c1_145 = arith.constant 1 : index
      %c0_146 = arith.constant 0 : index
      %c0_147 = arith.constant 0 : index
      %443 = vector.load %arg10[%c1_145, %c0_146, %c0_147] : memref<2x16x128xf32, #tpu.memory_space<vmem>>, vector<1x16x128xf32>
      %444 = vector.shape_cast %443 : vector<1x16x128xf32> to vector<16x128xf32>
      %445 = arith.truncf %444 : vector<16x128xf32> to vector<16x128xbf16>
      %c0_148 = arith.constant 0 : index
      %c0_149 = arith.constant 0 : index
      %446 = vector.load %arg7[%c0_148, %c0_149] : memref<128x128xbf16, #tpu.memory_space<vmem>>, vector<128x128xbf16>
      %cst_150 = arith.constant dense<0.000000e+00> : vector<16x128xf32>
      %447 = tpu.matmul %445, %446, %cst_150 {dimension_numbers = #tpu.dot_dimension_numbers<[1], [0], [0], [1], [0, 0, 1, 1], [], []>} : vector<16x128xbf16>, vector<128x128xbf16>, vector<16x128xf32> -> vector<16x128xf32>
      %c0_151 = arith.constant 0 : index
      %c0_152 = arith.constant 0 : index
      %448 = vector.load %arg8[%c0_151, %c0_152] : memref<1x128xf32, #tpu.memory_space<vmem>>, vector<1x128xf32>
      %449 = vector.broadcast %448 : vector<1x128xf32> to vector<16x128xf32>
      %450 = arith.addf %447, %449 : vector<16x128xf32>
      %c0_153 = arith.constant 0 : index
      %c0_154 = arith.constant 0 : index
      %451 = vector.load %arg9[%c0_153, %c0_154] : memref<16x128xf32, #tpu.memory_space<vmem>>, vector<16x128xf32>
      tpu.vector_store %arg9[%c0_153, %c0_154], %450 {strides = array<i32>} : memref<16x128xf32, #tpu.memory_space<vmem>>, vector<16x128xf32>,
    } else {
    }
    return
  }
  func.func @transform_0(%arg0: i32, %arg1: i32) -> (i32, i32, i32) {
    %c0_i32 = arith.constant 0 : i32
    %c0_i32_0 = arith.constant 0 : i32
    return %arg1, %arg0, %c0_i32 : i32, i32, i32
  }
  func.func @transform_1(%arg0: i32, %arg1: i32) -> (i32, i32) {
    %c0_i32 = arith.constant 0 : i32
    %c0_i32_0 = arith.constant 0 : i32
    %c0_i32_1 = arith.constant 0 : i32
    return %c0_i32, %c0_i32_0 : i32, i32
  }
  func.func @transform_2(%arg0: i32, %arg1: i32) -> (i32, i32, i32) {
    %c0_i32 = arith.constant 0 : i32
    %c0_i32_0 = arith.constant 0 : i32
    %c0_i32_1 = arith.constant 0 : i32
    %c0_i32_2 = arith.constant 0 : i32
    return %c0_i32, %c0_i32_0, %c0_i32_1 : i32, i32, i32
  }
  func.func @transform_3(%arg0: i32, %arg1: i32) -> (i32, i32, i32) {
    %c0_i32 = arith.constant 0 : i32
    %c0_i32_0 = arith.constant 0 : i32
    %c0_i32_1 = arith.constant 0 : i32
    %c0_i32_2 = arith.constant 0 : i32
    return %c0_i32, %c0_i32_0, %c0_i32_1 : i32, i32, i32
  }
  func.func @transform_4(%arg0: i32, %arg1: i32) -> (i32, i32, i32) {
    %c0_i32 = arith.constant 0 : i32
    %c0_i32_0 = arith.constant 0 : i32
    %c0_i32_1 = arith.constant 0 : i32
    %c0_i32_2 = arith.constant 0 : i32
    return %c0_i32, %c0_i32_0, %c0_i32_1 : i32, i32, i32
  }
  func.func @transform_5(%arg0: i32, %arg1: i32) -> (i32, i32) {
    %c0_i32 = arith.constant 0 : i32
    %c0_i32_0 = arith.constant 0 : i32
    %c0_i32_1 = arith.constant 0 : i32
    return %c0_i32, %c0_i32_0 : i32, i32
  }
  func.func @transform_6(%arg0: i32, %arg1: i32) -> (i32, i32) {
    %c0_i32 = arith.constant 0 : i32
    %c0_i32_0 = arith.constant 0 : i32
    %c0_i32_1 = arith.constant 0 : i32
    return %c0_i32, %c0_i32_0 : i32, i32
  }
  func.func @transform_7(%arg0: i32, %arg1: i32) -> (i32, i32) {
    %c0_i32 = arith.constant 0 : i32
    %c0_i32_0 = arith.constant 0 : i32
    return %arg0, %c0_i32 : i32, i32
  }
}

module attributes {stable_mosaic.version = 11 : i64} {
  func.func @_fused_lstm_fc_kernel(%arg0: i32, %arg1: i32, %arg2: memref<8x16x128xbf16, #tpu.memory_space<vmem>>, %arg3: memref<128x512xbf16, #tpu.memory_space<vmem>>, %arg4: memref<1x128x512xbf16, #tpu.memory_space<vmem>>, %arg5: memref<2x128x512xbf16, #tpu.memory_space<vmem>>, %arg6: memref<2x1x512xf32, #tpu.memory_space<vmem>>, %arg7: memref<128x128xbf16, #tpu.memory_space<vmem>>, %arg8: memref<1x128xf32, #tpu.memory_space<vmem>>, %arg9: memref<16x128xf32, #tpu.memory_space<vmem>>, %arg10: memref<2x16x128xf32, #tpu.memory_space<vmem>>, %arg11: memref<2x16x128xf32, #tpu.memory_space<vmem>>, %arg12: memref<8x16x512xf32, #tpu.memory_space<vmem>>, %arg13: memref<8x16x128xbf16, #tpu.memory_space<vmem>>) attributes {dimension_semantics = [#tpu.dimension_semantics<parallel>, #tpu.dimension_semantics<arbitrary>], iteration_bounds = array<i64: 1, 1>, scalar_prefetch = 0 : i64, scratch_operands = 4 : i64, tpu.core_type = #tpu.core_type<tc>, window_params = [{transform_indices = @transform_0, window_bounds = array<i64: 8, 16, 128>}, {pipeline_mode = #tpu.pipeline_mode<synchronous>, transform_indices = @transform_1, window_bounds = array<i64: 128, 512>}, {pipeline_mode = #tpu.pipeline_mode<synchronous>, transform_indices = @transform_2, window_bounds = array<i64: 1, 128, 512>}, {pipeline_mode = #tpu.pipeline_mode<synchronous>, transform_indices = @transform_3, window_bounds = array<i64: 2, 128, 512>}, {pipeline_mode = #tpu.pipeline_mode<synchronous>, transform_indices = @transform_4, window_bounds = array<i64: 2, 1, 512>}, {pipeline_mode = #tpu.pipeline_mode<synchronous>, transform_indices = @transform_5, window_bounds = array<i64: 128, 128>}, {pipeline_mode = #tpu.pipeline_mode<synchronous>, transform_indices = @transform_6, window_bounds = array<i64: 1, 128>}, {transform_indices = @transform_7, window_bounds = array<i64: 16, 128>}]} {
    %c0_i32 = arith.constant 0 : i32
    %0 = arith.cmpi eq, %arg1, %c0_i32 : i32
    %1 = arith.extui %0 : i1 to i32
    %c0_i32_0 = arith.constant 0 : i32
    %2 = arith.cmpi ne, %1, %c0_i32_0 : i32
    scf.if %2 {
      %cst_145 = arith.constant 0.000000e+00 : f32
      %443 = vector.broadcast %cst_145 : f32 to vector<2x16x128xf32>
      %c0_146 = arith.constant 0 : index
      %c0_147 = arith.constant 0 : index
      %c0_148 = arith.constant 0 : index
      %444 = vector.load %arg10[%c0_146, %c0_147, %c0_148] : memref<2x16x128xf32, #tpu.memory_space<vmem>>, vector<2x16x128xf32>
      tpu.vector_store %arg10[%c0_146, %c0_147, %c0_148], %443 {strides = array<i32>} : memref<2x16x128xf32, #tpu.memory_space<vmem>>, vector<2x16x128xf32>,
      %cst_149 = arith.constant 0.000000e+00 : f32
      %445 = vector.broadcast %cst_149 : f32 to vector<2x16x128xf32>
      %c0_150 = arith.constant 0 : index
      %c0_151 = arith.constant 0 : index
      %c0_152 = arith.constant 0 : index
      %446 = vector.load %arg11[%c0_150, %c0_151, %c0_152] : memref<2x16x128xf32, #tpu.memory_space<vmem>>, vector<2x16x128xf32>
      tpu.vector_store %arg11[%c0_150, %c0_151, %c0_152], %445 {strides = array<i32>} : memref<2x16x128xf32, #tpu.memory_space<vmem>>, vector<2x16x128xf32>,
    } else {
    }
    %c0 = arith.constant 0 : index
    %c0_1 = arith.constant 0 : index
    %c0_2 = arith.constant 0 : index
    %3 = vector.load %arg2[%c0, %c0_1, %c0_2] : memref<8x16x128xbf16, #tpu.memory_space<vmem>>, vector<8x16x128xbf16>
    %4 = vector.shape_cast %3 : vector<8x16x128xbf16> to vector<128x128xbf16>
    %c0_3 = arith.constant 0 : index
    %c0_4 = arith.constant 0 : index
    %5 = vector.load %arg3[%c0_3, %c0_4] : memref<128x512xbf16, #tpu.memory_space<vmem>>, vector<128x512xbf16>
    %cst = arith.constant dense<0.000000e+00> : vector<128x512xf32>
    %6 = tpu.matmul %4, %5, %cst {dimension_numbers = #tpu.dot_dimension_numbers<[1], [0], [0], [1], [0, 0, 1, 1], [], []>} : vector<128x128xbf16>, vector<128x512xbf16>, vector<128x512xf32> -> vector<128x512xf32>
    %c0_5 = arith.constant 0 : index
    %c0_6 = arith.constant 0 : index
    %c0_7 = arith.constant 0 : index
    %7 = vector.load %arg6[%c0_5, %c0_6, %c0_7] : memref<2x1x512xf32, #tpu.memory_space<vmem>>, vector<1x1x512xf32>
    %8 = vector.shape_cast %7 : vector<1x1x512xf32> to vector<1x512xf32>
    %9 = vector.broadcast %8 : vector<1x512xf32> to vector<128x512xf32>
    %10 = arith.addf %6, %9 : vector<128x512xf32>
    %11 = vector.shape_cast %10 : vector<128x512xf32> to vector<8x16x512xf32>
    %c0_8 = arith.constant 0 : index
    %c0_9 = arith.constant 0 : index
    %c0_10 = arith.constant 0 : index
    %12 = vector.load %arg12[%c0_8, %c0_9, %c0_10] : memref<8x16x512xf32, #tpu.memory_space<vmem>>, vector<8x16x512xf32>
    tpu.vector_store %arg12[%c0_8, %c0_9, %c0_10], %11 {strides = array<i32>} : memref<8x16x512xf32, #tpu.memory_space<vmem>>, vector<8x16x512xf32>,
    %c0_11 = arith.constant 0 : index
    %c0_12 = arith.constant 0 : index
    %c0_13 = arith.constant 0 : index
    %13 = vector.load %arg5[%c0_11, %c0_12, %c0_13] : memref<2x128x512xbf16, #tpu.memory_space<vmem>>, vector<1x128x512xbf16>
    %14 = vector.shape_cast %13 : vector<1x128x512xbf16> to vector<128x512xbf16>
    %c0_14 = arith.constant 0 : index
    %c0_15 = arith.constant 0 : index
    %c0_16 = arith.constant 0 : index
    %15 = vector.load %arg10[%c0_14, %c0_15, %c0_16] : memref<2x16x128xf32, #tpu.memory_space<vmem>>, vector<1x16x128xf32>
    %16 = vector.shape_cast %15 : vector<1x16x128xf32> to vector<16x128xf32>
    %c0_17 = arith.constant 0 : index
    %c0_18 = arith.constant 0 : index
    %c0_19 = arith.constant 0 : index
    %17 = vector.load %arg11[%c0_17, %c0_18, %c0_19] : memref<2x16x128xf32, #tpu.memory_space<vmem>>, vector<1x16x128xf32>
    %18 = vector.shape_cast %17 : vector<1x16x128xf32> to vector<16x128xf32>
    %c0_i32_20 = arith.constant 0 : i32
    %19 = arith.index_cast %c0_i32_20 : i32 to index
    %c0_21 = arith.constant 0 : index
    %c0_22 = arith.constant 0 : index
    %20 = vector.load %arg12[%19, %c0_21, %c0_22] : memref<8x16x512xf32, #tpu.memory_space<vmem>>, vector<1x16x512xf32>
    %21 = vector.shape_cast %20 : vector<1x16x512xf32> to vector<16x512xf32>
    %22 = arith.truncf %16 : vector<16x128xf32> to vector<16x128xbf16>
    %cst_23 = arith.constant dense<0.000000e+00> : vector<16x512xf32>
    %23 = tpu.matmul %22, %14, %cst_23 {dimension_numbers = #tpu.dot_dimension_numbers<[1], [0], [0], [1], [0, 0, 1, 1], [], []>} : vector<16x128xbf16>, vector<128x512xbf16>, vector<16x512xf32> -> vector<16x512xf32>
    %24 = arith.addf %21, %23 : vector<16x512xf32>
    %25 = vector.extract_strided_slice %24 {offsets = [0, 0], sizes = [16, 384], strides = [1, 1]} : vector<16x512xf32> to vector<16x384xf32>
    %26 = arith.negf %25 : vector<16x384xf32>
    %27 = math.exp %26 : vector<16x384xf32>
    %cst_24 = arith.constant 1.000000e+00 : f32
    %28 = vector.broadcast %cst_24 : f32 to vector<16x384xf32>
    %29 = arith.addf %28, %27 : vector<16x384xf32>
    %30 = arith.divf %28, %29 : vector<16x384xf32>
    %31 = vector.extract_strided_slice %30 {offsets = [0, 0], sizes = [16, 128], strides = [1, 1]} : vector<16x384xf32> to vector<16x128xf32>
    %32 = vector.extract_strided_slice %30 {offsets = [0, 128], sizes = [16, 128], strides = [1, 1]} : vector<16x384xf32> to vector<16x128xf32>
    %33 = vector.extract_strided_slice %30 {offsets = [0, 256], sizes = [16, 128], strides = [1, 1]} : vector<16x384xf32> to vector<16x128xf32>
    %34 = vector.extract_strided_slice %24 {offsets = [0, 384], sizes = [16, 128], strides = [1, 1]} : vector<16x512xf32> to vector<16x128xf32>
    %35 = math.tanh %34 : vector<16x128xf32>
    %36 = arith.mulf %32, %18 : vector<16x128xf32>
    %37 = arith.mulf %31, %35 : vector<16x128xf32>
    %38 = arith.addf %36, %37 : vector<16x128xf32>
    %39 = math.tanh %38 : vector<16x128xf32>
    %40 = arith.mulf %33, %39 : vector<16x128xf32>
    %41 = arith.truncf %40 : vector<16x128xf32> to vector<16x128xbf16>
    %42 = arith.index_cast %c0_i32_20 : i32 to index
    %c0_25 = arith.constant 0 : index
    %c0_26 = arith.constant 0 : index
    %43 = vector.load %arg13[%42, %c0_25, %c0_26] : memref<8x16x128xbf16, #tpu.memory_space<vmem>>, vector<1x16x128xbf16>
    %44 = vector.shape_cast %43 : vector<1x16x128xbf16> to vector<16x128xbf16>
    %45 = vector.shape_cast %41 : vector<16x128xbf16> to vector<1x16x128xbf16>
    tpu.vector_store %arg13[%42, %c0_25, %c0_26], %45 {strides = array<i32>} : memref<8x16x128xbf16, #tpu.memory_space<vmem>>, vector<1x16x128xbf16>,
    %c1_i32 = arith.constant 1 : i32
    %46 = arith.index_cast %c1_i32 : i32 to index
    %c0_27 = arith.constant 0 : index
    %c0_28 = arith.constant 0 : index
    %47 = vector.load %arg12[%46, %c0_27, %c0_28] : memref<8x16x512xf32, #tpu.memory_space<vmem>>, vector<1x16x512xf32>
    %48 = vector.shape_cast %47 : vector<1x16x512xf32> to vector<16x512xf32>
    %49 = arith.truncf %40 : vector<16x128xf32> to vector<16x128xbf16>
    %cst_29 = arith.constant dense<0.000000e+00> : vector<16x512xf32>
    %50 = tpu.matmul %49, %14, %cst_29 {dimension_numbers = #tpu.dot_dimension_numbers<[1], [0], [0], [1], [0, 0, 1, 1], [], []>} : vector<16x128xbf16>, vector<128x512xbf16>, vector<16x512xf32> -> vector<16x512xf32>
    %51 = arith.addf %48, %50 : vector<16x512xf32>
    %52 = vector.extract_strided_slice %51 {offsets = [0, 0], sizes = [16, 384], strides = [1, 1]} : vector<16x512xf32> to vector<16x384xf32>
    %53 = arith.negf %52 : vector<16x384xf32>
    %54 = math.exp %53 : vector<16x384xf32>
    %cst_30 = arith.constant 1.000000e+00 : f32
    %55 = vector.broadcast %cst_30 : f32 to vector<16x384xf32>
    %56 = arith.addf %55, %54 : vector<16x384xf32>
    %57 = arith.divf %55, %56 : vector<16x384xf32>
    %58 = vector.extract_strided_slice %57 {offsets = [0, 0], sizes = [16, 128], strides = [1, 1]} : vector<16x384xf32> to vector<16x128xf32>
    %59 = vector.extract_strided_slice %57 {offsets = [0, 128], sizes = [16, 128], strides = [1, 1]} : vector<16x384xf32> to vector<16x128xf32>
    %60 = vector.extract_strided_slice %57 {offsets = [0, 256], sizes = [16, 128], strides = [1, 1]} : vector<16x384xf32> to vector<16x128xf32>
    %61 = vector.extract_strided_slice %51 {offsets = [0, 384], sizes = [16, 128], strides = [1, 1]} : vector<16x512xf32> to vector<16x128xf32>
    %62 = math.tanh %61 : vector<16x128xf32>
    %63 = arith.mulf %59, %38 : vector<16x128xf32>
    %64 = arith.mulf %58, %62 : vector<16x128xf32>
    %65 = arith.addf %63, %64 : vector<16x128xf32>
    %66 = math.tanh %65 : vector<16x128xf32>
    %67 = arith.mulf %60, %66 : vector<16x128xf32>
    %68 = arith.truncf %67 : vector<16x128xf32> to vector<16x128xbf16>
    %69 = arith.index_cast %c1_i32 : i32 to index
    %c0_31 = arith.constant 0 : index
    %c0_32 = arith.constant 0 : index
    %70 = vector.load %arg13[%69, %c0_31, %c0_32] : memref<8x16x128xbf16, #tpu.memory_space<vmem>>, vector<1x16x128xbf16>
    %71 = vector.shape_cast %70 : vector<1x16x128xbf16> to vector<16x128xbf16>
    %72 = vector.shape_cast %68 : vector<16x128xbf16> to vector<1x16x128xbf16>
    tpu.vector_store %arg13[%69, %c0_31, %c0_32], %72 {strides = array<i32>} : memref<8x16x128xbf16, #tpu.memory_space<vmem>>, vector<1x16x128xbf16>,
    %c2_i32 = arith.constant 2 : i32
    %73 = arith.index_cast %c2_i32 : i32 to index
    %c0_33 = arith.constant 0 : index
    %c0_34 = arith.constant 0 : index
    %74 = vector.load %arg12[%73, %c0_33, %c0_34] : memref<8x16x512xf32, #tpu.memory_space<vmem>>, vector<1x16x512xf32>
    %75 = vector.shape_cast %74 : vector<1x16x512xf32> to vector<16x512xf32>
    %76 = arith.truncf %67 : vector<16x128xf32> to vector<16x128xbf16>
    %cst_35 = arith.constant dense<0.000000e+00> : vector<16x512xf32>
    %77 = tpu.matmul %76, %14, %cst_35 {dimension_numbers = #tpu.dot_dimension_numbers<[1], [0], [0], [1], [0, 0, 1, 1], [], []>} : vector<16x128xbf16>, vector<128x512xbf16>, vector<16x512xf32> -> vector<16x512xf32>
    %78 = arith.addf %75, %77 : vector<16x512xf32>
    %79 = vector.extract_strided_slice %78 {offsets = [0, 0], sizes = [16, 384], strides = [1, 1]} : vector<16x512xf32> to vector<16x384xf32>
    %80 = arith.negf %79 : vector<16x384xf32>
    %81 = math.exp %80 : vector<16x384xf32>
    %cst_36 = arith.constant 1.000000e+00 : f32
    %82 = vector.broadcast %cst_36 : f32 to vector<16x384xf32>
    %83 = arith.addf %82, %81 : vector<16x384xf32>
    %84 = arith.divf %82, %83 : vector<16x384xf32>
    %85 = vector.extract_strided_slice %84 {offsets = [0, 0], sizes = [16, 128], strides = [1, 1]} : vector<16x384xf32> to vector<16x128xf32>
    %86 = vector.extract_strided_slice %84 {offsets = [0, 128], sizes = [16, 128], strides = [1, 1]} : vector<16x384xf32> to vector<16x128xf32>
    %87 = vector.extract_strided_slice %84 {offsets = [0, 256], sizes = [16, 128], strides = [1, 1]} : vector<16x384xf32> to vector<16x128xf32>
    %88 = vector.extract_strided_slice %78 {offsets = [0, 384], sizes = [16, 128], strides = [1, 1]} : vector<16x512xf32> to vector<16x128xf32>
    %89 = math.tanh %88 : vector<16x128xf32>
    %90 = arith.mulf %86, %65 : vector<16x128xf32>
    %91 = arith.mulf %85, %89 : vector<16x128xf32>
    %92 = arith.addf %90, %91 : vector<16x128xf32>
    %93 = math.tanh %92 : vector<16x128xf32>
    %94 = arith.mulf %87, %93 : vector<16x128xf32>
    %95 = arith.truncf %94 : vector<16x128xf32> to vector<16x128xbf16>
    %96 = arith.index_cast %c2_i32 : i32 to index
    %c0_37 = arith.constant 0 : index
    %c0_38 = arith.constant 0 : index
    %97 = vector.load %arg13[%96, %c0_37, %c0_38] : memref<8x16x128xbf16, #tpu.memory_space<vmem>>, vector<1x16x128xbf16>
    %98 = vector.shape_cast %97 : vector<1x16x128xbf16> to vector<16x128xbf16>
    %99 = vector.shape_cast %95 : vector<16x128xbf16> to vector<1x16x128xbf16>
    tpu.vector_store %arg13[%96, %c0_37, %c0_38], %99 {strides = array<i32>} : memref<8x16x128xbf16, #tpu.memory_space<vmem>>, vector<1x16x128xbf16>,
    %c3_i32 = arith.constant 3 : i32
    %100 = arith.index_cast %c3_i32 : i32 to index
    %c0_39 = arith.constant 0 : index
    %c0_40 = arith.constant 0 : index
    %101 = vector.load %arg12[%100, %c0_39, %c0_40] : memref<8x16x512xf32, #tpu.memory_space<vmem>>, vector<1x16x512xf32>
    %102 = vector.shape_cast %101 : vector<1x16x512xf32> to vector<16x512xf32>
    %103 = arith.truncf %94 : vector<16x128xf32> to vector<16x128xbf16>
    %cst_41 = arith.constant dense<0.000000e+00> : vector<16x512xf32>
    %104 = tpu.matmul %103, %14, %cst_41 {dimension_numbers = #tpu.dot_dimension_numbers<[1], [0], [0], [1], [0, 0, 1, 1], [], []>} : vector<16x128xbf16>, vector<128x512xbf16>, vector<16x512xf32> -> vector<16x512xf32>
    %105 = arith.addf %102, %104 : vector<16x512xf32>
    %106 = vector.extract_strided_slice %105 {offsets = [0, 0], sizes = [16, 384], strides = [1, 1]} : vector<16x512xf32> to vector<16x384xf32>
    %107 = arith.negf %106 : vector<16x384xf32>
    %108 = math.exp %107 : vector<16x384xf32>
    %cst_42 = arith.constant 1.000000e+00 : f32
    %109 = vector.broadcast %cst_42 : f32 to vector<16x384xf32>
    %110 = arith.addf %109, %108 : vector<16x384xf32>
    %111 = arith.divf %109, %110 : vector<16x384xf32>
    %112 = vector.extract_strided_slice %111 {offsets = [0, 0], sizes = [16, 128], strides = [1, 1]} : vector<16x384xf32> to vector<16x128xf32>
    %113 = vector.extract_strided_slice %111 {offsets = [0, 128], sizes = [16, 128], strides = [1, 1]} : vector<16x384xf32> to vector<16x128xf32>
    %114 = vector.extract_strided_slice %111 {offsets = [0, 256], sizes = [16, 128], strides = [1, 1]} : vector<16x384xf32> to vector<16x128xf32>
    %115 = vector.extract_strided_slice %105 {offsets = [0, 384], sizes = [16, 128], strides = [1, 1]} : vector<16x512xf32> to vector<16x128xf32>
    %116 = math.tanh %115 : vector<16x128xf32>
    %117 = arith.mulf %113, %92 : vector<16x128xf32>
    %118 = arith.mulf %112, %116 : vector<16x128xf32>
    %119 = arith.addf %117, %118 : vector<16x128xf32>
    %120 = math.tanh %119 : vector<16x128xf32>
    %121 = arith.mulf %114, %120 : vector<16x128xf32>
    %122 = arith.truncf %121 : vector<16x128xf32> to vector<16x128xbf16>
    %123 = arith.index_cast %c3_i32 : i32 to index
    %c0_43 = arith.constant 0 : index
    %c0_44 = arith.constant 0 : index
    %124 = vector.load %arg13[%123, %c0_43, %c0_44] : memref<8x16x128xbf16, #tpu.memory_space<vmem>>, vector<1x16x128xbf16>
    %125 = vector.shape_cast %124 : vector<1x16x128xbf16> to vector<16x128xbf16>
    %126 = vector.shape_cast %122 : vector<16x128xbf16> to vector<1x16x128xbf16>
    tpu.vector_store %arg13[%123, %c0_43, %c0_44], %126 {strides = array<i32>} : memref<8x16x128xbf16, #tpu.memory_space<vmem>>, vector<1x16x128xbf16>,
    %c4_i32 = arith.constant 4 : i32
    %127 = arith.index_cast %c4_i32 : i32 to index
    %c0_45 = arith.constant 0 : index
    %c0_46 = arith.constant 0 : index
    %128 = vector.load %arg12[%127, %c0_45, %c0_46] : memref<8x16x512xf32, #tpu.memory_space<vmem>>, vector<1x16x512xf32>
    %129 = vector.shape_cast %128 : vector<1x16x512xf32> to vector<16x512xf32>
    %130 = arith.truncf %121 : vector<16x128xf32> to vector<16x128xbf16>
    %cst_47 = arith.constant dense<0.000000e+00> : vector<16x512xf32>
    %131 = tpu.matmul %130, %14, %cst_47 {dimension_numbers = #tpu.dot_dimension_numbers<[1], [0], [0], [1], [0, 0, 1, 1], [], []>} : vector<16x128xbf16>, vector<128x512xbf16>, vector<16x512xf32> -> vector<16x512xf32>
    %132 = arith.addf %129, %131 : vector<16x512xf32>
    %133 = vector.extract_strided_slice %132 {offsets = [0, 0], sizes = [16, 384], strides = [1, 1]} : vector<16x512xf32> to vector<16x384xf32>
    %134 = arith.negf %133 : vector<16x384xf32>
    %135 = math.exp %134 : vector<16x384xf32>
    %cst_48 = arith.constant 1.000000e+00 : f32
    %136 = vector.broadcast %cst_48 : f32 to vector<16x384xf32>
    %137 = arith.addf %136, %135 : vector<16x384xf32>
    %138 = arith.divf %136, %137 : vector<16x384xf32>
    %139 = vector.extract_strided_slice %138 {offsets = [0, 0], sizes = [16, 128], strides = [1, 1]} : vector<16x384xf32> to vector<16x128xf32>
    %140 = vector.extract_strided_slice %138 {offsets = [0, 128], sizes = [16, 128], strides = [1, 1]} : vector<16x384xf32> to vector<16x128xf32>
    %141 = vector.extract_strided_slice %138 {offsets = [0, 256], sizes = [16, 128], strides = [1, 1]} : vector<16x384xf32> to vector<16x128xf32>
    %142 = vector.extract_strided_slice %132 {offsets = [0, 384], sizes = [16, 128], strides = [1, 1]} : vector<16x512xf32> to vector<16x128xf32>
    %143 = math.tanh %142 : vector<16x128xf32>
    %144 = arith.mulf %140, %119 : vector<16x128xf32>
    %145 = arith.mulf %139, %143 : vector<16x128xf32>
    %146 = arith.addf %144, %145 : vector<16x128xf32>
    %147 = math.tanh %146 : vector<16x128xf32>
    %148 = arith.mulf %141, %147 : vector<16x128xf32>
    %149 = arith.truncf %148 : vector<16x128xf32> to vector<16x128xbf16>
    %150 = arith.index_cast %c4_i32 : i32 to index
    %c0_49 = arith.constant 0 : index
    %c0_50 = arith.constant 0 : index
    %151 = vector.load %arg13[%150, %c0_49, %c0_50] : memref<8x16x128xbf16, #tpu.memory_space<vmem>>, vector<1x16x128xbf16>
    %152 = vector.shape_cast %151 : vector<1x16x128xbf16> to vector<16x128xbf16>
    %153 = vector.shape_cast %149 : vector<16x128xbf16> to vector<1x16x128xbf16>
    tpu.vector_store %arg13[%150, %c0_49, %c0_50], %153 {strides = array<i32>} : memref<8x16x128xbf16, #tpu.memory_space<vmem>>, vector<1x16x128xbf16>,
    %c5_i32 = arith.constant 5 : i32
    %154 = arith.index_cast %c5_i32 : i32 to index
    %c0_51 = arith.constant 0 : index
    %c0_52 = arith.constant 0 : index
    %155 = vector.load %arg12[%154, %c0_51, %c0_52] : memref<8x16x512xf32, #tpu.memory_space<vmem>>, vector<1x16x512xf32>
    %156 = vector.shape_cast %155 : vector<1x16x512xf32> to vector<16x512xf32>
    %157 = arith.truncf %148 : vector<16x128xf32> to vector<16x128xbf16>
    %cst_53 = arith.constant dense<0.000000e+00> : vector<16x512xf32>
    %158 = tpu.matmul %157, %14, %cst_53 {dimension_numbers = #tpu.dot_dimension_numbers<[1], [0], [0], [1], [0, 0, 1, 1], [], []>} : vector<16x128xbf16>, vector<128x512xbf16>, vector<16x512xf32> -> vector<16x512xf32>
    %159 = arith.addf %156, %158 : vector<16x512xf32>
    %160 = vector.extract_strided_slice %159 {offsets = [0, 0], sizes = [16, 384], strides = [1, 1]} : vector<16x512xf32> to vector<16x384xf32>
    %161 = arith.negf %160 : vector<16x384xf32>
    %162 = math.exp %161 : vector<16x384xf32>
    %cst_54 = arith.constant 1.000000e+00 : f32
    %163 = vector.broadcast %cst_54 : f32 to vector<16x384xf32>
    %164 = arith.addf %163, %162 : vector<16x384xf32>
    %165 = arith.divf %163, %164 : vector<16x384xf32>
    %166 = vector.extract_strided_slice %165 {offsets = [0, 0], sizes = [16, 128], strides = [1, 1]} : vector<16x384xf32> to vector<16x128xf32>
    %167 = vector.extract_strided_slice %165 {offsets = [0, 128], sizes = [16, 128], strides = [1, 1]} : vector<16x384xf32> to vector<16x128xf32>
    %168 = vector.extract_strided_slice %165 {offsets = [0, 256], sizes = [16, 128], strides = [1, 1]} : vector<16x384xf32> to vector<16x128xf32>
    %169 = vector.extract_strided_slice %159 {offsets = [0, 384], sizes = [16, 128], strides = [1, 1]} : vector<16x512xf32> to vector<16x128xf32>
    %170 = math.tanh %169 : vector<16x128xf32>
    %171 = arith.mulf %167, %146 : vector<16x128xf32>
    %172 = arith.mulf %166, %170 : vector<16x128xf32>
    %173 = arith.addf %171, %172 : vector<16x128xf32>
    %174 = math.tanh %173 : vector<16x128xf32>
    %175 = arith.mulf %168, %174 : vector<16x128xf32>
    %176 = arith.truncf %175 : vector<16x128xf32> to vector<16x128xbf16>
    %177 = arith.index_cast %c5_i32 : i32 to index
    %c0_55 = arith.constant 0 : index
    %c0_56 = arith.constant 0 : index
    %178 = vector.load %arg13[%177, %c0_55, %c0_56] : memref<8x16x128xbf16, #tpu.memory_space<vmem>>, vector<1x16x128xbf16>
    %179 = vector.shape_cast %178 : vector<1x16x128xbf16> to vector<16x128xbf16>
    %180 = vector.shape_cast %176 : vector<16x128xbf16> to vector<1x16x128xbf16>
    tpu.vector_store %arg13[%177, %c0_55, %c0_56], %180 {strides = array<i32>} : memref<8x16x128xbf16, #tpu.memory_space<vmem>>, vector<1x16x128xbf16>,
    %c6_i32 = arith.constant 6 : i32
    %181 = arith.index_cast %c6_i32 : i32 to index
    %c0_57 = arith.constant 0 : index
    %c0_58 = arith.constant 0 : index
    %182 = vector.load %arg12[%181, %c0_57, %c0_58] : memref<8x16x512xf32, #tpu.memory_space<vmem>>, vector<1x16x512xf32>
    %183 = vector.shape_cast %182 : vector<1x16x512xf32> to vector<16x512xf32>
    %184 = arith.truncf %175 : vector<16x128xf32> to vector<16x128xbf16>
    %cst_59 = arith.constant dense<0.000000e+00> : vector<16x512xf32>
    %185 = tpu.matmul %184, %14, %cst_59 {dimension_numbers = #tpu.dot_dimension_numbers<[1], [0], [0], [1], [0, 0, 1, 1], [], []>} : vector<16x128xbf16>, vector<128x512xbf16>, vector<16x512xf32> -> vector<16x512xf32>
    %186 = arith.addf %183, %185 : vector<16x512xf32>
    %187 = vector.extract_strided_slice %186 {offsets = [0, 0], sizes = [16, 384], strides = [1, 1]} : vector<16x512xf32> to vector<16x384xf32>
    %188 = arith.negf %187 : vector<16x384xf32>
    %189 = math.exp %188 : vector<16x384xf32>
    %cst_60 = arith.constant 1.000000e+00 : f32
    %190 = vector.broadcast %cst_60 : f32 to vector<16x384xf32>
    %191 = arith.addf %190, %189 : vector<16x384xf32>
    %192 = arith.divf %190, %191 : vector<16x384xf32>
    %193 = vector.extract_strided_slice %192 {offsets = [0, 0], sizes = [16, 128], strides = [1, 1]} : vector<16x384xf32> to vector<16x128xf32>
    %194 = vector.extract_strided_slice %192 {offsets = [0, 128], sizes = [16, 128], strides = [1, 1]} : vector<16x384xf32> to vector<16x128xf32>
    %195 = vector.extract_strided_slice %192 {offsets = [0, 256], sizes = [16, 128], strides = [1, 1]} : vector<16x384xf32> to vector<16x128xf32>
    %196 = vector.extract_strided_slice %186 {offsets = [0, 384], sizes = [16, 128], strides = [1, 1]} : vector<16x512xf32> to vector<16x128xf32>
    %197 = math.tanh %196 : vector<16x128xf32>
    %198 = arith.mulf %194, %173 : vector<16x128xf32>
    %199 = arith.mulf %193, %197 : vector<16x128xf32>
    %200 = arith.addf %198, %199 : vector<16x128xf32>
    %201 = math.tanh %200 : vector<16x128xf32>
    %202 = arith.mulf %195, %201 : vector<16x128xf32>
    %203 = arith.truncf %202 : vector<16x128xf32> to vector<16x128xbf16>
    %204 = arith.index_cast %c6_i32 : i32 to index
    %c0_61 = arith.constant 0 : index
    %c0_62 = arith.constant 0 : index
    %205 = vector.load %arg13[%204, %c0_61, %c0_62] : memref<8x16x128xbf16, #tpu.memory_space<vmem>>, vector<1x16x128xbf16>
    %206 = vector.shape_cast %205 : vector<1x16x128xbf16> to vector<16x128xbf16>
    %207 = vector.shape_cast %203 : vector<16x128xbf16> to vector<1x16x128xbf16>
    tpu.vector_store %arg13[%204, %c0_61, %c0_62], %207 {strides = array<i32>} : memref<8x16x128xbf16, #tpu.memory_space<vmem>>, vector<1x16x128xbf16>,
    %c7_i32 = arith.constant 7 : i32
    %208 = arith.index_cast %c7_i32 : i32 to index
    %c0_63 = arith.constant 0 : index
    %c0_64 = arith.constant 0 : index
    %209 = vector.load %arg12[%208, %c0_63, %c0_64] : memref<8x16x512xf32, #tpu.memory_space<vmem>>, vector<1x16x512xf32>
    %210 = vector.shape_cast %209 : vector<1x16x512xf32> to vector<16x512xf32>
    %211 = arith.truncf %202 : vector<16x128xf32> to vector<16x128xbf16>
    %cst_65 = arith.constant dense<0.000000e+00> : vector<16x512xf32>
    %212 = tpu.matmul %211, %14, %cst_65 {dimension_numbers = #tpu.dot_dimension_numbers<[1], [0], [0], [1], [0, 0, 1, 1], [], []>} : vector<16x128xbf16>, vector<128x512xbf16>, vector<16x512xf32> -> vector<16x512xf32>
    %213 = arith.addf %210, %212 : vector<16x512xf32>
    %214 = vector.extract_strided_slice %213 {offsets = [0, 0], sizes = [16, 384], strides = [1, 1]} : vector<16x512xf32> to vector<16x384xf32>
    %215 = arith.negf %214 : vector<16x384xf32>
    %216 = math.exp %215 : vector<16x384xf32>
    %cst_66 = arith.constant 1.000000e+00 : f32
    %217 = vector.broadcast %cst_66 : f32 to vector<16x384xf32>
    %218 = arith.addf %217, %216 : vector<16x384xf32>
    %219 = arith.divf %217, %218 : vector<16x384xf32>
    %220 = vector.extract_strided_slice %219 {offsets = [0, 0], sizes = [16, 128], strides = [1, 1]} : vector<16x384xf32> to vector<16x128xf32>
    %221 = vector.extract_strided_slice %219 {offsets = [0, 128], sizes = [16, 128], strides = [1, 1]} : vector<16x384xf32> to vector<16x128xf32>
    %222 = vector.extract_strided_slice %219 {offsets = [0, 256], sizes = [16, 128], strides = [1, 1]} : vector<16x384xf32> to vector<16x128xf32>
    %223 = vector.extract_strided_slice %213 {offsets = [0, 384], sizes = [16, 128], strides = [1, 1]} : vector<16x512xf32> to vector<16x128xf32>
    %224 = math.tanh %223 : vector<16x128xf32>
    %225 = arith.mulf %221, %200 : vector<16x128xf32>
    %226 = arith.mulf %220, %224 : vector<16x128xf32>
    %227 = arith.addf %225, %226 : vector<16x128xf32>
    %228 = math.tanh %227 : vector<16x128xf32>
    %229 = arith.mulf %222, %228 : vector<16x128xf32>
    %230 = arith.truncf %229 : vector<16x128xf32> to vector<16x128xbf16>
    %231 = arith.index_cast %c7_i32 : i32 to index
    %c0_67 = arith.constant 0 : index
    %c0_68 = arith.constant 0 : index
    %232 = vector.load %arg13[%231, %c0_67, %c0_68] : memref<8x16x128xbf16, #tpu.memory_space<vmem>>, vector<1x16x128xbf16>
    %233 = vector.shape_cast %232 : vector<1x16x128xbf16> to vector<16x128xbf16>
    %234 = vector.shape_cast %230 : vector<16x128xbf16> to vector<1x16x128xbf16>
    tpu.vector_store %arg13[%231, %c0_67, %c0_68], %234 {strides = array<i32>} : memref<8x16x128xbf16, #tpu.memory_space<vmem>>, vector<1x16x128xbf16>,
    %c8_i32 = arith.constant 8 : i32
    %c0_69 = arith.constant 0 : index
    %c0_70 = arith.constant 0 : index
    %c0_71 = arith.constant 0 : index
    %235 = vector.load %arg10[%c0_69, %c0_70, %c0_71] : memref<2x16x128xf32, #tpu.memory_space<vmem>>, vector<1x16x128xf32>
    %236 = vector.shape_cast %235 : vector<1x16x128xf32> to vector<16x128xf32>
    %237 = vector.shape_cast %229 : vector<16x128xf32> to vector<1x16x128xf32>
    tpu.vector_store %arg10[%c0_69, %c0_70, %c0_71], %237 {strides = array<i32>} : memref<2x16x128xf32, #tpu.memory_space<vmem>>, vector<1x16x128xf32>,
    %c0_72 = arith.constant 0 : index
    %c0_73 = arith.constant 0 : index
    %c0_74 = arith.constant 0 : index
    %238 = vector.load %arg11[%c0_72, %c0_73, %c0_74] : memref<2x16x128xf32, #tpu.memory_space<vmem>>, vector<1x16x128xf32>
    %239 = vector.shape_cast %238 : vector<1x16x128xf32> to vector<16x128xf32>
    %240 = vector.shape_cast %227 : vector<16x128xf32> to vector<1x16x128xf32>
    tpu.vector_store %arg11[%c0_72, %c0_73, %c0_74], %240 {strides = array<i32>} : memref<2x16x128xf32, #tpu.memory_space<vmem>>, vector<1x16x128xf32>,
    %c0_75 = arith.constant 0 : index
    %c0_76 = arith.constant 0 : index
    %c0_77 = arith.constant 0 : index
    %241 = vector.load %arg13[%c0_75, %c0_76, %c0_77] : memref<8x16x128xbf16, #tpu.memory_space<vmem>>, vector<8x16x128xbf16>
    %242 = vector.shape_cast %241 : vector<8x16x128xbf16> to vector<128x128xbf16>
    %c0_78 = arith.constant 0 : index
    %c0_79 = arith.constant 0 : index
    %c0_80 = arith.constant 0 : index
    %243 = vector.load %arg4[%c0_78, %c0_79, %c0_80] : memref<1x128x512xbf16, #tpu.memory_space<vmem>>, vector<1x128x512xbf16>
    %244 = vector.shape_cast %243 : vector<1x128x512xbf16> to vector<128x512xbf16>
    %cst_81 = arith.constant dense<0.000000e+00> : vector<128x512xf32>
    %245 = tpu.matmul %242, %244, %cst_81 {dimension_numbers = #tpu.dot_dimension_numbers<[1], [0], [0], [1], [0, 0, 1, 1], [], []>} : vector<128x128xbf16>, vector<128x512xbf16>, vector<128x512xf32> -> vector<128x512xf32>
    %c1 = arith.constant 1 : index
    %c0_82 = arith.constant 0 : index
    %c0_83 = arith.constant 0 : index
    %246 = vector.load %arg6[%c1, %c0_82, %c0_83] : memref<2x1x512xf32, #tpu.memory_space<vmem>>, vector<1x1x512xf32>
    %247 = vector.shape_cast %246 : vector<1x1x512xf32> to vector<1x512xf32>
    %248 = vector.broadcast %247 : vector<1x512xf32> to vector<128x512xf32>
    %249 = arith.addf %245, %248 : vector<128x512xf32>
    %250 = vector.shape_cast %249 : vector<128x512xf32> to vector<8x16x512xf32>
    %c0_84 = arith.constant 0 : index
    %c0_85 = arith.constant 0 : index
    %c0_86 = arith.constant 0 : index
    %251 = vector.load %arg12[%c0_84, %c0_85, %c0_86] : memref<8x16x512xf32, #tpu.memory_space<vmem>>, vector<8x16x512xf32>
    tpu.vector_store %arg12[%c0_84, %c0_85, %c0_86], %250 {strides = array<i32>} : memref<8x16x512xf32, #tpu.memory_space<vmem>>, vector<8x16x512xf32>,
    %c1_87 = arith.constant 1 : index
    %c0_88 = arith.constant 0 : index
    %c0_89 = arith.constant 0 : index
    %252 = vector.load %arg5[%c1_87, %c0_88, %c0_89] : memref<2x128x512xbf16, #tpu.memory_space<vmem>>, vector<1x128x512xbf16>
    %253 = vector.shape_cast %252 : vector<1x128x512xbf16> to vector<128x512xbf16>
    %c1_90 = arith.constant 1 : index
    %c0_91 = arith.constant 0 : index
    %c0_92 = arith.constant 0 : index
    %254 = vector.load %arg10[%c1_90, %c0_91, %c0_92] : memref<2x16x128xf32, #tpu.memory_space<vmem>>, vector<1x16x128xf32>
    %255 = vector.shape_cast %254 : vector<1x16x128xf32> to vector<16x128xf32>
    %c1_93 = arith.constant 1 : index
    %c0_94 = arith.constant 0 : index
    %c0_95 = arith.constant 0 : index
    %256 = vector.load %arg11[%c1_93, %c0_94, %c0_95] : memref<2x16x128xf32, #tpu.memory_space<vmem>>, vector<1x16x128xf32>
    %257 = vector.shape_cast %256 : vector<1x16x128xf32> to vector<16x128xf32>
    %c0_i32_96 = arith.constant 0 : i32
    %258 = arith.index_cast %c0_i32_96 : i32 to index
    %c0_97 = arith.constant 0 : index
    %c0_98 = arith.constant 0 : index
    %259 = vector.load %arg12[%258, %c0_97, %c0_98] : memref<8x16x512xf32, #tpu.memory_space<vmem>>, vector<1x16x512xf32>
    %260 = vector.shape_cast %259 : vector<1x16x512xf32> to vector<16x512xf32>
    %261 = arith.truncf %255 : vector<16x128xf32> to vector<16x128xbf16>
    %cst_99 = arith.constant dense<0.000000e+00> : vector<16x512xf32>
    %262 = tpu.matmul %261, %253, %cst_99 {dimension_numbers = #tpu.dot_dimension_numbers<[1], [0], [0], [1], [0, 0, 1, 1], [], []>} : vector<16x128xbf16>, vector<128x512xbf16>, vector<16x512xf32> -> vector<16x512xf32>
    %263 = arith.addf %260, %262 : vector<16x512xf32>
    %264 = vector.extract_strided_slice %263 {offsets = [0, 0], sizes = [16, 384], strides = [1, 1]} : vector<16x512xf32> to vector<16x384xf32>
    %265 = arith.negf %264 : vector<16x384xf32>
    %266 = math.exp %265 : vector<16x384xf32>
    %cst_100 = arith.constant 1.000000e+00 : f32
    %267 = vector.broadcast %cst_100 : f32 to vector<16x384xf32>
    %268 = arith.addf %267, %266 : vector<16x384xf32>
    %269 = arith.divf %267, %268 : vector<16x384xf32>
    %270 = vector.extract_strided_slice %269 {offsets = [0, 0], sizes = [16, 128], strides = [1, 1]} : vector<16x384xf32> to vector<16x128xf32>
    %271 = vector.extract_strided_slice %269 {offsets = [0, 128], sizes = [16, 128], strides = [1, 1]} : vector<16x384xf32> to vector<16x128xf32>
    %272 = vector.extract_strided_slice %269 {offsets = [0, 256], sizes = [16, 128], strides = [1, 1]} : vector<16x384xf32> to vector<16x128xf32>
    %273 = vector.extract_strided_slice %263 {offsets = [0, 384], sizes = [16, 128], strides = [1, 1]} : vector<16x512xf32> to vector<16x128xf32>
    %274 = math.tanh %273 : vector<16x128xf32>
    %275 = arith.mulf %271, %257 : vector<16x128xf32>
    %276 = arith.mulf %270, %274 : vector<16x128xf32>
    %277 = arith.addf %275, %276 : vector<16x128xf32>
    %278 = math.tanh %277 : vector<16x128xf32>
    %279 = arith.mulf %272, %278 : vector<16x128xf32>
    %c1_i32_101 = arith.constant 1 : i32
    %280 = arith.index_cast %c1_i32_101 : i32 to index
    %c0_102 = arith.constant 0 : index
    %c0_103 = arith.constant 0 : index
    %281 = vector.load %arg12[%280, %c0_102, %c0_103] : memref<8x16x512xf32, #tpu.memory_space<vmem>>, vector<1x16x512xf32>
    %282 = vector.shape_cast %281 : vector<1x16x512xf32> to vector<16x512xf32>
    %283 = arith.truncf %279 : vector<16x128xf32> to vector<16x128xbf16>
    %cst_104 = arith.constant dense<0.000000e+00> : vector<16x512xf32>
    %284 = tpu.matmul %283, %253, %cst_104 {dimension_numbers = #tpu.dot_dimension_numbers<[1], [0], [0], [1], [0, 0, 1, 1], [], []>} : vector<16x128xbf16>, vector<128x512xbf16>, vector<16x512xf32> -> vector<16x512xf32>
    %285 = arith.addf %282, %284 : vector<16x512xf32>
    %286 = vector.extract_strided_slice %285 {offsets = [0, 0], sizes = [16, 384], strides = [1, 1]} : vector<16x512xf32> to vector<16x384xf32>
    %287 = arith.negf %286 : vector<16x384xf32>
    %288 = math.exp %287 : vector<16x384xf32>
    %cst_105 = arith.constant 1.000000e+00 : f32
    %289 = vector.broadcast %cst_105 : f32 to vector<16x384xf32>
    %290 = arith.addf %289, %288 : vector<16x384xf32>
    %291 = arith.divf %289, %290 : vector<16x384xf32>
    %292 = vector.extract_strided_slice %291 {offsets = [0, 0], sizes = [16, 128], strides = [1, 1]} : vector<16x384xf32> to vector<16x128xf32>
    %293 = vector.extract_strided_slice %291 {offsets = [0, 128], sizes = [16, 128], strides = [1, 1]} : vector<16x384xf32> to vector<16x128xf32>
    %294 = vector.extract_strided_slice %291 {offsets = [0, 256], sizes = [16, 128], strides = [1, 1]} : vector<16x384xf32> to vector<16x128xf32>
    %295 = vector.extract_strided_slice %285 {offsets = [0, 384], sizes = [16, 128], strides = [1, 1]} : vector<16x512xf32> to vector<16x128xf32>
    %296 = math.tanh %295 : vector<16x128xf32>
    %297 = arith.mulf %293, %277 : vector<16x128xf32>
    %298 = arith.mulf %292, %296 : vector<16x128xf32>
    %299 = arith.addf %297, %298 : vector<16x128xf32>
    %300 = math.tanh %299 : vector<16x128xf32>
    %301 = arith.mulf %294, %300 : vector<16x128xf32>
    %c2_i32_106 = arith.constant 2 : i32
    %302 = arith.index_cast %c2_i32_106 : i32 to index
    %c0_107 = arith.constant 0 : index
    %c0_108 = arith.constant 0 : index
    %303 = vector.load %arg12[%302, %c0_107, %c0_108] : memref<8x16x512xf32, #tpu.memory_space<vmem>>, vector<1x16x512xf32>
    %304 = vector.shape_cast %303 : vector<1x16x512xf32> to vector<16x512xf32>
    %305 = arith.truncf %301 : vector<16x128xf32> to vector<16x128xbf16>
    %cst_109 = arith.constant dense<0.000000e+00> : vector<16x512xf32>
    %306 = tpu.matmul %305, %253, %cst_109 {dimension_numbers = #tpu.dot_dimension_numbers<[1], [0], [0], [1], [0, 0, 1, 1], [], []>} : vector<16x128xbf16>, vector<128x512xbf16>, vector<16x512xf32> -> vector<16x512xf32>
    %307 = arith.addf %304, %306 : vector<16x512xf32>
    %308 = vector.extract_strided_slice %307 {offsets = [0, 0], sizes = [16, 384], strides = [1, 1]} : vector<16x512xf32> to vector<16x384xf32>
    %309 = arith.negf %308 : vector<16x384xf32>
    %310 = math.exp %309 : vector<16x384xf32>
    %cst_110 = arith.constant 1.000000e+00 : f32
    %311 = vector.broadcast %cst_110 : f32 to vector<16x384xf32>
    %312 = arith.addf %311, %310 : vector<16x384xf32>
    %313 = arith.divf %311, %312 : vector<16x384xf32>
    %314 = vector.extract_strided_slice %313 {offsets = [0, 0], sizes = [16, 128], strides = [1, 1]} : vector<16x384xf32> to vector<16x128xf32>
    %315 = vector.extract_strided_slice %313 {offsets = [0, 128], sizes = [16, 128], strides = [1, 1]} : vector<16x384xf32> to vector<16x128xf32>
    %316 = vector.extract_strided_slice %313 {offsets = [0, 256], sizes = [16, 128], strides = [1, 1]} : vector<16x384xf32> to vector<16x128xf32>
    %317 = vector.extract_strided_slice %307 {offsets = [0, 384], sizes = [16, 128], strides = [1, 1]} : vector<16x512xf32> to vector<16x128xf32>
    %318 = math.tanh %317 : vector<16x128xf32>
    %319 = arith.mulf %315, %299 : vector<16x128xf32>
    %320 = arith.mulf %314, %318 : vector<16x128xf32>
    %321 = arith.addf %319, %320 : vector<16x128xf32>
    %322 = math.tanh %321 : vector<16x128xf32>
    %323 = arith.mulf %316, %322 : vector<16x128xf32>
    %c3_i32_111 = arith.constant 3 : i32
    %324 = arith.index_cast %c3_i32_111 : i32 to index
    %c0_112 = arith.constant 0 : index
    %c0_113 = arith.constant 0 : index
    %325 = vector.load %arg12[%324, %c0_112, %c0_113] : memref<8x16x512xf32, #tpu.memory_space<vmem>>, vector<1x16x512xf32>
    %326 = vector.shape_cast %325 : vector<1x16x512xf32> to vector<16x512xf32>
    %327 = arith.truncf %323 : vector<16x128xf32> to vector<16x128xbf16>
    %cst_114 = arith.constant dense<0.000000e+00> : vector<16x512xf32>
    %328 = tpu.matmul %327, %253, %cst_114 {dimension_numbers = #tpu.dot_dimension_numbers<[1], [0], [0], [1], [0, 0, 1, 1], [], []>} : vector<16x128xbf16>, vector<128x512xbf16>, vector<16x512xf32> -> vector<16x512xf32>
    %329 = arith.addf %326, %328 : vector<16x512xf32>
    %330 = vector.extract_strided_slice %329 {offsets = [0, 0], sizes = [16, 384], strides = [1, 1]} : vector<16x512xf32> to vector<16x384xf32>
    %331 = arith.negf %330 : vector<16x384xf32>
    %332 = math.exp %331 : vector<16x384xf32>
    %cst_115 = arith.constant 1.000000e+00 : f32
    %333 = vector.broadcast %cst_115 : f32 to vector<16x384xf32>
    %334 = arith.addf %333, %332 : vector<16x384xf32>
    %335 = arith.divf %333, %334 : vector<16x384xf32>
    %336 = vector.extract_strided_slice %335 {offsets = [0, 0], sizes = [16, 128], strides = [1, 1]} : vector<16x384xf32> to vector<16x128xf32>
    %337 = vector.extract_strided_slice %335 {offsets = [0, 128], sizes = [16, 128], strides = [1, 1]} : vector<16x384xf32> to vector<16x128xf32>
    %338 = vector.extract_strided_slice %335 {offsets = [0, 256], sizes = [16, 128], strides = [1, 1]} : vector<16x384xf32> to vector<16x128xf32>
    %339 = vector.extract_strided_slice %329 {offsets = [0, 384], sizes = [16, 128], strides = [1, 1]} : vector<16x512xf32> to vector<16x128xf32>
    %340 = math.tanh %339 : vector<16x128xf32>
    %341 = arith.mulf %337, %321 : vector<16x128xf32>
    %342 = arith.mulf %336, %340 : vector<16x128xf32>
    %343 = arith.addf %341, %342 : vector<16x128xf32>
    %344 = math.tanh %343 : vector<16x128xf32>
    %345 = arith.mulf %338, %344 : vector<16x128xf32>
    %c4_i32_116 = arith.constant 4 : i32
    %346 = arith.index_cast %c4_i32_116 : i32 to index
    %c0_117 = arith.constant 0 : index
    %c0_118 = arith.constant 0 : index
    %347 = vector.load %arg12[%346, %c0_117, %c0_118] : memref<8x16x512xf32, #tpu.memory_space<vmem>>, vector<1x16x512xf32>
    %348 = vector.shape_cast %347 : vector<1x16x512xf32> to vector<16x512xf32>
    %349 = arith.truncf %345 : vector<16x128xf32> to vector<16x128xbf16>
    %cst_119 = arith.constant dense<0.000000e+00> : vector<16x512xf32>
    %350 = tpu.matmul %349, %253, %cst_119 {dimension_numbers = #tpu.dot_dimension_numbers<[1], [0], [0], [1], [0, 0, 1, 1], [], []>} : vector<16x128xbf16>, vector<128x512xbf16>, vector<16x512xf32> -> vector<16x512xf32>
    %351 = arith.addf %348, %350 : vector<16x512xf32>
    %352 = vector.extract_strided_slice %351 {offsets = [0, 0], sizes = [16, 384], strides = [1, 1]} : vector<16x512xf32> to vector<16x384xf32>
    %353 = arith.negf %352 : vector<16x384xf32>
    %354 = math.exp %353 : vector<16x384xf32>
    %cst_120 = arith.constant 1.000000e+00 : f32
    %355 = vector.broadcast %cst_120 : f32 to vector<16x384xf32>
    %356 = arith.addf %355, %354 : vector<16x384xf32>
    %357 = arith.divf %355, %356 : vector<16x384xf32>
    %358 = vector.extract_strided_slice %357 {offsets = [0, 0], sizes = [16, 128], strides = [1, 1]} : vector<16x384xf32> to vector<16x128xf32>
    %359 = vector.extract_strided_slice %357 {offsets = [0, 128], sizes = [16, 128], strides = [1, 1]} : vector<16x384xf32> to vector<16x128xf32>
    %360 = vector.extract_strided_slice %357 {offsets = [0, 256], sizes = [16, 128], strides = [1, 1]} : vector<16x384xf32> to vector<16x128xf32>
    %361 = vector.extract_strided_slice %351 {offsets = [0, 384], sizes = [16, 128], strides = [1, 1]} : vector<16x512xf32> to vector<16x128xf32>
    %362 = math.tanh %361 : vector<16x128xf32>
    %363 = arith.mulf %359, %343 : vector<16x128xf32>
    %364 = arith.mulf %358, %362 : vector<16x128xf32>
    %365 = arith.addf %363, %364 : vector<16x128xf32>
    %366 = math.tanh %365 : vector<16x128xf32>
    %367 = arith.mulf %360, %366 : vector<16x128xf32>
    %c5_i32_121 = arith.constant 5 : i32
    %368 = arith.index_cast %c5_i32_121 : i32 to index
    %c0_122 = arith.constant 0 : index
    %c0_123 = arith.constant 0 : index
    %369 = vector.load %arg12[%368, %c0_122, %c0_123] : memref<8x16x512xf32, #tpu.memory_space<vmem>>, vector<1x16x512xf32>
    %370 = vector.shape_cast %369 : vector<1x16x512xf32> to vector<16x512xf32>
    %371 = arith.truncf %367 : vector<16x128xf32> to vector<16x128xbf16>
    %cst_124 = arith.constant dense<0.000000e+00> : vector<16x512xf32>
    %372 = tpu.matmul %371, %253, %cst_124 {dimension_numbers = #tpu.dot_dimension_numbers<[1], [0], [0], [1], [0, 0, 1, 1], [], []>} : vector<16x128xbf16>, vector<128x512xbf16>, vector<16x512xf32> -> vector<16x512xf32>
    %373 = arith.addf %370, %372 : vector<16x512xf32>
    %374 = vector.extract_strided_slice %373 {offsets = [0, 0], sizes = [16, 384], strides = [1, 1]} : vector<16x512xf32> to vector<16x384xf32>
    %375 = arith.negf %374 : vector<16x384xf32>
    %376 = math.exp %375 : vector<16x384xf32>
    %cst_125 = arith.constant 1.000000e+00 : f32
    %377 = vector.broadcast %cst_125 : f32 to vector<16x384xf32>
    %378 = arith.addf %377, %376 : vector<16x384xf32>
    %379 = arith.divf %377, %378 : vector<16x384xf32>
    %380 = vector.extract_strided_slice %379 {offsets = [0, 0], sizes = [16, 128], strides = [1, 1]} : vector<16x384xf32> to vector<16x128xf32>
    %381 = vector.extract_strided_slice %379 {offsets = [0, 128], sizes = [16, 128], strides = [1, 1]} : vector<16x384xf32> to vector<16x128xf32>
    %382 = vector.extract_strided_slice %379 {offsets = [0, 256], sizes = [16, 128], strides = [1, 1]} : vector<16x384xf32> to vector<16x128xf32>
    %383 = vector.extract_strided_slice %373 {offsets = [0, 384], sizes = [16, 128], strides = [1, 1]} : vector<16x512xf32> to vector<16x128xf32>
    %384 = math.tanh %383 : vector<16x128xf32>
    %385 = arith.mulf %381, %365 : vector<16x128xf32>
    %386 = arith.mulf %380, %384 : vector<16x128xf32>
    %387 = arith.addf %385, %386 : vector<16x128xf32>
    %388 = math.tanh %387 : vector<16x128xf32>
    %389 = arith.mulf %382, %388 : vector<16x128xf32>
    %c6_i32_126 = arith.constant 6 : i32
    %390 = arith.index_cast %c6_i32_126 : i32 to index
    %c0_127 = arith.constant 0 : index
    %c0_128 = arith.constant 0 : index
    %391 = vector.load %arg12[%390, %c0_127, %c0_128] : memref<8x16x512xf32, #tpu.memory_space<vmem>>, vector<1x16x512xf32>
    %392 = vector.shape_cast %391 : vector<1x16x512xf32> to vector<16x512xf32>
    %393 = arith.truncf %389 : vector<16x128xf32> to vector<16x128xbf16>
    %cst_129 = arith.constant dense<0.000000e+00> : vector<16x512xf32>
    %394 = tpu.matmul %393, %253, %cst_129 {dimension_numbers = #tpu.dot_dimension_numbers<[1], [0], [0], [1], [0, 0, 1, 1], [], []>} : vector<16x128xbf16>, vector<128x512xbf16>, vector<16x512xf32> -> vector<16x512xf32>
    %395 = arith.addf %392, %394 : vector<16x512xf32>
    %396 = vector.extract_strided_slice %395 {offsets = [0, 0], sizes = [16, 384], strides = [1, 1]} : vector<16x512xf32> to vector<16x384xf32>
    %397 = arith.negf %396 : vector<16x384xf32>
    %398 = math.exp %397 : vector<16x384xf32>
    %cst_130 = arith.constant 1.000000e+00 : f32
    %399 = vector.broadcast %cst_130 : f32 to vector<16x384xf32>
    %400 = arith.addf %399, %398 : vector<16x384xf32>
    %401 = arith.divf %399, %400 : vector<16x384xf32>
    %402 = vector.extract_strided_slice %401 {offsets = [0, 0], sizes = [16, 128], strides = [1, 1]} : vector<16x384xf32> to vector<16x128xf32>
    %403 = vector.extract_strided_slice %401 {offsets = [0, 128], sizes = [16, 128], strides = [1, 1]} : vector<16x384xf32> to vector<16x128xf32>
    %404 = vector.extract_strided_slice %401 {offsets = [0, 256], sizes = [16, 128], strides = [1, 1]} : vector<16x384xf32> to vector<16x128xf32>
    %405 = vector.extract_strided_slice %395 {offsets = [0, 384], sizes = [16, 128], strides = [1, 1]} : vector<16x512xf32> to vector<16x128xf32>
    %406 = math.tanh %405 : vector<16x128xf32>
    %407 = arith.mulf %403, %387 : vector<16x128xf32>
    %408 = arith.mulf %402, %406 : vector<16x128xf32>
    %409 = arith.addf %407, %408 : vector<16x128xf32>
    %410 = math.tanh %409 : vector<16x128xf32>
    %411 = arith.mulf %404, %410 : vector<16x128xf32>
    %c7_i32_131 = arith.constant 7 : i32
    %412 = arith.index_cast %c7_i32_131 : i32 to index
    %c0_132 = arith.constant 0 : index
    %c0_133 = arith.constant 0 : index
    %413 = vector.load %arg12[%412, %c0_132, %c0_133] : memref<8x16x512xf32, #tpu.memory_space<vmem>>, vector<1x16x512xf32>
    %414 = vector.shape_cast %413 : vector<1x16x512xf32> to vector<16x512xf32>
    %415 = arith.truncf %411 : vector<16x128xf32> to vector<16x128xbf16>
    %cst_134 = arith.constant dense<0.000000e+00> : vector<16x512xf32>
    %416 = tpu.matmul %415, %253, %cst_134 {dimension_numbers = #tpu.dot_dimension_numbers<[1], [0], [0], [1], [0, 0, 1, 1], [], []>} : vector<16x128xbf16>, vector<128x512xbf16>, vector<16x512xf32> -> vector<16x512xf32>
    %417 = arith.addf %414, %416 : vector<16x512xf32>
    %418 = vector.extract_strided_slice %417 {offsets = [0, 0], sizes = [16, 384], strides = [1, 1]} : vector<16x512xf32> to vector<16x384xf32>
    %419 = arith.negf %418 : vector<16x384xf32>
    %420 = math.exp %419 : vector<16x384xf32>
    %cst_135 = arith.constant 1.000000e+00 : f32
    %421 = vector.broadcast %cst_135 : f32 to vector<16x384xf32>
    %422 = arith.addf %421, %420 : vector<16x384xf32>
    %423 = arith.divf %421, %422 : vector<16x384xf32>
    %424 = vector.extract_strided_slice %423 {offsets = [0, 0], sizes = [16, 128], strides = [1, 1]} : vector<16x384xf32> to vector<16x128xf32>
    %425 = vector.extract_strided_slice %423 {offsets = [0, 128], sizes = [16, 128], strides = [1, 1]} : vector<16x384xf32> to vector<16x128xf32>
    %426 = vector.extract_strided_slice %423 {offsets = [0, 256], sizes = [16, 128], strides = [1, 1]} : vector<16x384xf32> to vector<16x128xf32>
    %427 = vector.extract_strided_slice %417 {offsets = [0, 384], sizes = [16, 128], strides = [1, 1]} : vector<16x512xf32> to vector<16x128xf32>
    %428 = math.tanh %427 : vector<16x128xf32>
    %429 = arith.mulf %425, %409 : vector<16x128xf32>
    %430 = arith.mulf %424, %428 : vector<16x128xf32>
    %431 = arith.addf %429, %430 : vector<16x128xf32>
    %432 = math.tanh %431 : vector<16x128xf32>
    %433 = arith.mulf %426, %432 : vector<16x128xf32>
    %c8_i32_136 = arith.constant 8 : i32
    %c1_137 = arith.constant 1 : index
    %c0_138 = arith.constant 0 : index
    %c0_139 = arith.constant 0 : index
    %434 = vector.load %arg10[%c1_137, %c0_138, %c0_139] : memref<2x16x128xf32, #tpu.memory_space<vmem>>, vector<1x16x128xf32>
    %435 = vector.shape_cast %434 : vector<1x16x128xf32> to vector<16x128xf32>
    %436 = vector.shape_cast %433 : vector<16x128xf32> to vector<1x16x128xf32>
    tpu.vector_store %arg10[%c1_137, %c0_138, %c0_139], %436 {strides = array<i32>} : memref<2x16x128xf32, #tpu.memory_space<vmem>>, vector<1x16x128xf32>,
    %c1_140 = arith.constant 1 : index
    %c0_141 = arith.constant 0 : index
    %c0_142 = arith.constant 0 : index
    %437 = vector.load %arg11[%c1_140, %c0_141, %c0_142] : memref<2x16x128xf32, #tpu.memory_space<vmem>>, vector<1x16x128xf32>
    %438 = vector.shape_cast %437 : vector<1x16x128xf32> to vector<16x128xf32>
    %439 = vector.shape_cast %431 : vector<16x128xf32> to vector<1x16x128xf32>
    tpu.vector_store %arg11[%c1_140, %c0_141, %c0_142], %439 {strides = array<i32>} : memref<2x16x128xf32, #tpu.memory_space<vmem>>, vector<1x16x128xf32>,
    %c0_i32_143 = arith.constant 0 : i32
    %440 = arith.cmpi eq, %arg1, %c0_i32_143 : i32
    %441 = arith.extui %440 : i1 to i32
    %c0_i32_144 = arith.constant 0 : i32
    %442 = arith.cmpi ne, %441, %c0_i32_144 : i32
    scf.if %442 {
      %c1_145 = arith.constant 1 : index
      %c0_146 = arith.constant 0 : index
      %c0_147 = arith.constant 0 : index
      %443 = vector.load %arg10[%c1_145, %c0_146, %c0_147] : memref<2x16x128xf32, #tpu.memory_space<vmem>>, vector<1x16x128xf32>
      %444 = vector.shape_cast %443 : vector<1x16x128xf32> to vector<16x128xf32>
      %445 = arith.truncf %444 : vector<16x128xf32> to vector<16x128xbf16>
      %c0_148 = arith.constant 0 : index
      %c0_149 = arith.constant 0 : index
      %446 = vector.load %arg7[%c0_148, %c0_149] : memref<128x128xbf16, #tpu.memory_space<vmem>>, vector<128x128xbf16>
      %cst_150 = arith.constant dense<0.000000e+00> : vector<16x128xf32>
      %447 = tpu.matmul %445, %446, %cst_150 {dimension_numbers = #tpu.dot_dimension_numbers<[1], [0], [0], [1], [0, 0, 1, 1], [], []>} : vector<16x128xbf16>, vector<128x128xbf16>, vector<16x128xf32> -> vector<16x128xf32>
      %c0_151 = arith.constant 0 : index
      %c0_152 = arith.constant 0 : index
      %448 = vector.load %arg8[%c0_151, %c0_152] : memref<1x128xf32, #tpu.memory_space<vmem>>, vector<1x128xf32>
      %449 = vector.broadcast %448 : vector<1x128xf32> to vector<16x128xf32>
      %450 = arith.addf %447, %449 : vector<16x128xf32>
      %c0_153 = arith.constant 0 : index
      %c0_154 = arith.constant 0 : index
      %451 = vector.load %arg9[%c0_153, %c0_154] : memref<16x128xf32, #tpu.memory_space<vmem>>, vector<16x128xf32>
      tpu.vector_store %arg9[%c0_153, %c0_154], %450 {strides = array<i32>} : memref<16x128xf32, #tpu.memory_space<vmem>>, vector<16x128xf32>,
    } else {
    }
    return
  }
  func.func @transform_0(%arg0: i32, %arg1: i32) -> (i32, i32, i32) {
    %c0_i32 = arith.constant 0 : i32
    %c0_i32_0 = arith.constant 0 : i32
    return %arg1, %arg0, %c0_i32 : i32, i32, i32
  }
  func.func @transform_1(%arg0: i32, %arg1: i32) -> (i32, i32) {
    %c0_i32 = arith.constant 0 : i32
    %c0_i32_0 = arith.constant 0 : i32
    %c0_i32_1 = arith.constant 0 : i32
    return %c0_i32, %c0_i32_0 : i32, i32
  }
  func.func @transform_2(%arg0: i32, %arg1: i32) -> (i32, i32, i32) {
    %c0_i32 = arith.constant 0 : i32
    %c0_i32_0 = arith.constant 0 : i32
    %c0_i32_1 = arith.constant 0 : i32
    %c0_i32_2 = arith.constant 0 : i32
    return %c0_i32, %c0_i32_0, %c0_i32_1 : i32, i32, i32
  }
  func.func @transform_3(%arg0: i32, %arg1: i32) -> (i32, i32, i32) {
    %c0_i32 = arith.constant 0 : i32
    %c0_i32_0 = arith.constant 0 : i32
    %c0_i32_1 = arith.constant 0 : i32
    %c0_i32_2 = arith.constant 0 : i32
    return %c0_i32, %c0_i32_0, %c0_i32_1 : i32, i32, i32
  }
  func.func @transform_4(%arg0: i32, %arg1: i32) -> (i32, i32, i32) {
    %c0_i32 = arith.constant 0 : i32
    %c0_i32_0 = arith.constant 0 : i32
    %c0_i32_1 = arith.constant 0 : i32
    %c0_i32_2 = arith.constant 0 : i32
    return %c0_i32, %c0_i32_0, %c0_i32_1 : i32, i32, i32
  }
  func.func @transform_5(%arg0: i32, %arg1: i32) -> (i32, i32) {
    %c0_i32 = arith.constant 0 : i32
    %c0_i32_0 = arith.constant 0 : i32
    %c0_i32_1 = arith.constant 0 : i32
    return %c0_i32, %c0_i32_0 : i32, i32
  }
  func.func @transform_6(%arg0: i32, %arg1: i32) -> (i32, i32) {
    %c0_i32 = arith.constant 0 : i32
    %c0_i32_0 = arith.constant 0 : i32
    %c0_i32_1 = arith.constant 0 : i32
    return %c0_i32, %c0_i32_0 : i32, i32
  }
  func.func @transform_7(%arg0: i32, %arg1: i32) -> (i32, i32) {
    %c0_i32 = arith.constant 0 : i32
    %c0_i32_0 = arith.constant 0 : i32
    return %arg0, %c0_i32 : i32, i32
  }
}

</mosaic_0001>

<bundles_post_ra>
// kernel: tpu_custom_call.1
= control target key start
LH: loop header
LB: loop body
LE: loop exit
PB: predicated region body
PF: predicated region fallthrough
CT: control target
= control target key end

     0   :  { %12 = vsyncpa [#allocation7], 0  ;;  %s6945_s0 = inlined_call_operand.hbm [shape: bf16[8,16,128], index: 0, kind: input, shape index: {}]   ;;  %s6946_s1 = inlined_call_operand.hbm [shape: bf16[128,512], index: 1, kind: input, shape index: {}]   ;;  %s6947_s2 = inlined_call_operand.hbm [shape: bf16[1,128,512], index: 2, kind: input, shape index: {}]   ;;  %s6948_s3 = inlined_call_operand.hbm [shape: bf16[2,128,512], index: 3, kind: input, shape index: {}]   ;;  %s6949_s4 = inlined_call_operand.vmem [shape: f32[2,1,512], index: 4, kind: input, shape index: {}]   ;;  %s6950_s5 = inlined_call_operand.hbm [shape: bf16[128,128], index: 5, kind: input, shape index: {}]   ;;  %s6951_s6 = inlined_call_operand.vmem [shape: f32[1,128], index: 6, kind: input, shape index: {}]   ;;  %s6952_s7 = inlined_call_operand.hbm [shape: f32[16,128], index: 7, kind: output, shape index: {}]  }
   0x1   :  { %13 = vsyncpa [#allocation10], 0 }
   0x2   :  { %14 = vsyncpa [#allocation13], 0 }
   0x3   :  { %15 = vsyncpa [#allocation8], 0  ;;  %s5637_s24 = smov [#allocation9]   ;;  %s5497_s28 = scalar_lea.hbm %s6946_s1, 4096 }
   0x4   :  { %s33_s25 = sshll.u32 %s5637_s24, 4  ;;  %p5498_p0 = scmp.ne.s32.totalorder %s6946_s1, %s5497_s28  ;;  %s34_s25 = int_to_ptr.vmem [resolvable:$true] %s33_s25 }
   0x5   :  { %p5501_p1 = scmp.lt.u32.totalorder %s5497_s28, %s6946_s1 }
   0x7   :  { %p5503_p2 = pnand %p5501_p1, %p5498_p0 }
   0x9   :  { %5506 = shalt.err (!%p5503_p2)
}
   0xa   :  { %s5507_s10 = scalar_lea.vmem %s34_s25, 4096  ;;  %p5512_p4 = scmp.lt.s32.totalorder %s34_s25, %s34_s25 }
   0xb   :  { %p5508_p3 = scmp.ne.s32.totalorder %s34_s25, %s5507_s10  ;;  %p5513_p5 = scmp.lt.s32.totalorder %s5507_s10, %s5507_s10 }
   0xd   :  { %p5514_p6 = por %p5513_p5, %p5512_p4 }
   0xf   :  { %p5515_p7 = pnand %p5514_p6, %p5508_p3 }
  0x11   :  { %5518 = shalt.err (!%p5515_p7)
}
  0x12   :  { %s5638_s11 = smov 256   ;;  %s5639_s12 = smov 16  }
  0x13   :  { %39 = dma.hbm_to_vmem [thread:$0]  %s6946_s1, 4096, %s34_s25, [#allocation10], %s5638_s11, %s5638_s11, %s5639_s12  }
  0x14   :  { %s5640_s15 = smov [#allocation12]   ;;  %s5641_s17 = smov [#allocation6]  }
  0x15   :  { %s57_s16 = sshll.u32 %s5640_s15, 4  ;;  %s21_s18 = sshll.u32 %s5641_s17, 4  ;;  %s58_s16 = int_to_ptr.vmem [resolvable:$true] %s57_s16  ;;  %s22_s18 = int_to_ptr.vmem [resolvable:$true] %s21_s18 }
  0x16   :  { %s5519_s21 = scalar_lea.hbm %s6948_s3, 8192 }
  0x17   :  { %p5520_p8 = scmp.ne.s32.totalorder %s6948_s3, %s5519_s21  ;;  %p5523_p9 = scmp.lt.u32.totalorder %s5519_s21, %s6948_s3 }
  0x19   :  { %p5525_p10 = pnand %p5523_p9, %p5520_p8 }
  0x1b   :  { %5528 = shalt.err (!%p5525_p10)
}
  0x1c   :  { %s5529_s1 = scalar_lea.vmem %s58_s16, 8192  ;;  %p5534_p12 = scmp.lt.s32.totalorder %s58_s16, %s58_s16 }
  0x1d   :  { %p5530_p11 = scmp.ne.s32.totalorder %s58_s16, %s5529_s1  ;;  %p5535_p13 = scmp.lt.s32.totalorder %s5529_s1, %s5529_s1 }
  0x1f   :  { %p5536_p0 = por %p5535_p13, %p5534_p12 }
  0x21   :  { %p5537_p1 = pnand %p5536_p0, %p5530_p11 }
  0x23   :  { %5540 = shalt.err (!%p5537_p1)
}
  0x24   :  { %63 = dma.hbm_to_vmem [thread:$0]  %s6948_s3, 8192, %s58_s16, [#allocation13], %s5638_s11, %s5638_s11, %s5639_s12  }
  0x25   :  { %s5541_s30 = scalar_lea.hbm %s6945_s0, 1024 }
  0x26   :  { %p5542_p2 = scmp.ne.s32.totalorder %s6945_s0, %s5541_s30  ;;  %p5545_p3 = scmp.lt.u32.totalorder %s5541_s30, %s6945_s0 }
  0x28   :  { %p5547_p4 = pnand %p5545_p3, %p5542_p2 }
  0x2a   :  { %5550 = shalt.err (!%p5547_p4)
}
  0x2b   :  { %s5551_s14 = scalar_lea.vmem %s22_s18, 1024  ;;  %p5556_p6 = scmp.lt.s32.totalorder %s22_s18, %s22_s18 }
  0x2c   :  { %p5552_p5 = scmp.ne.s32.totalorder %s22_s18, %s5551_s14  ;;  %p5557_p7 = scmp.lt.s32.totalorder %s5551_s14, %s5551_s14 }
  0x2e   :  { %p5558_p8 = por %p5557_p7, %p5556_p6 }
  0x30   :  { %p5559_p9 = pnand %p5558_p8, %p5552_p5 }
  0x32   :  { %5562 = shalt.err (!%p5559_p9)
}
  0x33   :  { %s5642_s3 = smov 64   ;;  %s5643_s15 = smov 4  }
  0x34   :  { %27 = dma.hbm_to_vmem [thread:$0]  %s6945_s0, 1024, %s22_s18, [#allocation7], %s5642_s3, %s5642_s3, %s5643_s15  }
  0x35   :  { %s5644_s19 = smov [#allocation11]   ;;  %s5645_s21 = smov [#allocation14]  }
  0x36   :  { %s45_s20 = sshll.u32 %s5644_s19, 4  ;;  %s71_s22 = sshll.u32 %s5645_s21, 4  ;;  %s46_s20 = int_to_ptr.vmem [resolvable:$true] %s45_s20  ;;  %s72_s22 = int_to_ptr.vmem [resolvable:$true] %s71_s22 }
  0x37   :  { %s5563_s26 = scalar_lea.hbm %s6947_s2, 4096 }
  0x38   :  { %p5564_p10 = scmp.ne.s32.totalorder %s6947_s2, %s5563_s26  ;;  %p5567_p11 = scmp.lt.u32.totalorder %s5563_s26, %s6947_s2 }
  0x3a   :  { %p5569_p12 = pnand %p5567_p11, %p5564_p10 }
  0x3c   :  { %5572 = shalt.err (!%p5569_p12)
}
  0x3d   :  { %s5573_s0 = scalar_lea.vmem %s46_s20, 4096  ;;  %p5578_p0 = scmp.lt.s32.totalorder %s46_s20, %s46_s20 }
  0x3e   :  { %p5574_p13 = scmp.ne.s32.totalorder %s46_s20, %s5573_s0  ;;  %p5579_p1 = scmp.lt.s32.totalorder %s5573_s0, %s5573_s0 }
  0x40   :  { %p5580_p2 = por %p5579_p1, %p5578_p0 }
  0x42   :  { %p5581_p3 = pnand %p5580_p2, %p5574_p13 }
  0x44   :  { %5584 = shalt.err (!%p5581_p3)
}
  0x45   :  { %51 = dma.hbm_to_vmem [thread:$0]  %s6947_s2, 4096, %s46_s20, [#allocation10], %s5638_s11, %s5638_s11, %s5639_s12  }
  0x46   :  { %s5585_s9 = scalar_lea.hbm %s6950_s5, 1024 }
  0x47   :  { %p5586_p4 = scmp.ne.s32.totalorder %s6950_s5, %s5585_s9  ;;  %p5589_p5 = scmp.lt.u32.totalorder %s5585_s9, %s6950_s5 }
  0x49   :  { %p5591_p6 = pnand %p5589_p5, %p5586_p4 }
  0x4b   :  { %5594 = shalt.err (!%p5591_p6)
}
  0x4c   :  { %s5595_s17 = scalar_lea.vmem %s72_s22, 1024  ;;  %p5600_p8 = scmp.lt.s32.totalorder %s72_s22, %s72_s22 }
  0x4d   :  { %p5596_p7 = scmp.ne.s32.totalorder %s72_s22, %s5595_s17  ;;  %p5601_p9 = scmp.lt.s32.totalorder %s5595_s17, %s5595_s17 }
  0x4f   :  { %p5602_p10 = por %p5601_p9, %p5600_p8 }
  0x51   :  { %p5603_p11 = pnand %p5602_p10, %p5596_p7 }
  0x53   :  { %5606 = shalt.err (!%p5603_p11)
}
  0x54   :  { %77 = dma.hbm_to_vmem [thread:$0]  %s6950_s5, 1024, %s72_s22, [#allocation13], %s5642_s3, %s5642_s3, %s5643_s15  }
  0x55   :  { %5629 = dma.done.wait [#allocation7], 1024  }
  0x56   :  { %5630 = vsyncadd [#allocation7], 4294966272 }
  0x57   :  { %5631 = dma.done.wait [#allocation10], 8192  }
  0x58   :  { %5632 = vsyncadd [#allocation10], 4294959104 }
  0x59   :  { %5633 = dma.done.wait [#allocation13], 9216  }
  0x5a   :  { %5634 = vsyncadd [#allocation13], 4294958080  ;;  %v5646_v0 = vmov 0   ;;  %v4713_v1 = vld [vmem:[#allocation9 + $0x4] ss:$16 sps:$4 sm:$0xff]   ;;  %v4765_v43 = vld [vmem:[#allocation6 + $0x8] sm:$0xff]  }
  0x5b   :  { %418 = vmatprep.mubr.bf16.mxu0 %v5646_v0  ;;  %531 = vmatprep.mubr.bf16.mxu1 %v5646_v0  ;;  %v4715_v2 = vld [vmem:[#allocation9 + $0xc] ss:$16 sps:$4 sm:$0xff]   ;;  %v4717_v3 = vld [vmem:[#allocation9] ss:$16 sps:$4 sm:$0xff]   ;;  %v4718_v4 = vld [vmem:[#allocation9 + $0x8] ss:$16 sps:$4 sm:$0xff]  }
  0x5c   :  { %386 = vmatprep.subr.bf16.mxu0 %v4713_v1  ;;  %499 = vmatprep.subr.bf16.mxu1 %v4715_v2  ;;  %v4719_v5 = vld [vmem:[#allocation9 + $0x24] ss:$16 sps:$4 sm:$0xff]   ;;  %v4721_v6 = vld [vmem:[#allocation9 + $0x2c] ss:$16 sps:$4 sm:$0xff]   ;;  %v4723_v7 = vld [vmem:[#allocation9 + $0x20] ss:$16 sps:$4 sm:$0xff]  }
  0x5d   :  { %387 = vmatpush1.bf16.msra.mxu0 %v4717_v3  ;;  %500 = vmatpush1.bf16.msra.mxu1 %v4718_v4  ;;  %v4724_v8 = vld [vmem:[#allocation9 + $0x28] ss:$16 sps:$4 sm:$0xff]   ;;  %v4725_v9 = vld [vmem:[#allocation9 + $0x44] ss:$16 sps:$4 sm:$0xff]   ;;  %v4727_v10 = vld [vmem:[#allocation9 + $0x4c] ss:$16 sps:$4 sm:$0xff]  }
  0x5e   :  { %388 = vmatprep.subr.bf16.mxu0 %v4719_v5  ;;  %501 = vmatprep.subr.bf16.mxu1 %v4721_v6  ;;  %v4729_v11 = vld [vmem:[#allocation9 + $0x40] ss:$16 sps:$4 sm:$0xff]   ;;  %v4730_v12 = vld [vmem:[#allocation9 + $0x48] ss:$16 sps:$4 sm:$0xff]   ;;  %v4731_v13 = vld [vmem:[#allocation9 + $0x64] ss:$16 sps:$4 sm:$0xff]  }
  0x5f   :  { %v4733_v14 = vld [vmem:[#allocation9 + $0x6c] ss:$16 sps:$4 sm:$0xff]   ;;  %v4735_v15 = vld [vmem:[#allocation9 + $0x60] ss:$16 sps:$4 sm:$0xff]   ;;  %v4736_v16 = vld [vmem:[#allocation9 + $0x68] ss:$16 sps:$4 sm:$0xff]  }
  0x60   :  { %v4737_v17 = vld [vmem:[#allocation9 + $0x84] ss:$16 sps:$4 sm:$0xff]   ;;  %v4739_v18 = vld [vmem:[#allocation9 + $0x8c] ss:$16 sps:$4 sm:$0xff]   ;;  %v4741_v19 = vld [vmem:[#allocation9 + $0x80] ss:$16 sps:$4 sm:$0xff]  }
  0x61   :  { %389 = vmatpush1.bf16.msra.mxu0 %v4723_v7  ;;  %502 = vmatpush1.bf16.msra.mxu1 %v4724_v8  ;;  %v4742_v20 = vld [vmem:[#allocation9 + $0x88] ss:$16 sps:$4 sm:$0xff]   ;;  %v4743_v21 = vld [vmem:[#allocation9 + $0xa4] ss:$16 sps:$4 sm:$0xff]   ;;  %v4745_v22 = vld [vmem:[#allocation9 + $0xac] ss:$16 sps:$4 sm:$0xff]  }
  0x62   :  { %390 = vmatprep.subr.bf16.mxu0 %v4725_v9  ;;  %503 = vmatprep.subr.bf16.mxu1 %v4727_v10  ;;  %v4747_v23 = vld [vmem:[#allocation9 + $0xa0] ss:$16 sps:$4 sm:$0xff]   ;;  %v4748_v24 = vld [vmem:[#allocation9 + $0xa8] ss:$16 sps:$4 sm:$0xff]   ;;  %v4749_v25 = vld [vmem:[#allocation9 + $0xc4] ss:$16 sps:$4 sm:$0xff]  }
  0x63   :  { %v4751_v26 = vld [vmem:[#allocation9 + $0xcc] ss:$16 sps:$4 sm:$0xff]   ;;  %v4753_v27 = vld [vmem:[#allocation9 + $0xc0] ss:$16 sps:$4 sm:$0xff]   ;;  %v4754_v28 = vld [vmem:[#allocation9 + $0xc8] ss:$16 sps:$4 sm:$0xff]  }
  0x64   :  { %v4755_v29 = vld [vmem:[#allocation9 + $0xe4] ss:$16 sps:$4 sm:$0xff]   ;;  %v4757_v30 = vld [vmem:[#allocation9 + $0xec] ss:$16 sps:$4 sm:$0xff]   ;;  %v4759_v31 = vld [vmem:[#allocation9 + $0xe0] ss:$16 sps:$4 sm:$0xff]  }
  0x65   :  { %391 = vmatpush1.bf16.msra.mxu0 %v4729_v11  ;;  %504 = vmatpush1.bf16.msra.mxu1 %v4730_v12  ;;  %v4760_v32 = vld [vmem:[#allocation9 + $0xe8] ss:$16 sps:$4 sm:$0xff]   ;;  %v5770_v33 = vld [vmem:[#allocation12 + $0x4] ss:$16 sps:$4 sm:$0xff]   ;;  %v5772_v34 = vld [vmem:[#allocation12 + $0xc] ss:$16 sps:$4 sm:$0xff]   ;;  %v158_v11 = vlaneseq }
  0x66   :  { %392 = vmatprep.subr.bf16.mxu0 %v4731_v13  ;;  %505 = vmatprep.subr.bf16.mxu1 %v4733_v14  ;;  %v4761_v35 = vld [vmem:[#allocation6] sm:$0xff]   ;;  %v5780_v38 = vld [vmem:[#allocation12 + $0x8] ss:$16 sps:$4 sm:$0xff]   ;;  %v5782_v39 = vld [vmem:[#allocation12 + $0x2c] ss:$16 sps:$4 sm:$0xff]   ;;  %v5647_v10 = vmov 0.0|0.0  }
  0x67   :  { %v5774_v36 = vld [vmem:[#allocation12] ss:$16 sps:$4 sm:$0xff]   ;;  %v5777_v37 = vld [vmem:[#allocation12 + $0x24] ss:$16 sps:$4 sm:$0xff]   ;;  %v5793_v42 = vld [vmem:[#allocation12 + $0x28] ss:$16 sps:$4 sm:$0xff]  }
  0x68   :  { %v5786_v40 = vld [vmem:[#allocation12 + $0x20] ss:$16 sps:$4 sm:$0xff]   ;;  %v5790_v41 = vld [vmem:[#allocation12 + $0x44] ss:$16 sps:$4 sm:$0xff]   ;;  %v5802_v46 = vld [vmem:[#allocation12 + $0x4c] ss:$16 sps:$4 sm:$0xff]  }
  0x69   :  { %393 = vmatpush1.bf16.msra.mxu0 %v4735_v15  ;;  %506 = vmatpush1.bf16.msra.mxu1 %v4736_v16  ;;  %v5797_v44 = vld [vmem:[#allocation12 + $0x40] ss:$16 sps:$4 sm:$0xff]   ;;  %v5799_v45 = vld [vmem:[#allocation12 + $0x64] ss:$16 sps:$4 sm:$0xff]   ;;  %v5805_v47 = vld [vmem:[#allocation12 + $0x48] ss:$16 sps:$4 sm:$0xff]  }
  0x6a   :  { %394 = vmatprep.subr.bf16.mxu0 %v4737_v17  ;;  %507 = vmatprep.subr.bf16.mxu1 %v4739_v18  ;;  %v5807_v48 = vld [vmem:[#allocation12 + $0x6c] ss:$16 sps:$4 sm:$0xff]   ;;  %v5812_v49 = vld [vmem:[#allocation12 + $0x60] ss:$16 sps:$4 sm:$0xff]   ;;  %v5815_v50 = vld [vmem:[#allocation12 + $0x84] ss:$16 sps:$4 sm:$0xff]  }
  0x6b   :  { %v5819_v51 = vld [vmem:[#allocation12 + $0x68] ss:$16 sps:$4 sm:$0xff]   ;;  %v4771_v52 = vld [vmem:[#allocation6 + $0x10] sm:$0xff]   ;;  %v5825_v54 = vld [vmem:[#allocation12 + $0x8c] ss:$16 sps:$4 sm:$0xff]   ;;  %v5920_v12 = vshrl.u32 %v158_v11, 7 }
  0x6c   :  { %v5822_v53 = vld [vmem:[#allocation12 + $0x80] ss:$16 sps:$4 sm:$0xff]   ;;  %v5828_v55 = vld [vmem:[#allocation12 + $0xa4] ss:$16 sps:$4 sm:$0xff]   ;;  %v5831_v56 = vld [vmem:[#allocation12 + $0x88] ss:$16 sps:$4 sm:$0xff]  }
  0x6d   :  { %395 = vmatpush1.bf16.msra.mxu0 %v4741_v19  ;;  %508 = vmatpush1.bf16.msra.mxu1 %v4742_v20  ;;  %v5833_v57 = vld [vmem:[#allocation12 + $0xac] ss:$16 sps:$4 sm:$0xff]   ;;  %v5835_v58 = vld [vmem:[#allocation12 + $0xa0] ss:$16 sps:$4 sm:$0xff]   ;;  %v5839_v59 = vld [vmem:[#allocation12 + $0xc4] ss:$16 sps:$4 sm:$0xff]  }
  0x6e   :  { %396 = vmatprep.subr.bf16.mxu0 %v4743_v21  ;;  %509 = vmatprep.subr.bf16.mxu1 %v4745_v22  ;;  %v5841_v60 = vld [vmem:[#allocation12 + $0xa8] ss:$16 sps:$4 sm:$0xff]   ;;  %v5847_v62 = vld [vmem:[#allocation12 + $0xc0] ss:$16 sps:$4 sm:$0xff]   ;;  %v5850_v63 = vld [vmem:[#allocation12 + $0xcc] ss:$16 sps:$4 sm:$0xff]  }
  0x6f   :  { %v4778_v61 = vld [vmem:[#allocation6 + $0x18] sm:$0xff]   ;;  %v5852_v1 = vld [vmem:[#allocation12 + $0xe4] ss:$16 sps:$4 sm:$0xff]   ;;  %v5861_v4 = vld [vmem:[#allocation12 + $0xe0] ss:$16 sps:$4 sm:$0xff]   ;;  %v6956_v13 = vsub.s32 0, %v5920_v12 }
  0x70   :  { %v5854_v2 = vld [vmem:[#allocation12 + $0xc8] ss:$16 sps:$4 sm:$0xff]   ;;  %v5857_v3 = vld [vmem:[#allocation12 + $0xec] ss:$16 sps:$4 sm:$0xff]   ;;  %v4785_v6 = vld [vmem:[#allocation6 + $0x20] sm:$0xff]   ;;  %v6955_v15 = vsub.s32 1, %v5920_v12 }
  0x71   :  { %397 = vmatpush1.bf16.msra.mxu0 %v4747_v23  ;;  %510 = vmatpush1.bf16.msra.mxu1 %v4748_v24  ;;  %v5865_v5 = vld [vmem:[#allocation12 + $0xe8] ss:$16 sps:$4 sm:$0xff]   ;;  %v4799_v8 = vld [vmem:[#allocation6 + $0x30] sm:$0xff]   ;;  %v156_v14 = vld [vmem:[%s6949_s4] sm:$0xf]  ;;  %v6954_v19 = vsub.s32 2, %v5920_v12 }
  0x72   :  { %398 = vmatprep.subr.bf16.mxu0 %v4749_v25  ;;  %511 = vmatprep.subr.bf16.mxu1 %v4751_v26  ;;  %v4792_v7 = vld [vmem:[#allocation6 + $0x28] sm:$0xff]   ;;  %v4807_v9 = vld [vmem:[#allocation6 + $0x38] sm:$0xff]   ;;  %v5929_v16 = vrot.slane %v156_v14, %v6956_v13  ;;  %v5933_v17 = vrot.slane %v156_v14, %v6955_v15  ;;  %vm5649_vm0 = vmmov 0   ;;  %s5650_s20 = smov [#allocation15]  }
  0x73   :  { %s4156_s21 = sshll.u32 %s5650_s20, 4  ;;  %s4157_s21 = int_to_ptr.vmem [resolvable:$true] %s4156_s21 }
  0x74   :  { %s5607_s22 = scalar_lea.vmem %s4157_s21, 256  ;;  %p5612_p13 = scmp.lt.s32.totalorder %s4157_s21, %s4157_s21 }
  0x75   :  { %399 = vmatpush1.bf16.msra.mxu0 %v4753_v27  ;;  %512 = vmatpush1.bf16.msra.mxu1 %v4754_v28  ;;  %v6953_v28 = vsub.s32 3, %v5920_v12  ;;  %p5608_p12 = scmp.ne.s32.totalorder %s4157_s21, %s5607_s22  ;;  %p5613_p0 = scmp.lt.s32.totalorder %s5607_s22, %s5607_s22 }
  0x76   :  { %400 = vmatprep.subr.bf16.mxu0 %v4755_v29  ;;  %513 = vmatprep.subr.bf16.mxu1 %v4757_v30 }
  0x77   :  { %p5614_p1 = por %p5613_p0, %p5612_p13 }
  0x79   :  { %401 = vmatpush1.bf16.msra.mxu0 %v4759_v31  ;;  %514 = vmatpush1.bf16.msra.mxu1 %v4760_v32  ;;  %v5942_v32 = vrot.slane %v156_v14, %v6954_v19  ;;  %p5615_p2 = pnand %p5614_p1, %p5608_p12 }
  0x7a   :  { %881 = vmatprep.subr.bf16.mxu0 %v5770_v33  ;;  %924 = vmatprep.subr.bf16.mxu1 %v5772_v34 }
  0x7c   :  { %419 = vmatmul.mubr.bf16.vlgmr.msra.gmra.mrb[0].mxu0 %v4761_v35  ;;  %532 = vmatmul.mubr.bf16.vlgmr.msra.gmra.mrb[0].mxu1 %v4761_v35 }
  0x7d   :  { %882 = vmatpush1.bf16.msra.mxu0 %v5774_v36  ;;  %428 = vmatprep.mubr.bf16.mxu0 %v5646_v0 }
  0x7e   :  { %541 = vmatprep.mubr.bf16.mxu1 %v5646_v0  ;;  %883 = vmatprep.subr.bf16.mxu0 %v5777_v37 }
  0x7f   :  { %925 = vmatpush1.bf16.msra.mxu1 %v5780_v38 }
  0x80   :  { %926 = vmatprep.subr.bf16.mxu1 %v5782_v39 }
  0x81   :  { %884 = vmatpush1.bf16.msra.mxu0 %v5786_v40 }
  0x82   :  { %885 = vmatprep.subr.bf16.mxu0 %v5790_v41 }
  0x83   :  { %927 = vmatpush1.bf16.msra.mxu1 %v5793_v42 }
  0x84   :  { %429 = vmatmul.mubr.bf16.gmra.mrb[4].mxu0 %v4765_v43  ;;  %542 = vmatmul.mubr.bf16.gmra.mrb[4].mxu1 %v4765_v43 }
  0x85   :  { %438 = vmatprep.mubr.bf16.mxu0 %v5646_v0  ;;  %551 = vmatprep.mubr.bf16.mxu1 %v5646_v0 }
  0x86   :  { %886 = vmatpush1.bf16.msra.mxu0 %v5797_v44  ;;  %928 = vmatprep.subr.bf16.mxu1 %v5802_v46 }
  0x87   :  { %887 = vmatprep.subr.bf16.mxu0 %v5799_v45  ;;  %929 = vmatpush1.bf16.msra.mxu1 %v5805_v47 }
  0x88   :  { %930 = vmatprep.subr.bf16.mxu1 %v5807_v48 }
  0x8a   :  { %888 = vmatpush1.bf16.msra.mxu0 %v5812_v49 }
  0x8b   :  { %889 = vmatprep.subr.bf16.mxu0 %v5815_v50  ;;  %931 = vmatpush1.bf16.msra.mxu1 %v5819_v51 }
  0x8c   :  { %439 = vmatmul.mubr.bf16.gmra.mrb[8].mxu0 %v4771_v52  ;;  %552 = vmatmul.mubr.bf16.gmra.mrb[8].mxu1 %v4771_v52 }
  0x8d   :  { %448 = vmatprep.mubr.bf16.mxu0 %v5646_v0  ;;  %561 = vmatprep.mubr.bf16.mxu1 %v5646_v0 }
  0x8e   :  { %890 = vmatpush1.bf16.msra.mxu0 %v5822_v53  ;;  %932 = vmatprep.subr.bf16.mxu1 %v5825_v54 }
  0x8f   :  { %891 = vmatprep.subr.bf16.mxu0 %v5828_v55  ;;  %933 = vmatpush1.bf16.msra.mxu1 %v5831_v56 }
  0x90   :  { %934 = vmatprep.subr.bf16.mxu1 %v5833_v57 }
  0x92   :  { %892 = vmatpush1.bf16.msra.mxu0 %v5835_v58 }
  0x93   :  { %893 = vmatprep.subr.bf16.mxu0 %v5839_v59  ;;  %935 = vmatpush1.bf16.msra.mxu1 %v5841_v60 }
  0x94   :  { %449 = vmatmul.mubr.bf16.gmra.mrb[12].mxu0 %v4778_v61  ;;  %562 = vmatmul.mubr.bf16.gmra.mrb[12].mxu1 %v4778_v61 }
  0x95   :  { %458 = vmatprep.mubr.bf16.mxu0 %v5646_v0  ;;  %571 = vmatprep.mubr.bf16.mxu1 %v5646_v0 }
  0x96   :  { %894 = vmatpush1.bf16.msra.mxu0 %v5847_v62  ;;  %936 = vmatprep.subr.bf16.mxu1 %v5850_v63 }
  0x97   :  { %895 = vmatprep.subr.bf16.mxu0 %v5852_v1  ;;  %937 = vmatpush1.bf16.msra.mxu1 %v5854_v2 }
  0x98   :  { %938 = vmatprep.subr.bf16.mxu1 %v5857_v3 }
  0x9a   :  { %896 = vmatpush1.bf16.msra.mxu0 %v5861_v4 }
  0x9b   :  { %939 = vmatpush1.bf16.msra.mxu1 %v5865_v5  ;;  %1034 = vmatprep.subr.bf16.mxu0 %v5770_v33 }
  0x9c   :  { %459 = vmatmul.mubr.bf16.gmra.mrb[16].mxu0 %v4785_v6  ;;  %572 = vmatmul.mubr.bf16.gmra.mrb[16].mxu1 %v4785_v6  ;;  %v5947_v6 = vrot.slane %v156_v14, %v6953_v28 }
  0x9d   :  { %468 = vmatprep.mubr.bf16.mxu0 %v5646_v0  ;;  %581 = vmatprep.mubr.bf16.mxu1 %v5646_v0 }
  0x9e   :  { %1077 = vmatprep.subr.bf16.mxu1 %v5772_v34 }
  0xa4   :  { %469 = vmatmul.mubr.bf16.gmra.mrb[20].mxu0 %v4792_v7  ;;  %582 = vmatmul.mubr.bf16.gmra.mrb[20].mxu1 %v4792_v7 }
  0xa5   :  { %478 = vmatprep.mubr.bf16.mxu0 %v5646_v0  ;;  %591 = vmatprep.mubr.bf16.mxu1 %v5646_v0 }
  0xac   :  { %479 = vmatmul.mubr.bf16.gmra.mrb[24].mxu0 %v4799_v8  ;;  %592 = vmatmul.mubr.bf16.gmra.mrb[24].mxu1 %v4799_v8 }
  0xad   :  { %488 = vmatprep.mubr.bf16.mxu0 %v5646_v0  ;;  %601 = vmatprep.mubr.bf16.mxu1 %v5646_v0 }
  0xb4   :  { %489 = vmatmul.mubr.bf16.gmra.mrb[28].mxu0 %v4807_v9  ;;  %602 = vmatmul.mubr.bf16.gmra.mrb[28].mxu1 %v4807_v9 }
  0xb5   :  { %913 = vmatprep.mubr.bf16.mxu0 %v5646_v0  ;;  %956 = vmatprep.mubr.bf16.mxu1 %v5646_v0 }
  0xbc   :  { %914 = vmatmul.mubr.bf16.vlgmr.msra.gmra.mrb[0].mxu0 %v5647_v10  ;;  %957 = vmatmul.mubr.bf16.vlgmr.msra.gmra.mrb[0].mxu1 %v5647_v10 }
  0xbd   :  { %1035 = vmatpush1.bf16.msra.mxu0 %v5774_v36  ;;  %1078 = vmatpush1.bf16.msra.mxu1 %v5780_v38 }
  0xbe   :  { %1036 = vmatprep.subr.bf16.mxu0 %v5777_v37  ;;  %1079 = vmatprep.subr.bf16.mxu1 %v5782_v39 }
  0xbf   :  { %1066 = vmatprep.mubr.bf16.mxu0 %v5646_v0  ;;  %1109 = vmatprep.mubr.bf16.mxu1 %v5646_v0 }
  0xc1   :  { %1037 = vmatpush1.bf16.msra.mxu0 %v5786_v40  ;;  %1080 = vmatpush1.bf16.msra.mxu1 %v5793_v42 }
  0xc2   :  { %1038 = vmatprep.subr.bf16.mxu0 %v5790_v41  ;;  %1081 = vmatprep.subr.bf16.mxu1 %v5802_v46 }
  0xc5   :  { %1039 = vmatpush1.bf16.msra.mxu0 %v5797_v44  ;;  %1082 = vmatpush1.bf16.msra.mxu1 %v5805_v47 }
  0xc6   :  { %1040 = vmatprep.subr.bf16.mxu0 %v5799_v45  ;;  %1083 = vmatprep.subr.bf16.mxu1 %v5807_v48 }
  0xc9   :  { %1041 = vmatpush1.bf16.msra.mxu0 %v5812_v49  ;;  %1084 = vmatpush1.bf16.msra.mxu1 %v5819_v51 }
  0xca   :  { %1042 = vmatprep.subr.bf16.mxu0 %v5815_v50  ;;  %1085 = vmatprep.subr.bf16.mxu1 %v5825_v54 }
  0xcd   :  { %1043 = vmatpush1.bf16.msra.mxu0 %v5822_v53  ;;  %1086 = vmatpush1.bf16.msra.mxu1 %v5831_v56 }
  0xce   :  { %1044 = vmatprep.subr.bf16.mxu0 %v5828_v55  ;;  %1087 = vmatprep.subr.bf16.mxu1 %v5833_v57 }
  0xd1   :  { %1045 = vmatpush1.bf16.msra.mxu0 %v5835_v58  ;;  %1088 = vmatpush1.bf16.msra.mxu1 %v5841_v60 }
  0xd2   :  { %1046 = vmatprep.subr.bf16.mxu0 %v5839_v59  ;;  %1089 = vmatprep.subr.bf16.mxu1 %v5850_v63 }
  0xd5   :  { %1047 = vmatpush1.bf16.msra.mxu0 %v5847_v62  ;;  %1090 = vmatpush1.bf16.msra.mxu1 %v5854_v2 }
  0xd6   :  { %1048 = vmatprep.subr.bf16.mxu0 %v5852_v1  ;;  %1091 = vmatprep.subr.bf16.mxu1 %v5857_v3 }
  0xd9   :  { %1049 = vmatpush1.bf16.msra.mxu0 %v5861_v4  ;;  %1092 = vmatpush1.bf16.msra.mxu1 %v5865_v5 }
  0xda   :  { %1188 = vmatprep.subr.bf16.mxu0 %v5770_v33  ;;  %1231 = vmatprep.subr.bf16.mxu1 %v5772_v34 }
 0x18f   :  { %v915_v18 = vpop.f32.mrb[0].mxu0  ;;  %v958_v20 = vpop.f32.mrb[0].mxu1 }
 0x190   :  { %v4441_v21 = vadd.f32 %v915_v18, %v5929_v16  ;;  %v917_v22 = vpop.f32.mrb[1].mxu0  ;;  %v960_v23 = vpop.f32.mrb[1].mxu1  ;;  %v4473_v7 = vadd.f32 %v958_v20, %v5942_v32 }
 0x191   :  { %v4442_v24 = vadd.f32 %v917_v22, %v5933_v17  ;;  %v919_v25 = vpop.f32.mrb[2].mxu0  ;;  %v962_v26 = vpop.f32.mrb[2].mxu1  ;;  %v4474_v9 = vadd.f32 %v960_v23, %v5947_v6 }
 0x192   :  { %v4242_v27 = vmul.f32 -1.442695, %v4441_v21  ;;  %v4443_v29 = vadd.f32 %v919_v25, %v5929_v16  ;;  %v921_v30 = vpop.f32.mrb[3].mxu0  ;;  %v964_v31 = vpop.f32.mrb[3].mxu1  ;;  %v4475_v8 = vadd.f32 %v962_v26, %v5942_v32  ;;  %v4244_v11 = vmul.f32 -1.442695, %v4473_v7 }
 0x193   :  { %v4243_v35 = vmul.f32 -1.442695, %v4442_v24  ;;  %v4444_v43 = vadd.f32 %v921_v30, %v5933_v17  ;;  %v4476_v22 = vadd.f32 %v964_v31, %v5947_v6 }
 0x194   :  { %4921 = vpow2.f32 %v4242_v27  ;;  %v4245_v52 = vmul.f32 -1.442695, %v4443_v29  ;;  %v4247_v18 = vmul.f32 -1.442695, %v4475_v8 }
 0x195   :  { %v4246_v61 = vmul.f32 -1.442695, %v4444_v43  ;;  %4923 = vpow2.f32 %v4243_v35 }
 0x196   :  { %4925 = vpow2.f32 %v4245_v52 }
 0x197   :  { %4927 = vpow2.f32 %v4246_v61 }
 0x198   :  { %4929 = vtanh.f32 %v4474_v9 }
 0x199   :  { %4931 = vpow2.f32 %v4244_v11 }
 0x19a   :  { %4933 = vpow2.f32 %v4247_v18 }
 0x19e   :  { %v4922_v21 = vpop.eup %4921 }
 0x19f   :  { %v993_v24 = vadd.f32 1.0, %v4922_v21  ;;  %v4924_v25 = vpop.eup %4923 }
 0x1a0   :  { %v4926_v14 = vpop.eup %4925  ;;  %v994_v27 = vadd.f32 1.0, %v4924_v25 }
 0x1a1   :  { %4935 = vrcp.f32 %v993_v24  ;;  %v996_v20 = vadd.f32 1.0, %v4926_v14  ;;  %v4928_v29 = vpop.eup %4927 }
 0x1a2   :  { %4937 = vtanh.f32 %v4476_v22  ;;  %v997_v26 = vadd.f32 1.0, %v4928_v29  ;;  %v4930_v23 = vpop.eup %4929 }
 0x1a3   :  { %4939 = vrcp.f32 %v994_v27  ;;  %v4932_v30 = vpop.eup %4931 }
 0x1a4   :  { %4941 = vrcp.f32 %v996_v20  ;;  %v4934_v35 = vpop.eup %4933  ;;  %v995_v8 = vadd.f32 1.0, %v4932_v30 }
 0x1a5   :  { %4943 = vrcp.f32 %v997_v26  ;;  %v998_v22 = vadd.f32 1.0, %v4934_v35 }
 0x1a6   :  { %4945 = vrcp.f32 %v995_v8 }
 0x1ab   :  { %v4936_v43 = vpop.eup %4935 }
 0x1ac   :  { %v4938_v52 = vpop.eup %4937  ;;  %v1015_v31 = vmul.f32 %v4936_v43, %v4930_v23 }
 0x1ad   :  { %v4940_v61 = vpop.eup %4939 }
 0x1ae   :  { %v4942_v7 = vpop.eup %4941  ;;  %v1013_v9 = vmul.f32 0.0, %v4940_v61 }
 0x1af   :  { %v1016_v11 = vmul.f32 %v4942_v7, %v4938_v52  ;;  %v4944_v18 = vpop.eup %4943 }
 0x1b0   :  { %v5953_v21 = vadd.f32 %v1015_v31, %v1013_v9  ;;  %v1014_v24 = vmul.f32 0.0, %v4944_v18  ;;  %v4946_v14 = vpop.eup %4945 }
 0x1b2   :  { %4947 = vtanh.f32 %v5953_v21  ;;  %v5956_v25 = vadd.f32 %v1016_v11, %v1014_v24 }
 0x1b3   :  { %4949 = vrcp.f32 %v998_v22 }
 0x1b4   :  { %4951 = vtanh.f32 %v5956_v25 }
 0x1bc   :  { %v4948_v27 = vpop.eup %4947 }
 0x1bd   :  { %v4950_v20 = vpop.eup %4949  ;;  %v1021_v26 = vmul.f32 %v4948_v27, %v4946_v14 }
 0x1be   :  { %v4952_v29 = vpop.eup %4951 }
 0x1bf   :  { %v1022_v23 = vmul.f32 %v4952_v29, %v4950_v20 }
 0x1c1   :  { %v5959_v30 = vpack.c.bf16 %v1022_v23, %v1021_v26 }
 0x1c3   :  { %1067 = vmatmul.mubr.bf16.vlgmr.msra.gmra.mrb[4].mxu0 %v5959_v30  ;;  %1110 = vmatmul.mubr.bf16.vlgmr.msra.gmra.mrb[4].mxu1 %v5959_v30 }
 0x1c4   :  { %1189 = vmatpush1.bf16.msra.mxu0 %v5774_v36  ;;  %1232 = vmatpush1.bf16.msra.mxu1 %v5780_v38 }
 0x1c5   :  { %1190 = vmatprep.subr.bf16.mxu0 %v5777_v37  ;;  %1233 = vmatprep.subr.bf16.mxu1 %v5782_v39 }
 0x1c6   :  { %1220 = vmatprep.mubr.bf16.mxu0 %v5646_v0  ;;  %1263 = vmatprep.mubr.bf16.mxu1 %v5646_v0 }
 0x1c8   :  { %1191 = vmatpush1.bf16.msra.mxu0 %v5786_v40  ;;  %1234 = vmatpush1.bf16.msra.mxu1 %v5793_v42 }
 0x1c9   :  { %1192 = vmatprep.subr.bf16.mxu0 %v5790_v41  ;;  %1235 = vmatprep.subr.bf16.mxu1 %v5802_v46 }
 0x1cc   :  { %1193 = vmatpush1.bf16.msra.mxu0 %v5797_v44  ;;  %1236 = vmatpush1.bf16.msra.mxu1 %v5805_v47 }
 0x1cd   :  { %1194 = vmatprep.subr.bf16.mxu0 %v5799_v45  ;;  %1237 = vmatprep.subr.bf16.mxu1 %v5807_v48 }
 0x1d0   :  { %1195 = vmatpush1.bf16.msra.mxu0 %v5812_v49  ;;  %1238 = vmatpush1.bf16.msra.mxu1 %v5819_v51 }
 0x1d1   :  { %1196 = vmatprep.subr.bf16.mxu0 %v5815_v50  ;;  %1239 = vmatprep.subr.bf16.mxu1 %v5825_v54 }
 0x1d4   :  { %1197 = vmatpush1.bf16.msra.mxu0 %v5822_v53  ;;  %1240 = vmatpush1.bf16.msra.mxu1 %v5831_v56 }
 0x1d5   :  { %1198 = vmatprep.subr.bf16.mxu0 %v5828_v55  ;;  %1241 = vmatprep.subr.bf16.mxu1 %v5833_v57 }
 0x1d8   :  { %1199 = vmatpush1.bf16.msra.mxu0 %v5835_v58  ;;  %1242 = vmatpush1.bf16.msra.mxu1 %v5841_v60 }
 0x1d9   :  { %1200 = vmatprep.subr.bf16.mxu0 %v5839_v59  ;;  %1243 = vmatprep.subr.bf16.mxu1 %v5850_v63 }
 0x1dc   :  { %1201 = vmatpush1.bf16.msra.mxu0 %v5847_v62  ;;  %1244 = vmatpush1.bf16.msra.mxu1 %v5854_v2 }
 0x1dd   :  { %1202 = vmatprep.subr.bf16.mxu0 %v5852_v1  ;;  %1245 = vmatprep.subr.bf16.mxu1 %v5857_v3 }
 0x1e0   :  { %1203 = vmatpush1.bf16.msra.mxu0 %v5861_v4  ;;  %1246 = vmatpush1.bf16.msra.mxu1 %v5865_v5 }
 0x1e1   :  { %1342 = vmatprep.subr.bf16.mxu0 %v5770_v33  ;;  %1385 = vmatprep.subr.bf16.mxu1 %v5772_v34 }
 0x296   :  { %v1068_v35 = vpop.f32.mrb[4].mxu0  ;;  %v1111_v43 = vpop.f32.mrb[4].mxu1 }
 0x297   :  { %v4445_v52 = vadd.f32 %v1068_v35, %v5929_v16  ;;  %v1070_v31 = vpop.f32.mrb[5].mxu0  ;;  %v1113_v61 = vpop.f32.mrb[5].mxu1  ;;  %v4477_v26 = vadd.f32 %v1111_v43, %v5942_v32 }
 0x298   :  { %v4446_v7 = vadd.f32 %v1070_v31, %v5933_v17  ;;  %v1072_v8 = vpop.f32.mrb[6].mxu0  ;;  %v1115_v9 = vpop.f32.mrb[6].mxu1  ;;  %v4478_v35 = vadd.f32 %v1113_v61, %v5947_v6 }
 0x299   :  { %v4248_v11 = vmul.f32 -1.442695, %v4445_v52  ;;  %v4447_v18 = vadd.f32 %v1072_v8, %v5929_v16  ;;  %v1074_v22 = vpop.f32.mrb[7].mxu0  ;;  %v1117_v24 = vpop.f32.mrb[7].mxu1  ;;  %v4479_v23 = vadd.f32 %v1115_v9, %v5942_v32  ;;  %v4250_v52 = vmul.f32 -1.442695, %v4477_v26 }
 0x29a   :  { %v4249_v14 = vmul.f32 -1.442695, %v4446_v7  ;;  %v4448_v27 = vadd.f32 %v1074_v22, %v5933_v17  ;;  %v4480_v7 = vadd.f32 %v1117_v24, %v5947_v6 }
 0x29b   :  { %4953 = vpow2.f32 %v4248_v11  ;;  %v4251_v20 = vmul.f32 -1.442695, %v4447_v18  ;;  %v4253_v31 = vmul.f32 -1.442695, %v4479_v23 }
 0x29c   :  { %v4252_v29 = vmul.f32 -1.442695, %v4448_v27  ;;  %4955 = vpow2.f32 %v4249_v14 }
 0x29d   :  { %4957 = vpow2.f32 %v4251_v20 }
 0x29e   :  { %4959 = vpow2.f32 %v4252_v29 }
 0x29f   :  { %4961 = vtanh.f32 %v4478_v35 }
 0x2a0   :  { %4963 = vpow2.f32 %v4250_v52 }
 0x2a1   :  { %4965 = vpow2.f32 %v4253_v31 }
 0x2a5   :  { %v4954_v8 = vpop.eup %4953 }
 0x2a6   :  { %v1146_v28 = vadd.f32 1.0, %v4954_v8  ;;  %v4956_v11 = vpop.eup %4955 }
 0x2a7   :  { %v4958_v18 = vpop.eup %4957  ;;  %v1147_v22 = vadd.f32 1.0, %v4956_v11 }
 0x2a8   :  { %4967 = vrcp.f32 %v1146_v28  ;;  %v1149_v43 = vadd.f32 1.0, %v4958_v18  ;;  %v4960_v14 = vpop.eup %4959 }
 0x2a9   :  { %4969 = vtanh.f32 %v4480_v7  ;;  %v1150_v9 = vadd.f32 1.0, %v4960_v14  ;;  %v4962_v61 = vpop.eup %4961 }
 0x2aa   :  { %4971 = vrcp.f32 %v1147_v22  ;;  %v4964_v27 = vpop.eup %4963 }
 0x2ab   :  { %4973 = vrcp.f32 %v1149_v43  ;;  %v4966_v20 = vpop.eup %4965  ;;  %v1148_v52 = vadd.f32 1.0, %v4964_v27 }
 0x2ac   :  { %4975 = vrcp.f32 %v1150_v9  ;;  %v1151_v7 = vadd.f32 1.0, %v4966_v20 }
 0x2ad   :  { %4977 = vrcp.f32 %v1148_v52 }
 0x2b2   :  { %v4968_v29 = vpop.eup %4967 }
 0x2b3   :  { %v4970_v26 = vpop.eup %4969  ;;  %v1168_v24 = vmul.f32 %v4968_v29, %v4962_v61 }
 0x2b4   :  { %v4972_v23 = vpop.eup %4971 }
 0x2b5   :  { %v4974_v35 = vpop.eup %4973  ;;  %v1166_v31 = vmul.f32 %v4972_v23, %v5953_v21 }
 0x2b6   :  { %v1169_v28 = vmul.f32 %v4974_v35, %v4970_v26  ;;  %v4976_v8 = vpop.eup %4975 }
 0x2b7   :  { %v6006_v11 = vadd.f32 %v1168_v24, %v1166_v31  ;;  %v1167_v18 = vmul.f32 %v4976_v8, %v5956_v25  ;;  %v4978_v43 = vpop.eup %4977 }
 0x2b9   :  { %4979 = vtanh.f32 %v6006_v11  ;;  %v6010_v22 = vadd.f32 %v1169_v28, %v1167_v18 }
 0x2ba   :  { %4981 = vrcp.f32 %v1151_v7 }
 0x2bb   :  { %4983 = vtanh.f32 %v6010_v22 }
 0x2c3   :  { %v4980_v14 = vpop.eup %4979 }
 0x2c4   :  { %v4982_v9 = vpop.eup %4981  ;;  %v1174_v21 = vmul.f32 %v4980_v14, %v4978_v43 }
 0x2c5   :  { %v4984_v61 = vpop.eup %4983 }
 0x2c6   :  { %v1175_v27 = vmul.f32 %v4984_v61, %v4982_v9 }
 0x2c8   :  { %v6013_v29 = vpack.c.bf16 %v1175_v27, %v1174_v21 }
 0x2ca   :  { %1221 = vmatmul.mubr.bf16.vlgmr.msra.gmra.mrb[8].mxu0 %v6013_v29  ;;  %1264 = vmatmul.mubr.bf16.vlgmr.msra.gmra.mrb[8].mxu1 %v6013_v29 }
 0x2cb   :  { %1343 = vmatpush1.bf16.msra.mxu0 %v5774_v36  ;;  %1386 = vmatpush1.bf16.msra.mxu1 %v5780_v38 }
 0x2cc   :  { %1344 = vmatprep.subr.bf16.mxu0 %v5777_v37  ;;  %1387 = vmatprep.subr.bf16.mxu1 %v5782_v39 }
 0x2cd   :  { %1374 = vmatprep.mubr.bf16.mxu0 %v5646_v0  ;;  %1417 = vmatprep.mubr.bf16.mxu1 %v5646_v0 }
 0x2cf   :  { %1345 = vmatpush1.bf16.msra.mxu0 %v5786_v40  ;;  %1388 = vmatpush1.bf16.msra.mxu1 %v5793_v42 }
 0x2d0   :  { %1346 = vmatprep.subr.bf16.mxu0 %v5790_v41  ;;  %1389 = vmatprep.subr.bf16.mxu1 %v5802_v46 }
 0x2d3   :  { %1347 = vmatpush1.bf16.msra.mxu0 %v5797_v44  ;;  %1390 = vmatpush1.bf16.msra.mxu1 %v5805_v47 }
 0x2d4   :  { %1348 = vmatprep.subr.bf16.mxu0 %v5799_v45  ;;  %1391 = vmatprep.subr.bf16.mxu1 %v5807_v48 }
 0x2d7   :  { %1349 = vmatpush1.bf16.msra.mxu0 %v5812_v49  ;;  %1392 = vmatpush1.bf16.msra.mxu1 %v5819_v51 }
 0x2d8   :  { %1350 = vmatprep.subr.bf16.mxu0 %v5815_v50  ;;  %1393 = vmatprep.subr.bf16.mxu1 %v5825_v54 }
 0x2db   :  { %1351 = vmatpush1.bf16.msra.mxu0 %v5822_v53  ;;  %1394 = vmatpush1.bf16.msra.mxu1 %v5831_v56 }
 0x2dc   :  { %1352 = vmatprep.subr.bf16.mxu0 %v5828_v55  ;;  %1395 = vmatprep.subr.bf16.mxu1 %v5833_v57 }
 0x2df   :  { %1353 = vmatpush1.bf16.msra.mxu0 %v5835_v58  ;;  %1396 = vmatpush1.bf16.msra.mxu1 %v5841_v60 }
 0x2e0   :  { %1354 = vmatprep.subr.bf16.mxu0 %v5839_v59  ;;  %1397 = vmatprep.subr.bf16.mxu1 %v5850_v63 }
 0x2e3   :  { %1355 = vmatpush1.bf16.msra.mxu0 %v5847_v62  ;;  %1398 = vmatpush1.bf16.msra.mxu1 %v5854_v2 }
 0x2e4   :  { %1356 = vmatprep.subr.bf16.mxu0 %v5852_v1  ;;  %1399 = vmatprep.subr.bf16.mxu1 %v5857_v3 }
 0x2e7   :  { %1357 = vmatpush1.bf16.msra.mxu0 %v5861_v4  ;;  %1400 = vmatpush1.bf16.msra.mxu1 %v5865_v5 }
 0x2e8   :  { %1496 = vmatprep.subr.bf16.mxu0 %v5770_v33  ;;  %1539 = vmatprep.subr.bf16.mxu1 %v5772_v34 }
 0x39d   :  { %v1222_v36 = vpop.f32.mrb[8].mxu0  ;;  %v1265_v37 = vpop.f32.mrb[8].mxu1 }
 0x39e   :  { %v4449_v38 = vadd.f32 %v1222_v36, %v5929_v16  ;;  %v1224_v39 = vpop.f32.mrb[9].mxu0  ;;  %v1267_v40 = vpop.f32.mrb[9].mxu1  ;;  %v4481_v24 = vadd.f32 %v1265_v37, %v5942_v32 }
 0x39f   :  { %v4450_v41 = vadd.f32 %v1224_v39, %v5933_v17  ;;  %v1226_v42 = vpop.f32.mrb[10].mxu0  ;;  %v1269_v44 = vpop.f32.mrb[10].mxu1  ;;  %v4482_v35 = vadd.f32 %v1267_v40, %v5947_v6 }
 0x3a0   :  { %v4254_v45 = vmul.f32 -1.442695, %v4449_v38  ;;  %v4451_v46 = vadd.f32 %v1226_v42, %v5929_v16  ;;  %v1228_v47 = vpop.f32.mrb[11].mxu0  ;;  %v1271_v25 = vpop.f32.mrb[11].mxu1  ;;  %v4483_v23 = vadd.f32 %v1269_v44, %v5942_v32  ;;  %v4256_v52 = vmul.f32 -1.442695, %v4481_v24 }
 0x3a1   :  { %v4255_v20 = vmul.f32 -1.442695, %v4450_v41  ;;  %v4452_v33 = vadd.f32 %v1228_v47, %v5933_v17  ;;  %v4484_v8 = vadd.f32 %v1271_v25, %v5947_v6 }
 0x3a2   :  { %4985 = vpow2.f32 %v4254_v45  ;;  %v4257_v34 = vmul.f32 -1.442695, %v4451_v46  ;;  %v4259_v31 = vmul.f32 -1.442695, %v4483_v23 }
 0x3a3   :  { %v4258_v26 = vmul.f32 -1.442695, %v4452_v33  ;;  %4987 = vpow2.f32 %v4255_v20 }
 0x3a4   :  { %4989 = vpow2.f32 %v4257_v34 }
 0x3a5   :  { %4991 = vpow2.f32 %v4258_v26 }
 0x3a6   :  { %4993 = vtanh.f32 %v4482_v35 }
 0x3a7   :  { %4995 = vpow2.f32 %v4256_v52 }
 0x3a8   :  { %4997 = vpow2.f32 %v4259_v31 }
 0x3ac   :  { %v4986_v28 = vpop.eup %4985 }
 0x3ad   :  { %v1300_v7 = vadd.f32 1.0, %v4986_v28  ;;  %v4988_v18 = vpop.eup %4987  ;;  %v6074_v28 = vld [vmem:[#allocation12 + $0x8] ss:$16 sps:$4 sm:$0xff]  }
 0x3ae   :  { %v4990_v43 = vpop.eup %4989  ;;  %v1301_v14 = vadd.f32 1.0, %v4988_v18  ;;  %v6085_v18 = vld [vmem:[#allocation12 + $0x20] ss:$16 sps:$4 sm:$0xff]  }
 0x3af   :  { %4999 = vrcp.f32 %v1300_v7  ;;  %v1303_v9 = vadd.f32 1.0, %v4990_v43  ;;  %v4992_v61 = vpop.eup %4991  ;;  %v6080_v7 = vld [vmem:[#allocation12 + $0x2c] ss:$16 sps:$4 sm:$0xff]   ;;  %v6088_v43 = vld [vmem:[#allocation12 + $0x28] ss:$16 sps:$4 sm:$0xff]  }
 0x3b0   :  { %5001 = vtanh.f32 %v4484_v8  ;;  %v1304_v21 = vadd.f32 1.0, %v4992_v61  ;;  %v4994_v27 = vpop.eup %4993  ;;  %v6077_v8 = vld [vmem:[#allocation12 + $0x24] ss:$16 sps:$4 sm:$0xff]   ;;  %v6097_v61 = vld [vmem:[#allocation12 + $0x40] ss:$16 sps:$4 sm:$0xff]  }
 0x3b1   :  { %5003 = vrcp.f32 %v1301_v14  ;;  %v4996_v36 = vpop.eup %4995  ;;  %v6091_v14 = vld [vmem:[#allocation12 + $0x44] ss:$16 sps:$4 sm:$0xff]  }
 0x3b2   :  { %5005 = vrcp.f32 %v1303_v9  ;;  %v4998_v37 = vpop.eup %4997  ;;  %v1302_v44 = vadd.f32 1.0, %v4996_v36  ;;  %v6094_v9 = vld [vmem:[#allocation12 + $0x4c] ss:$16 sps:$4 sm:$0xff]  }
 0x3b3   :  { %5007 = vrcp.f32 %v1304_v21  ;;  %v1305_v20 = vadd.f32 1.0, %v4998_v37  ;;  %v6100_v21 = vld [vmem:[#allocation12 + $0x48] ss:$16 sps:$4 sm:$0xff]  }
 0x3b4   :  { %5009 = vrcp.f32 %v1302_v44 }
 0x3b9   :  { %v5000_v38 = vpop.eup %4999 }
 0x3ba   :  { %v5002_v39 = vpop.eup %5001  ;;  %v1322_v40 = vmul.f32 %v5000_v38, %v4994_v27  ;;  %v6103_v27 = vld [vmem:[#allocation12 + $0x64] ss:$16 sps:$4 sm:$0xff]  }
 0x3bb   :  { %v5004_v41 = vpop.eup %5003 }
 0x3bc   :  { %v5006_v42 = vpop.eup %5005  ;;  %v1320_v45 = vmul.f32 %v5004_v41, %v6006_v11 }
 0x3bd   :  { %v1323_v46 = vmul.f32 %v5006_v42, %v5002_v39  ;;  %v5008_v47 = vpop.eup %5007 }
 0x3be   :  { %v6060_v25 = vadd.f32 %v1322_v40, %v1320_v45  ;;  %v1321_v33 = vmul.f32 %v5008_v47, %v6010_v22  ;;  %v5010_v26 = vpop.eup %5009  ;;  %v6071_v22 = vld [vmem:[#allocation12] ss:$16 sps:$4 sm:$0xff]  }
 0x3c0   :  { %5011 = vtanh.f32 %v6060_v25  ;;  %v6064_v34 = vadd.f32 %v1323_v46, %v1321_v33 }
 0x3c1   :  { %5013 = vrcp.f32 %v1305_v20 }
 0x3c2   :  { %5015 = vtanh.f32 %v6064_v34 }
 0x3ca   :  { %v5012_v24 = vpop.eup %5011 }
 0x3cb   :  { %v5014_v23 = vpop.eup %5013  ;;  %v1328_v11 = vmul.f32 %v5012_v24, %v5010_v26 }
 0x3cc   :  { %v5016_v35 = vpop.eup %5015 }
 0x3cd   :  { %v1329_v52 = vmul.f32 %v5016_v35, %v5014_v23 }
 0x3cf   :  { %v6067_v31 = vpack.c.bf16 %v1329_v52, %v1328_v11 }
 0x3d1   :  { %1375 = vmatmul.mubr.bf16.vlgmr.msra.gmra.mrb[12].mxu0 %v6067_v31  ;;  %1418 = vmatmul.mubr.bf16.vlgmr.msra.gmra.mrb[12].mxu1 %v6067_v31 }
 0x3d2   :  { %1497 = vmatpush1.bf16.msra.mxu0 %v6071_v22  ;;  %1540 = vmatpush1.bf16.msra.mxu1 %v6074_v28 }
 0x3d3   :  { %1498 = vmatprep.subr.bf16.mxu0 %v6077_v8  ;;  %1541 = vmatprep.subr.bf16.mxu1 %v6080_v7 }
 0x3d4   :  { %1528 = vmatprep.mubr.bf16.mxu0 %v5646_v0  ;;  %1571 = vmatprep.mubr.bf16.mxu1 %v5646_v0 }
 0x3d6   :  { %1499 = vmatpush1.bf16.msra.mxu0 %v6085_v18  ;;  %1542 = vmatpush1.bf16.msra.mxu1 %v6088_v43 }
 0x3d7   :  { %1500 = vmatprep.subr.bf16.mxu0 %v6091_v14  ;;  %1543 = vmatprep.subr.bf16.mxu1 %v6094_v9 }
 0x3da   :  { %1501 = vmatpush1.bf16.msra.mxu0 %v6097_v61  ;;  %1544 = vmatpush1.bf16.msra.mxu1 %v6100_v21 }
 0x3db   :  { %1502 = vmatprep.subr.bf16.mxu0 %v6103_v27  ;;  %1545 = vmatprep.subr.bf16.mxu1 %v5807_v48  ;;  %v6125_v48 = vld [vmem:[#allocation12 + $0x4] ss:$16 sps:$4 sm:$0xff]  }
 0x3de   :  { %1503 = vmatpush1.bf16.msra.mxu0 %v5812_v49  ;;  %1546 = vmatpush1.bf16.msra.mxu1 %v5819_v51  ;;  %v6128_v49 = vld [vmem:[#allocation12 + $0xc] ss:$16 sps:$4 sm:$0xff]  }
 0x3df   :  { %1504 = vmatprep.subr.bf16.mxu0 %v5815_v50  ;;  %1547 = vmatprep.subr.bf16.mxu1 %v5825_v54 }
 0x3e2   :  { %1505 = vmatpush1.bf16.msra.mxu0 %v5822_v53  ;;  %1548 = vmatpush1.bf16.msra.mxu1 %v5831_v56 }
 0x3e3   :  { %1506 = vmatprep.subr.bf16.mxu0 %v5828_v55  ;;  %1549 = vmatprep.subr.bf16.mxu1 %v5833_v57 }
 0x3e6   :  { %1507 = vmatpush1.bf16.msra.mxu0 %v5835_v58  ;;  %1550 = vmatpush1.bf16.msra.mxu1 %v5841_v60 }
 0x3e7   :  { %1508 = vmatprep.subr.bf16.mxu0 %v5839_v59  ;;  %1551 = vmatprep.subr.bf16.mxu1 %v5850_v63 }
 0x3ea   :  { %1509 = vmatpush1.bf16.msra.mxu0 %v5847_v62  ;;  %1552 = vmatpush1.bf16.msra.mxu1 %v5854_v2 }
 0x3eb   :  { %1510 = vmatprep.subr.bf16.mxu0 %v5852_v1  ;;  %1553 = vmatprep.subr.bf16.mxu1 %v5857_v3 }
 0x3ee   :  { %1511 = vmatpush1.bf16.msra.mxu0 %v5861_v4  ;;  %1554 = vmatpush1.bf16.msra.mxu1 %v5865_v5 }
 0x3ef   :  { %1650 = vmatprep.subr.bf16.mxu0 %v6125_v48  ;;  %1693 = vmatprep.subr.bf16.mxu1 %v6128_v49 }
 0x4a4   :  { %v1376_v50 = vpop.f32.mrb[12].mxu0  ;;  %v1419_v51 = vpop.f32.mrb[12].mxu1 }
 0x4a5   :  { %v4453_v53 = vadd.f32 %v1376_v50, %v5929_v16  ;;  %v1378_v54 = vpop.f32.mrb[13].mxu0  ;;  %v1421_v55 = vpop.f32.mrb[13].mxu1  ;;  %v4485_v5 = vadd.f32 %v1419_v51, %v5942_v32 }
 0x4a6   :  { %v4454_v56 = vadd.f32 %v1378_v54, %v5933_v17  ;;  %v1380_v57 = vpop.f32.mrb[14].mxu0  ;;  %v1423_v58 = vpop.f32.mrb[14].mxu1  ;;  %v4486_v37 = vadd.f32 %v1421_v55, %v5947_v6 }
 0x4a7   :  { %v4260_v59 = vmul.f32 -1.442695, %v4453_v53  ;;  %v4455_v60 = vadd.f32 %v1380_v57, %v5929_v16  ;;  %v1382_v62 = vpop.f32.mrb[15].mxu0  ;;  %v1425_v63 = vpop.f32.mrb[15].mxu1  ;;  %v4487_v36 = vadd.f32 %v1423_v58, %v5942_v32  ;;  %v4262_v38 = vmul.f32 -1.442695, %v4485_v5 }
 0x4a8   :  { %v4261_v1 = vmul.f32 -1.442695, %v4454_v56  ;;  %v4456_v2 = vadd.f32 %v1382_v62, %v5933_v17  ;;  %v4488_v41 = vadd.f32 %v1425_v63, %v5947_v6  ;;  %v6167_v5 = vld [vmem:[#allocation12 + $0x60] ss:$16 sps:$4 sm:$0xff]  }
 0x4a9   :  { %5017 = vpow2.f32 %v4260_v59  ;;  %v4263_v3 = vmul.f32 -1.442695, %v4455_v60  ;;  %v4265_v39 = vmul.f32 -1.442695, %v4487_v36  ;;  %v6170_v36 = vld [vmem:[#allocation12 + $0x68] ss:$16 sps:$4 sm:$0xff]  }
 0x4aa   :  { %v4264_v4 = vmul.f32 -1.442695, %v4456_v2  ;;  %5019 = vpow2.f32 %v4261_v1 }
 0x4ab   :  { %5021 = vpow2.f32 %v4263_v3 }
 0x4ac   :  { %5023 = vpow2.f32 %v4264_v4 }
 0x4ad   :  { %5025 = vtanh.f32 %v4486_v37  ;;  %v6173_v37 = vld [vmem:[#allocation12 + $0x84] ss:$16 sps:$4 sm:$0xff]  }
 0x4ae   :  { %5027 = vpow2.f32 %v4262_v38  ;;  %v6176_v38 = vld [vmem:[#allocation12 + $0x8c] ss:$16 sps:$4 sm:$0xff]  }
 0x4af   :  { %5029 = vpow2.f32 %v4265_v39  ;;  %v6179_v39 = vld [vmem:[#allocation12 + $0x80] ss:$16 sps:$4 sm:$0xff]  }
 0x4b3   :  { %v5018_v40 = vpop.eup %5017 }
 0x4b4   :  { %v1454_v42 = vadd.f32 1.0, %v5018_v40  ;;  %v5020_v44 = vpop.eup %5019  ;;  %v6182_v40 = vld [vmem:[#allocation12 + $0x88] ss:$16 sps:$4 sm:$0xff]  }
 0x4b5   :  { %v5022_v45 = vpop.eup %5021  ;;  %v1455_v46 = vadd.f32 1.0, %v5020_v44  ;;  %v6191_v44 = vld [vmem:[#allocation12 + $0xa0] ss:$16 sps:$4 sm:$0xff]  }
 0x4b6   :  { %5031 = vrcp.f32 %v1454_v42  ;;  %v1457_v47 = vadd.f32 1.0, %v5022_v45  ;;  %v5024_v20 = vpop.eup %5023  ;;  %v6188_v42 = vld [vmem:[#allocation12 + $0xac] ss:$16 sps:$4 sm:$0xff]   ;;  %v6194_v45 = vld [vmem:[#allocation12 + $0xa8] ss:$16 sps:$4 sm:$0xff]  }
 0x4b7   :  { %5033 = vtanh.f32 %v4488_v41  ;;  %v1458_v33 = vadd.f32 1.0, %v5024_v20  ;;  %v5026_v26 = vpop.eup %5025  ;;  %v6185_v41 = vld [vmem:[#allocation12 + $0xa4] ss:$16 sps:$4 sm:$0xff]   ;;  %v6203_v20 = vld [vmem:[#allocation12 + $0xc0] ss:$16 sps:$4 sm:$0xff]  }
 0x4b8   :  { %5035 = vrcp.f32 %v1455_v46  ;;  %v5028_v24 = vpop.eup %5027  ;;  %v6197_v46 = vld [vmem:[#allocation12 + $0xc4] ss:$16 sps:$4 sm:$0xff]  }
 0x4b9   :  { %5037 = vrcp.f32 %v1457_v47  ;;  %v5030_v23 = vpop.eup %5029  ;;  %v1456_v53 = vadd.f32 1.0, %v5028_v24  ;;  %v6200_v47 = vld [vmem:[#allocation12 + $0xcc] ss:$16 sps:$4 sm:$0xff]  }
 0x4ba   :  { %5039 = vrcp.f32 %v1458_v33  ;;  %v1459_v58 = vadd.f32 1.0, %v5030_v23  ;;  %v6206_v33 = vld [vmem:[#allocation12 + $0xc8] ss:$16 sps:$4 sm:$0xff]   ;;  %v6212_v24 = vld [vmem:[#allocation12 + $0xec] ss:$16 sps:$4 sm:$0xff]  }
 0x4bb   :  { %5041 = vrcp.f32 %v1456_v53  ;;  %v6215_v23 = vld [vmem:[#allocation12 + $0xe0] ss:$16 sps:$4 sm:$0xff]  }
 0x4c0   :  { %v5032_v35 = vpop.eup %5031 }
 0x4c1   :  { %v5034_v11 = vpop.eup %5033  ;;  %v1476_v52 = vmul.f32 %v5032_v35, %v5026_v26  ;;  %v6209_v26 = vld [vmem:[#allocation12 + $0xe4] ss:$16 sps:$4 sm:$0xff]   ;;  %v6218_v35 = vld [vmem:[#allocation12 + $0xe8] ss:$16 sps:$4 sm:$0xff]  }
 0x4c2   :  { %v5036_v50 = vpop.eup %5035 }
 0x4c3   :  { %v5038_v51 = vpop.eup %5037  ;;  %v1474_v54 = vmul.f32 %v5036_v50, %v6060_v25 }
 0x4c4   :  { %v1477_v55 = vmul.f32 %v5038_v51, %v5034_v11  ;;  %v5040_v56 = vpop.eup %5039 }
 0x4c5   :  { %v6140_v57 = vadd.f32 %v1476_v52, %v1474_v54  ;;  %v1475_v59 = vmul.f32 %v5040_v56, %v6064_v34  ;;  %v5042_v62 = vpop.eup %5041  ;;  %v6164_v34 = vld [vmem:[#allocation12 + $0x6c] ss:$16 sps:$4 sm:$0xff]  }
 0x4c7   :  { %5043 = vtanh.f32 %v6140_v57  ;;  %v6144_v60 = vadd.f32 %v1477_v55, %v1475_v59 }
 0x4c8   :  { %5045 = vrcp.f32 %v1459_v58 }
 0x4c9   :  { %5047 = vtanh.f32 %v6144_v60 }
 0x4d1   :  { %v5044_v63 = vpop.eup %5043 }
 0x4d2   :  { %v5046_v1 = vpop.eup %5045  ;;  %v1482_v25 = vmul.f32 %v5044_v63, %v5042_v62 }
 0x4d3   :  { %v5048_v2 = vpop.eup %5047 }
 0x4d4   :  { %v1483_v3 = vmul.f32 %v5048_v2, %v5046_v1 }
 0x4d6   :  { %v6147_v4 = vpack.c.bf16 %v1483_v3, %v1482_v25 }
 0x4d8   :  { %1529 = vmatmul.mubr.bf16.vlgmr.msra.gmra.mrb[16].mxu0 %v6147_v4  ;;  %1572 = vmatmul.mubr.bf16.vlgmr.msra.gmra.mrb[16].mxu1 %v6147_v4 }
 0x4d9   :  { %1651 = vmatpush1.bf16.msra.mxu0 %v6071_v22  ;;  %1694 = vmatpush1.bf16.msra.mxu1 %v6074_v28 }
 0x4da   :  { %1652 = vmatprep.subr.bf16.mxu0 %v6077_v8  ;;  %1695 = vmatprep.subr.bf16.mxu1 %v6080_v7 }
 0x4db   :  { %1682 = vmatprep.mubr.bf16.mxu0 %v5646_v0  ;;  %1725 = vmatprep.mubr.bf16.mxu1 %v5646_v0 }
 0x4dd   :  { %1653 = vmatpush1.bf16.msra.mxu0 %v6085_v18  ;;  %1696 = vmatpush1.bf16.msra.mxu1 %v6088_v43 }
 0x4de   :  { %1654 = vmatprep.subr.bf16.mxu0 %v6091_v14  ;;  %1697 = vmatprep.subr.bf16.mxu1 %v6094_v9 }
 0x4e1   :  { %1655 = vmatpush1.bf16.msra.mxu0 %v6097_v61  ;;  %1698 = vmatpush1.bf16.msra.mxu1 %v6100_v21 }
 0x4e2   :  { %1656 = vmatprep.subr.bf16.mxu0 %v6103_v27  ;;  %1699 = vmatprep.subr.bf16.mxu1 %v6164_v34 }
 0x4e5   :  { %1657 = vmatpush1.bf16.msra.mxu0 %v6167_v5  ;;  %1700 = vmatpush1.bf16.msra.mxu1 %v6170_v36 }
 0x4e6   :  { %1658 = vmatprep.subr.bf16.mxu0 %v6173_v37  ;;  %1701 = vmatprep.subr.bf16.mxu1 %v6176_v38 }
 0x4e9   :  { %1659 = vmatpush1.bf16.msra.mxu0 %v6179_v39  ;;  %1702 = vmatpush1.bf16.msra.mxu1 %v6182_v40 }
 0x4ea   :  { %1660 = vmatprep.subr.bf16.mxu0 %v6185_v41  ;;  %1703 = vmatprep.subr.bf16.mxu1 %v6188_v42 }
 0x4ed   :  { %1661 = vmatpush1.bf16.msra.mxu0 %v6191_v44  ;;  %1704 = vmatpush1.bf16.msra.mxu1 %v6194_v45 }
 0x4ee   :  { %1662 = vmatprep.subr.bf16.mxu0 %v6197_v46  ;;  %1705 = vmatprep.subr.bf16.mxu1 %v6200_v47 }
 0x4f1   :  { %1663 = vmatpush1.bf16.msra.mxu0 %v6203_v20  ;;  %1706 = vmatpush1.bf16.msra.mxu1 %v6206_v33 }
 0x4f2   :  { %1664 = vmatprep.subr.bf16.mxu0 %v6209_v26  ;;  %1707 = vmatprep.subr.bf16.mxu1 %v6212_v24 }
 0x4f5   :  { %1665 = vmatpush1.bf16.msra.mxu0 %v6215_v23  ;;  %1708 = vmatpush1.bf16.msra.mxu1 %v6218_v35 }
 0x4f6   :  { %1804 = vmatprep.subr.bf16.mxu0 %v6125_v48  ;;  %1847 = vmatprep.subr.bf16.mxu1 %v6128_v49 }
 0x5ab   :  { %v1530_v11 = vpop.f32.mrb[16].mxu0  ;;  %v1573_v52 = vpop.f32.mrb[16].mxu1 }
 0x5ac   :  { %v4457_v50 = vadd.f32 %v1530_v11, %v5929_v16  ;;  %v1532_v51 = vpop.f32.mrb[17].mxu0  ;;  %v1575_v53 = vpop.f32.mrb[17].mxu1  ;;  %v4489_v11 = vadd.f32 %v1573_v52, %v5942_v32 }
 0x5ad   :  { %v4458_v54 = vadd.f32 %v1532_v51, %v5933_v17  ;;  %v1534_v55 = vpop.f32.mrb[18].mxu0  ;;  %v1577_v56 = vpop.f32.mrb[18].mxu1  ;;  %v4490_v51 = vadd.f32 %v1575_v53, %v5947_v6 }
 0x5ae   :  { %v4266_v58 = vmul.f32 -1.442695, %v4457_v50  ;;  %v4459_v59 = vadd.f32 %v1534_v55, %v5929_v16  ;;  %v1536_v62 = vpop.f32.mrb[19].mxu0  ;;  %v1579_v63 = vpop.f32.mrb[19].mxu1  ;;  %v4491_v19 = vadd.f32 %v1577_v56, %v5942_v32  ;;  %v4268_v50 = vmul.f32 -1.442695, %v4489_v11 }
 0x5af   :  { %v4267_v1 = vmul.f32 -1.442695, %v4458_v54  ;;  %v4460_v2 = vadd.f32 %v1536_v62, %v5933_v17  ;;  %v4492_v54 = vadd.f32 %v1579_v63, %v5947_v6 }
 0x5b0   :  { %5049 = vpow2.f32 %v4266_v58  ;;  %v4269_v25 = vmul.f32 -1.442695, %v4459_v59  ;;  %v4271_v15 = vmul.f32 -1.442695, %v4491_v19 }
 0x5b1   :  { %v4270_v3 = vmul.f32 -1.442695, %v4460_v2  ;;  %5051 = vpow2.f32 %v4267_v1 }
 0x5b2   :  { %5053 = vpow2.f32 %v4269_v25 }
 0x5b3   :  { %5055 = vpow2.f32 %v4270_v3 }
 0x5b4   :  { %5057 = vtanh.f32 %v4490_v51 }
 0x5b5   :  { %5059 = vpow2.f32 %v4268_v50 }
 0x5b6   :  { %5061 = vpow2.f32 %v4271_v15 }
 0x5ba   :  { %v5050_v55 = vpop.eup %5049 }
 0x5bb   :  { %v1608_v13 = vadd.f32 1.0, %v5050_v55  ;;  %v5052_v58 = vpop.eup %5051 }
 0x5bc   :  { %v5054_v59 = vpop.eup %5053  ;;  %v1609_v62 = vadd.f32 1.0, %v5052_v58 }
 0x5bd   :  { %5063 = vrcp.f32 %v1608_v13  ;;  %v1611_v52 = vadd.f32 1.0, %v5054_v59  ;;  %v5056_v1 = vpop.eup %5055 }
 0x5be   :  { %5065 = vtanh.f32 %v4492_v54  ;;  %v1612_v56 = vadd.f32 1.0, %v5056_v1  ;;  %v5058_v53 = vpop.eup %5057 }
 0x5bf   :  { %5067 = vrcp.f32 %v1609_v62  ;;  %v5060_v19 = vpop.eup %5059 }
 0x5c0   :  { %5069 = vrcp.f32 %v1611_v52  ;;  %v5062_v2 = vpop.eup %5061  ;;  %v1610_v50 = vadd.f32 1.0, %v5060_v19 }
 0x5c1   :  { %5071 = vrcp.f32 %v1612_v56  ;;  %v1613_v54 = vadd.f32 1.0, %v5062_v2 }
 0x5c2   :  { %5073 = vrcp.f32 %v1610_v50 }
 0x5c7   :  { %v5064_v25 = vpop.eup %5063 }
 0x5c8   :  { %v5066_v3 = vpop.eup %5065  ;;  %v1630_v63 = vmul.f32 %v5064_v25, %v5058_v53 }
 0x5c9   :  { %v5068_v11 = vpop.eup %5067 }
 0x5ca   :  { %v5070_v51 = vpop.eup %5069  ;;  %v1628_v15 = vmul.f32 %v5068_v11, %v6140_v57 }
 0x5cb   :  { %v1631_v13 = vmul.f32 %v5070_v51, %v5066_v3  ;;  %v5072_v55 = vpop.eup %5071 }
 0x5cc   :  { %v6232_v58 = vadd.f32 %v1630_v63, %v1628_v15  ;;  %v1629_v59 = vmul.f32 %v5072_v55, %v6144_v60  ;;  %v5074_v52 = vpop.eup %5073 }
 0x5ce   :  { %5075 = vtanh.f32 %v6232_v58  ;;  %v6236_v62 = vadd.f32 %v1631_v13, %v1629_v59 }
 0x5cf   :  { %5077 = vrcp.f32 %v1613_v54 }
 0x5d0   :  { %5079 = vtanh.f32 %v6236_v62 }
 0x5d8   :  { %v5076_v1 = vpop.eup %5075 }
 0x5d9   :  { %v5078_v56 = vpop.eup %5077  ;;  %v1636_v57 = vmul.f32 %v5076_v1, %v5074_v52 }
 0x5da   :  { %v5080_v53 = vpop.eup %5079 }
 0x5db   :  { %v1637_v19 = vmul.f32 %v5080_v53, %v5078_v56 }
 0x5dd   :  { %v6239_v25 = vpack.c.bf16 %v1637_v19, %v1636_v57 }
 0x5df   :  { %1683 = vmatmul.mubr.bf16.vlgmr.msra.gmra.mrb[20].mxu0 %v6239_v25  ;;  %1726 = vmatmul.mubr.bf16.vlgmr.msra.gmra.mrb[20].mxu1 %v6239_v25 }
 0x5e0   :  { %1805 = vmatpush1.bf16.msra.mxu0 %v6071_v22  ;;  %1848 = vmatpush1.bf16.msra.mxu1 %v6074_v28 }
 0x5e1   :  { %1806 = vmatprep.subr.bf16.mxu0 %v6077_v8  ;;  %1849 = vmatprep.subr.bf16.mxu1 %v6080_v7 }
 0x5e2   :  { %1836 = vmatprep.mubr.bf16.mxu0 %v5646_v0  ;;  %1879 = vmatprep.mubr.bf16.mxu1 %v5646_v0 }
 0x5e4   :  { %1807 = vmatpush1.bf16.msra.mxu0 %v6085_v18  ;;  %1850 = vmatpush1.bf16.msra.mxu1 %v6088_v43 }
 0x5e5   :  { %1808 = vmatprep.subr.bf16.mxu0 %v6091_v14  ;;  %1851 = vmatprep.subr.bf16.mxu1 %v6094_v9 }
 0x5e8   :  { %1809 = vmatpush1.bf16.msra.mxu0 %v6097_v61  ;;  %1852 = vmatpush1.bf16.msra.mxu1 %v6100_v21 }
 0x5e9   :  { %1810 = vmatprep.subr.bf16.mxu0 %v6103_v27  ;;  %1853 = vmatprep.subr.bf16.mxu1 %v6164_v34 }
 0x5ec   :  { %1811 = vmatpush1.bf16.msra.mxu0 %v6167_v5  ;;  %1854 = vmatpush1.bf16.msra.mxu1 %v6170_v36 }
 0x5ed   :  { %1812 = vmatprep.subr.bf16.mxu0 %v6173_v37  ;;  %1855 = vmatprep.subr.bf16.mxu1 %v6176_v38 }
 0x5f0   :  { %1813 = vmatpush1.bf16.msra.mxu0 %v6179_v39  ;;  %1856 = vmatpush1.bf16.msra.mxu1 %v6182_v40 }
 0x5f1   :  { %1814 = vmatprep.subr.bf16.mxu0 %v6185_v41  ;;  %1857 = vmatprep.subr.bf16.mxu1 %v6188_v42 }
 0x5f4   :  { %1815 = vmatpush1.bf16.msra.mxu0 %v6191_v44  ;;  %1858 = vmatpush1.bf16.msra.mxu1 %v6194_v45 }
 0x5f5   :  { %1816 = vmatprep.subr.bf16.mxu0 %v6197_v46  ;;  %1859 = vmatprep.subr.bf16.mxu1 %v6200_v47 }
 0x5f8   :  { %1817 = vmatpush1.bf16.msra.mxu0 %v6203_v20  ;;  %1860 = vmatpush1.bf16.msra.mxu1 %v6206_v33 }
 0x5f9   :  { %1818 = vmatprep.subr.bf16.mxu0 %v6209_v26  ;;  %1861 = vmatprep.subr.bf16.mxu1 %v6212_v24 }
 0x5fc   :  { %1819 = vmatpush1.bf16.msra.mxu0 %v6215_v23  ;;  %1862 = vmatpush1.bf16.msra.mxu1 %v6218_v35 }
 0x5fd   :  { %1958 = vmatprep.subr.bf16.mxu0 %v6125_v48  ;;  %2001 = vmatprep.subr.bf16.mxu1 %v6128_v49 }
 0x6b2   :  { %v1684_v60 = vpop.f32.mrb[20].mxu0  ;;  %v1727_v2 = vpop.f32.mrb[20].mxu1 }
 0x6b3   :  { %v4461_v3 = vadd.f32 %v1684_v60, %v5929_v16  ;;  %v1686_v63 = vpop.f32.mrb[21].mxu0  ;;  %v1729_v11 = vpop.f32.mrb[21].mxu1  ;;  %v4493_v56 = vadd.f32 %v1727_v2, %v5942_v32 }
 0x6b4   :  { %v4462_v51 = vadd.f32 %v1686_v63, %v5933_v17  ;;  %v1688_v50 = vpop.f32.mrb[22].mxu0  ;;  %v1731_v15 = vpop.f32.mrb[22].mxu1  ;;  %v4494_v57 = vadd.f32 %v1729_v11, %v5947_v6 }
 0x6b5   :  { %v4272_v13 = vmul.f32 -1.442695, %v4461_v3  ;;  %v4463_v55 = vadd.f32 %v1688_v50, %v5929_v16  ;;  %v1690_v54 = vpop.f32.mrb[23].mxu0  ;;  %v1733_v59 = vpop.f32.mrb[23].mxu1  ;;  %v4495_v53 = vadd.f32 %v1731_v15, %v5942_v32  ;;  %v4274_v19 = vmul.f32 -1.442695, %v4493_v56 }
 0x6b6   :  { %v4273_v52 = vmul.f32 -1.442695, %v4462_v51  ;;  %v4464_v48 = vadd.f32 %v1690_v54, %v5933_v17  ;;  %v4496_v63 = vadd.f32 %v1733_v59, %v5947_v6 }
 0x6b7   :  { %5081 = vpow2.f32 %v4272_v13  ;;  %v4275_v49 = vmul.f32 -1.442695, %v4463_v55  ;;  %v4277_v60 = vmul.f32 -1.442695, %v4495_v53 }
 0x6b8   :  { %v4276_v1 = vmul.f32 -1.442695, %v4464_v48  ;;  %5083 = vpow2.f32 %v4273_v52 }
 0x6b9   :  { %5085 = vpow2.f32 %v4275_v49 }
 0x6ba   :  { %5087 = vpow2.f32 %v4276_v1 }
 0x6bb   :  { %5089 = vtanh.f32 %v4494_v57 }
 0x6bc   :  { %5091 = vpow2.f32 %v4274_v19 }
 0x6bd   :  { %5093 = vpow2.f32 %v4277_v60 }
 0x6c1   :  { %v5082_v3 = vpop.eup %5081 }
 0x6c2   :  { %v1762_v51 = vadd.f32 1.0, %v5082_v3  ;;  %v5084_v50 = vpop.eup %5083 }
 0x6c3   :  { %v5086_v13 = vpop.eup %5085  ;;  %v1763_v55 = vadd.f32 1.0, %v5084_v50 }
 0x6c4   :  { %5095 = vrcp.f32 %v1762_v51  ;;  %v1765_v2 = vadd.f32 1.0, %v5086_v13  ;;  %v5088_v54 = vpop.eup %5087 }
 0x6c5   :  { %5097 = vtanh.f32 %v4496_v63  ;;  %v1766_v15 = vadd.f32 1.0, %v5088_v54  ;;  %v5090_v11 = vpop.eup %5089 }
 0x6c6   :  { %5099 = vrcp.f32 %v1763_v55  ;;  %v5092_v52 = vpop.eup %5091 }
 0x6c7   :  { %5101 = vrcp.f32 %v1765_v2  ;;  %v5094_v48 = vpop.eup %5093  ;;  %v1764_v57 = vadd.f32 1.0, %v5092_v52 }
 0x6c8   :  { %5103 = vrcp.f32 %v1766_v15  ;;  %v1767_v63 = vadd.f32 1.0, %v5094_v48 }
 0x6c9   :  { %5105 = vrcp.f32 %v1764_v57 }
 0x6ce   :  { %v5096_v49 = vpop.eup %5095 }
 0x6cf   :  { %v5098_v1 = vpop.eup %5097  ;;  %v1784_v59 = vmul.f32 %v5096_v49, %v5090_v11 }
 0x6d0   :  { %v5100_v56 = vpop.eup %5099 }
 0x6d1   :  { %v5102_v53 = vpop.eup %5101  ;;  %v1782_v19 = vmul.f32 %v5100_v56, %v6232_v58 }
 0x6d2   :  { %v1785_v60 = vmul.f32 %v5102_v53, %v5098_v1  ;;  %v5104_v3 = vpop.eup %5103 }
 0x6d3   :  { %v6286_v51 = vadd.f32 %v1784_v59, %v1782_v19  ;;  %v1783_v50 = vmul.f32 %v5104_v3, %v6236_v62  ;;  %v5106_v55 = vpop.eup %5105 }
 0x6d5   :  { %5107 = vtanh.f32 %v6286_v51  ;;  %v6290_v13 = vadd.f32 %v1785_v60, %v1783_v50 }
 0x6d6   :  { %5109 = vrcp.f32 %v1767_v63 }
 0x6d7   :  { %5111 = vtanh.f32 %v6290_v13 }
 0x6df   :  { %v5108_v2 = vpop.eup %5107 }
 0x6e0   :  { %v5110_v54 = vpop.eup %5109  ;;  %v1790_v58 = vmul.f32 %v5108_v2, %v5106_v55 }
 0x6e1   :  { %v5112_v15 = vpop.eup %5111 }
 0x6e2   :  { %v1791_v11 = vmul.f32 %v5112_v15, %v5110_v54 }
 0x6e4   :  { %v6293_v52 = vpack.c.bf16 %v1791_v11, %v1790_v58 }
 0x6e6   :  { %1837 = vmatmul.mubr.bf16.vlgmr.msra.gmra.mrb[24].mxu0 %v6293_v52  ;;  %1880 = vmatmul.mubr.bf16.vlgmr.msra.gmra.mrb[24].mxu1 %v6293_v52 }
 0x6e7   :  { %1959 = vmatpush1.bf16.msra.mxu0 %v6071_v22  ;;  %2002 = vmatpush1.bf16.msra.mxu1 %v6074_v28  ;;  %v4819_v22 = vld [vmem:[#allocation11 + $0x4] ss:$16 sps:$4 sm:$0xff]   ;;  %v4822_v28 = vld [vmem:[#allocation11 + $0xc] ss:$16 sps:$4 sm:$0xff]  }
 0x6e8   :  { %1960 = vmatprep.subr.bf16.mxu0 %v6077_v8  ;;  %2003 = vmatprep.subr.bf16.mxu1 %v6080_v7 }
 0x6e9   :  { %1990 = vmatprep.mubr.bf16.mxu0 %v5646_v0  ;;  %2033 = vmatprep.mubr.bf16.mxu1 %v5646_v0 }
 0x6eb   :  { %1961 = vmatpush1.bf16.msra.mxu0 %v6085_v18  ;;  %2004 = vmatpush1.bf16.msra.mxu1 %v6088_v43 }
 0x6ec   :  { %1962 = vmatprep.subr.bf16.mxu0 %v6091_v14  ;;  %2005 = vmatprep.subr.bf16.mxu1 %v6094_v9 }
 0x6ef   :  { %1963 = vmatpush1.bf16.msra.mxu0 %v6097_v61  ;;  %2006 = vmatpush1.bf16.msra.mxu1 %v6100_v21 }
 0x6f0   :  { %1964 = vmatprep.subr.bf16.mxu0 %v6103_v27  ;;  %2007 = vmatprep.subr.bf16.mxu1 %v6164_v34 }
 0x6f3   :  { %1965 = vmatpush1.bf16.msra.mxu0 %v6167_v5  ;;  %2008 = vmatpush1.bf16.msra.mxu1 %v6170_v36 }
 0x6f4   :  { %1966 = vmatprep.subr.bf16.mxu0 %v6173_v37  ;;  %2009 = vmatprep.subr.bf16.mxu1 %v6176_v38 }
 0x6f7   :  { %1967 = vmatpush1.bf16.msra.mxu0 %v6179_v39  ;;  %2010 = vmatpush1.bf16.msra.mxu1 %v6182_v40 }
 0x6f8   :  { %1968 = vmatprep.subr.bf16.mxu0 %v6185_v41  ;;  %2011 = vmatprep.subr.bf16.mxu1 %v6188_v42 }
 0x6fb   :  { %1969 = vmatpush1.bf16.msra.mxu0 %v6191_v44  ;;  %2012 = vmatpush1.bf16.msra.mxu1 %v6194_v45 }
 0x6fc   :  { %1970 = vmatprep.subr.bf16.mxu0 %v6197_v46  ;;  %2013 = vmatprep.subr.bf16.mxu1 %v6200_v47 }
 0x6ff   :  { %1971 = vmatpush1.bf16.msra.mxu0 %v6203_v20  ;;  %2014 = vmatpush1.bf16.msra.mxu1 %v6206_v33 }
 0x700   :  { %1972 = vmatprep.subr.bf16.mxu0 %v6209_v26  ;;  %2015 = vmatprep.subr.bf16.mxu1 %v6212_v24 }
 0x703   :  { %1973 = vmatpush1.bf16.msra.mxu0 %v6215_v23  ;;  %2016 = vmatpush1.bf16.msra.mxu1 %v6218_v35 }
 0x704   :  { %2330 = vmatprep.subr.bf16.mxu0 %v4819_v22  ;;  %2443 = vmatprep.subr.bf16.mxu1 %v4822_v28 }
 0x7b9   :  { %v1838_v8 = vpop.f32.mrb[24].mxu0  ;;  %v1881_v7 = vpop.f32.mrb[24].mxu1 }
 0x7ba   :  { %v4465_v18 = vadd.f32 %v1838_v8, %v5929_v16  ;;  %v1840_v43 = vpop.f32.mrb[25].mxu0  ;;  %v1883_v14 = vpop.f32.mrb[25].mxu1  ;;  %v4497_v41 = vadd.f32 %v1881_v7, %v5942_v32 }
 0x7bb   :  { %v4466_v9 = vadd.f32 %v1840_v43, %v5933_v17  ;;  %v1842_v61 = vpop.f32.mrb[26].mxu0  ;;  %v1885_v21 = vpop.f32.mrb[26].mxu1  ;;  %v4498_v44 = vadd.f32 %v1883_v14, %v5947_v6  ;;  %v4820_v43 = vld [vmem:[#allocation11 + $0x8] ss:$16 sps:$4 sm:$0xff]  }
 0x7bc   :  { %v4278_v27 = vmul.f32 -1.442695, %v4465_v18  ;;  %v4467_v34 = vadd.f32 %v1842_v61, %v5929_v16  ;;  %v1844_v5 = vpop.f32.mrb[27].mxu0  ;;  %v1887_v36 = vpop.f32.mrb[27].mxu1  ;;  %v4499_v42 = vadd.f32 %v1885_v21, %v5942_v32  ;;  %v4280_v45 = vmul.f32 -1.442695, %v4497_v41 }
 0x7bd   :  { %v4279_v37 = vmul.f32 -1.442695, %v4466_v9  ;;  %v4468_v38 = vadd.f32 %v1844_v5, %v5933_v17  ;;  %v4500_v20 = vadd.f32 %v1887_v36, %v5947_v6  ;;  %v4817_v18 = vld [vmem:[#allocation11] ss:$16 sps:$4 sm:$0xff]   ;;  %v4825_v9 = vld [vmem:[#allocation11 + $0x24] ss:$16 sps:$4 sm:$0xff]  }
 0x7be   :  { %5113 = vpow2.f32 %v4278_v27  ;;  %v4281_v39 = vmul.f32 -1.442695, %v4467_v34  ;;  %v4283_v46 = vmul.f32 -1.442695, %v4499_v42  ;;  %v4823_v61 = vld [vmem:[#allocation11 + $0x20] ss:$16 sps:$4 sm:$0xff]  }
 0x7bf   :  { %v4282_v40 = vmul.f32 -1.442695, %v4468_v38  ;;  %5115 = vpow2.f32 %v4279_v37  ;;  %v4826_v21 = vld [vmem:[#allocation11 + $0x28] ss:$16 sps:$4 sm:$0xff]   ;;  %v4831_v27 = vld [vmem:[#allocation11 + $0x44] ss:$16 sps:$4 sm:$0xff]  }
 0x7c0   :  { %5117 = vpow2.f32 %v4281_v39  ;;  %v4834_v34 = vld [vmem:[#allocation11 + $0x4c] ss:$16 sps:$4 sm:$0xff]   ;;  %v4829_v5 = vld [vmem:[#allocation11 + $0x40] ss:$16 sps:$4 sm:$0xff]   ;;  %v4832_v36 = vld [vmem:[#allocation11 + $0x48] ss:$16 sps:$4 sm:$0xff]  }
 0x7c1   :  { %5119 = vpow2.f32 %v4282_v40  ;;  %v4837_v37 = vld [vmem:[#allocation11 + $0x64] ss:$16 sps:$4 sm:$0xff]   ;;  %v4840_v38 = vld [vmem:[#allocation11 + $0x6c] ss:$16 sps:$4 sm:$0xff]   ;;  %v4835_v39 = vld [vmem:[#allocation11 + $0x60] ss:$16 sps:$4 sm:$0xff]  }
 0x7c2   :  { %5121 = vtanh.f32 %v4498_v44  ;;  %v4838_v40 = vld [vmem:[#allocation11 + $0x68] ss:$16 sps:$4 sm:$0xff]   ;;  %v4843_v41 = vld [vmem:[#allocation11 + $0x84] ss:$16 sps:$4 sm:$0xff]   ;;  %v4846_v42 = vld [vmem:[#allocation11 + $0x8c] ss:$16 sps:$4 sm:$0xff]  }
 0x7c3   :  { %5123 = vpow2.f32 %v4280_v45  ;;  %v4841_v44 = vld [vmem:[#allocation11 + $0x80] ss:$16 sps:$4 sm:$0xff]   ;;  %v4844_v45 = vld [vmem:[#allocation11 + $0x88] ss:$16 sps:$4 sm:$0xff]  }
 0x7c4   :  { %5125 = vpow2.f32 %v4283_v46  ;;  %v4849_v46 = vld [vmem:[#allocation11 + $0xa4] ss:$16 sps:$4 sm:$0xff]  }
 0x7c8   :  { %v5114_v47 = vpop.eup %5113 }
 0x7c9   :  { %v1916_v33 = vadd.f32 1.0, %v5114_v47  ;;  %v5116_v26 = vpop.eup %5115  ;;  %v4852_v47 = vld [vmem:[#allocation11 + $0xac] ss:$16 sps:$4 sm:$0xff]  }
 0x7ca   :  { %v5118_v24 = vpop.eup %5117  ;;  %v1917_v23 = vadd.f32 1.0, %v5116_v26  ;;  %v4855_v26 = vld [vmem:[#allocation11 + $0xc4] ss:$16 sps:$4 sm:$0xff]  }
 0x7cb   :  { %5127 = vrcp.f32 %v1916_v33  ;;  %v1919_v35 = vadd.f32 1.0, %v5118_v24  ;;  %v5120_v62 = vpop.eup %5119  ;;  %v4850_v33 = vld [vmem:[#allocation11 + $0xa8] ss:$16 sps:$4 sm:$0xff]   ;;  %v4858_v24 = vld [vmem:[#allocation11 + $0xcc] ss:$16 sps:$4 sm:$0xff]  }
 0x7cc   :  { %5129 = vtanh.f32 %v4500_v20  ;;  %v1920_v48 = vadd.f32 1.0, %v5120_v62  ;;  %v5122_v49 = vpop.eup %5121  ;;  %v4847_v20 = vld [vmem:[#allocation11 + $0xa0] ss:$16 sps:$4 sm:$0xff]   ;;  %v4861_v62 = vld [vmem:[#allocation11 + $0xe4] ss:$16 sps:$4 sm:$0xff]  }
 0x7cd   :  { %5131 = vrcp.f32 %v1917_v23  ;;  %v5124_v1 = vpop.eup %5123  ;;  %v4853_v23 = vld [vmem:[#allocation11 + $0xc0] ss:$16 sps:$4 sm:$0xff]  }
 0x7ce   :  { %5133 = vrcp.f32 %v1919_v35  ;;  %v5126_v59 = vpop.eup %5125  ;;  %v1918_v3 = vadd.f32 1.0, %v5124_v1  ;;  %v4856_v35 = vld [vmem:[#allocation11 + $0xc8] ss:$16 sps:$4 sm:$0xff]  }
 0x7cf   :  { %5135 = vrcp.f32 %v1920_v48  ;;  %v1921_v54 = vadd.f32 1.0, %v5126_v59  ;;  %v4864_v48 = vld [vmem:[#allocation11 + $0xec] ss:$16 sps:$4 sm:$0xff]   ;;  %v4862_v1 = vld [vmem:[#allocation11 + $0xe8] ss:$16 sps:$4 sm:$0xff]  }
 0x7d0   :  { %5137 = vrcp.f32 %v1918_v3  ;;  %v6351_v59 = vld [vmem:[#allocation12 + $0x104] ss:$16 sps:$4 sm:$0xff]   ;;  %v6412_v3 = vld [vmem:[#allocation12 + $0x148] ss:$16 sps:$4 sm:$0xff]  }
 0x7d5   :  { %v5128_v56 = vpop.eup %5127 }
 0x7d6   :  { %v5130_v53 = vpop.eup %5129  ;;  %v1938_v57 = vmul.f32 %v5128_v56, %v5122_v49  ;;  %v4859_v49 = vld [vmem:[#allocation11 + $0xe0] ss:$16 sps:$4 sm:$0xff]  }
 0x7d7   :  { %v5132_v19 = vpop.eup %5131  ;;  %v6354_v56 = vld [vmem:[#allocation12 + $0x100] ss:$16 sps:$4 sm:$0xff]  }
 0x7d8   :  { %v5134_v60 = vpop.eup %5133  ;;  %v1936_v63 = vmul.f32 %v5132_v19, %v6286_v51  ;;  %v6407_v19 = vld [vmem:[#allocation12 + $0x164] ss:$16 sps:$4 sm:$0xff]  }
 0x7d9   :  { %v1939_v50 = vmul.f32 %v5134_v60, %v5130_v53  ;;  %v5136_v55 = vpop.eup %5135  ;;  %v6403_v53 = vld [vmem:[#allocation12 + $0x144] ss:$16 sps:$4 sm:$0xff]   ;;  %v6409_v60 = vld [vmem:[#allocation12 + $0x14c] ss:$16 sps:$4 sm:$0xff]  }
 0x7da   :  { %v6338_v2 = vadd.f32 %v1938_v57, %v1936_v63  ;;  %v1937_v15 = vmul.f32 %v5136_v55, %v6290_v13  ;;  %v5138_v11 = vpop.eup %5137  ;;  %v4828_v13 = vld [vmem:[#allocation11 + $0x2c] ss:$16 sps:$4 sm:$0xff]   ;;  %v6405_v57 = vld [vmem:[#allocation12 + $0x140] ss:$16 sps:$4 sm:$0xff]   ;;  %v6421_v55 = vld [vmem:[#allocation12 + $0x184] ss:$16 sps:$4 sm:$0xff]  }
 0x7db   :  { %v6414_v63 = vld [vmem:[#allocation12 + $0x16c] ss:$16 sps:$4 sm:$0xff]  }
 0x7dc   :  { %5139 = vtanh.f32 %v6338_v2  ;;  %v6342_v58 = vadd.f32 %v1939_v50, %v1937_v15  ;;  %v6417_v50 = vld [vmem:[#allocation12 + $0x160] ss:$16 sps:$4 sm:$0xff]   ;;  %v6427_v15 = vld [vmem:[#allocation12 + $0x18c] ss:$16 sps:$4 sm:$0xff]  }
 0x7dd   :  { %5141 = vrcp.f32 %v1921_v54  ;;  %v6424_v54 = vld [vmem:[#allocation12 + $0x168] ss:$16 sps:$4 sm:$0xff]  }
 0x7de   :  { %5143 = vtanh.f32 %v6342_v58 }
 0x7e6   :  { %v5140_v22 = vpop.eup %5139 }
 0x7e7   :  { %v5142_v28 = vpop.eup %5141  ;;  %v1944_v51 = vmul.f32 %v5140_v22, %v5138_v11  ;;  %v6430_v11 = vld [vmem:[#allocation12 + $0x180] ss:$16 sps:$4 sm:$0xff]   ;;  %v6433_v22 = vld [vmem:[#allocation12 + $0x1a4] ss:$16 sps:$4 sm:$0xff]  }
 0x7e8   :  { %v5144_v8 = vpop.eup %5143 }
 0x7e9   :  { %v1945_v7 = vmul.f32 %v5144_v8, %v5142_v28  ;;  %v6436_v28 = vld [vmem:[#allocation12 + $0x188] ss:$16 sps:$4 sm:$0xff]   ;;  %v6439_v8 = vld [vmem:[#allocation12 + $0x1ac] ss:$16 sps:$4 sm:$0xff]  }
 0x7eb   :  { %v6345_v14 = vpack.c.bf16 %v1945_v7, %v1944_v51  ;;  %v6442_v51 = vld [vmem:[#allocation12 + $0x1a0] ss:$16 sps:$4 sm:$0xff]   ;;  %v6445_v7 = vld [vmem:[#allocation12 + $0x1c4] ss:$16 sps:$4 sm:$0xff]  }
 0x7ed   :  { %1991 = vmatmul.mubr.bf16.vlgmr.msra.gmra.mrb[28].mxu0 %v6345_v14  ;;  %2034 = vmatmul.mubr.bf16.vlgmr.msra.gmra.mrb[28].mxu1 %v6345_v14 }
 0x7ee   :  { %2331 = vmatpush1.bf16.msra.mxu0 %v4817_v18  ;;  %2444 = vmatpush1.bf16.msra.mxu1 %v4820_v43  ;;  %v6448_v18 = vld [vmem:[#allocation12 + $0x1a8] ss:$16 sps:$4 sm:$0xff]   ;;  %v6452_v43 = vld [vmem:[#allocation12 + $0x1c0] ss:$16 sps:$4 sm:$0xff]  }
 0x7ef   :  { %2332 = vmatprep.subr.bf16.mxu0 %v4825_v9  ;;  %2445 = vmatprep.subr.bf16.mxu1 %v4828_v13  ;;  %v6458_v9 = vld [vmem:[#allocation12 + $0x1e4] ss:$16 sps:$4 sm:$0xff]   ;;  %v6460_v13 = vld [vmem:[#allocation12 + $0x1c8] ss:$16 sps:$4 sm:$0xff]  }
 0x7f0   :  { %2362 = vmatprep.mubr.bf16.mxu0 %v5646_v0  ;;  %2475 = vmatprep.mubr.bf16.mxu1 %v5646_v0 }
 0x7f2   :  { %2333 = vmatpush1.bf16.msra.mxu0 %v4823_v61  ;;  %2446 = vmatpush1.bf16.msra.mxu1 %v4826_v21  ;;  %v6463_v61 = vld [vmem:[#allocation12 + $0x1ec] ss:$16 sps:$4 sm:$0xff]   ;;  %v6466_v21 = vld [vmem:[#allocation12 + $0x1e0] ss:$16 sps:$4 sm:$0xff]  }
 0x7f3   :  { %2334 = vmatprep.subr.bf16.mxu0 %v4831_v27  ;;  %2447 = vmatprep.subr.bf16.mxu1 %v4834_v34  ;;  %v6470_v27 = vld [vmem:[#allocation12 + $0x1e8] ss:$16 sps:$4 sm:$0xff]  }
 0x7f6   :  { %2335 = vmatpush1.bf16.msra.mxu0 %v4829_v5  ;;  %2448 = vmatpush1.bf16.msra.mxu1 %v4832_v36 }
 0x7f7   :  { %2336 = vmatprep.subr.bf16.mxu0 %v4837_v37  ;;  %2449 = vmatprep.subr.bf16.mxu1 %v4840_v38 }
 0x7fa   :  { %2337 = vmatpush1.bf16.msra.mxu0 %v4835_v39  ;;  %2450 = vmatpush1.bf16.msra.mxu1 %v4838_v40 }
 0x7fb   :  { %2338 = vmatprep.subr.bf16.mxu0 %v4843_v41  ;;  %2451 = vmatprep.subr.bf16.mxu1 %v4846_v42 }
 0x7fe   :  { %2339 = vmatpush1.bf16.msra.mxu0 %v4841_v44  ;;  %2452 = vmatpush1.bf16.msra.mxu1 %v4844_v45 }
 0x7ff   :  { %2340 = vmatprep.subr.bf16.mxu0 %v4849_v46  ;;  %2453 = vmatprep.subr.bf16.mxu1 %v4852_v47 }
 0x802   :  { %2341 = vmatpush1.bf16.msra.mxu0 %v4847_v20  ;;  %2454 = vmatpush1.bf16.msra.mxu1 %v4850_v33 }
 0x803   :  { %2342 = vmatprep.subr.bf16.mxu0 %v4855_v26  ;;  %2455 = vmatprep.subr.bf16.mxu1 %v4858_v24 }
 0x806   :  { %2343 = vmatpush1.bf16.msra.mxu0 %v4853_v23  ;;  %2456 = vmatpush1.bf16.msra.mxu1 %v4856_v35 }
 0x807   :  { %2344 = vmatprep.subr.bf16.mxu0 %v4861_v62  ;;  %2457 = vmatprep.subr.bf16.mxu1 %v4864_v48 }
 0x80a   :  { %2345 = vmatpush1.bf16.msra.mxu0 %v4859_v49  ;;  %2458 = vmatpush1.bf16.msra.mxu1 %v4862_v1 }
 0x80b   :  { %2828 = vmatprep.subr.bf16.mxu0 %v6351_v59 }
 0x80d   :  { %2363 = vmatmul.mubr.bf16.vlgmr.msra.gmra.mrb[32].mxu0 %v5959_v30  ;;  %2476 = vmatmul.mubr.bf16.vlgmr.msra.gmra.mrb[32].mxu1 %v5959_v30  ;;  %v6385_v30 = vld [vmem:[#allocation12 + $0x10c] ss:$16 sps:$4 sm:$0xff]  }
 0x80e   :  { %2372 = vmatprep.mubr.bf16.mxu0 %v5646_v0  ;;  %2485 = vmatprep.mubr.bf16.mxu1 %v5646_v0 }
 0x80f   :  { %2829 = vmatpush1.bf16.msra.mxu0 %v6354_v56  ;;  %2871 = vmatprep.subr.bf16.mxu1 %v6385_v30 }
 0x815   :  { %2373 = vmatmul.mubr.bf16.gmra.mrb[36].mxu0 %v6013_v29  ;;  %2486 = vmatmul.mubr.bf16.gmra.mrb[36].mxu1 %v6013_v29  ;;  %v6387_v29 = vld [vmem:[#allocation12 + $0x108] ss:$16 sps:$4 sm:$0xff]  }
 0x816   :  { %2382 = vmatprep.mubr.bf16.mxu0 %v5646_v0  ;;  %2495 = vmatprep.mubr.bf16.mxu1 %v5646_v0 }
 0x817   :  { %2872 = vmatpush1.bf16.msra.mxu1 %v6387_v29 }
 0x81d   :  { %2383 = vmatmul.mubr.bf16.gmra.mrb[40].mxu0 %v6067_v31  ;;  %2496 = vmatmul.mubr.bf16.gmra.mrb[40].mxu1 %v6067_v31  ;;  %v6391_v31 = vld [vmem:[#allocation12 + $0x124] ss:$16 sps:$4 sm:$0xff]  }
 0x81e   :  { %2392 = vmatprep.mubr.bf16.mxu0 %v5646_v0  ;;  %2505 = vmatprep.mubr.bf16.mxu1 %v5646_v0 }
 0x81f   :  { %2830 = vmatprep.subr.bf16.mxu0 %v6391_v31 }
 0x825   :  { %2393 = vmatmul.mubr.bf16.gmra.mrb[44].mxu0 %v6147_v4  ;;  %2506 = vmatmul.mubr.bf16.gmra.mrb[44].mxu1 %v6147_v4  ;;  %v6393_v4 = vld [vmem:[#allocation12 + $0x12c] ss:$16 sps:$4 sm:$0xff]  }
 0x826   :  { %2402 = vmatprep.mubr.bf16.mxu0 %v5646_v0  ;;  %2515 = vmatprep.mubr.bf16.mxu1 %v5646_v0 }
 0x827   :  { %2873 = vmatprep.subr.bf16.mxu1 %v6393_v4 }
 0x82d   :  { %2403 = vmatmul.mubr.bf16.gmra.mrb[48].mxu0 %v6239_v25  ;;  %2516 = vmatmul.mubr.bf16.gmra.mrb[48].mxu1 %v6239_v25  ;;  %v6395_v25 = vld [vmem:[#allocation12 + $0x120] ss:$16 sps:$4 sm:$0xff]  }
 0x82e   :  { %2412 = vmatprep.mubr.bf16.mxu0 %v5646_v0  ;;  %2525 = vmatprep.mubr.bf16.mxu1 %v5646_v0 }
 0x82f   :  { %2831 = vmatpush1.bf16.msra.mxu0 %v6395_v25 }
 0x830   :  { %2832 = vmatprep.subr.bf16.mxu0 %v6403_v53 }
 0x833   :  { %2833 = vmatpush1.bf16.msra.mxu0 %v6405_v57 }
 0x834   :  { %2834 = vmatprep.subr.bf16.mxu0 %v6407_v19 }
 0x835   :  { %2413 = vmatmul.mubr.bf16.gmra.mrb[52].mxu0 %v6293_v52  ;;  %2526 = vmatmul.mubr.bf16.gmra.mrb[52].mxu1 %v6293_v52  ;;  %v6397_v52 = vld [vmem:[#allocation12 + $0x128] ss:$16 sps:$4 sm:$0xff]  }
 0x836   :  { %2422 = vmatprep.mubr.bf16.mxu0 %v5646_v0  ;;  %2535 = vmatprep.mubr.bf16.mxu1 %v5646_v0 }
 0x837   :  { %2874 = vmatpush1.bf16.msra.mxu1 %v6397_v52  ;;  %2835 = vmatpush1.bf16.msra.mxu0 %v6417_v50 }
 0x838   :  { %2875 = vmatprep.subr.bf16.mxu1 %v6409_v60  ;;  %2836 = vmatprep.subr.bf16.mxu0 %v6421_v55 }
 0x83b   :  { %2876 = vmatpush1.bf16.msra.mxu1 %v6412_v3  ;;  %2837 = vmatpush1.bf16.msra.mxu0 %v6430_v11 }
 0x83c   :  { %2877 = vmatprep.subr.bf16.mxu1 %v6414_v63  ;;  %2838 = vmatprep.subr.bf16.mxu0 %v6433_v22 }
 0x83d   :  { %2423 = vmatmul.mubr.bf16.gmra.mrb[56].mxu0 %v6345_v14  ;;  %2536 = vmatmul.mubr.bf16.gmra.mrb[56].mxu1 %v6345_v14  ;;  %v6454_v14 = vld [vmem:[#allocation12 + $0x1cc] ss:$16 sps:$4 sm:$0xff]  }
 0x83e   :  { %2432 = vmatprep.mubr.bf16.mxu0 %v5646_v0  ;;  %2545 = vmatprep.mubr.bf16.mxu1 %v5646_v0 }
 0x83f   :  { %2878 = vmatpush1.bf16.msra.mxu1 %v6424_v54  ;;  %2839 = vmatpush1.bf16.msra.mxu0 %v6442_v51 }
 0x840   :  { %2879 = vmatprep.subr.bf16.mxu1 %v6427_v15  ;;  %2840 = vmatprep.subr.bf16.mxu0 %v6445_v7 }
 0x843   :  { %2880 = vmatpush1.bf16.msra.mxu1 %v6436_v28  ;;  %2841 = vmatpush1.bf16.msra.mxu0 %v6452_v43 }
 0x844   :  { %2881 = vmatprep.subr.bf16.mxu1 %v6439_v8  ;;  %2842 = vmatprep.subr.bf16.mxu0 %v6458_v9 }
 0x847   :  { %2882 = vmatpush1.bf16.msra.mxu1 %v6448_v18  ;;  %2843 = vmatpush1.bf16.msra.mxu0 %v6466_v21 }
 0x848   :  { %2883 = vmatprep.subr.bf16.mxu1 %v6454_v14  ;;  %2979 = vmatprep.subr.bf16.mxu0 %v6351_v59 }
 0x84b   :  { %2884 = vmatpush1.bf16.msra.mxu1 %v6460_v13 }
 0x84c   :  { %2885 = vmatprep.subr.bf16.mxu1 %v6463_v61 }
 0x84f   :  { %2886 = vmatpush1.bf16.msra.mxu1 %v6470_v27 }
 0x850   :  { %3022 = vmatprep.subr.bf16.mxu1 %v6385_v30 }
 0x8c0   :  { %v1992_v34 = vpop.f32.mrb[28].mxu0  ;;  %v2035_v5 = vpop.f32.mrb[28].mxu1 }
 0x8c1   :  { %v4469_v36 = vadd.f32 %v1992_v34, %v5929_v16  ;;  %v1994_v37 = vpop.f32.mrb[29].mxu0  ;;  %v2037_v38 = vpop.f32.mrb[29].mxu1  ;;  %v4501_v24 = vadd.f32 %v2035_v5, %v5942_v32 }
 0x8c2   :  { %v4470_v39 = vadd.f32 %v1994_v37, %v5933_v17  ;;  %v1996_v40 = vpop.f32.mrb[30].mxu0  ;;  %v2039_v41 = vpop.f32.mrb[30].mxu1  ;;  %v4502_v35 = vadd.f32 %v2037_v38, %v5947_v6 }
 0x8c3   :  { %v4284_v42 = vmul.f32 -1.442695, %v4469_v36  ;;  %v4471_v44 = vadd.f32 %v1996_v40, %v5929_v16  ;;  %v1998_v45 = vpop.f32.mrb[31].mxu0  ;;  %v2041_v46 = vpop.f32.mrb[31].mxu1  ;;  %v4503_v23 = vadd.f32 %v2039_v41, %v5942_v32  ;;  %v4286_v62 = vmul.f32 -1.442695, %v4501_v24 }
 0x8c4   :  { %v4285_v47 = vmul.f32 -1.442695, %v4470_v39  ;;  %v4472_v20 = vadd.f32 %v1998_v45, %v5933_v17  ;;  %v4504_v49 = vadd.f32 %v2041_v46, %v5947_v6 }
 0x8c5   :  { %5145 = vpow2.f32 %v4284_v42  ;;  %v4287_v33 = vmul.f32 -1.442695, %v4471_v44  ;;  %v4289_v48 = vmul.f32 -1.442695, %v4503_v23 }
 0x8c6   :  { %v4288_v26 = vmul.f32 -1.442695, %v4472_v20  ;;  %5147 = vpow2.f32 %v4285_v47 }
 0x8c7   :  { %5149 = vpow2.f32 %v4287_v33 }
 0x8c8   :  { %5151 = vpow2.f32 %v4288_v26 }
 0x8c9   :  { %5153 = vtanh.f32 %v4502_v35 }
 0x8ca   :  { %5155 = vpow2.f32 %v4286_v62 }
 0x8cb   :  { %5157 = vpow2.f32 %v4289_v48 }
 0x8cf   :  { %v5146_v16 = vpop.eup %5145 }
 0x8d0   :  { %v2070_v1 = vadd.f32 1.0, %v5146_v16  ;;  %v5148_v17 = vpop.eup %5147 }
 0x8d1   :  { %v5150_v34 = vpop.eup %5149  ;;  %v2071_v36 = vadd.f32 1.0, %v5148_v17 }
 0x8d2   :  { %5159 = vrcp.f32 %v2070_v1  ;;  %v2073_v5 = vadd.f32 1.0, %v5150_v34  ;;  %v5152_v37 = vpop.eup %5151 }
 0x8d3   :  { %5161 = vtanh.f32 %v4504_v49  ;;  %v2074_v32 = vadd.f32 1.0, %v5152_v37  ;;  %v5154_v38 = vpop.eup %5153 }
 0x8d4   :  { %5163 = vrcp.f32 %v2071_v36  ;;  %v5156_v39 = vpop.eup %5155  ;;  %v6958_v36 = vsub.s32 1, %v5920_v12 }
 0x8d5   :  { %5165 = vrcp.f32 %v2073_v5  ;;  %v5158_v40 = vpop.eup %5157  ;;  %v2072_v45 = vadd.f32 1.0, %v5156_v39 }
 0x8d6   :  { %5167 = vrcp.f32 %v2074_v32  ;;  %v2075_v24 = vadd.f32 1.0, %v5158_v40 }
 0x8d7   :  { %5169 = vrcp.f32 %v2072_v45 }
 0x8dc   :  { %v5160_v41 = vpop.eup %5159 }
 0x8dd   :  { %v5162_v42 = vpop.eup %5161  ;;  %v2092_v6 = vmul.f32 %v5160_v41, %v5154_v38 }
 0x8de   :  { %v5164_v44 = vpop.eup %5163 }
 0x8df   :  { %v5166_v46 = vpop.eup %5165  ;;  %v2090_v47 = vmul.f32 %v5164_v44, %v6338_v2  ;;  %v6957_v2 = vsub.s32 0, %v5920_v12 }
 0x8e0   :  { %v2093_v20 = vmul.f32 %v5166_v46, %v5162_v42  ;;  %v5168_v33 = vpop.eup %5167 }
 0x8e1   :  { %v2094_v26 = vadd.f32 %v2092_v6, %v2090_v47  ;;  %v2091_v23 = vmul.f32 %v5168_v33, %v6342_v58  ;;  %v5170_v62 = vpop.eup %5169 }
 0x8e3   :  { %5171 = vtanh.f32 %v2094_v26  ;;  %v2095_v35 = vadd.f32 %v2093_v20, %v2091_v23  ;;  %v6959_v20 = vsub.s32 2, %v5920_v12 }
 0x8e4   :  { %5173 = vrcp.f32 %v2075_v24 }
 0x8e5   :  { %5175 = vtanh.f32 %v2095_v35 }
 0x8ed   :  { %v5172_v48 = vpop.eup %5171 }
 0x8ee   :  { %v2098_v16 = vmul.f32 %v5172_v48, %v5170_v62  ;;  %v5174_v49 = vpop.eup %5173  ;;  %v6960_v62 = vsub.s32 3, %v5920_v12 }
 0x8ef   :  { %v5176_v1 = vpop.eup %5175 }
 0x8f0   :  { %v2099_v17 = vmul.f32 %v5176_v1, %v5174_v49 }
 0x8f2   :  { %v2100_v34 = vpack.c.bf16 %v2099_v17, %v2098_v16 }
 0x8f4   :  { %2433 = vmatmul.mubr.bf16.gmra.mrb[60].mxu0 %v2100_v34  ;;  %2546 = vmatmul.mubr.bf16.gmra.mrb[60].mxu1 %v2100_v34 }
 0x8f5   :  { %2860 = vmatprep.mubr.bf16.mxu0 %v5646_v0  ;;  %2903 = vmatprep.mubr.bf16.mxu1 %v5646_v0 }
 0x8fc   :  { %2861 = vmatmul.mubr.bf16.vlgmr.msra.gmra.mrb[32].mxu0 %v5647_v10  ;;  %2904 = vmatmul.mubr.bf16.vlgmr.msra.gmra.mrb[32].mxu1 %v5647_v10  ;;  %v4290_v10 = vld [vmem:[%s6949_s4 + $0x4] sm:$0xf] }
 0x8fd   :  { %2980 = vmatpush1.bf16.msra.mxu0 %v6354_v56  ;;  %3023 = vmatpush1.bf16.msra.mxu1 %v6387_v29  ;;  %v6530_v58 = vrot.slane %v4290_v10, %v6957_v2  ;;  %v6534_v5 = vrot.slane %v4290_v10, %v6958_v36  ;;  %v6541_v33 = vrot.slane %v4290_v10, %v6959_v20 }
 0x8fe   :  { %2981 = vmatprep.subr.bf16.mxu0 %v6391_v31  ;;  %3024 = vmatprep.subr.bf16.mxu1 %v6393_v4  ;;  %v6546_v48 = vrot.slane %v4290_v10, %v6960_v62 }
 0x8ff   :  { %3011 = vmatprep.mubr.bf16.mxu0 %v5646_v0  ;;  %3054 = vmatprep.mubr.bf16.mxu1 %v5646_v0 }
 0x901   :  { %2982 = vmatpush1.bf16.msra.mxu0 %v6395_v25  ;;  %3025 = vmatpush1.bf16.msra.mxu1 %v6397_v52 }
 0x902   :  { %2983 = vmatprep.subr.bf16.mxu0 %v6403_v53  ;;  %3026 = vmatprep.subr.bf16.mxu1 %v6409_v60 }
 0x905   :  { %2984 = vmatpush1.bf16.msra.mxu0 %v6405_v57  ;;  %3027 = vmatpush1.bf16.msra.mxu1 %v6412_v3 }
 0x906   :  { %2985 = vmatprep.subr.bf16.mxu0 %v6407_v19  ;;  %3028 = vmatprep.subr.bf16.mxu1 %v6414_v63 }
 0x909   :  { %2986 = vmatpush1.bf16.msra.mxu0 %v6417_v50  ;;  %3029 = vmatpush1.bf16.msra.mxu1 %v6424_v54 }
 0x90a   :  { %2987 = vmatprep.subr.bf16.mxu0 %v6421_v55  ;;  %3030 = vmatprep.subr.bf16.mxu1 %v6427_v15 }
 0x90d   :  { %2988 = vmatpush1.bf16.msra.mxu0 %v6430_v11  ;;  %3031 = vmatpush1.bf16.msra.mxu1 %v6436_v28 }
 0x90e   :  { %2989 = vmatprep.subr.bf16.mxu0 %v6433_v22  ;;  %3032 = vmatprep.subr.bf16.mxu1 %v6439_v8 }
 0x911   :  { %2990 = vmatpush1.bf16.msra.mxu0 %v6442_v51  ;;  %3033 = vmatpush1.bf16.msra.mxu1 %v6448_v18 }
 0x912   :  { %2991 = vmatprep.subr.bf16.mxu0 %v6445_v7  ;;  %3034 = vmatprep.subr.bf16.mxu1 %v6454_v14 }
 0x915   :  { %2992 = vmatpush1.bf16.msra.mxu0 %v6452_v43  ;;  %3035 = vmatpush1.bf16.msra.mxu1 %v6460_v13 }
 0x916   :  { %2993 = vmatprep.subr.bf16.mxu0 %v6458_v9  ;;  %3036 = vmatprep.subr.bf16.mxu1 %v6463_v61 }
 0x919   :  { %2994 = vmatpush1.bf16.msra.mxu0 %v6466_v21  ;;  %3037 = vmatpush1.bf16.msra.mxu1 %v6470_v27 }
 0x91a   :  { %3130 = vmatprep.subr.bf16.mxu0 %v6351_v59  ;;  %3173 = vmatprep.subr.bf16.mxu1 %v6385_v30 }
 0x9cf   :  { %v2862_v37 = vpop.f32.mrb[32].mxu0  ;;  %v2905_v32 = vpop.f32.mrb[32].mxu1 }
 0x9d0   :  { %v4505_v38 = vadd.f32 %v2862_v37, %v6530_v58  ;;  %v2864_v39 = vpop.f32.mrb[33].mxu0  ;;  %v2907_v40 = vpop.f32.mrb[33].mxu1  ;;  %v4537_v16 = vadd.f32 %v2905_v32, %v6541_v33 }
 0x9d1   :  { %v4506_v41 = vadd.f32 %v2864_v39, %v6534_v5  ;;  %v2866_v42 = vpop.f32.mrb[34].mxu0  ;;  %v2909_v6 = vpop.f32.mrb[34].mxu1  ;;  %v4538_v1 = vadd.f32 %v2907_v40, %v6546_v48 }
 0x9d2   :  { %v4355_v44 = vmul.f32 -1.442695, %v4505_v38  ;;  %v4507_v45 = vadd.f32 %v2866_v42, %v6530_v58  ;;  %v2868_v46 = vpop.f32.mrb[35].mxu0  ;;  %v2911_v47 = vpop.f32.mrb[35].mxu1  ;;  %v4539_v49 = vadd.f32 %v2909_v6, %v6541_v33  ;;  %v4357_v17 = vmul.f32 -1.442695, %v4537_v16 }
 0x9d3   :  { %v4356_v26 = vmul.f32 -1.442695, %v4506_v41  ;;  %v4508_v24 = vadd.f32 %v2868_v46, %v6534_v5  ;;  %v4540_v36 = vadd.f32 %v2911_v47, %v6546_v48 }
 0x9d4   :  { %5177 = vpow2.f32 %v4355_v44  ;;  %v4358_v23 = vmul.f32 -1.442695, %v4507_v45  ;;  %v4360_v34 = vmul.f32 -1.442695, %v4539_v49 }
 0x9d5   :  { %v4359_v35 = vmul.f32 -1.442695, %v4508_v24  ;;  %5179 = vpow2.f32 %v4356_v26 }
 0x9d6   :  { %5181 = vpow2.f32 %v4358_v23 }
 0x9d7   :  { %5183 = vpow2.f32 %v4359_v35 }
 0x9d8   :  { %5185 = vtanh.f32 %v4538_v1 }
 0x9d9   :  { %5187 = vpow2.f32 %v4357_v17 }
 0x9da   :  { %5189 = vpow2.f32 %v4360_v34 }
 0x9de   :  { %v5178_v2 = vpop.eup %5177 }
 0x9df   :  { %v2940_v37 = vadd.f32 1.0, %v5178_v2  ;;  %v5180_v38 = vpop.eup %5179 }
 0x9e0   :  { %v5182_v12 = vpop.eup %5181  ;;  %v2941_v10 = vadd.f32 1.0, %v5180_v38 }
 0x9e1   :  { %5191 = vrcp.f32 %v2940_v37  ;;  %v2943_v32 = vadd.f32 1.0, %v5182_v12  ;;  %v5184_v39 = vpop.eup %5183 }
 0x9e2   :  { %5193 = vtanh.f32 %v4540_v36  ;;  %v2944_v41 = vadd.f32 1.0, %v5184_v39  ;;  %v5186_v40 = vpop.eup %5185 }
 0x9e3   :  { %5195 = vrcp.f32 %v2941_v10  ;;  %v5188_v42 = vpop.eup %5187 }
 0x9e4   :  { %5197 = vrcp.f32 %v2943_v32  ;;  %v5190_v6 = vpop.eup %5189  ;;  %v2942_v26 = vadd.f32 1.0, %v5188_v42 }
 0x9e5   :  { %5199 = vrcp.f32 %v2944_v41  ;;  %v2945_v16 = vadd.f32 1.0, %v5190_v6 }
 0x9e6   :  { %5201 = vrcp.f32 %v2942_v26 }
 0x9eb   :  { %v5192_v44 = vpop.eup %5191 }
 0x9ec   :  { %v5194_v45 = vpop.eup %5193  ;;  %v2962_v46 = vmul.f32 %v5192_v44, %v5186_v40 }
 0x9ed   :  { %v5196_v47 = vpop.eup %5195 }
 0x9ee   :  { %v5198_v20 = vpop.eup %5197  ;;  %v2960_v24 = vmul.f32 0.0, %v5196_v47 }
 0x9ef   :  { %v2963_v23 = vmul.f32 %v5198_v20, %v5194_v45  ;;  %v5200_v35 = vpop.eup %5199 }
 0x9f0   :  { %v6552_v62 = vadd.f32 %v2962_v46, %v2960_v24  ;;  %v2961_v49 = vmul.f32 0.0, %v5200_v35  ;;  %v5202_v17 = vpop.eup %5201 }
 0x9f2   :  { %5203 = vtanh.f32 %v6552_v62  ;;  %v6555_v1 = vadd.f32 %v2963_v23, %v2961_v49 }
 0x9f3   :  { %5205 = vrcp.f32 %v2945_v16 }
 0x9f4   :  { %5207 = vtanh.f32 %v6555_v1 }
 0x9fc   :  { %v5204_v34 = vpop.eup %5203 }
 0x9fd   :  { %v5206_v2 = vpop.eup %5205  ;;  %v2968_v37 = vmul.f32 %v5204_v34, %v5202_v17 }
 0x9fe   :  { %v5208_v36 = vpop.eup %5207 }
 0x9ff   :  { %v2969_v38 = vmul.f32 %v5208_v36, %v5206_v2 }
 0xa01   :  { %v2978_v12 = vpack.c.bf16 %v2969_v38, %v2968_v37 }
 0xa03   :  { %3012 = vmatmul.mubr.bf16.vlgmr.msra.gmra.mrb[36].mxu0 %v2978_v12  ;;  %3055 = vmatmul.mubr.bf16.vlgmr.msra.gmra.mrb[36].mxu1 %v2978_v12 }
 0xa04   :  { %3131 = vmatpush1.bf16.msra.mxu0 %v6354_v56  ;;  %3174 = vmatpush1.bf16.msra.mxu1 %v6387_v29 }
 0xa05   :  { %3132 = vmatprep.subr.bf16.mxu0 %v6391_v31  ;;  %3175 = vmatprep.subr.bf16.mxu1 %v6393_v4 }
 0xa06   :  { %3162 = vmatprep.mubr.bf16.mxu0 %v5646_v0  ;;  %3205 = vmatprep.mubr.bf16.mxu1 %v5646_v0 }
 0xa08   :  { %3133 = vmatpush1.bf16.msra.mxu0 %v6395_v25  ;;  %3176 = vmatpush1.bf16.msra.mxu1 %v6397_v52 }
 0xa09   :  { %3134 = vmatprep.subr.bf16.mxu0 %v6403_v53  ;;  %3177 = vmatprep.subr.bf16.mxu1 %v6409_v60 }
 0xa0c   :  { %3135 = vmatpush1.bf16.msra.mxu0 %v6405_v57  ;;  %3178 = vmatpush1.bf16.msra.mxu1 %v6412_v3 }
 0xa0d   :  { %3136 = vmatprep.subr.bf16.mxu0 %v6407_v19  ;;  %3179 = vmatprep.subr.bf16.mxu1 %v6414_v63 }
 0xa10   :  { %3137 = vmatpush1.bf16.msra.mxu0 %v6417_v50  ;;  %3180 = vmatpush1.bf16.msra.mxu1 %v6424_v54 }
 0xa11   :  { %3138 = vmatprep.subr.bf16.mxu0 %v6421_v55  ;;  %3181 = vmatprep.subr.bf16.mxu1 %v6427_v15 }
 0xa14   :  { %3139 = vmatpush1.bf16.msra.mxu0 %v6430_v11  ;;  %3182 = vmatpush1.bf16.msra.mxu1 %v6436_v28 }
 0xa15   :  { %3140 = vmatprep.subr.bf16.mxu0 %v6433_v22  ;;  %3183 = vmatprep.subr.bf16.mxu1 %v6439_v8 }
 0xa18   :  { %3141 = vmatpush1.bf16.msra.mxu0 %v6442_v51  ;;  %3184 = vmatpush1.bf16.msra.mxu1 %v6448_v18 }
 0xa19   :  { %3142 = vmatprep.subr.bf16.mxu0 %v6445_v7  ;;  %3185 = vmatprep.subr.bf16.mxu1 %v6454_v14 }
 0xa1c   :  { %3143 = vmatpush1.bf16.msra.mxu0 %v6452_v43  ;;  %3186 = vmatpush1.bf16.msra.mxu1 %v6460_v13 }
 0xa1d   :  { %3144 = vmatprep.subr.bf16.mxu0 %v6458_v9  ;;  %3187 = vmatprep.subr.bf16.mxu1 %v6463_v61 }
 0xa20   :  { %3145 = vmatpush1.bf16.msra.mxu0 %v6466_v21  ;;  %3188 = vmatpush1.bf16.msra.mxu1 %v6470_v27 }
 0xa21   :  { %3281 = vmatprep.subr.bf16.mxu0 %v6351_v59  ;;  %3324 = vmatprep.subr.bf16.mxu1 %v6385_v30 }
 0xad6   :  { %v3013_v10 = vpop.f32.mrb[36].mxu0  ;;  %v3056_v32 = vpop.f32.mrb[36].mxu1 }
 0xad7   :  { %v4509_v39 = vadd.f32 %v3013_v10, %v6530_v58  ;;  %v3015_v41 = vpop.f32.mrb[37].mxu0  ;;  %v3058_v40 = vpop.f32.mrb[37].mxu1  ;;  %v4541_v16 = vadd.f32 %v3056_v32, %v6541_v33 }
 0xad8   :  { %v4510_v42 = vadd.f32 %v3015_v41, %v6534_v5  ;;  %v3017_v6 = vpop.f32.mrb[38].mxu0  ;;  %v3060_v44 = vpop.f32.mrb[38].mxu1  ;;  %v4542_v17 = vadd.f32 %v3058_v40, %v6546_v48 }
 0xad9   :  { %v4361_v45 = vmul.f32 -1.442695, %v4509_v39  ;;  %v4511_v46 = vadd.f32 %v3017_v6, %v6530_v58  ;;  %v3019_v47 = vpop.f32.mrb[39].mxu0  ;;  %v3062_v20 = vpop.f32.mrb[39].mxu1  ;;  %v4543_v49 = vadd.f32 %v3060_v44, %v6541_v33  ;;  %v4363_v34 = vmul.f32 -1.442695, %v4541_v16 }
 0xada   :  { %v4362_v26 = vmul.f32 -1.442695, %v4510_v42  ;;  %v4512_v24 = vadd.f32 %v3019_v47, %v6534_v5  ;;  %v4544_v37 = vadd.f32 %v3062_v20, %v6546_v48 }
 0xadb   :  { %5209 = vpow2.f32 %v4361_v45  ;;  %v4364_v23 = vmul.f32 -1.442695, %v4511_v46  ;;  %v4366_v2 = vmul.f32 -1.442695, %v4543_v49 }
 0xadc   :  { %v4365_v35 = vmul.f32 -1.442695, %v4512_v24  ;;  %5211 = vpow2.f32 %v4362_v26 }
 0xadd   :  { %5213 = vpow2.f32 %v4364_v23 }
 0xade   :  { %5215 = vpow2.f32 %v4365_v35 }
 0xadf   :  { %5217 = vtanh.f32 %v4542_v17 }
 0xae0   :  { %5219 = vpow2.f32 %v4363_v34 }
 0xae1   :  { %5221 = vpow2.f32 %v4366_v2 }
 0xae5   :  { %v5210_v36 = vpop.eup %5209 }
 0xae6   :  { %v3091_v38 = vadd.f32 1.0, %v5210_v36  ;;  %v5212_v12 = vpop.eup %5211 }
 0xae7   :  { %v5214_v10 = vpop.eup %5213  ;;  %v3092_v39 = vadd.f32 1.0, %v5212_v12 }
 0xae8   :  { %5223 = vrcp.f32 %v3091_v38  ;;  %v3094_v32 = vadd.f32 1.0, %v5214_v10  ;;  %v5216_v41 = vpop.eup %5215 }
 0xae9   :  { %5225 = vtanh.f32 %v4544_v37  ;;  %v3095_v42 = vadd.f32 1.0, %v5216_v41  ;;  %v5218_v40 = vpop.eup %5217 }
 0xaea   :  { %5227 = vrcp.f32 %v3092_v39  ;;  %v5220_v6 = vpop.eup %5219 }
 0xaeb   :  { %5229 = vrcp.f32 %v3094_v32  ;;  %v5222_v44 = vpop.eup %5221  ;;  %v3093_v24 = vadd.f32 1.0, %v5220_v6 }
 0xaec   :  { %5231 = vrcp.f32 %v3095_v42  ;;  %v3096_v17 = vadd.f32 1.0, %v5222_v44 }
 0xaed   :  { %5233 = vrcp.f32 %v3093_v24 }
 0xaf2   :  { %v5224_v45 = vpop.eup %5223 }
 0xaf3   :  { %v5226_v46 = vpop.eup %5225  ;;  %v3113_v47 = vmul.f32 %v5224_v45, %v5218_v40 }
 0xaf4   :  { %v5228_v20 = vpop.eup %5227 }
 0xaf5   :  { %v5230_v26 = vpop.eup %5229  ;;  %v3111_v23 = vmul.f32 %v5228_v20, %v6552_v62 }
 0xaf6   :  { %v3114_v35 = vmul.f32 %v5230_v26, %v5226_v46  ;;  %v5232_v16 = vpop.eup %5231 }
 0xaf7   :  { %v6601_v49 = vadd.f32 %v3113_v47, %v3111_v23  ;;  %v3112_v34 = vmul.f32 %v5232_v16, %v6555_v1  ;;  %v5234_v36 = vpop.eup %5233 }
 0xaf9   :  { %5235 = vtanh.f32 %v6601_v49  ;;  %v6605_v2 = vadd.f32 %v3114_v35, %v3112_v34 }
 0xafa   :  { %5237 = vrcp.f32 %v3096_v17 }
 0xafb   :  { %5239 = vtanh.f32 %v6605_v2 }
 0xb03   :  { %v5236_v37 = vpop.eup %5235 }
 0xb04   :  { %v5238_v38 = vpop.eup %5237  ;;  %v3119_v62 = vmul.f32 %v5236_v37, %v5234_v36 }
 0xb05   :  { %v5240_v12 = vpop.eup %5239 }
 0xb06   :  { %v3120_v10 = vmul.f32 %v5240_v12, %v5238_v38 }
 0xb08   :  { %v3129_v39 = vpack.c.bf16 %v3120_v10, %v3119_v62 }
 0xb0a   :  { %3163 = vmatmul.mubr.bf16.vlgmr.msra.gmra.mrb[40].mxu0 %v3129_v39  ;;  %3206 = vmatmul.mubr.bf16.vlgmr.msra.gmra.mrb[40].mxu1 %v3129_v39 }
 0xb0b   :  { %3282 = vmatpush1.bf16.msra.mxu0 %v6354_v56  ;;  %3325 = vmatpush1.bf16.msra.mxu1 %v6387_v29 }
 0xb0c   :  { %3283 = vmatprep.subr.bf16.mxu0 %v6391_v31  ;;  %3326 = vmatprep.subr.bf16.mxu1 %v6393_v4 }
 0xb0d   :  { %3313 = vmatprep.mubr.bf16.mxu0 %v5646_v0  ;;  %3356 = vmatprep.mubr.bf16.mxu1 %v5646_v0 }
 0xb0f   :  { %3284 = vmatpush1.bf16.msra.mxu0 %v6395_v25  ;;  %3327 = vmatpush1.bf16.msra.mxu1 %v6397_v52 }
 0xb10   :  { %3285 = vmatprep.subr.bf16.mxu0 %v6403_v53  ;;  %3328 = vmatprep.subr.bf16.mxu1 %v6409_v60 }
 0xb13   :  { %3286 = vmatpush1.bf16.msra.mxu0 %v6405_v57  ;;  %3329 = vmatpush1.bf16.msra.mxu1 %v6412_v3 }
 0xb14   :  { %3287 = vmatprep.subr.bf16.mxu0 %v6407_v19  ;;  %3330 = vmatprep.subr.bf16.mxu1 %v6414_v63 }
 0xb17   :  { %3288 = vmatpush1.bf16.msra.mxu0 %v6417_v50  ;;  %3331 = vmatpush1.bf16.msra.mxu1 %v6424_v54 }
 0xb18   :  { %3289 = vmatprep.subr.bf16.mxu0 %v6421_v55  ;;  %3332 = vmatprep.subr.bf16.mxu1 %v6427_v15 }
 0xb1b   :  { %3290 = vmatpush1.bf16.msra.mxu0 %v6430_v11  ;;  %3333 = vmatpush1.bf16.msra.mxu1 %v6436_v28 }
 0xb1c   :  { %3291 = vmatprep.subr.bf16.mxu0 %v6433_v22  ;;  %3334 = vmatprep.subr.bf16.mxu1 %v6439_v8 }
 0xb1f   :  { %3292 = vmatpush1.bf16.msra.mxu0 %v6442_v51  ;;  %3335 = vmatpush1.bf16.msra.mxu1 %v6448_v18 }
 0xb20   :  { %3293 = vmatprep.subr.bf16.mxu0 %v6445_v7  ;;  %3336 = vmatprep.subr.bf16.mxu1 %v6454_v14 }
 0xb23   :  { %3294 = vmatpush1.bf16.msra.mxu0 %v6452_v43  ;;  %3337 = vmatpush1.bf16.msra.mxu1 %v6460_v13 }
 0xb24   :  { %3295 = vmatprep.subr.bf16.mxu0 %v6458_v9  ;;  %3338 = vmatprep.subr.bf16.mxu1 %v6463_v61 }
 0xb27   :  { %3296 = vmatpush1.bf16.msra.mxu0 %v6466_v21  ;;  %3339 = vmatpush1.bf16.msra.mxu1 %v6470_v27 }
 0xb28   :  { %3432 = vmatprep.subr.bf16.mxu0 %v6351_v59  ;;  %3475 = vmatprep.subr.bf16.mxu1 %v6385_v30 }
 0xbdd   :  { %v3164_v1 = vpop.f32.mrb[40].mxu0  ;;  %v3207_v32 = vpop.f32.mrb[40].mxu1 }
 0xbde   :  { %v4513_v41 = vadd.f32 %v3164_v1, %v6530_v58  ;;  %v3166_v42 = vpop.f32.mrb[41].mxu0  ;;  %v3209_v40 = vpop.f32.mrb[41].mxu1  ;;  %v4545_v16 = vadd.f32 %v3207_v32, %v6541_v33 }
 0xbdf   :  { %v4514_v6 = vadd.f32 %v3166_v42, %v6534_v5  ;;  %v3168_v44 = vpop.f32.mrb[42].mxu0  ;;  %v3211_v45 = vpop.f32.mrb[42].mxu1  ;;  %v4546_v34 = vadd.f32 %v3209_v40, %v6546_v48 }
 0xbe0   :  { %v4367_v46 = vmul.f32 -1.442695, %v4513_v41  ;;  %v4515_v47 = vadd.f32 %v3168_v44, %v6530_v58  ;;  %v3170_v20 = vpop.f32.mrb[43].mxu0  ;;  %v3213_v26 = vpop.f32.mrb[43].mxu1  ;;  %v4547_v17 = vadd.f32 %v3211_v45, %v6541_v33  ;;  %v4369_v36 = vmul.f32 -1.442695, %v4545_v16 }
 0xbe1   :  { %v4368_v24 = vmul.f32 -1.442695, %v4514_v6  ;;  %v4516_v59 = vadd.f32 %v3170_v20, %v6534_v5  ;;  %v4548_v12 = vadd.f32 %v3213_v26, %v6546_v48 }
 0xbe2   :  { %5241 = vpow2.f32 %v4367_v46  ;;  %v4370_v23 = vmul.f32 -1.442695, %v4515_v47  ;;  %v4372_v37 = vmul.f32 -1.442695, %v4547_v17 }
 0xbe3   :  { %v4371_v35 = vmul.f32 -1.442695, %v4516_v59  ;;  %5243 = vpow2.f32 %v4368_v24 }
 0xbe4   :  { %5245 = vpow2.f32 %v4370_v23 }
 0xbe5   :  { %5247 = vpow2.f32 %v4371_v35 }
 0xbe6   :  { %5249 = vtanh.f32 %v4546_v34 }
 0xbe7   :  { %5251 = vpow2.f32 %v4369_v36 }
 0xbe8   :  { %5253 = vpow2.f32 %v4372_v37 }
 0xbec   :  { %v5242_v38 = vpop.eup %5241 }
 0xbed   :  { %v3242_v62 = vadd.f32 1.0, %v5242_v38  ;;  %v5244_v10 = vpop.eup %5243 }
 0xbee   :  { %v5246_v39 = vpop.eup %5245  ;;  %v3243_v1 = vadd.f32 1.0, %v5244_v10 }
 0xbef   :  { %5255 = vrcp.f32 %v3242_v62  ;;  %v3245_v32 = vadd.f32 1.0, %v5246_v39  ;;  %v5248_v41 = vpop.eup %5247 }
 0xbf0   :  { %5257 = vtanh.f32 %v4548_v12  ;;  %v3246_v42 = vadd.f32 1.0, %v5248_v41  ;;  %v5250_v40 = vpop.eup %5249 }
 0xbf1   :  { %5259 = vrcp.f32 %v3243_v1  ;;  %v5252_v6 = vpop.eup %5251 }
 0xbf2   :  { %5261 = vrcp.f32 %v3245_v32  ;;  %v5254_v44 = vpop.eup %5253  ;;  %v3244_v24 = vadd.f32 1.0, %v5252_v6 }
 0xbf3   :  { %5263 = vrcp.f32 %v3246_v42  ;;  %v3247_v17 = vadd.f32 1.0, %v5254_v44 }
 0xbf4   :  { %5265 = vrcp.f32 %v3244_v24 }
 0xbf9   :  { %v5256_v45 = vpop.eup %5255 }
 0xbfa   :  { %v5258_v46 = vpop.eup %5257  ;;  %v3264_v47 = vmul.f32 %v5256_v45, %v5250_v40 }
 0xbfb   :  { %v5260_v20 = vpop.eup %5259 }
 0xbfc   :  { %v5262_v26 = vpop.eup %5261  ;;  %v3262_v59 = vmul.f32 %v5260_v20, %v6601_v49 }
 0xbfd   :  { %v3265_v23 = vmul.f32 %v5262_v26, %v5258_v46  ;;  %v5264_v35 = vpop.eup %5263 }
 0xbfe   :  { %v6651_v16 = vadd.f32 %v3264_v47, %v3262_v59  ;;  %v3263_v34 = vmul.f32 %v5264_v35, %v6605_v2  ;;  %v5266_v37 = vpop.eup %5265 }
 0xc00   :  { %5267 = vtanh.f32 %v6651_v16  ;;  %v6655_v36 = vadd.f32 %v3265_v23, %v3263_v34 }
 0xc01   :  { %5269 = vrcp.f32 %v3247_v17 }
 0xc02   :  { %5271 = vtanh.f32 %v6655_v36 }
 0xc0a   :  { %v5268_v38 = vpop.eup %5267 }
 0xc0b   :  { %v5270_v12 = vpop.eup %5269  ;;  %v3270_v49 = vmul.f32 %v5268_v38, %v5266_v37 }
 0xc0c   :  { %v5272_v62 = vpop.eup %5271 }
 0xc0d   :  { %v3271_v10 = vmul.f32 %v5272_v62, %v5270_v12  ;;  %v6710_v62 = vld [vmem:[#allocation12 + $0x100] ss:$16 sps:$4 sm:$0xff]  }
 0xc0f   :  { %v3280_v39 = vpack.c.bf16 %v3271_v10, %v3270_v49  ;;  %v6716_v49 = vld [vmem:[#allocation12 + $0x124] ss:$16 sps:$4 sm:$0xff]   ;;  %v6719_v10 = vld [vmem:[#allocation12 + $0x12c] ss:$16 sps:$4 sm:$0xff]  }
 0xc11   :  { %3314 = vmatmul.mubr.bf16.vlgmr.msra.gmra.mrb[44].mxu0 %v3280_v39  ;;  %3357 = vmatmul.mubr.bf16.vlgmr.msra.gmra.mrb[44].mxu1 %v3280_v39  ;;  %v6724_v39 = vld [vmem:[#allocation12 + $0x120] ss:$16 sps:$4 sm:$0xff]  }
 0xc12   :  { %3433 = vmatpush1.bf16.msra.mxu0 %v6354_v56  ;;  %3476 = vmatpush1.bf16.msra.mxu1 %v6387_v29  ;;  %v6690_v56 = vld [vmem:[#allocation12 + $0x104] ss:$16 sps:$4 sm:$0xff]  }
 0xc13   :  { %3434 = vmatprep.subr.bf16.mxu0 %v6391_v31  ;;  %3477 = vmatprep.subr.bf16.mxu1 %v6393_v4 }
 0xc14   :  { %3464 = vmatprep.mubr.bf16.mxu0 %v5646_v0  ;;  %3507 = vmatprep.mubr.bf16.mxu1 %v5646_v0 }
 0xc16   :  { %3435 = vmatpush1.bf16.msra.mxu0 %v6395_v25  ;;  %3478 = vmatpush1.bf16.msra.mxu1 %v6397_v52 }
 0xc17   :  { %3436 = vmatprep.subr.bf16.mxu0 %v6403_v53  ;;  %3479 = vmatprep.subr.bf16.mxu1 %v6409_v60 }
 0xc1a   :  { %3437 = vmatpush1.bf16.msra.mxu0 %v6405_v57  ;;  %3480 = vmatpush1.bf16.msra.mxu1 %v6412_v3 }
 0xc1b   :  { %3438 = vmatprep.subr.bf16.mxu0 %v6407_v19  ;;  %3481 = vmatprep.subr.bf16.mxu1 %v6414_v63 }
 0xc1e   :  { %3439 = vmatpush1.bf16.msra.mxu0 %v6417_v50  ;;  %3482 = vmatpush1.bf16.msra.mxu1 %v6424_v54 }
 0xc1f   :  { %3440 = vmatprep.subr.bf16.mxu0 %v6421_v55  ;;  %3483 = vmatprep.subr.bf16.mxu1 %v6427_v15 }
 0xc22   :  { %3441 = vmatpush1.bf16.msra.mxu0 %v6430_v11  ;;  %3484 = vmatpush1.bf16.msra.mxu1 %v6436_v28 }
 0xc23   :  { %3442 = vmatprep.subr.bf16.mxu0 %v6433_v22  ;;  %3485 = vmatprep.subr.bf16.mxu1 %v6439_v8 }
 0xc26   :  { %3443 = vmatpush1.bf16.msra.mxu0 %v6442_v51  ;;  %3486 = vmatpush1.bf16.msra.mxu1 %v6448_v18 }
 0xc27   :  { %3444 = vmatprep.subr.bf16.mxu0 %v6445_v7  ;;  %3487 = vmatprep.subr.bf16.mxu1 %v6454_v14 }
 0xc2a   :  { %3445 = vmatpush1.bf16.msra.mxu0 %v6452_v43  ;;  %3488 = vmatpush1.bf16.msra.mxu1 %v6460_v13 }
 0xc2b   :  { %3446 = vmatprep.subr.bf16.mxu0 %v6458_v9  ;;  %3489 = vmatprep.subr.bf16.mxu1 %v6463_v61 }
 0xc2e   :  { %3447 = vmatpush1.bf16.msra.mxu0 %v6466_v21  ;;  %3490 = vmatpush1.bf16.msra.mxu1 %v6470_v27 }
 0xc2f   :  { %3583 = vmatprep.subr.bf16.mxu0 %v6690_v56  ;;  %3626 = vmatprep.subr.bf16.mxu1 %v6385_v30 }
 0xce4   :  { %v3315_v29 = vpop.f32.mrb[44].mxu0  ;;  %v3358_v31 = vpop.f32.mrb[44].mxu1 }
 0xce5   :  { %v4517_v4 = vadd.f32 %v3315_v29, %v6530_v58  ;;  %v3317_v25 = vpop.f32.mrb[45].mxu0  ;;  %v3360_v52 = vpop.f32.mrb[45].mxu1  ;;  %v4549_v11 = vadd.f32 %v3358_v31, %v6541_v33  ;;  %v6727_v29 = vld [vmem:[#allocation12 + $0x128] ss:$16 sps:$4 sm:$0xff]   ;;  %v6730_v31 = vld [vmem:[#allocation12 + $0x144] ss:$16 sps:$4 sm:$0xff]  }
 0xce6   :  { %v4518_v53 = vadd.f32 %v3317_v25, %v6534_v5  ;;  %v3319_v57 = vpop.f32.mrb[46].mxu0  ;;  %v3362_v19 = vpop.f32.mrb[46].mxu1  ;;  %v4550_v28 = vadd.f32 %v3360_v52, %v6546_v48  ;;  %v6736_v25 = vld [vmem:[#allocation12 + $0x140] ss:$16 sps:$4 sm:$0xff]   ;;  %v6739_v52 = vld [vmem:[#allocation12 + $0x148] ss:$16 sps:$4 sm:$0xff]  }
 0xce7   :  { %v4373_v60 = vmul.f32 -1.442695, %v4517_v4  ;;  %v4519_v3 = vadd.f32 %v3319_v57, %v6530_v58  ;;  %v3321_v63 = vpop.f32.mrb[47].mxu0  ;;  %v3364_v50 = vpop.f32.mrb[47].mxu1  ;;  %v4551_v22 = vadd.f32 %v3362_v19, %v6541_v33  ;;  %v4375_v8 = vmul.f32 -1.442695, %v4549_v11 }
 0xce8   :  { %v4374_v55 = vmul.f32 -1.442695, %v4518_v53  ;;  %v4520_v54 = vadd.f32 %v3321_v63, %v6534_v5  ;;  %v4552_v18 = vadd.f32 %v3364_v50, %v6546_v48  ;;  %v6733_v4 = vld [vmem:[#allocation12 + $0x14c] ss:$16 sps:$4 sm:$0xff]   ;;  %v6742_v53 = vld [vmem:[#allocation12 + $0x164] ss:$16 sps:$4 sm:$0xff]  }
 0xce9   :  { %5273 = vpow2.f32 %v4373_v60  ;;  %v4376_v30 = vmul.f32 -1.442695, %v4519_v3  ;;  %v4378_v51 = vmul.f32 -1.442695, %v4551_v22  ;;  %v6745_v57 = vld [vmem:[#allocation12 + $0x16c] ss:$16 sps:$4 sm:$0xff]  }
 0xcea   :  { %v4377_v15 = vmul.f32 -1.442695, %v4520_v54  ;;  %5275 = vpow2.f32 %v4374_v55  ;;  %v6748_v19 = vld [vmem:[#allocation12 + $0x160] ss:$16 sps:$4 sm:$0xff]   ;;  %v6751_v60 = vld [vmem:[#allocation12 + $0x168] ss:$16 sps:$4 sm:$0xff]  }
 0xceb   :  { %5277 = vpow2.f32 %v4376_v30  ;;  %v6754_v3 = vld [vmem:[#allocation12 + $0x184] ss:$16 sps:$4 sm:$0xff]   ;;  %v6757_v63 = vld [vmem:[#allocation12 + $0x18c] ss:$16 sps:$4 sm:$0xff]   ;;  %v6760_v50 = vld [vmem:[#allocation12 + $0x180] ss:$16 sps:$4 sm:$0xff]  }
 0xcec   :  { %5279 = vpow2.f32 %v4377_v15  ;;  %v6763_v55 = vld [vmem:[#allocation12 + $0x188] ss:$16 sps:$4 sm:$0xff]   ;;  %v6766_v54 = vld [vmem:[#allocation12 + $0x1a4] ss:$16 sps:$4 sm:$0xff]   ;;  %v6769_v30 = vld [vmem:[#allocation12 + $0x1ac] ss:$16 sps:$4 sm:$0xff]  }
 0xced   :  { %5281 = vtanh.f32 %v4550_v28  ;;  %v6772_v15 = vld [vmem:[#allocation12 + $0x1a0] ss:$16 sps:$4 sm:$0xff]   ;;  %v6775_v11 = vld [vmem:[#allocation12 + $0x1a8] ss:$16 sps:$4 sm:$0xff]   ;;  %v6778_v22 = vld [vmem:[#allocation12 + $0x1c4] ss:$16 sps:$4 sm:$0xff]  }
 0xcee   :  { %5283 = vpow2.f32 %v4375_v8  ;;  %v6781_v28 = vld [vmem:[#allocation12 + $0x1cc] ss:$16 sps:$4 sm:$0xff]   ;;  %v6784_v8 = vld [vmem:[#allocation12 + $0x1c0] ss:$16 sps:$4 sm:$0xff]  }
 0xcef   :  { %5285 = vpow2.f32 %v4378_v51  ;;  %v6787_v51 = vld [vmem:[#allocation12 + $0x1c8] ss:$16 sps:$4 sm:$0xff]  }
 0xcf3   :  { %v5274_v7 = vpop.eup %5273 }
 0xcf4   :  { %v3393_v43 = vadd.f32 1.0, %v5274_v7  ;;  %v5276_v14 = vpop.eup %5275  ;;  %v6790_v7 = vld [vmem:[#allocation12 + $0x1e4] ss:$16 sps:$4 sm:$0xff]  }
 0xcf5   :  { %v5278_v9 = vpop.eup %5277  ;;  %v3394_v13 = vadd.f32 1.0, %v5276_v14  ;;  %v6799_v14 = vld [vmem:[#allocation12 + $0x1e8] ss:$16 sps:$4 sm:$0xff]  }
 0xcf6   :  { %5287 = vrcp.f32 %v3393_v43  ;;  %v3396_v61 = vadd.f32 1.0, %v5278_v9  ;;  %v5280_v21 = vpop.eup %5279  ;;  %v6796_v43 = vld [vmem:[#allocation12 + $0x1e0] ss:$16 sps:$4 sm:$0xff]   ;;  %v6803_v9 = vld [vmem:[#allocation12 + $0x10c] ss:$16 sps:$4 sm:$0xff]  }
 0xcf7   :  { %5289 = vtanh.f32 %v4552_v18  ;;  %v3397_v27 = vadd.f32 1.0, %v5280_v21  ;;  %v5282_v2 = vpop.eup %5281  ;;  %v6793_v18 = vld [vmem:[#allocation12 + $0x1ec] ss:$16 sps:$4 sm:$0xff]  }
 0xcf8   :  { %5291 = vrcp.f32 %v3394_v13  ;;  %v5284_v1 = vpop.eup %5283 }
 0xcf9   :  { %5293 = vrcp.f32 %v3396_v61  ;;  %v5286_v32 = vpop.eup %5285  ;;  %v3395_v45 = vadd.f32 1.0, %v5284_v1 }
 0xcfa   :  { %5295 = vrcp.f32 %v3397_v27  ;;  %v3398_v24 = vadd.f32 1.0, %v5286_v32 }
 0xcfb   :  { %5297 = vrcp.f32 %v3395_v45 }
 0xd00   :  { %v5288_v41 = vpop.eup %5287 }
 0xd01   :  { %v5290_v42 = vpop.eup %5289  ;;  %v3415_v40 = vmul.f32 %v5288_v41, %v5282_v2 }
 0xd02   :  { %v5292_v6 = vpop.eup %5291 }
 0xd03   :  { %v5294_v44 = vpop.eup %5293  ;;  %v3413_v46 = vmul.f32 %v5292_v6, %v6651_v16 }
 0xd04   :  { %v3416_v47 = vmul.f32 %v5294_v44, %v5290_v42  ;;  %v5296_v20 = vpop.eup %5295 }
 0xd05   :  { %v6703_v26 = vadd.f32 %v3415_v40, %v3413_v46  ;;  %v3414_v59 = vmul.f32 %v5296_v20, %v6655_v36  ;;  %v5298_v35 = vpop.eup %5297  ;;  %v6713_v36 = vld [vmem:[#allocation12 + $0x108] ss:$16 sps:$4 sm:$0xff]  }
 0xd07   :  { %5299 = vtanh.f32 %v6703_v26  ;;  %v6707_v23 = vadd.f32 %v3416_v47, %v3414_v59 }
 0xd08   :  { %5301 = vrcp.f32 %v3398_v24 }
 0xd09   :  { %5303 = vtanh.f32 %v6707_v23 }
 0xd11   :  { %v5300_v17 = vpop.eup %5299 }
 0xd12   :  { %v5302_v34 = vpop.eup %5301  ;;  %v3421_v16 = vmul.f32 %v5300_v17, %v5298_v35 }
 0xd13   :  { %v5304_v37 = vpop.eup %5303 }
 0xd14   :  { %v3422_v38 = vmul.f32 %v5304_v37, %v5302_v34 }
 0xd16   :  { %v3431_v12 = vpack.c.bf16 %v3422_v38, %v3421_v16 }
 0xd18   :  { %3465 = vmatmul.mubr.bf16.vlgmr.msra.gmra.mrb[48].mxu0 %v3431_v12  ;;  %3508 = vmatmul.mubr.bf16.vlgmr.msra.gmra.mrb[48].mxu1 %v3431_v12 }
 0xd19   :  { %3584 = vmatpush1.bf16.msra.mxu0 %v6710_v62  ;;  %3627 = vmatpush1.bf16.msra.mxu1 %v6713_v36 }
 0xd1a   :  { %3585 = vmatprep.subr.bf16.mxu0 %v6716_v49  ;;  %3628 = vmatprep.subr.bf16.mxu1 %v6719_v10 }
 0xd1b   :  { %3615 = vmatprep.mubr.bf16.mxu0 %v5646_v0  ;;  %3658 = vmatprep.mubr.bf16.mxu1 %v5646_v0 }
 0xd1d   :  { %3586 = vmatpush1.bf16.msra.mxu0 %v6724_v39  ;;  %3629 = vmatpush1.bf16.msra.mxu1 %v6727_v29 }
 0xd1e   :  { %3587 = vmatprep.subr.bf16.mxu0 %v6730_v31  ;;  %3630 = vmatprep.subr.bf16.mxu1 %v6733_v4 }
 0xd21   :  { %3588 = vmatpush1.bf16.msra.mxu0 %v6736_v25  ;;  %3631 = vmatpush1.bf16.msra.mxu1 %v6739_v52 }
 0xd22   :  { %3589 = vmatprep.subr.bf16.mxu0 %v6742_v53  ;;  %3632 = vmatprep.subr.bf16.mxu1 %v6745_v57 }
 0xd25   :  { %3590 = vmatpush1.bf16.msra.mxu0 %v6748_v19  ;;  %3633 = vmatpush1.bf16.msra.mxu1 %v6751_v60 }
 0xd26   :  { %3591 = vmatprep.subr.bf16.mxu0 %v6754_v3  ;;  %3634 = vmatprep.subr.bf16.mxu1 %v6757_v63 }
 0xd29   :  { %3592 = vmatpush1.bf16.msra.mxu0 %v6760_v50  ;;  %3635 = vmatpush1.bf16.msra.mxu1 %v6763_v55 }
 0xd2a   :  { %3593 = vmatprep.subr.bf16.mxu0 %v6766_v54  ;;  %3636 = vmatprep.subr.bf16.mxu1 %v6769_v30 }
 0xd2d   :  { %3594 = vmatpush1.bf16.msra.mxu0 %v6772_v15  ;;  %3637 = vmatpush1.bf16.msra.mxu1 %v6775_v11 }
 0xd2e   :  { %3595 = vmatprep.subr.bf16.mxu0 %v6778_v22  ;;  %3638 = vmatprep.subr.bf16.mxu1 %v6781_v28 }
 0xd31   :  { %3596 = vmatpush1.bf16.msra.mxu0 %v6784_v8  ;;  %3639 = vmatpush1.bf16.msra.mxu1 %v6787_v51 }
 0xd32   :  { %3597 = vmatprep.subr.bf16.mxu0 %v6790_v7  ;;  %3640 = vmatprep.subr.bf16.mxu1 %v6793_v18 }
 0xd35   :  { %3598 = vmatpush1.bf16.msra.mxu0 %v6796_v43  ;;  %3641 = vmatpush1.bf16.msra.mxu1 %v6799_v14 }
 0xd36   :  { %3734 = vmatprep.subr.bf16.mxu0 %v6690_v56  ;;  %3777 = vmatprep.subr.bf16.mxu1 %v6803_v9 }
 0xdeb   :  { %v3466_v13 = vpop.f32.mrb[48].mxu0  ;;  %v3509_v61 = vpop.f32.mrb[48].mxu1 }
 0xdec   :  { %v4521_v21 = vadd.f32 %v3466_v13, %v6530_v58  ;;  %v3468_v27 = vpop.f32.mrb[49].mxu0  ;;  %v3511_v2 = vpop.f32.mrb[49].mxu1  ;;  %v4553_v24 = vadd.f32 %v3509_v61, %v6541_v33 }
 0xded   :  { %v4522_v1 = vadd.f32 %v3468_v27, %v6534_v5  ;;  %v3470_v32 = vpop.f32.mrb[50].mxu0  ;;  %v3513_v41 = vpop.f32.mrb[50].mxu1  ;;  %v4554_v35 = vadd.f32 %v3511_v2, %v6546_v48 }
 0xdee   :  { %v4379_v42 = vmul.f32 -1.442695, %v4521_v21  ;;  %v4523_v40 = vadd.f32 %v3470_v32, %v6530_v58  ;;  %v3472_v6 = vpop.f32.mrb[51].mxu0  ;;  %v3515_v44 = vpop.f32.mrb[51].mxu1  ;;  %v4555_v59 = vadd.f32 %v3513_v41, %v6541_v33  ;;  %v4381_v17 = vmul.f32 -1.442695, %v4553_v24 }
 0xdef   :  { %v4380_v45 = vmul.f32 -1.442695, %v4522_v1  ;;  %v4524_v46 = vadd.f32 %v3472_v6, %v6534_v5  ;;  %v4556_v16 = vadd.f32 %v3515_v44, %v6546_v48 }
 0xdf0   :  { %5305 = vpow2.f32 %v4379_v42  ;;  %v4382_v47 = vmul.f32 -1.442695, %v4523_v40  ;;  %v4384_v34 = vmul.f32 -1.442695, %v4555_v59 }
 0xdf1   :  { %v4383_v20 = vmul.f32 -1.442695, %v4524_v46  ;;  %5307 = vpow2.f32 %v4380_v45 }
 0xdf2   :  { %5309 = vpow2.f32 %v4382_v47 }
 0xdf3   :  { %5311 = vpow2.f32 %v4383_v20 }
 0xdf4   :  { %5313 = vtanh.f32 %v4554_v35 }
 0xdf5   :  { %5315 = vpow2.f32 %v4381_v17 }
 0xdf6   :  { %5317 = vpow2.f32 %v4384_v34 }
 0xdfa   :  { %v5306_v37 = vpop.eup %5305 }
 0xdfb   :  { %v3544_v38 = vadd.f32 1.0, %v5306_v37  ;;  %v5308_v12 = vpop.eup %5307 }
 0xdfc   :  { %v5310_v13 = vpop.eup %5309  ;;  %v3545_v21 = vadd.f32 1.0, %v5308_v12 }
 0xdfd   :  { %5319 = vrcp.f32 %v3544_v38  ;;  %v3547_v61 = vadd.f32 1.0, %v5310_v13  ;;  %v5312_v27 = vpop.eup %5311 }
 0xdfe   :  { %5321 = vtanh.f32 %v4556_v16  ;;  %v3548_v1 = vadd.f32 1.0, %v5312_v27  ;;  %v5314_v2 = vpop.eup %5313 }
 0xdff   :  { %5323 = vrcp.f32 %v3545_v21  ;;  %v5316_v32 = vpop.eup %5315 }
 0xe00   :  { %5325 = vrcp.f32 %v3547_v61  ;;  %v5318_v41 = vpop.eup %5317  ;;  %v3546_v46 = vadd.f32 1.0, %v5316_v32 }
 0xe01   :  { %5327 = vrcp.f32 %v3548_v1  ;;  %v3549_v35 = vadd.f32 1.0, %v5318_v41 }
 0xe02   :  { %5329 = vrcp.f32 %v3546_v46 }
 0xe07   :  { %v5320_v42 = vpop.eup %5319 }
 0xe08   :  { %v5322_v40 = vpop.eup %5321  ;;  %v3566_v6 = vmul.f32 %v5320_v42, %v5314_v2 }
 0xe09   :  { %v5324_v44 = vpop.eup %5323 }
 0xe0a   :  { %v5326_v45 = vpop.eup %5325  ;;  %v3564_v47 = vmul.f32 %v5324_v44, %v6703_v26 }
 0xe0b   :  { %v3567_v20 = vmul.f32 %v5326_v45, %v5322_v40  ;;  %v5328_v24 = vpop.eup %5327 }
 0xe0c   :  { %v6815_v59 = vadd.f32 %v3566_v6, %v3564_v47  ;;  %v3565_v17 = vmul.f32 %v5328_v24, %v6707_v23  ;;  %v5330_v37 = vpop.eup %5329 }
 0xe0e   :  { %5331 = vtanh.f32 %v6815_v59  ;;  %v6819_v34 = vadd.f32 %v3567_v20, %v3565_v17 }
 0xe0f   :  { %5333 = vrcp.f32 %v3549_v35 }
 0xe10   :  { %5335 = vtanh.f32 %v6819_v34 }
 0xe18   :  { %v5332_v16 = vpop.eup %5331 }
 0xe19   :  { %v5334_v38 = vpop.eup %5333  ;;  %v3572_v26 = vmul.f32 %v5332_v16, %v5330_v37 }
 0xe1a   :  { %v5336_v12 = vpop.eup %5335 }
 0xe1b   :  { %v3573_v13 = vmul.f32 %v5336_v12, %v5334_v38 }
 0xe1d   :  { %v3582_v21 = vpack.c.bf16 %v3573_v13, %v3572_v26 }
 0xe1f   :  { %3616 = vmatmul.mubr.bf16.vlgmr.msra.gmra.mrb[52].mxu0 %v3582_v21  ;;  %3659 = vmatmul.mubr.bf16.vlgmr.msra.gmra.mrb[52].mxu1 %v3582_v21 }
 0xe20   :  { %3735 = vmatpush1.bf16.msra.mxu0 %v6710_v62  ;;  %3778 = vmatpush1.bf16.msra.mxu1 %v6713_v36 }
 0xe21   :  { %3736 = vmatprep.subr.bf16.mxu0 %v6716_v49  ;;  %3779 = vmatprep.subr.bf16.mxu1 %v6719_v10 }
 0xe22   :  { %3766 = vmatprep.mubr.bf16.mxu0 %v5646_v0  ;;  %3809 = vmatprep.mubr.bf16.mxu1 %v5646_v0 }
 0xe24   :  { %3737 = vmatpush1.bf16.msra.mxu0 %v6724_v39  ;;  %3780 = vmatpush1.bf16.msra.mxu1 %v6727_v29 }
 0xe25   :  { %3738 = vmatprep.subr.bf16.mxu0 %v6730_v31  ;;  %3781 = vmatprep.subr.bf16.mxu1 %v6733_v4 }
 0xe28   :  { %3739 = vmatpush1.bf16.msra.mxu0 %v6736_v25  ;;  %3782 = vmatpush1.bf16.msra.mxu1 %v6739_v52 }
 0xe29   :  { %3740 = vmatprep.subr.bf16.mxu0 %v6742_v53  ;;  %3783 = vmatprep.subr.bf16.mxu1 %v6745_v57 }
 0xe2c   :  { %3741 = vmatpush1.bf16.msra.mxu0 %v6748_v19  ;;  %3784 = vmatpush1.bf16.msra.mxu1 %v6751_v60 }
 0xe2d   :  { %3742 = vmatprep.subr.bf16.mxu0 %v6754_v3  ;;  %3785 = vmatprep.subr.bf16.mxu1 %v6757_v63 }
 0xe30   :  { %3743 = vmatpush1.bf16.msra.mxu0 %v6760_v50  ;;  %3786 = vmatpush1.bf16.msra.mxu1 %v6763_v55 }
 0xe31   :  { %3744 = vmatprep.subr.bf16.mxu0 %v6766_v54  ;;  %3787 = vmatprep.subr.bf16.mxu1 %v6769_v30 }
 0xe34   :  { %3745 = vmatpush1.bf16.msra.mxu0 %v6772_v15  ;;  %3788 = vmatpush1.bf16.msra.mxu1 %v6775_v11 }
 0xe35   :  { %3746 = vmatprep.subr.bf16.mxu0 %v6778_v22  ;;  %3789 = vmatprep.subr.bf16.mxu1 %v6781_v28 }
 0xe38   :  { %3747 = vmatpush1.bf16.msra.mxu0 %v6784_v8  ;;  %3790 = vmatpush1.bf16.msra.mxu1 %v6787_v51 }
 0xe39   :  { %3748 = vmatprep.subr.bf16.mxu0 %v6790_v7  ;;  %3791 = vmatprep.subr.bf16.mxu1 %v6793_v18 }
 0xe3c   :  { %3749 = vmatpush1.bf16.msra.mxu0 %v6796_v43  ;;  %3792 = vmatpush1.bf16.msra.mxu1 %v6799_v14 }
 0xe3d   :  { %3885 = vmatprep.subr.bf16.mxu0 %v6690_v56  ;;  %3928 = vmatprep.subr.bf16.mxu1 %v6803_v9 }
 0xef2   :  { %v3617_v23 = vpop.f32.mrb[52].mxu0  ;;  %v3660_v61 = vpop.f32.mrb[52].mxu1 }
 0xef3   :  { %v4525_v27 = vadd.f32 %v3617_v23, %v6530_v58  ;;  %v3619_v1 = vpop.f32.mrb[53].mxu0  ;;  %v3662_v2 = vpop.f32.mrb[53].mxu1  ;;  %v4557_v20 = vadd.f32 %v3660_v61, %v6541_v33 }
 0xef4   :  { %v4526_v32 = vadd.f32 %v3619_v1, %v6534_v5  ;;  %v3621_v41 = vpop.f32.mrb[54].mxu0  ;;  %v3664_v42 = vpop.f32.mrb[54].mxu1  ;;  %v4558_v35 = vadd.f32 %v3662_v2, %v6546_v48 }
 0xef5   :  { %v4385_v40 = vmul.f32 -1.442695, %v4525_v27  ;;  %v4527_v6 = vadd.f32 %v3621_v41, %v6530_v58  ;;  %v3623_v44 = vpop.f32.mrb[55].mxu0  ;;  %v3666_v45 = vpop.f32.mrb[55].mxu1  ;;  %v4559_v24 = vadd.f32 %v3664_v42, %v6541_v33  ;;  %v4387_v17 = vmul.f32 -1.442695, %v4557_v20 }
 0xef6   :  { %v4386_v46 = vmul.f32 -1.442695, %v4526_v32  ;;  %v4528_v56 = vadd.f32 %v3623_v44, %v6534_v5  ;;  %v4560_v38 = vadd.f32 %v3666_v45, %v6546_v48 }
 0xef7   :  { %5337 = vpow2.f32 %v4385_v40  ;;  %v4388_v9 = vmul.f32 -1.442695, %v4527_v6  ;;  %v4390_v37 = vmul.f32 -1.442695, %v4559_v24 }
 0xef8   :  { %v4389_v47 = vmul.f32 -1.442695, %v4528_v56  ;;  %5339 = vpow2.f32 %v4386_v46 }
 0xef9   :  { %5341 = vpow2.f32 %v4388_v9 }
 0xefa   :  { %5343 = vpow2.f32 %v4389_v47 }
 0xefb   :  { %5345 = vtanh.f32 %v4558_v35 }
 0xefc   :  { %5347 = vpow2.f32 %v4387_v17 }
 0xefd   :  { %5349 = vpow2.f32 %v4390_v37 }
 0xf01   :  { %v5338_v16 = vpop.eup %5337 }
 0xf02   :  { %v3695_v12 = vadd.f32 1.0, %v5338_v16  ;;  %v5340_v26 = vpop.eup %5339 }
 0xf03   :  { %v5342_v13 = vpop.eup %5341  ;;  %v3696_v21 = vadd.f32 1.0, %v5340_v26 }
 0xf04   :  { %5351 = vrcp.f32 %v3695_v12  ;;  %v3698_v23 = vadd.f32 1.0, %v5342_v13  ;;  %v5344_v61 = vpop.eup %5343 }
 0xf05   :  { %5353 = vtanh.f32 %v4560_v38  ;;  %v3699_v27 = vadd.f32 1.0, %v5344_v61  ;;  %v5346_v1 = vpop.eup %5345 }
 0xf06   :  { %5355 = vrcp.f32 %v3696_v21  ;;  %v5348_v2 = vpop.eup %5347 }
 0xf07   :  { %5357 = vrcp.f32 %v3698_v23  ;;  %v5350_v32 = vpop.eup %5349  ;;  %v3697_v45 = vadd.f32 1.0, %v5348_v2 }
 0xf08   :  { %5359 = vrcp.f32 %v3699_v27  ;;  %v3700_v20 = vadd.f32 1.0, %v5350_v32 }
 0xf09   :  { %5361 = vrcp.f32 %v3697_v45 }
 0xf0e   :  { %v5352_v41 = vpop.eup %5351 }
 0xf0f   :  { %v5354_v42 = vpop.eup %5353  ;;  %v3717_v40 = vmul.f32 %v5352_v41, %v5346_v1 }
 0xf10   :  { %v5356_v6 = vpop.eup %5355 }
 0xf11   :  { %v5358_v44 = vpop.eup %5357  ;;  %v3715_v46 = vmul.f32 %v5356_v6, %v6815_v59 }
 0xf12   :  { %v3718_v56 = vmul.f32 %v5358_v44, %v5354_v42  ;;  %v5360_v9 = vpop.eup %5359 }
 0xf13   :  { %v6865_v47 = vadd.f32 %v3717_v40, %v3715_v46  ;;  %v3716_v24 = vmul.f32 %v5360_v9, %v6819_v34  ;;  %v5362_v17 = vpop.eup %5361 }
 0xf15   :  { %5363 = vtanh.f32 %v6865_v47  ;;  %v6869_v35 = vadd.f32 %v3718_v56, %v3716_v24 }
 0xf16   :  { %5365 = vrcp.f32 %v3700_v20 }
 0xf17   :  { %5367 = vtanh.f32 %v6869_v35 }
 0xf1f   :  { %v5364_v37 = vpop.eup %5363 }
 0xf20   :  { %v5366_v16 = vpop.eup %5365  ;;  %v3723_v59 = vmul.f32 %v5364_v37, %v5362_v17  ;;  %v4913_v37 = vld [vmem:[#allocation14] sm:$0xff]  }
 0xf21   :  { %v5368_v38 = vpop.eup %5367 }
 0xf22   :  { %v3724_v12 = vmul.f32 %v5368_v38, %v5366_v16  ;;  %v5648_v16 = vmov 0.0   ;;  %v4915_v38 = vld [vmem:[#allocation14 + $0x10] sm:$0xff]  }
 0xf24   :  { %v3733_v26 = vpack.c.bf16 %v3724_v12, %v3723_v59  ;;  %v4916_v59 = vld [vmem:[#allocation14 + $0x18] sm:$0xff]   ;;  %v4917_v12 = vld [vmem:[#allocation14 + $0x20] sm:$0xff]  }
 0xf26   :  { %3767 = vmatmul.mubr.bf16.vlgmr.msra.gmra.mrb[56].mxu0 %v3733_v26  ;;  %3810 = vmatmul.mubr.bf16.vlgmr.msra.gmra.mrb[56].mxu1 %v3733_v26  ;;  %v4918_v26 = vld [vmem:[#allocation14 + $0x28] sm:$0xff]  }
 0xf27   :  { %3886 = vmatpush1.bf16.msra.mxu0 %v6710_v62  ;;  %3929 = vmatpush1.bf16.msra.mxu1 %v6713_v36 }
 0xf28   :  { %3887 = vmatprep.subr.bf16.mxu0 %v6716_v49  ;;  %3930 = vmatprep.subr.bf16.mxu1 %v6719_v10 }
 0xf29   :  { %3917 = vmatprep.mubr.bf16.mxu0 %v5646_v0  ;;  %3960 = vmatprep.mubr.bf16.mxu1 %v5646_v0 }
 0xf2b   :  { %3888 = vmatpush1.bf16.msra.mxu0 %v6724_v39  ;;  %3931 = vmatpush1.bf16.msra.mxu1 %v6727_v29 }
 0xf2c   :  { %3889 = vmatprep.subr.bf16.mxu0 %v6730_v31  ;;  %3932 = vmatprep.subr.bf16.mxu1 %v6733_v4 }
 0xf2f   :  { %3890 = vmatpush1.bf16.msra.mxu0 %v6736_v25  ;;  %3933 = vmatpush1.bf16.msra.mxu1 %v6739_v52 }
 0xf30   :  { %3891 = vmatprep.subr.bf16.mxu0 %v6742_v53  ;;  %3934 = vmatprep.subr.bf16.mxu1 %v6745_v57 }
 0xf33   :  { %3892 = vmatpush1.bf16.msra.mxu0 %v6748_v19  ;;  %3935 = vmatpush1.bf16.msra.mxu1 %v6751_v60 }
 0xf34   :  { %3893 = vmatprep.subr.bf16.mxu0 %v6754_v3  ;;  %3936 = vmatprep.subr.bf16.mxu1 %v6757_v63 }
 0xf37   :  { %3894 = vmatpush1.bf16.msra.mxu0 %v6760_v50  ;;  %3937 = vmatpush1.bf16.msra.mxu1 %v6763_v55 }
 0xf38   :  { %3895 = vmatprep.subr.bf16.mxu0 %v6766_v54  ;;  %3938 = vmatprep.subr.bf16.mxu1 %v6769_v30 }
 0xf3b   :  { %3896 = vmatpush1.bf16.msra.mxu0 %v6772_v15  ;;  %3939 = vmatpush1.bf16.msra.mxu1 %v6775_v11 }
 0xf3c   :  { %3897 = vmatprep.subr.bf16.mxu0 %v6778_v22  ;;  %3940 = vmatprep.subr.bf16.mxu1 %v6781_v28 }
 0xf3f   :  { %3898 = vmatpush1.bf16.msra.mxu0 %v6784_v8  ;;  %3941 = vmatpush1.bf16.msra.mxu1 %v6787_v51 }
 0xf40   :  { %3899 = vmatprep.subr.bf16.mxu0 %v6790_v7  ;;  %3942 = vmatprep.subr.bf16.mxu1 %v6793_v18 }
 0xf43   :  { %3900 = vmatpush1.bf16.msra.mxu0 %v6796_v43  ;;  %3943 = vmatpush1.bf16.msra.mxu1 %v6799_v14 }
 0xf44   :  { %4421 = vmatprep.subr.bf16.mxu0 %v5648_v16 }
 0xff9   :  { %v3768_v0 = vpop.f32.mrb[56].mxu0  ;;  %v3811_v62 = vpop.f32.mrb[56].mxu1 }
 0xffa   :  { %v4529_v36 = vadd.f32 %v3768_v0, %v6530_v58  ;;  %v3770_v49 = vpop.f32.mrb[57].mxu0  ;;  %v3813_v10 = vpop.f32.mrb[57].mxu1  ;;  %v4561_v63 = vadd.f32 %v3811_v62, %v6541_v33  ;;  %v4919_v0 = vld [vmem:[#allocation14 + $0x30] sm:$0xff]   ;;  %v4920_v62 = vld [vmem:[#allocation14 + $0x38] sm:$0xff]  }
 0xffb   :  { %v4530_v39 = vadd.f32 %v3770_v49, %v6534_v5  ;;  %v3772_v29 = vpop.f32.mrb[58].mxu0  ;;  %v3815_v31 = vpop.f32.mrb[58].mxu1  ;;  %v4562_v55 = vadd.f32 %v3813_v10, %v6546_v48 }
 0xffc   :  { %v4391_v4 = vmul.f32 -1.442695, %v4529_v36  ;;  %v4531_v25 = vadd.f32 %v3772_v29, %v6530_v58  ;;  %v3774_v52 = vpop.f32.mrb[59].mxu0  ;;  %v3817_v53 = vpop.f32.mrb[59].mxu1  ;;  %v4563_v50 = vadd.f32 %v3815_v31, %v6541_v33  ;;  %v4393_v54 = vmul.f32 -1.442695, %v4561_v63 }
 0xffd   :  { %v4392_v57 = vmul.f32 -1.442695, %v4530_v39  ;;  %v4532_v19 = vadd.f32 %v3774_v52, %v6534_v5  ;;  %v4564_v11 = vadd.f32 %v3817_v53, %v6546_v48 }
 0xffe   :  { %5369 = vpow2.f32 %v4391_v4  ;;  %v4394_v60 = vmul.f32 -1.442695, %v4531_v25  ;;  %v4396_v30 = vmul.f32 -1.442695, %v4563_v50 }
 0xfff   :  { %v4395_v3 = vmul.f32 -1.442695, %v4532_v19  ;;  %5371 = vpow2.f32 %v4392_v57 }
0x1000   :  { %5373 = vpow2.f32 %v4394_v60 }
0x1001   :  { %5375 = vpow2.f32 %v4395_v3 }
0x1002   :  { %5377 = vtanh.f32 %v4562_v55 }
0x1003   :  { %5379 = vpow2.f32 %v4393_v54 }
0x1004   :  { %5381 = vpow2.f32 %v4396_v30 }
0x1008   :  { %v5370_v15 = vpop.eup %5369 }
0x1009   :  { %v3846_v22 = vadd.f32 1.0, %v5370_v15  ;;  %v5372_v28 = vpop.eup %5371 }
0x100a   :  { %v5374_v8 = vpop.eup %5373  ;;  %v3847_v51 = vadd.f32 1.0, %v5372_v28 }
0x100b   :  { %5383 = vrcp.f32 %v3846_v22  ;;  %v3849_v7 = vadd.f32 1.0, %v5374_v8  ;;  %v5376_v18 = vpop.eup %5375 }
0x100c   :  { %5385 = vtanh.f32 %v4564_v11  ;;  %v3850_v43 = vadd.f32 1.0, %v5376_v18  ;;  %v5378_v14 = vpop.eup %5377 }
0x100d   :  { %5387 = vrcp.f32 %v3847_v51  ;;  %v5380_v34 = vpop.eup %5379 }
0x100e   :  { %5389 = vrcp.f32 %v3849_v7  ;;  %v5382_v13 = vpop.eup %5381  ;;  %v3848_v2 = vadd.f32 1.0, %v5380_v34 }
0x100f   :  { %5391 = vrcp.f32 %v3850_v43  ;;  %v3851_v6 = vadd.f32 1.0, %v5382_v13 }
0x1010   :  { %5393 = vrcp.f32 %v3848_v2 }
0x1015   :  { %v5384_v21 = vpop.eup %5383 }
0x1016   :  { %v5386_v23 = vpop.eup %5385  ;;  %v3868_v61 = vmul.f32 %v5384_v21, %v5378_v14 }
0x1017   :  { %v5388_v27 = vpop.eup %5387 }
0x1018   :  { %v5390_v1 = vpop.eup %5389  ;;  %v3866_v32 = vmul.f32 %v5388_v27, %v6865_v47 }
0x1019   :  { %v3869_v41 = vmul.f32 %v5390_v1, %v5386_v23  ;;  %v5392_v42 = vpop.eup %5391 }
0x101a   :  { %v6913_v40 = vadd.f32 %v3868_v61, %v3866_v32  ;;  %v3867_v44 = vmul.f32 %v5392_v42, %v6869_v35  ;;  %v5394_v46 = vpop.eup %5393  ;;  %v4914_v35 = vld [vmem:[#allocation14 + $0x8] sm:$0xff]  }
0x101c   :  { %5395 = vtanh.f32 %v6913_v40  ;;  %v6917_v45 = vadd.f32 %v3869_v41, %v3867_v44 }
0x101d   :  { %5397 = vrcp.f32 %v3851_v6 }
0x101e   :  { %5399 = vtanh.f32 %v6917_v45 }
0x1026   :  { %v5396_v56 = vpop.eup %5395 }
0x1027   :  { %v5398_v9 = vpop.eup %5397  ;;  %v3874_v47 = vmul.f32 %v5396_v56, %v5394_v46 }
0x1028   :  { %v5400_v20 = vpop.eup %5399 }
0x1029   :  { %v3875_v24 = vmul.f32 %v5400_v20, %v5398_v9 }
0x102b   :  { %v3884_v17 = vpack.c.bf16 %v3875_v24, %v3874_v47 }
0x102d   :  { %3918 = vmatmul.mubr.bf16.vlgmr.msra.gmra.mrb[60].mxu0 %v3884_v17  ;;  %3961 = vmatmul.mubr.bf16.vlgmr.msra.gmra.mrb[60].mxu1 %v3884_v17 }
0x102e   :  { %4422 = vmatpush3.bf16.msra.mxu0 %v4913_v37  ;;  %4437 = vmatprep.mubr.msk.bf16.mxu0 %vm5649_vm0, %v5648_v16 }
0x102f   :  { %4423 = vmatprep.subr.bf16.mxu0 %v5648_v16 }
0x1032   :  { %4424 = vmatpush3.bf16.msra.mxu0 %v4914_v35 }
0x1033   :  { %4425 = vmatprep.subr.bf16.mxu0 %v5648_v16 }
0x1036   :  { %4426 = vmatpush3.bf16.msra.mxu0 %v4915_v38 }
0x1037   :  { %4427 = vmatprep.subr.bf16.mxu0 %v5648_v16 }
0x103a   :  { %4428 = vmatpush3.bf16.msra.mxu0 %v4916_v59 }
0x103b   :  { %4429 = vmatprep.subr.bf16.mxu0 %v5648_v16 }
0x103e   :  { %4430 = vmatpush3.bf16.msra.mxu0 %v4917_v12 }
0x103f   :  { %4431 = vmatprep.subr.bf16.mxu0 %v5648_v16 }
0x1042   :  { %4432 = vmatpush3.bf16.msra.mxu0 %v4918_v26 }
0x1043   :  { %4433 = vmatprep.subr.bf16.mxu0 %v5648_v16 }
0x1046   :  { %4434 = vmatpush3.bf16.msra.mxu0 %v4919_v0 }
0x1047   :  { %4435 = vmatprep.subr.bf16.mxu0 %v5648_v16 }
0x104a   :  { %4436 = vmatpush3.bf16.msra.mxu0 %v4920_v62 }
0x1100   :  { %v3919_v36 = vpop.f32.mrb[60].mxu0  ;;  %v3962_v49 = vpop.f32.mrb[60].mxu1 }
0x1101   :  { %v4533_v10 = vadd.f32 %v3919_v36, %v6530_v58  ;;  %v3921_v39 = vpop.f32.mrb[61].mxu0  ;;  %v3964_v29 = vpop.f32.mrb[61].mxu1  ;;  %v4565_v55 = vadd.f32 %v3962_v49, %v6541_v33 }
0x1102   :  { %v4534_v31 = vadd.f32 %v3921_v39, %v6534_v5  ;;  %v3923_v4 = vpop.f32.mrb[62].mxu0  ;;  %v3966_v25 = vpop.f32.mrb[62].mxu1  ;;  %v4566_v30 = vadd.f32 %v3964_v29, %v6546_v48 }
0x1103   :  { %v4397_v52 = vmul.f32 -1.442695, %v4533_v10  ;;  %v4535_v53 = vadd.f32 %v3923_v4, %v6530_v58  ;;  %v3925_v57 = vpop.f32.mrb[63].mxu0  ;;  %v3968_v19 = vpop.f32.mrb[63].mxu1  ;;  %v4567_v54 = vadd.f32 %v3966_v25, %v6541_v33  ;;  %v4399_v15 = vmul.f32 -1.442695, %v4565_v55 }
0x1104   :  { %v4398_v60 = vmul.f32 -1.442695, %v4534_v31  ;;  %v4536_v3 = vadd.f32 %v3925_v57, %v6534_v5  ;;  %v4568_v22 = vadd.f32 %v3968_v19, %v6546_v48 }
0x1105   :  { %5401 = vpow2.f32 %v4397_v52  ;;  %v4400_v63 = vmul.f32 -1.442695, %v4535_v53  ;;  %v4402_v11 = vmul.f32 -1.442695, %v4567_v54 }
0x1106   :  { %v4401_v50 = vmul.f32 -1.442695, %v4536_v3  ;;  %5403 = vpow2.f32 %v4398_v60 }
0x1107   :  { %5405 = vpow2.f32 %v4400_v63 }
0x1108   :  { %5407 = vpow2.f32 %v4401_v50 }
0x1109   :  { %5409 = vtanh.f32 %v4566_v30 }
0x110a   :  { %5411 = vpow2.f32 %v4399_v15 }
0x110b   :  { %5413 = vpow2.f32 %v4402_v11 }
0x110f   :  { %v5402_v58 = vpop.eup %5401 }
0x1110   :  { %v3997_v28 = vadd.f32 1.0, %v5402_v58  ;;  %v5404_v5 = vpop.eup %5403 }
0x1111   :  { %v5406_v8 = vpop.eup %5405  ;;  %v3998_v51 = vadd.f32 1.0, %v5404_v5 }
0x1112   :  { %5415 = vrcp.f32 %v3997_v28  ;;  %v4000_v7 = vadd.f32 1.0, %v5406_v8  ;;  %v5408_v18 = vpop.eup %5407 }
0x1113   :  { %5417 = vtanh.f32 %v4568_v22  ;;  %v4001_v33 = vadd.f32 1.0, %v5408_v18  ;;  %v5410_v43 = vpop.eup %5409 }
0x1114   :  { %5419 = vrcp.f32 %v3998_v51  ;;  %v5412_v14 = vpop.eup %5411 }
0x1115   :  { %5421 = vrcp.f32 %v4000_v7  ;;  %v5414_v34 = vpop.eup %5413  ;;  %v3999_v61 = vadd.f32 1.0, %v5412_v14 }
0x1116   :  { %5423 = vrcp.f32 %v4001_v33  ;;  %v4002_v42 = vadd.f32 1.0, %v5414_v34 }
0x1117   :  { %5425 = vrcp.f32 %v3999_v61 }
0x111c   :  { %v5416_v13 = vpop.eup %5415 }
0x111d   :  { %v5418_v21 = vpop.eup %5417  ;;  %v4019_v48 = vmul.f32 %v5416_v13, %v5410_v43 }
0x111e   :  { %v5420_v23 = vpop.eup %5419 }
0x111f   :  { %v5422_v27 = vpop.eup %5421  ;;  %v4017_v1 = vmul.f32 %v5420_v23, %v6913_v40  ;;  %v4403_v40 = vld [vmem:[%s6951_s6] ss:$0 sm:$0xff] }
0x1120   :  { %v4020_v2 = vmul.f32 %v5422_v27, %v5418_v21  ;;  %v5424_v32 = vpop.eup %5423 }
0x1121   :  { %v4021_v41 = vadd.f32 %v4019_v48, %v4017_v1  ;;  %v4018_v6 = vmul.f32 %v5424_v32, %v6917_v45  ;;  %v5426_v46 = vpop.eup %5425 }
0x1123   :  { %5427 = vtanh.f32 %v4021_v41  ;;  %v4022_v44 = vadd.f32 %v4020_v2, %v4018_v6 }
0x1124   :  { %5429 = vrcp.f32 %v4002_v42 }
0x1125   :  { %5431 = vtanh.f32 %v4022_v44 }
0x112d   :  { %v5428_v56 = vpop.eup %5427 }
0x112e   :  { %v4025_v9 = vmul.f32 %v5428_v56, %v5426_v46  ;;  %v5430_v20 = vpop.eup %5429 }
0x112f   :  { %v5432_v47 = vpop.eup %5431 }
0x1130   :  { %v4026_v24 = vmul.f32 %v5432_v47, %v5430_v20 }
0x1132   :  { %v4036_v17 = vpack.c.bf16 %v4026_v24, %v4025_v9 }
0x1134   :  { %4438 = vmatmul.mubr.bf16.vlgmr.msra.gmra.mrb[64].mxu0 %v4036_v17 }
0x1207   :  { %v4142_v37 = vpop.f32.mrb[64].mxu0 }
0x1208   :  { %v4143_v45 = vadd.f32 %v4403_v40, %v4142_v37  ;;  %v4439_v16 = vpop.f32.mrb[65].mxu0 }
0x1209   :  { %v4145_v35 = vpop.f32.mrb[66].mxu0 }
0x120a   :  { %4149 = vst [vmem:[#allocation15] sm:$0xff] %v4143_v45  ;;  %v4146_v38 = vadd.f32 %v4403_v40, %v4145_v35  ;;  %v4440_v59 = vpop.f32.mrb[67].mxu0 }
0x120c   :  { %4150 = vst [vmem:[#allocation15 + $0x8] sm:$0xff] %v4146_v38 }
0x120d   :  { %5618 = shalt.err (!%p5615_p2)
}
0x120e   :  { %s5619_s24 = scalar_lea.hbm %s6952_s7, 256 }
0x120f   :  { %p5620_p3 = scmp.ne.s32.totalorder %s6952_s7, %s5619_s24  ;;  %p5623_p4 = scmp.lt.u32.totalorder %s5619_s24, %s6952_s7 }
0x1211   :  { %p5625_p5 = pnand %p5623_p4, %p5620_p3 }
0x1213   :  { %5628 = shalt.err (!%p5625_p5)
}
0x1214   :  { %s5651_s28 = smov 128   ;;  %s5652_s0 = smov 8  }
0x1215   :  { %4162 = dma.vmem_to_hbm [thread:$0]  %s4157_s21, 256, %s6952_s7, [#allocation8], %s5651_s28, %s5651_s28, %s5652_s0  }
0x1216   :  { %5635 = dma.done.wait [#allocation8], 256  }
0x1217   :  { %5636 = vsyncadd [#allocation8], 4294967040 }
0x1218   :  { %4166 = vsyncpa [#allocation7], 1 }
0x1219   :  { %4167 = vsyncpa [#allocation10], 1 }
0x121a   :  { %4168 = vsyncpa [#allocation13], 1 }
0x121b   :  { %4169 = vsyncpa [#allocation8], 1 }

// kernel: tpu_custom_call.1
= control target key start
LH: loop header
LB: loop body
LE: loop exit
PB: predicated region body
PF: predicated region fallthrough
CT: control target
= control target key end

     0   :  { %12 = vsyncpa [#allocation7], 0  ;;  %s6945_s0 = inlined_call_operand.hbm [shape: bf16[8,16,128], index: 0, kind: input, shape index: {}]   ;;  %s6946_s1 = inlined_call_operand.hbm [shape: bf16[128,512], index: 1, kind: input, shape index: {}]   ;;  %s6947_s2 = inlined_call_operand.hbm [shape: bf16[1,128,512], index: 2, kind: input, shape index: {}]   ;;  %s6948_s3 = inlined_call_operand.hbm [shape: bf16[2,128,512], index: 3, kind: input, shape index: {}]   ;;  %s6949_s4 = inlined_call_operand.vmem [shape: f32[2,1,512], index: 4, kind: input, shape index: {}]   ;;  %s6950_s5 = inlined_call_operand.hbm [shape: bf16[128,128], index: 5, kind: input, shape index: {}]   ;;  %s6951_s6 = inlined_call_operand.vmem [shape: f32[1,128], index: 6, kind: input, shape index: {}]   ;;  %s6952_s7 = inlined_call_operand.hbm [shape: f32[16,128], index: 7, kind: output, shape index: {}]  }
   0x1   :  { %13 = vsyncpa [#allocation10], 0 }
   0x2   :  { %14 = vsyncpa [#allocation13], 0 }
   0x3   :  { %15 = vsyncpa [#allocation8], 0  ;;  %s5637_s24 = smov [#allocation9]   ;;  %s5497_s28 = scalar_lea.hbm %s6946_s1, 4096 }
   0x4   :  { %s33_s25 = sshll.u32 %s5637_s24, 4  ;;  %p5498_p0 = scmp.ne.s32.totalorder %s6946_s1, %s5497_s28  ;;  %s34_s25 = int_to_ptr.vmem [resolvable:$true] %s33_s25 }
   0x5   :  { %p5501_p1 = scmp.lt.u32.totalorder %s5497_s28, %s6946_s1 }
   0x7   :  { %p5503_p2 = pnand %p5501_p1, %p5498_p0 }
   0x9   :  { %5506 = shalt.err (!%p5503_p2)
}
   0xa   :  { %s5507_s10 = scalar_lea.vmem %s34_s25, 4096  ;;  %p5512_p4 = scmp.lt.s32.totalorder %s34_s25, %s34_s25 }
   0xb   :  { %p5508_p3 = scmp.ne.s32.totalorder %s34_s25, %s5507_s10  ;;  %p5513_p5 = scmp.lt.s32.totalorder %s5507_s10, %s5507_s10 }
   0xd   :  { %p5514_p6 = por %p5513_p5, %p5512_p4 }
   0xf   :  { %p5515_p7 = pnand %p5514_p6, %p5508_p3 }
  0x11   :  { %5518 = shalt.err (!%p5515_p7)
}
  0x12   :  { %s5638_s11 = smov 256   ;;  %s5639_s12 = smov 16  }
  0x13   :  { %39 = dma.hbm_to_vmem [thread:$0]  %s6946_s1, 4096, %s34_s25, [#allocation10], %s5638_s11, %s5638_s11, %s5639_s12  }
  0x14   :  { %s5640_s15 = smov [#allocation12]   ;;  %s5641_s17 = smov [#allocation6]  }
  0x15   :  { %s57_s16 = sshll.u32 %s5640_s15, 4  ;;  %s21_s18 = sshll.u32 %s5641_s17, 4  ;;  %s58_s16 = int_to_ptr.vmem [resolvable:$true] %s57_s16  ;;  %s22_s18 = int_to_ptr.vmem [resolvable:$true] %s21_s18 }
  0x16   :  { %s5519_s21 = scalar_lea.hbm %s6948_s3, 8192 }
  0x17   :  { %p5520_p8 = scmp.ne.s32.totalorder %s6948_s3, %s5519_s21  ;;  %p5523_p9 = scmp.lt.u32.totalorder %s5519_s21, %s6948_s3 }
  0x19   :  { %p5525_p10 = pnand %p5523_p9, %p5520_p8 }
  0x1b   :  { %5528 = shalt.err (!%p5525_p10)
}
  0x1c   :  { %s5529_s1 = scalar_lea.vmem %s58_s16, 8192  ;;  %p5534_p12 = scmp.lt.s32.totalorder %s58_s16, %s58_s16 }
  0x1d   :  { %p5530_p11 = scmp.ne.s32.totalorder %s58_s16, %s5529_s1  ;;  %p5535_p13 = scmp.lt.s32.totalorder %s5529_s1, %s5529_s1 }
  0x1f   :  { %p5536_p0 = por %p5535_p13, %p5534_p12 }
  0x21   :  { %p5537_p1 = pnand %p5536_p0, %p5530_p11 }
  0x23   :  { %5540 = shalt.err (!%p5537_p1)
}
  0x24   :  { %63 = dma.hbm_to_vmem [thread:$0]  %s6948_s3, 8192, %s58_s16, [#allocation13], %s5638_s11, %s5638_s11, %s5639_s12  }
  0x25   :  { %s5541_s30 = scalar_lea.hbm %s6945_s0, 1024 }
  0x26   :  { %p5542_p2 = scmp.ne.s32.totalorder %s6945_s0, %s5541_s30  ;;  %p5545_p3 = scmp.lt.u32.totalorder %s5541_s30, %s6945_s0 }
  0x28   :  { %p5547_p4 = pnand %p5545_p3, %p5542_p2 }
  0x2a   :  { %5550 = shalt.err (!%p5547_p4)
}
  0x2b   :  { %s5551_s14 = scalar_lea.vmem %s22_s18, 1024  ;;  %p5556_p6 = scmp.lt.s32.totalorder %s22_s18, %s22_s18 }
  0x2c   :  { %p5552_p5 = scmp.ne.s32.totalorder %s22_s18, %s5551_s14  ;;  %p5557_p7 = scmp.lt.s32.totalorder %s5551_s14, %s5551_s14 }
  0x2e   :  { %p5558_p8 = por %p5557_p7, %p5556_p6 }
  0x30   :  { %p5559_p9 = pnand %p5558_p8, %p5552_p5 }
  0x32   :  { %5562 = shalt.err (!%p5559_p9)
}
  0x33   :  { %s5642_s3 = smov 64   ;;  %s5643_s15 = smov 4  }
  0x34   :  { %27 = dma.hbm_to_vmem [thread:$0]  %s6945_s0, 1024, %s22_s18, [#allocation7], %s5642_s3, %s5642_s3, %s5643_s15  }
  0x35   :  { %s5644_s19 = smov [#allocation11]   ;;  %s5645_s21 = smov [#allocation14]  }
  0x36   :  { %s45_s20 = sshll.u32 %s5644_s19, 4  ;;  %s71_s22 = sshll.u32 %s5645_s21, 4  ;;  %s46_s20 = int_to_ptr.vmem [resolvable:$true] %s45_s20  ;;  %s72_s22 = int_to_ptr.vmem [resolvable:$true] %s71_s22 }
  0x37   :  { %s5563_s26 = scalar_lea.hbm %s6947_s2, 4096 }
  0x38   :  { %p5564_p10 = scmp.ne.s32.totalorder %s6947_s2, %s5563_s26  ;;  %p5567_p11 = scmp.lt.u32.totalorder %s5563_s26, %s6947_s2 }
  0x3a   :  { %p5569_p12 = pnand %p5567_p11, %p5564_p10 }
  0x3c   :  { %5572 = shalt.err (!%p5569_p12)
}
  0x3d   :  { %s5573_s0 = scalar_lea.vmem %s46_s20, 4096  ;;  %p5578_p0 = scmp.lt.s32.totalorder %s46_s20, %s46_s20 }
  0x3e   :  { %p5574_p13 = scmp.ne.s32.totalorder %s46_s20, %s5573_s0  ;;  %p5579_p1 = scmp.lt.s32.totalorder %s5573_s0, %s5573_s0 }
  0x40   :  { %p5580_p2 = por %p5579_p1, %p5578_p0 }
  0x42   :  { %p5581_p3 = pnand %p5580_p2, %p5574_p13 }
  0x44   :  { %5584 = shalt.err (!%p5581_p3)
}
  0x45   :  { %51 = dma.hbm_to_vmem [thread:$0]  %s6947_s2, 4096, %s46_s20, [#allocation10], %s5638_s11, %s5638_s11, %s5639_s12  }
  0x46   :  { %s5585_s9 = scalar_lea.hbm %s6950_s5, 1024 }
  0x47   :  { %p5586_p4 = scmp.ne.s32.totalorder %s6950_s5, %s5585_s9  ;;  %p5589_p5 = scmp.lt.u32.totalorder %s5585_s9, %s6950_s5 }
  0x49   :  { %p5591_p6 = pnand %p5589_p5, %p5586_p4 }
  0x4b   :  { %5594 = shalt.err (!%p5591_p6)
}
  0x4c   :  { %s5595_s17 = scalar_lea.vmem %s72_s22, 1024  ;;  %p5600_p8 = scmp.lt.s32.totalorder %s72_s22, %s72_s22 }
  0x4d   :  { %p5596_p7 = scmp.ne.s32.totalorder %s72_s22, %s5595_s17  ;;  %p5601_p9 = scmp.lt.s32.totalorder %s5595_s17, %s5595_s17 }
  0x4f   :  { %p5602_p10 = por %p5601_p9, %p5600_p8 }
  0x51   :  { %p5603_p11 = pnand %p5602_p10, %p5596_p7 }
  0x53   :  { %5606 = shalt.err (!%p5603_p11)
}
  0x54   :  { %77 = dma.hbm_to_vmem [thread:$0]  %s6950_s5, 1024, %s72_s22, [#allocation13], %s5642_s3, %s5642_s3, %s5643_s15  }
  0x55   :  { %5629 = dma.done.wait [#allocation7], 1024  }
  0x56   :  { %5630 = vsyncadd [#allocation7], 4294966272 }
  0x57   :  { %5631 = dma.done.wait [#allocation10], 8192  }
  0x58   :  { %5632 = vsyncadd [#allocation10], 4294959104 }
  0x59   :  { %5633 = dma.done.wait [#allocation13], 9216  }
  0x5a   :  { %5634 = vsyncadd [#allocation13], 4294958080  ;;  %v5646_v0 = vmov 0   ;;  %v4713_v1 = vld [vmem:[#allocation9 + $0x4] ss:$16 sps:$4 sm:$0xff]   ;;  %v4765_v43 = vld [vmem:[#allocation6 + $0x8] sm:$0xff]  }
  0x5b   :  { %418 = vmatprep.mubr.bf16.mxu0 %v5646_v0  ;;  %531 = vmatprep.mubr.bf16.mxu1 %v5646_v0  ;;  %v4715_v2 = vld [vmem:[#allocation9 + $0xc] ss:$16 sps:$4 sm:$0xff]   ;;  %v4717_v3 = vld [vmem:[#allocation9] ss:$16 sps:$4 sm:$0xff]   ;;  %v4718_v4 = vld [vmem:[#allocation9 + $0x8] ss:$16 sps:$4 sm:$0xff]  }
  0x5c   :  { %386 = vmatprep.subr.bf16.mxu0 %v4713_v1  ;;  %499 = vmatprep.subr.bf16.mxu1 %v4715_v2  ;;  %v4719_v5 = vld [vmem:[#allocation9 + $0x24] ss:$16 sps:$4 sm:$0xff]   ;;  %v4721_v6 = vld [vmem:[#allocation9 + $0x2c] ss:$16 sps:$4 sm:$0xff]   ;;  %v4723_v7 = vld [vmem:[#allocation9 + $0x20] ss:$16 sps:$4 sm:$0xff]  }
  0x5d   :  { %387 = vmatpush1.bf16.msra.mxu0 %v4717_v3  ;;  %500 = vmatpush1.bf16.msra.mxu1 %v4718_v4  ;;  %v4724_v8 = vld [vmem:[#allocation9 + $0x28] ss:$16 sps:$4 sm:$0xff]   ;;  %v4725_v9 = vld [vmem:[#allocation9 + $0x44] ss:$16 sps:$4 sm:$0xff]   ;;  %v4727_v10 = vld [vmem:[#allocation9 + $0x4c] ss:$16 sps:$4 sm:$0xff]  }
  0x5e   :  { %388 = vmatprep.subr.bf16.mxu0 %v4719_v5  ;;  %501 = vmatprep.subr.bf16.mxu1 %v4721_v6  ;;  %v4729_v11 = vld [vmem:[#allocation9 + $0x40] ss:$16 sps:$4 sm:$0xff]   ;;  %v4730_v12 = vld [vmem:[#allocation9 + $0x48] ss:$16 sps:$4 sm:$0xff]   ;;  %v4731_v13 = vld [vmem:[#allocation9 + $0x64] ss:$16 sps:$4 sm:$0xff]  }
  0x5f   :  { %v4733_v14 = vld [vmem:[#allocation9 + $0x6c] ss:$16 sps:$4 sm:$0xff]   ;;  %v4735_v15 = vld [vmem:[#allocation9 + $0x60] ss:$16 sps:$4 sm:$0xff]   ;;  %v4736_v16 = vld [vmem:[#allocation9 + $0x68] ss:$16 sps:$4 sm:$0xff]  }
  0x60   :  { %v4737_v17 = vld [vmem:[#allocation9 + $0x84] ss:$16 sps:$4 sm:$0xff]   ;;  %v4739_v18 = vld [vmem:[#allocation9 + $0x8c] ss:$16 sps:$4 sm:$0xff]   ;;  %v4741_v19 = vld [vmem:[#allocation9 + $0x80] ss:$16 sps:$4 sm:$0xff]  }
  0x61   :  { %389 = vmatpush1.bf16.msra.mxu0 %v4723_v7  ;;  %502 = vmatpush1.bf16.msra.mxu1 %v4724_v8  ;;  %v4742_v20 = vld [vmem:[#allocation9 + $0x88] ss:$16 sps:$4 sm:$0xff]   ;;  %v4743_v21 = vld [vmem:[#allocation9 + $0xa4] ss:$16 sps:$4 sm:$0xff]   ;;  %v4745_v22 = vld [vmem:[#allocation9 + $0xac] ss:$16 sps:$4 sm:$0xff]  }
  0x62   :  { %390 = vmatprep.subr.bf16.mxu0 %v4725_v9  ;;  %503 = vmatprep.subr.bf16.mxu1 %v4727_v10  ;;  %v4747_v23 = vld [vmem:[#allocation9 + $0xa0] ss:$16 sps:$4 sm:$0xff]   ;;  %v4748_v24 = vld [vmem:[#allocation9 + $0xa8] ss:$16 sps:$4 sm:$0xff]   ;;  %v4749_v25 = vld [vmem:[#allocation9 + $0xc4] ss:$16 sps:$4 sm:$0xff]  }
  0x63   :  { %v4751_v26 = vld [vmem:[#allocation9 + $0xcc] ss:$16 sps:$4 sm:$0xff]   ;;  %v4753_v27 = vld [vmem:[#allocation9 + $0xc0] ss:$16 sps:$4 sm:$0xff]   ;;  %v4754_v28 = vld [vmem:[#allocation9 + $0xc8] ss:$16 sps:$4 sm:$0xff]  }
  0x64   :  { %v4755_v29 = vld [vmem:[#allocation9 + $0xe4] ss:$16 sps:$4 sm:$0xff]   ;;  %v4757_v30 = vld [vmem:[#allocation9 + $0xec] ss:$16 sps:$4 sm:$0xff]   ;;  %v4759_v31 = vld [vmem:[#allocation9 + $0xe0] ss:$16 sps:$4 sm:$0xff]  }
  0x65   :  { %391 = vmatpush1.bf16.msra.mxu0 %v4729_v11  ;;  %504 = vmatpush1.bf16.msra.mxu1 %v4730_v12  ;;  %v4760_v32 = vld [vmem:[#allocation9 + $0xe8] ss:$16 sps:$4 sm:$0xff]   ;;  %v5770_v33 = vld [vmem:[#allocation12 + $0x4] ss:$16 sps:$4 sm:$0xff]   ;;  %v5772_v34 = vld [vmem:[#allocation12 + $0xc] ss:$16 sps:$4 sm:$0xff]   ;;  %v158_v11 = vlaneseq }
  0x66   :  { %392 = vmatprep.subr.bf16.mxu0 %v4731_v13  ;;  %505 = vmatprep.subr.bf16.mxu1 %v4733_v14  ;;  %v4761_v35 = vld [vmem:[#allocation6] sm:$0xff]   ;;  %v5780_v38 = vld [vmem:[#allocation12 + $0x8] ss:$16 sps:$4 sm:$0xff]   ;;  %v5782_v39 = vld [vmem:[#allocation12 + $0x2c] ss:$16 sps:$4 sm:$0xff]   ;;  %v5647_v10 = vmov 0.0|0.0  }
  0x67   :  { %v5774_v36 = vld [vmem:[#allocation12] ss:$16 sps:$4 sm:$0xff]   ;;  %v5777_v37 = vld [vmem:[#allocation12 + $0x24] ss:$16 sps:$4 sm:$0xff]   ;;  %v5793_v42 = vld [vmem:[#allocation12 + $0x28] ss:$16 sps:$4 sm:$0xff]  }
  0x68   :  { %v5786_v40 = vld [vmem:[#allocation12 + $0x20] ss:$16 sps:$4 sm:$0xff]   ;;  %v5790_v41 = vld [vmem:[#allocation12 + $0x44] ss:$16 sps:$4 sm:$0xff]   ;;  %v5802_v46 = vld [vmem:[#allocation12 + $0x4c] ss:$16 sps:$4 sm:$0xff]  }
  0x69   :  { %393 = vmatpush1.bf16.msra.mxu0 %v4735_v15  ;;  %506 = vmatpush1.bf16.msra.mxu1 %v4736_v16  ;;  %v5797_v44 = vld [vmem:[#allocation12 + $0x40] ss:$16 sps:$4 sm:$0xff]   ;;  %v5799_v45 = vld [vmem:[#allocation12 + $0x64] ss:$16 sps:$4 sm:$0xff]   ;;  %v5805_v47 = vld [vmem:[#allocation12 + $0x48] ss:$16 sps:$4 sm:$0xff]  }
  0x6a   :  { %394 = vmatprep.subr.bf16.mxu0 %v4737_v17  ;;  %507 = vmatprep.subr.bf16.mxu1 %v4739_v18  ;;  %v5807_v48 = vld [vmem:[#allocation12 + $0x6c] ss:$16 sps:$4 sm:$0xff]   ;;  %v5812_v49 = vld [vmem:[#allocation12 + $0x60] ss:$16 sps:$4 sm:$0xff]   ;;  %v5815_v50 = vld [vmem:[#allocation12 + $0x84] ss:$16 sps:$4 sm:$0xff]  }
  0x6b   :  { %v5819_v51 = vld [vmem:[#allocation12 + $0x68] ss:$16 sps:$4 sm:$0xff]   ;;  %v4771_v52 = vld [vmem:[#allocation6 + $0x10] sm:$0xff]   ;;  %v5825_v54 = vld [vmem:[#allocation12 + $0x8c] ss:$16 sps:$4 sm:$0xff]   ;;  %v5920_v12 = vshrl.u32 %v158_v11, 7 }
  0x6c   :  { %v5822_v53 = vld [vmem:[#allocation12 + $0x80] ss:$16 sps:$4 sm:$0xff]   ;;  %v5828_v55 = vld [vmem:[#allocation12 + $0xa4] ss:$16 sps:$4 sm:$0xff]   ;;  %v5831_v56 = vld [vmem:[#allocation12 + $0x88] ss:$16 sps:$4 sm:$0xff]  }
  0x6d   :  { %395 = vmatpush1.bf16.msra.mxu0 %v4741_v19  ;;  %508 = vmatpush1.bf16.msra.mxu1 %v4742_v20  ;;  %v5833_v57 = vld [vmem:[#allocation12 + $0xac] ss:$16 sps:$4 sm:$0xff]   ;;  %v5835_v58 = vld [vmem:[#allocation12 + $0xa0] ss:$16 sps:$4 sm:$0xff]   ;;  %v5839_v59 = vld [vmem:[#allocation12 + $0xc4] ss:$16 sps:$4 sm:$0xff]  }
  0x6e   :  { %396 = vmatprep.subr.bf16.mxu0 %v4743_v21  ;;  %509 = vmatprep.subr.bf16.mxu1 %v4745_v22  ;;  %v5841_v60 = vld [vmem:[#allocation12 + $0xa8] ss:$16 sps:$4 sm:$0xff]   ;;  %v5847_v62 = vld [vmem:[#allocation12 + $0xc0] ss:$16 sps:$4 sm:$0xff]   ;;  %v5850_v63 = vld [vmem:[#allocation12 + $0xcc] ss:$16 sps:$4 sm:$0xff]  }
  0x6f   :  { %v4778_v61 = vld [vmem:[#allocation6 + $0x18] sm:$0xff]   ;;  %v5852_v1 = vld [vmem:[#allocation12 + $0xe4] ss:$16 sps:$4 sm:$0xff]   ;;  %v5861_v4 = vld [vmem:[#allocation12 + $0xe0] ss:$16 sps:$4 sm:$0xff]   ;;  %v6956_v13 = vsub.s32 0, %v5920_v12 }
  0x70   :  { %v5854_v2 = vld [vmem:[#allocation12 + $0xc8] ss:$16 sps:$4 sm:$0xff]   ;;  %v5857_v3 = vld [vmem:[#allocation12 + $0xec] ss:$16 sps:$4 sm:$0xff]   ;;  %v4785_v6 = vld [vmem:[#allocation6 + $0x20] sm:$0xff]   ;;  %v6955_v15 = vsub.s32 1, %v5920_v12 }
  0x71   :  { %397 = vmatpush1.bf16.msra.mxu0 %v4747_v23  ;;  %510 = vmatpush1.bf16.msra.mxu1 %v4748_v24  ;;  %v5865_v5 = vld [vmem:[#allocation12 + $0xe8] ss:$16 sps:$4 sm:$0xff]   ;;  %v4799_v8 = vld [vmem:[#allocation6 + $0x30] sm:$0xff]   ;;  %v156_v14 = vld [vmem:[%s6949_s4] sm:$0xf]  ;;  %v6954_v19 = vsub.s32 2, %v5920_v12 }
  0x72   :  { %398 = vmatprep.subr.bf16.mxu0 %v4749_v25  ;;  %511 = vmatprep.subr.bf16.mxu1 %v4751_v26  ;;  %v4792_v7 = vld [vmem:[#allocation6 + $0x28] sm:$0xff]   ;;  %v4807_v9 = vld [vmem:[#allocation6 + $0x38] sm:$0xff]   ;;  %v5929_v16 = vrot.slane %v156_v14, %v6956_v13  ;;  %v5933_v17 = vrot.slane %v156_v14, %v6955_v15  ;;  %vm5649_vm0 = vmmov 0   ;;  %s5650_s20 = smov [#allocation15]  }
  0x73   :  { %s4156_s21 = sshll.u32 %s5650_s20, 4  ;;  %s4157_s21 = int_to_ptr.vmem [resolvable:$true] %s4156_s21 }
  0x74   :  { %s5607_s22 = scalar_lea.vmem %s4157_s21, 256  ;;  %p5612_p13 = scmp.lt.s32.totalorder %s4157_s21, %s4157_s21 }
  0x75   :  { %399 = vmatpush1.bf16.msra.mxu0 %v4753_v27  ;;  %512 = vmatpush1.bf16.msra.mxu1 %v4754_v28  ;;  %v6953_v28 = vsub.s32 3, %v5920_v12  ;;  %p5608_p12 = scmp.ne.s32.totalorder %s4157_s21, %s5607_s22  ;;  %p5613_p0 = scmp.lt.s32.totalorder %s5607_s22, %s5607_s22 }
  0x76   :  { %400 = vmatprep.subr.bf16.mxu0 %v4755_v29  ;;  %513 = vmatprep.subr.bf16.mxu1 %v4757_v30 }
  0x77   :  { %p5614_p1 = por %p5613_p0, %p5612_p13 }
  0x79   :  { %401 = vmatpush1.bf16.msra.mxu0 %v4759_v31  ;;  %514 = vmatpush1.bf16.msra.mxu1 %v4760_v32  ;;  %v5942_v32 = vrot.slane %v156_v14, %v6954_v19  ;;  %p5615_p2 = pnand %p5614_p1, %p5608_p12 }
  0x7a   :  { %881 = vmatprep.subr.bf16.mxu0 %v5770_v33  ;;  %924 = vmatprep.subr.bf16.mxu1 %v5772_v34 }
  0x7c   :  { %419 = vmatmul.mubr.bf16.vlgmr.msra.gmra.mrb[0].mxu0 %v4761_v35  ;;  %532 = vmatmul.mubr.bf16.vlgmr.msra.gmra.mrb[0].mxu1 %v4761_v35 }
  0x7d   :  { %882 = vmatpush1.bf16.msra.mxu0 %v5774_v36  ;;  %428 = vmatprep.mubr.bf16.mxu0 %v5646_v0 }
  0x7e   :  { %541 = vmatprep.mubr.bf16.mxu1 %v5646_v0  ;;  %883 = vmatprep.subr.bf16.mxu0 %v5777_v37 }
  0x7f   :  { %925 = vmatpush1.bf16.msra.mxu1 %v5780_v38 }
  0x80   :  { %926 = vmatprep.subr.bf16.mxu1 %v5782_v39 }
  0x81   :  { %884 = vmatpush1.bf16.msra.mxu0 %v5786_v40 }
  0x82   :  { %885 = vmatprep.subr.bf16.mxu0 %v5790_v41 }
  0x83   :  { %927 = vmatpush1.bf16.msra.mxu1 %v5793_v42 }
  0x84   :  { %429 = vmatmul.mubr.bf16.gmra.mrb[4].mxu0 %v4765_v43  ;;  %542 = vmatmul.mubr.bf16.gmra.mrb[4].mxu1 %v4765_v43 }
  0x85   :  { %438 = vmatprep.mubr.bf16.mxu0 %v5646_v0  ;;  %551 = vmatprep.mubr.bf16.mxu1 %v5646_v0 }
  0x86   :  { %886 = vmatpush1.bf16.msra.mxu0 %v5797_v44  ;;  %928 = vmatprep.subr.bf16.mxu1 %v5802_v46 }
  0x87   :  { %887 = vmatprep.subr.bf16.mxu0 %v5799_v45  ;;  %929 = vmatpush1.bf16.msra.mxu1 %v5805_v47 }
  0x88   :  { %930 = vmatprep.subr.bf16.mxu1 %v5807_v48 }
  0x8a   :  { %888 = vmatpush1.bf16.msra.mxu0 %v5812_v49 }
  0x8b   :  { %889 = vmatprep.subr.bf16.mxu0 %v5815_v50  ;;  %931 = vmatpush1.bf16.msra.mxu1 %v5819_v51 }
  0x8c   :  { %439 = vmatmul.mubr.bf16.gmra.mrb[8].mxu0 %v4771_v52  ;;  %552 = vmatmul.mubr.bf16.gmra.mrb[8].mxu1 %v4771_v52 }
  0x8d   :  { %448 = vmatprep.mubr.bf16.mxu0 %v5646_v0  ;;  %561 = vmatprep.mubr.bf16.mxu1 %v5646_v0 }
  0x8e   :  { %890 = vmatpush1.bf16.msra.mxu0 %v5822_v53  ;;  %932 = vmatprep.subr.bf16.mxu1 %v5825_v54 }
  0x8f   :  { %891 = vmatprep.subr.bf16.mxu0 %v5828_v55  ;;  %933 = vmatpush1.bf16.msra.mxu1 %v5831_v56 }
  0x90   :  { %934 = vmatprep.subr.bf16.mxu1 %v5833_v57 }
  0x92   :  { %892 = vmatpush1.bf16.msra.mxu0 %v5835_v58 }
  0x93   :  { %893 = vmatprep.subr.bf16.mxu0 %v5839_v59  ;;  %935 = vmatpush1.bf16.msra.mxu1 %v5841_v60 }
  0x94   :  { %449 = vmatmul.mubr.bf16.gmra.mrb[12].mxu0 %v4778_v61  ;;  %562 = vmatmul.mubr.bf16.gmra.mrb[12].mxu1 %v4778_v61 }
  0x95   :  { %458 = vmatprep.mubr.bf16.mxu0 %v5646_v0  ;;  %571 = vmatprep.mubr.bf16.mxu1 %v5646_v0 }
  0x96   :  { %894 = vmatpush1.bf16.msra.mxu0 %v5847_v62  ;;  %936 = vmatprep.subr.bf16.mxu1 %v5850_v63 }
  0x97   :  { %895 = vmatprep.subr.bf16.mxu0 %v5852_v1  ;;  %937 = vmatpush1.bf16.msra.mxu1 %v5854_v2 }
  0x98   :  { %938 = vmatprep.subr.bf16.mxu1 %v5857_v3 }
  0x9a   :  { %896 = vmatpush1.bf16.msra.mxu0 %v5861_v4 }
  0x9b   :  { %939 = vmatpush1.bf16.msra.mxu1 %v5865_v5  ;;  %1034 = vmatprep.subr.bf16.mxu0 %v5770_v33 }
  0x9c   :  { %459 = vmatmul.mubr.bf16.gmra.mrb[16].mxu0 %v4785_v6  ;;  %572 = vmatmul.mubr.bf16.gmra.mrb[16].mxu1 %v4785_v6  ;;  %v5947_v6 = vrot.slane %v156_v14, %v6953_v28 }
  0x9d   :  { %468 = vmatprep.mubr.bf16.mxu0 %v5646_v0  ;;  %581 = vmatprep.mubr.bf16.mxu1 %v5646_v0 }
  0x9e   :  { %1077 = vmatprep.subr.bf16.mxu1 %v5772_v34 }
  0xa4   :  { %469 = vmatmul.mubr.bf16.gmra.mrb[20].mxu0 %v4792_v7  ;;  %582 = vmatmul.mubr.bf16.gmra.mrb[20].mxu1 %v4792_v7 }
  0xa5   :  { %478 = vmatprep.mubr.bf16.mxu0 %v5646_v0  ;;  %591 = vmatprep.mubr.bf16.mxu1 %v5646_v0 }
  0xac   :  { %479 = vmatmul.mubr.bf16.gmra.mrb[24].mxu0 %v4799_v8  ;;  %592 = vmatmul.mubr.bf16.gmra.mrb[24].mxu1 %v4799_v8 }
  0xad   :  { %488 = vmatprep.mubr.bf16.mxu0 %v5646_v0  ;;  %601 = vmatprep.mubr.bf16.mxu1 %v5646_v0 }
  0xb4   :  { %489 = vmatmul.mubr.bf16.gmra.mrb[28].mxu0 %v4807_v9  ;;  %602 = vmatmul.mubr.bf16.gmra.mrb[28].mxu1 %v4807_v9 }
  0xb5   :  { %913 = vmatprep.mubr.bf16.mxu0 %v5646_v0  ;;  %956 = vmatprep.mubr.bf16.mxu1 %v5646_v0 }
  0xbc   :  { %914 = vmatmul.mubr.bf16.vlgmr.msra.gmra.mrb[0].mxu0 %v5647_v10  ;;  %957 = vmatmul.mubr.bf16.vlgmr.msra.gmra.mrb[0].mxu1 %v5647_v10 }
  0xbd   :  { %1035 = vmatpush1.bf16.msra.mxu0 %v5774_v36  ;;  %1078 = vmatpush1.bf16.msra.mxu1 %v5780_v38 }
  0xbe   :  { %1036 = vmatprep.subr.bf16.mxu0 %v5777_v37  ;;  %1079 = vmatprep.subr.bf16.mxu1 %v5782_v39 }
  0xbf   :  { %1066 = vmatprep.mubr.bf16.mxu0 %v5646_v0  ;;  %1109 = vmatprep.mubr.bf16.mxu1 %v5646_v0 }
  0xc1   :  { %1037 = vmatpush1.bf16.msra.mxu0 %v5786_v40  ;;  %1080 = vmatpush1.bf16.msra.mxu1 %v5793_v42 }
  0xc2   :  { %1038 = vmatprep.subr.bf16.mxu0 %v5790_v41  ;;  %1081 = vmatprep.subr.bf16.mxu1 %v5802_v46 }
  0xc5   :  { %1039 = vmatpush1.bf16.msra.mxu0 %v5797_v44  ;;  %1082 = vmatpush1.bf16.msra.mxu1 %v5805_v47 }
  0xc6   :  { %1040 = vmatprep.subr.bf16.mxu0 %v5799_v45  ;;  %1083 = vmatprep.subr.bf16.mxu1 %v5807_v48 }
  0xc9   :  { %1041 = vmatpush1.bf16.msra.mxu0 %v5812_v49  ;;  %1084 = vmatpush1.bf16.msra.mxu1 %v5819_v51 }
  0xca   :  { %1042 = vmatprep.subr.bf16.mxu0 %v5815_v50  ;;  %1085 = vmatprep.subr.bf16.mxu1 %v5825_v54 }
  0xcd   :  { %1043 = vmatpush1.bf16.msra.mxu0 %v5822_v53  ;;  %1086 = vmatpush1.bf16.msra.mxu1 %v5831_v56 }
  0xce   :  { %1044 = vmatprep.subr.bf16.mxu0 %v5828_v55  ;;  %1087 = vmatprep.subr.bf16.mxu1 %v5833_v57 }
  0xd1   :  { %1045 = vmatpush1.bf16.msra.mxu0 %v5835_v58  ;;  %1088 = vmatpush1.bf16.msra.mxu1 %v5841_v60 }
  0xd2   :  { %1046 = vmatprep.subr.bf16.mxu0 %v5839_v59  ;;  %1089 = vmatprep.subr.bf16.mxu1 %v5850_v63 }
  0xd5   :  { %1047 = vmatpush1.bf16.msra.mxu0 %v5847_v62  ;;  %1090 = vmatpush1.bf16.msra.mxu1 %v5854_v2 }
  0xd6   :  { %1048 = vmatprep.subr.bf16.mxu0 %v5852_v1  ;;  %1091 = vmatprep.subr.bf16.mxu1 %v5857_v3 }
  0xd9   :  { %1049 = vmatpush1.bf16.msra.mxu0 %v5861_v4  ;;  %1092 = vmatpush1.bf16.msra.mxu1 %v5865_v5 }
  0xda   :  { %1188 = vmatprep.subr.bf16.mxu0 %v5770_v33  ;;  %1231 = vmatprep.subr.bf16.mxu1 %v5772_v34 }
 0x18f   :  { %v915_v18 = vpop.f32.mrb[0].mxu0  ;;  %v958_v20 = vpop.f32.mrb[0].mxu1 }
 0x190   :  { %v4441_v21 = vadd.f32 %v915_v18, %v5929_v16  ;;  %v917_v22 = vpop.f32.mrb[1].mxu0  ;;  %v960_v23 = vpop.f32.mrb[1].mxu1  ;;  %v4473_v7 = vadd.f32 %v958_v20, %v5942_v32 }
 0x191   :  { %v4442_v24 = vadd.f32 %v917_v22, %v5933_v17  ;;  %v919_v25 = vpop.f32.mrb[2].mxu0  ;;  %v962_v26 = vpop.f32.mrb[2].mxu1  ;;  %v4474_v9 = vadd.f32 %v960_v23, %v5947_v6 }
 0x192   :  { %v4242_v27 = vmul.f32 -1.442695, %v4441_v21  ;;  %v4443_v29 = vadd.f32 %v919_v25, %v5929_v16  ;;  %v921_v30 = vpop.f32.mrb[3].mxu0  ;;  %v964_v31 = vpop.f32.mrb[3].mxu1  ;;  %v4475_v8 = vadd.f32 %v962_v26, %v5942_v32  ;;  %v4244_v11 = vmul.f32 -1.442695, %v4473_v7 }
 0x193   :  { %v4243_v35 = vmul.f32 -1.442695, %v4442_v24  ;;  %v4444_v43 = vadd.f32 %v921_v30, %v5933_v17  ;;  %v4476_v22 = vadd.f32 %v964_v31, %v5947_v6 }
 0x194   :  { %4921 = vpow2.f32 %v4242_v27  ;;  %v4245_v52 = vmul.f32 -1.442695, %v4443_v29  ;;  %v4247_v18 = vmul.f32 -1.442695, %v4475_v8 }
 0x195   :  { %v4246_v61 = vmul.f32 -1.442695, %v4444_v43  ;;  %4923 = vpow2.f32 %v4243_v35 }
 0x196   :  { %4925 = vpow2.f32 %v4245_v52 }
 0x197   :  { %4927 = vpow2.f32 %v4246_v61 }
 0x198   :  { %4929 = vtanh.f32 %v4474_v9 }
 0x199   :  { %4931 = vpow2.f32 %v4244_v11 }
 0x19a   :  { %4933 = vpow2.f32 %v4247_v18 }
 0x19e   :  { %v4922_v21 = vpop.eup %4921 }
 0x19f   :  { %v993_v24 = vadd.f32 1.0, %v4922_v21  ;;  %v4924_v25 = vpop.eup %4923 }
 0x1a0   :  { %v4926_v14 = vpop.eup %4925  ;;  %v994_v27 = vadd.f32 1.0, %v4924_v25 }
 0x1a1   :  { %4935 = vrcp.f32 %v993_v24  ;;  %v996_v20 = vadd.f32 1.0, %v4926_v14  ;;  %v4928_v29 = vpop.eup %4927 }
 0x1a2   :  { %4937 = vtanh.f32 %v4476_v22  ;;  %v997_v26 = vadd.f32 1.0, %v4928_v29  ;;  %v4930_v23 = vpop.eup %4929 }
 0x1a3   :  { %4939 = vrcp.f32 %v994_v27  ;;  %v4932_v30 = vpop.eup %4931 }
 0x1a4   :  { %4941 = vrcp.f32 %v996_v20  ;;  %v4934_v35 = vpop.eup %4933  ;;  %v995_v8 = vadd.f32 1.0, %v4932_v30 }
 0x1a5   :  { %4943 = vrcp.f32 %v997_v26  ;;  %v998_v22 = vadd.f32 1.0, %v4934_v35 }
 0x1a6   :  { %4945 = vrcp.f32 %v995_v8 }
 0x1ab   :  { %v4936_v43 = vpop.eup %4935 }
 0x1ac   :  { %v4938_v52 = vpop.eup %4937  ;;  %v1015_v31 = vmul.f32 %v4936_v43, %v4930_v23 }
 0x1ad   :  { %v4940_v61 = vpop.eup %4939 }
 0x1ae   :  { %v4942_v7 = vpop.eup %4941  ;;  %v1013_v9 = vmul.f32 0.0, %v4940_v61 }
 0x1af   :  { %v1016_v11 = vmul.f32 %v4942_v7, %v4938_v52  ;;  %v4944_v18 = vpop.eup %4943 }
 0x1b0   :  { %v5953_v21 = vadd.f32 %v1015_v31, %v1013_v9  ;;  %v1014_v24 = vmul.f32 0.0, %v4944_v18  ;;  %v4946_v14 = vpop.eup %4945 }
 0x1b2   :  { %4947 = vtanh.f32 %v5953_v21  ;;  %v5956_v25 = vadd.f32 %v1016_v11, %v1014_v24 }
 0x1b3   :  { %4949 = vrcp.f32 %v998_v22 }
 0x1b4   :  { %4951 = vtanh.f32 %v5956_v25 }
 0x1bc   :  { %v4948_v27 = vpop.eup %4947 }
 0x1bd   :  { %v4950_v20 = vpop.eup %4949  ;;  %v1021_v26 = vmul.f32 %v4948_v27, %v4946_v14 }
 0x1be   :  { %v4952_v29 = vpop.eup %4951 }
 0x1bf   :  { %v1022_v23 = vmul.f32 %v4952_v29, %v4950_v20 }
 0x1c1   :  { %v5959_v30 = vpack.c.bf16 %v1022_v23, %v1021_v26 }
 0x1c3   :  { %1067 = vmatmul.mubr.bf16.vlgmr.msra.gmra.mrb[4].mxu0 %v5959_v30  ;;  %1110 = vmatmul.mubr.bf16.vlgmr.msra.gmra.mrb[4].mxu1 %v5959_v30 }
 0x1c4   :  { %1189 = vmatpush1.bf16.msra.mxu0 %v5774_v36  ;;  %1232 = vmatpush1.bf16.msra.mxu1 %v5780_v38 }
 0x1c5   :  { %1190 = vmatprep.subr.bf16.mxu0 %v5777_v37  ;;  %1233 = vmatprep.subr.bf16.mxu1 %v5782_v39 }
 0x1c6   :  { %1220 = vmatprep.mubr.bf16.mxu0 %v5646_v0  ;;  %1263 = vmatprep.mubr.bf16.mxu1 %v5646_v0 }
 0x1c8   :  { %1191 = vmatpush1.bf16.msra.mxu0 %v5786_v40  ;;  %1234 = vmatpush1.bf16.msra.mxu1 %v5793_v42 }
 0x1c9   :  { %1192 = vmatprep.subr.bf16.mxu0 %v5790_v41  ;;  %1235 = vmatprep.subr.bf16.mxu1 %v5802_v46 }
 0x1cc   :  { %1193 = vmatpush1.bf16.msra.mxu0 %v5797_v44  ;;  %1236 = vmatpush1.bf16.msra.mxu1 %v5805_v47 }
 0x1cd   :  { %1194 = vmatprep.subr.bf16.mxu0 %v5799_v45  ;;  %1237 = vmatprep.subr.bf16.mxu1 %v5807_v48 }
 0x1d0   :  { %1195 = vmatpush1.bf16.msra.mxu0 %v5812_v49  ;;  %1238 = vmatpush1.bf16.msra.mxu1 %v5819_v51 }
 0x1d1   :  { %1196 = vmatprep.subr.bf16.mxu0 %v5815_v50  ;;  %1239 = vmatprep.subr.bf16.mxu1 %v5825_v54 }
 0x1d4   :  { %1197 = vmatpush1.bf16.msra.mxu0 %v5822_v53  ;;  %1240 = vmatpush1.bf16.msra.mxu1 %v5831_v56 }
 0x1d5   :  { %1198 = vmatprep.subr.bf16.mxu0 %v5828_v55  ;;  %1241 = vmatprep.subr.bf16.mxu1 %v5833_v57 }
 0x1d8   :  { %1199 = vmatpush1.bf16.msra.mxu0 %v5835_v58  ;;  %1242 = vmatpush1.bf16.msra.mxu1 %v5841_v60 }
 0x1d9   :  { %1200 = vmatprep.subr.bf16.mxu0 %v5839_v59  ;;  %1243 = vmatprep.subr.bf16.mxu1 %v5850_v63 }
 0x1dc   :  { %1201 = vmatpush1.bf16.msra.mxu0 %v5847_v62  ;;  %1244 = vmatpush1.bf16.msra.mxu1 %v5854_v2 }
 0x1dd   :  { %1202 = vmatprep.subr.bf16.mxu0 %v5852_v1  ;;  %1245 = vmatprep.subr.bf16.mxu1 %v5857_v3 }
 0x1e0   :  { %1203 = vmatpush1.bf16.msra.mxu0 %v5861_v4  ;;  %1246 = vmatpush1.bf16.msra.mxu1 %v5865_v5 }
 0x1e1   :  { %1342 = vmatprep.subr.bf16.mxu0 %v5770_v33  ;;  %1385 = vmatprep.subr.bf16.mxu1 %v5772_v34 }
 0x296   :  { %v1068_v35 = vpop.f32.mrb[4].mxu0  ;;  %v1111_v43 = vpop.f32.mrb[4].mxu1 }
 0x297   :  { %v4445_v52 = vadd.f32 %v1068_v35, %v5929_v16  ;;  %v1070_v31 = vpop.f32.mrb[5].mxu0  ;;  %v1113_v61 = vpop.f32.mrb[5].mxu1  ;;  %v4477_v26 = vadd.f32 %v1111_v43, %v5942_v32 }
 0x298   :  { %v4446_v7 = vadd.f32 %v1070_v31, %v5933_v17  ;;  %v1072_v8 = vpop.f32.mrb[6].mxu0  ;;  %v1115_v9 = vpop.f32.mrb[6].mxu1  ;;  %v4478_v35 = vadd.f32 %v1113_v61, %v5947_v6 }
 0x299   :  { %v4248_v11 = vmul.f32 -1.442695, %v4445_v52  ;;  %v4447_v18 = vadd.f32 %v1072_v8, %v5929_v16  ;;  %v1074_v22 = vpop.f32.mrb[7].mxu0  ;;  %v1117_v24 = vpop.f32.mrb[7].mxu1  ;;  %v4479_v23 = vadd.f32 %v1115_v9, %v5942_v32  ;;  %v4250_v52 = vmul.f32 -1.442695, %v4477_v26 }
 0x29a   :  { %v4249_v14 = vmul.f32 -1.442695, %v4446_v7  ;;  %v4448_v27 = vadd.f32 %v1074_v22, %v5933_v17  ;;  %v4480_v7 = vadd.f32 %v1117_v24, %v5947_v6 }
 0x29b   :  { %4953 = vpow2.f32 %v4248_v11  ;;  %v4251_v20 = vmul.f32 -1.442695, %v4447_v18  ;;  %v4253_v31 = vmul.f32 -1.442695, %v4479_v23 }
 0x29c   :  { %v4252_v29 = vmul.f32 -1.442695, %v4448_v27  ;;  %4955 = vpow2.f32 %v4249_v14 }
 0x29d   :  { %4957 = vpow2.f32 %v4251_v20 }
 0x29e   :  { %4959 = vpow2.f32 %v4252_v29 }
 0x29f   :  { %4961 = vtanh.f32 %v4478_v35 }
 0x2a0   :  { %4963 = vpow2.f32 %v4250_v52 }
 0x2a1   :  { %4965 = vpow2.f32 %v4253_v31 }
 0x2a5   :  { %v4954_v8 = vpop.eup %4953 }
 0x2a6   :  { %v1146_v28 = vadd.f32 1.0, %v4954_v8  ;;  %v4956_v11 = vpop.eup %4955 }
 0x2a7   :  { %v4958_v18 = vpop.eup %4957  ;;  %v1147_v22 = vadd.f32 1.0, %v4956_v11 }
 0x2a8   :  { %4967 = vrcp.f32 %v1146_v28  ;;  %v1149_v43 = vadd.f32 1.0, %v4958_v18  ;;  %v4960_v14 = vpop.eup %4959 }
 0x2a9   :  { %4969 = vtanh.f32 %v4480_v7  ;;  %v1150_v9 = vadd.f32 1.0, %v4960_v14  ;;  %v4962_v61 = vpop.eup %4961 }
 0x2aa   :  { %4971 = vrcp.f32 %v1147_v22  ;;  %v4964_v27 = vpop.eup %4963 }
 0x2ab   :  { %4973 = vrcp.f32 %v1149_v43  ;;  %v4966_v20 = vpop.eup %4965  ;;  %v1148_v52 = vadd.f32 1.0, %v4964_v27 }
 0x2ac   :  { %4975 = vrcp.f32 %v1150_v9  ;;  %v1151_v7 = vadd.f32 1.0, %v4966_v20 }
 0x2ad   :  { %4977 = vrcp.f32 %v1148_v52 }
 0x2b2   :  { %v4968_v29 = vpop.eup %4967 }
 0x2b3   :  { %v4970_v26 = vpop.eup %4969  ;;  %v1168_v24 = vmul.f32 %v4968_v29, %v4962_v61 }
 0x2b4   :  { %v4972_v23 = vpop.eup %4971 }
 0x2b5   :  { %v4974_v35 = vpop.eup %4973  ;;  %v1166_v31 = vmul.f32 %v4972_v23, %v5953_v21 }
 0x2b6   :  { %v1169_v28 = vmul.f32 %v4974_v35, %v4970_v26  ;;  %v4976_v8 = vpop.eup %4975 }
 0x2b7   :  { %v6006_v11 = vadd.f32 %v1168_v24, %v1166_v31  ;;  %v1167_v18 = vmul.f32 %v4976_v8, %v5956_v25  ;;  %v4978_v43 = vpop.eup %4977 }
 0x2b9   :  { %4979 = vtanh.f32 %v6006_v11  ;;  %v6010_v22 = vadd.f32 %v1169_v28, %v1167_v18 }
 0x2ba   :  { %4981 = vrcp.f32 %v1151_v7 }
 0x2bb   :  { %4983 = vtanh.f32 %v6010_v22 }
 0x2c3   :  { %v4980_v14 = vpop.eup %4979 }
 0x2c4   :  { %v4982_v9 = vpop.eup %4981  ;;  %v1174_v21 = vmul.f32 %v4980_v14, %v4978_v43 }
 0x2c5   :  { %v4984_v61 = vpop.eup %4983 }
 0x2c6   :  { %v1175_v27 = vmul.f32 %v4984_v61, %v4982_v9 }
 0x2c8   :  { %v6013_v29 = vpack.c.bf16 %v1175_v27, %v1174_v21 }
 0x2ca   :  { %1221 = vmatmul.mubr.bf16.vlgmr.msra.gmra.mrb[8].mxu0 %v6013_v29  ;;  %1264 = vmatmul.mubr.bf16.vlgmr.msra.gmra.mrb[8].mxu1 %v6013_v29 }
 0x2cb   :  { %1343 = vmatpush1.bf16.msra.mxu0 %v5774_v36  ;;  %1386 = vmatpush1.bf16.msra.mxu1 %v5780_v38 }
 0x2cc   :  { %1344 = vmatprep.subr.bf16.mxu0 %v5777_v37  ;;  %1387 = vmatprep.subr.bf16.mxu1 %v5782_v39 }
 0x2cd   :  { %1374 = vmatprep.mubr.bf16.mxu0 %v5646_v0  ;;  %1417 = vmatprep.mubr.bf16.mxu1 %v5646_v0 }
 0x2cf   :  { %1345 = vmatpush1.bf16.msra.mxu0 %v5786_v40  ;;  %1388 = vmatpush1.bf16.msra.mxu1 %v5793_v42 }
 0x2d0   :  { %1346 = vmatprep.subr.bf16.mxu0 %v5790_v41  ;;  %1389 = vmatprep.subr.bf16.mxu1 %v5802_v46 }
 0x2d3   :  { %1347 = vmatpush1.bf16.msra.mxu0 %v5797_v44  ;;  %1390 = vmatpush1.bf16.msra.mxu1 %v5805_v47 }
 0x2d4   :  { %1348 = vmatprep.subr.bf16.mxu0 %v5799_v45  ;;  %1391 = vmatprep.subr.bf16.mxu1 %v5807_v48 }
 0x2d7   :  { %1349 = vmatpush1.bf16.msra.mxu0 %v5812_v49  ;;  %1392 = vmatpush1.bf16.msra.mxu1 %v5819_v51 }
 0x2d8   :  { %1350 = vmatprep.subr.bf16.mxu0 %v5815_v50  ;;  %1393 = vmatprep.subr.bf16.mxu1 %v5825_v54 }
 0x2db   :  { %1351 = vmatpush1.bf16.msra.mxu0 %v5822_v53  ;;  %1394 = vmatpush1.bf16.msra.mxu1 %v5831_v56 }
 0x2dc   :  { %1352 = vmatprep.subr.bf16.mxu0 %v5828_v55  ;;  %1395 = vmatprep.subr.bf16.mxu1 %v5833_v57 }
 0x2df   :  { %1353 = vmatpush1.bf16.msra.mxu0 %v5835_v58  ;;  %1396 = vmatpush1.bf16.msra.mxu1 %v5841_v60 }
 0x2e0   :  { %1354 = vmatprep.subr.bf16.mxu0 %v5839_v59  ;;  %1397 = vmatprep.subr.bf16.mxu1 %v5850_v63 }
 0x2e3   :  { %1355 = vmatpush1.bf16.msra.mxu0 %v5847_v62  ;;  %1398 = vmatpush1.bf16.msra.mxu1 %v5854_v2 }
 0x2e4   :  { %1356 = vmatprep.subr.bf16.mxu0 %v5852_v1  ;;  %1399 = vmatprep.subr.bf16.mxu1 %v5857_v3 }
 0x2e7   :  { %1357 = vmatpush1.bf16.msra.mxu0 %v5861_v4  ;;  %1400 = vmatpush1.bf16.msra.mxu1 %v5865_v5 }
 0x2e8   :  { %1496 = vmatprep.subr.bf16.mxu0 %v5770_v33  ;;  %1539 = vmatprep.subr.bf16.mxu1 %v5772_v34 }
 0x39d   :  { %v1222_v36 = vpop.f32.mrb[8].mxu0  ;;  %v1265_v37 = vpop.f32.mrb[8].mxu1 }
 0x39e   :  { %v4449_v38 = vadd.f32 %v1222_v36, %v5929_v16  ;;  %v1224_v39 = vpop.f32.mrb[9].mxu0  ;;  %v1267_v40 = vpop.f32.mrb[9].mxu1  ;;  %v4481_v24 = vadd.f32 %v1265_v37, %v5942_v32 }
 0x39f   :  { %v4450_v41 = vadd.f32 %v1224_v39, %v5933_v17  ;;  %v1226_v42 = vpop.f32.mrb[10].mxu0  ;;  %v1269_v44 = vpop.f32.mrb[10].mxu1  ;;  %v4482_v35 = vadd.f32 %v1267_v40, %v5947_v6 }
 0x3a0   :  { %v4254_v45 = vmul.f32 -1.442695, %v4449_v38  ;;  %v4451_v46 = vadd.f32 %v1226_v42, %v5929_v16  ;;  %v1228_v47 = vpop.f32.mrb[11].mxu0  ;;  %v1271_v25 = vpop.f32.mrb[11].mxu1  ;;  %v4483_v23 = vadd.f32 %v1269_v44, %v5942_v32  ;;  %v4256_v52 = vmul.f32 -1.442695, %v4481_v24 }
 0x3a1   :  { %v4255_v20 = vmul.f32 -1.442695, %v4450_v41  ;;  %v4452_v33 = vadd.f32 %v1228_v47, %v5933_v17  ;;  %v4484_v8 = vadd.f32 %v1271_v25, %v5947_v6 }
 0x3a2   :  { %4985 = vpow2.f32 %v4254_v45  ;;  %v4257_v34 = vmul.f32 -1.442695, %v4451_v46  ;;  %v4259_v31 = vmul.f32 -1.442695, %v4483_v23 }
 0x3a3   :  { %v4258_v26 = vmul.f32 -1.442695, %v4452_v33  ;;  %4987 = vpow2.f32 %v4255_v20 }
 0x3a4   :  { %4989 = vpow2.f32 %v4257_v34 }
 0x3a5   :  { %4991 = vpow2.f32 %v4258_v26 }
 0x3a6   :  { %4993 = vtanh.f32 %v4482_v35 }
 0x3a7   :  { %4995 = vpow2.f32 %v4256_v52 }
 0x3a8   :  { %4997 = vpow2.f32 %v4259_v31 }
 0x3ac   :  { %v4986_v28 = vpop.eup %4985 }
 0x3ad   :  { %v1300_v7 = vadd.f32 1.0, %v4986_v28  ;;  %v4988_v18 = vpop.eup %4987  ;;  %v6074_v28 = vld [vmem:[#allocation12 + $0x8] ss:$16 sps:$4 sm:$0xff]  }
 0x3ae   :  { %v4990_v43 = vpop.eup %4989  ;;  %v1301_v14 = vadd.f32 1.0, %v4988_v18  ;;  %v6085_v18 = vld [vmem:[#allocation12 + $0x20] ss:$16 sps:$4 sm:$0xff]  }
 0x3af   :  { %4999 = vrcp.f32 %v1300_v7  ;;  %v1303_v9 = vadd.f32 1.0, %v4990_v43  ;;  %v4992_v61 = vpop.eup %4991  ;;  %v6080_v7 = vld [vmem:[#allocation12 + $0x2c] ss:$16 sps:$4 sm:$0xff]   ;;  %v6088_v43 = vld [vmem:[#allocation12 + $0x28] ss:$16 sps:$4 sm:$0xff]  }
 0x3b0   :  { %5001 = vtanh.f32 %v4484_v8  ;;  %v1304_v21 = vadd.f32 1.0, %v4992_v61  ;;  %v4994_v27 = vpop.eup %4993  ;;  %v6077_v8 = vld [vmem:[#allocation12 + $0x24] ss:$16 sps:$4 sm:$0xff]   ;;  %v6097_v61 = vld [vmem:[#allocation12 + $0x40] ss:$16 sps:$4 sm:$0xff]  }
 0x3b1   :  { %5003 = vrcp.f32 %v1301_v14  ;;  %v4996_v36 = vpop.eup %4995  ;;  %v6091_v14 = vld [vmem:[#allocation12 + $0x44] ss:$16 sps:$4 sm:$0xff]  }
 0x3b2   :  { %5005 = vrcp.f32 %v1303_v9  ;;  %v4998_v37 = vpop.eup %4997  ;;  %v1302_v44 = vadd.f32 1.0, %v4996_v36  ;;  %v6094_v9 = vld [vmem:[#allocation12 + $0x4c] ss:$16 sps:$4 sm:$0xff]  }
 0x3b3   :  { %5007 = vrcp.f32 %v1304_v21  ;;  %v1305_v20 = vadd.f32 1.0, %v4998_v37  ;;  %v6100_v21 = vld [vmem:[#allocation12 + $0x48] ss:$16 sps:$4 sm:$0xff]  }
 0x3b4   :  { %5009 = vrcp.f32 %v1302_v44 }
 0x3b9   :  { %v5000_v38 = vpop.eup %4999 }
 0x3ba   :  { %v5002_v39 = vpop.eup %5001  ;;  %v1322_v40 = vmul.f32 %v5000_v38, %v4994_v27  ;;  %v6103_v27 = vld [vmem:[#allocation12 + $0x64] ss:$16 sps:$4 sm:$0xff]  }
 0x3bb   :  { %v5004_v41 = vpop.eup %5003 }
 0x3bc   :  { %v5006_v42 = vpop.eup %5005  ;;  %v1320_v45 = vmul.f32 %v5004_v41, %v6006_v11 }
 0x3bd   :  { %v1323_v46 = vmul.f32 %v5006_v42, %v5002_v39  ;;  %v5008_v47 = vpop.eup %5007 }
 0x3be   :  { %v6060_v25 = vadd.f32 %v1322_v40, %v1320_v45  ;;  %v1321_v33 = vmul.f32 %v5008_v47, %v6010_v22  ;;  %v5010_v26 = vpop.eup %5009  ;;  %v6071_v22 = vld [vmem:[#allocation12] ss:$16 sps:$4 sm:$0xff]  }
 0x3c0   :  { %5011 = vtanh.f32 %v6060_v25  ;;  %v6064_v34 = vadd.f32 %v1323_v46, %v1321_v33 }
 0x3c1   :  { %5013 = vrcp.f32 %v1305_v20 }
 0x3c2   :  { %5015 = vtanh.f32 %v6064_v34 }
 0x3ca   :  { %v5012_v24 = vpop.eup %5011 }
 0x3cb   :  { %v5014_v23 = vpop.eup %5013  ;;  %v1328_v11 = vmul.f32 %v5012_v24, %v5010_v26 }
 0x3cc   :  { %v5016_v35 = vpop.eup %5015 }
 0x3cd   :  { %v1329_v52 = vmul.f32 %v5016_v35, %v5014_v23 }
 0x3cf   :  { %v6067_v31 = vpack.c.bf16 %v1329_v52, %v1328_v11 }
 0x3d1   :  { %1375 = vmatmul.mubr.bf16.vlgmr.msra.gmra.mrb[12].mxu0 %v6067_v31  ;;  %1418 = vmatmul.mubr.bf16.vlgmr.msra.gmra.mrb[12].mxu1 %v6067_v31 }
 0x3d2   :  { %1497 = vmatpush1.bf16.msra.mxu0 %v6071_v22  ;;  %1540 = vmatpush1.bf16.msra.mxu1 %v6074_v28 }
 0x3d3   :  { %1498 = vmatprep.subr.bf16.mxu0 %v6077_v8  ;;  %1541 = vmatprep.subr.bf16.mxu1 %v6080_v7 }
 0x3d4   :  { %1528 = vmatprep.mubr.bf16.mxu0 %v5646_v0  ;;  %1571 = vmatprep.mubr.bf16.mxu1 %v5646_v0 }
 0x3d6   :  { %1499 = vmatpush1.bf16.msra.mxu0 %v6085_v18  ;;  %1542 = vmatpush1.bf16.msra.mxu1 %v6088_v43 }
 0x3d7   :  { %1500 = vmatprep.subr.bf16.mxu0 %v6091_v14  ;;  %1543 = vmatprep.subr.bf16.mxu1 %v6094_v9 }
 0x3da   :  { %1501 = vmatpush1.bf16.msra.mxu0 %v6097_v61  ;;  %1544 = vmatpush1.bf16.msra.mxu1 %v6100_v21 }
 0x3db   :  { %1502 = vmatprep.subr.bf16.mxu0 %v6103_v27  ;;  %1545 = vmatprep.subr.bf16.mxu1 %v5807_v48  ;;  %v6125_v48 = vld [vmem:[#allocation12 + $0x4] ss:$16 sps:$4 sm:$0xff]  }
 0x3de   :  { %1503 = vmatpush1.bf16.msra.mxu0 %v5812_v49  ;;  %1546 = vmatpush1.bf16.msra.mxu1 %v5819_v51  ;;  %v6128_v49 = vld [vmem:[#allocation12 + $0xc] ss:$16 sps:$4 sm:$0xff]  }
 0x3df   :  { %1504 = vmatprep.subr.bf16.mxu0 %v5815_v50  ;;  %1547 = vmatprep.subr.bf16.mxu1 %v5825_v54 }
 0x3e2   :  { %1505 = vmatpush1.bf16.msra.mxu0 %v5822_v53  ;;  %1548 = vmatpush1.bf16.msra.mxu1 %v5831_v56 }
 0x3e3   :  { %1506 = vmatprep.subr.bf16.mxu0 %v5828_v55  ;;  %1549 = vmatprep.subr.bf16.mxu1 %v5833_v57 }
 0x3e6   :  { %1507 = vmatpush1.bf16.msra.mxu0 %v5835_v58  ;;  %1550 = vmatpush1.bf16.msra.mxu1 %v5841_v60 }
 0x3e7   :  { %1508 = vmatprep.subr.bf16.mxu0 %v5839_v59  ;;  %1551 = vmatprep.subr.bf16.mxu1 %v5850_v63 }
 0x3ea   :  { %1509 = vmatpush1.bf16.msra.mxu0 %v5847_v62  ;;  %1552 = vmatpush1.bf16.msra.mxu1 %v5854_v2 }
 0x3eb   :  { %1510 = vmatprep.subr.bf16.mxu0 %v5852_v1  ;;  %1553 = vmatprep.subr.bf16.mxu1 %v5857_v3 }
 0x3ee   :  { %1511 = vmatpush1.bf16.msra.mxu0 %v5861_v4  ;;  %1554 = vmatpush1.bf16.msra.mxu1 %v5865_v5 }
 0x3ef   :  { %1650 = vmatprep.subr.bf16.mxu0 %v6125_v48  ;;  %1693 = vmatprep.subr.bf16.mxu1 %v6128_v49 }
 0x4a4   :  { %v1376_v50 = vpop.f32.mrb[12].mxu0  ;;  %v1419_v51 = vpop.f32.mrb[12].mxu1 }
 0x4a5   :  { %v4453_v53 = vadd.f32 %v1376_v50, %v5929_v16  ;;  %v1378_v54 = vpop.f32.mrb[13].mxu0  ;;  %v1421_v55 = vpop.f32.mrb[13].mxu1  ;;  %v4485_v5 = vadd.f32 %v1419_v51, %v5942_v32 }
 0x4a6   :  { %v4454_v56 = vadd.f32 %v1378_v54, %v5933_v17  ;;  %v1380_v57 = vpop.f32.mrb[14].mxu0  ;;  %v1423_v58 = vpop.f32.mrb[14].mxu1  ;;  %v4486_v37 = vadd.f32 %v1421_v55, %v5947_v6 }
 0x4a7   :  { %v4260_v59 = vmul.f32 -1.442695, %v4453_v53  ;;  %v4455_v60 = vadd.f32 %v1380_v57, %v5929_v16  ;;  %v1382_v62 = vpop.f32.mrb[15].mxu0  ;;  %v1425_v63 = vpop.f32.mrb[15].mxu1  ;;  %v4487_v36 = vadd.f32 %v1423_v58, %v5942_v32  ;;  %v4262_v38 = vmul.f32 -1.442695, %v4485_v5 }
 0x4a8   :  { %v4261_v1 = vmul.f32 -1.442695, %v4454_v56  ;;  %v4456_v2 = vadd.f32 %v1382_v62, %v5933_v17  ;;  %v4488_v41 = vadd.f32 %v1425_v63, %v5947_v6  ;;  %v6167_v5 = vld [vmem:[#allocation12 + $0x60] ss:$16 sps:$4 sm:$0xff]  }
 0x4a9   :  { %5017 = vpow2.f32 %v4260_v59  ;;  %v4263_v3 = vmul.f32 -1.442695, %v4455_v60  ;;  %v4265_v39 = vmul.f32 -1.442695, %v4487_v36  ;;  %v6170_v36 = vld [vmem:[#allocation12 + $0x68] ss:$16 sps:$4 sm:$0xff]  }
 0x4aa   :  { %v4264_v4 = vmul.f32 -1.442695, %v4456_v2  ;;  %5019 = vpow2.f32 %v4261_v1 }
 0x4ab   :  { %5021 = vpow2.f32 %v4263_v3 }
 0x4ac   :  { %5023 = vpow2.f32 %v4264_v4 }
 0x4ad   :  { %5025 = vtanh.f32 %v4486_v37  ;;  %v6173_v37 = vld [vmem:[#allocation12 + $0x84] ss:$16 sps:$4 sm:$0xff]  }
 0x4ae   :  { %5027 = vpow2.f32 %v4262_v38  ;;  %v6176_v38 = vld [vmem:[#allocation12 + $0x8c] ss:$16 sps:$4 sm:$0xff]  }
 0x4af   :  { %5029 = vpow2.f32 %v4265_v39  ;;  %v6179_v39 = vld [vmem:[#allocation12 + $0x80] ss:$16 sps:$4 sm:$0xff]  }
 0x4b3   :  { %v5018_v40 = vpop.eup %5017 }
 0x4b4   :  { %v1454_v42 = vadd.f32 1.0, %v5018_v40  ;;  %v5020_v44 = vpop.eup %5019  ;;  %v6182_v40 = vld [vmem:[#allocation12 + $0x88] ss:$16 sps:$4 sm:$0xff]  }
 0x4b5   :  { %v5022_v45 = vpop.eup %5021  ;;  %v1455_v46 = vadd.f32 1.0, %v5020_v44  ;;  %v6191_v44 = vld [vmem:[#allocation12 + $0xa0] ss:$16 sps:$4 sm:$0xff]  }
 0x4b6   :  { %5031 = vrcp.f32 %v1454_v42  ;;  %v1457_v47 = vadd.f32 1.0, %v5022_v45  ;;  %v5024_v20 = vpop.eup %5023  ;;  %v6188_v42 = vld [vmem:[#allocation12 + $0xac] ss:$16 sps:$4 sm:$0xff]   ;;  %v6194_v45 = vld [vmem:[#allocation12 + $0xa8] ss:$16 sps:$4 sm:$0xff]  }
 0x4b7   :  { %5033 = vtanh.f32 %v4488_v41  ;;  %v1458_v33 = vadd.f32 1.0, %v5024_v20  ;;  %v5026_v26 = vpop.eup %5025  ;;  %v6185_v41 = vld [vmem:[#allocation12 + $0xa4] ss:$16 sps:$4 sm:$0xff]   ;;  %v6203_v20 = vld [vmem:[#allocation12 + $0xc0] ss:$16 sps:$4 sm:$0xff]  }
 0x4b8   :  { %5035 = vrcp.f32 %v1455_v46  ;;  %v5028_v24 = vpop.eup %5027  ;;  %v6197_v46 = vld [vmem:[#allocation12 + $0xc4] ss:$16 sps:$4 sm:$0xff]  }
 0x4b9   :  { %5037 = vrcp.f32 %v1457_v47  ;;  %v5030_v23 = vpop.eup %5029  ;;  %v1456_v53 = vadd.f32 1.0, %v5028_v24  ;;  %v6200_v47 = vld [vmem:[#allocation12 + $0xcc] ss:$16 sps:$4 sm:$0xff]  }
 0x4ba   :  { %5039 = vrcp.f32 %v1458_v33  ;;  %v1459_v58 = vadd.f32 1.0, %v5030_v23  ;;  %v6206_v33 = vld [vmem:[#allocation12 + $0xc8] ss:$16 sps:$4 sm:$0xff]   ;;  %v6212_v24 = vld [vmem:[#allocation12 + $0xec] ss:$16 sps:$4 sm:$0xff]  }
 0x4bb   :  { %5041 = vrcp.f32 %v1456_v53  ;;  %v6215_v23 = vld [vmem:[#allocation12 + $0xe0] ss:$16 sps:$4 sm:$0xff]  }
 0x4c0   :  { %v5032_v35 = vpop.eup %5031 }
 0x4c1   :  { %v5034_v11 = vpop.eup %5033  ;;  %v1476_v52 = vmul.f32 %v5032_v35, %v5026_v26  ;;  %v6209_v26 = vld [vmem:[#allocation12 + $0xe4] ss:$16 sps:$4 sm:$0xff]   ;;  %v6218_v35 = vld [vmem:[#allocation12 + $0xe8] ss:$16 sps:$4 sm:$0xff]  }
 0x4c2   :  { %v5036_v50 = vpop.eup %5035 }
 0x4c3   :  { %v5038_v51 = vpop.eup %5037  ;;  %v1474_v54 = vmul.f32 %v5036_v50, %v6060_v25 }
 0x4c4   :  { %v1477_v55 = vmul.f32 %v5038_v51, %v5034_v11  ;;  %v5040_v56 = vpop.eup %5039 }
 0x4c5   :  { %v6140_v57 = vadd.f32 %v1476_v52, %v1474_v54  ;;  %v1475_v59 = vmul.f32 %v5040_v56, %v6064_v34  ;;  %v5042_v62 = vpop.eup %5041  ;;  %v6164_v34 = vld [vmem:[#allocation12 + $0x6c] ss:$16 sps:$4 sm:$0xff]  }
 0x4c7   :  { %5043 = vtanh.f32 %v6140_v57  ;;  %v6144_v60 = vadd.f32 %v1477_v55, %v1475_v59 }
 0x4c8   :  { %5045 = vrcp.f32 %v1459_v58 }
 0x4c9   :  { %5047 = vtanh.f32 %v6144_v60 }
 0x4d1   :  { %v5044_v63 = vpop.eup %5043 }
 0x4d2   :  { %v5046_v1 = vpop.eup %5045  ;;  %v1482_v25 = vmul.f32 %v5044_v63, %v5042_v62 }
 0x4d3   :  { %v5048_v2 = vpop.eup %5047 }
 0x4d4   :  { %v1483_v3 = vmul.f32 %v5048_v2, %v5046_v1 }
 0x4d6   :  { %v6147_v4 = vpack.c.bf16 %v1483_v3, %v1482_v25 }
 0x4d8   :  { %1529 = vmatmul.mubr.bf16.vlgmr.msra.gmra.mrb[16].mxu0 %v6147_v4  ;;  %1572 = vmatmul.mubr.bf16.vlgmr.msra.gmra.mrb[16].mxu1 %v6147_v4 }
 0x4d9   :  { %1651 = vmatpush1.bf16.msra.mxu0 %v6071_v22  ;;  %1694 = vmatpush1.bf16.msra.mxu1 %v6074_v28 }
 0x4da   :  { %1652 = vmatprep.subr.bf16.mxu0 %v6077_v8  ;;  %1695 = vmatprep.subr.bf16.mxu1 %v6080_v7 }
 0x4db   :  { %1682 = vmatprep.mubr.bf16.mxu0 %v5646_v0  ;;  %1725 = vmatprep.mubr.bf16.mxu1 %v5646_v0 }
 0x4dd   :  { %1653 = vmatpush1.bf16.msra.mxu0 %v6085_v18  ;;  %1696 = vmatpush1.bf16.msra.mxu1 %v6088_v43 }
 0x4de   :  { %1654 = vmatprep.subr.bf16.mxu0 %v6091_v14  ;;  %1697 = vmatprep.subr.bf16.mxu1 %v6094_v9 }
 0x4e1   :  { %1655 = vmatpush1.bf16.msra.mxu0 %v6097_v61  ;;  %1698 = vmatpush1.bf16.msra.mxu1 %v6100_v21 }
 0x4e2   :  { %1656 = vmatprep.subr.bf16.mxu0 %v6103_v27  ;;  %1699 = vmatprep.subr.bf16.mxu1 %v6164_v34 }
 0x4e5   :  { %1657 = vmatpush1.bf16.msra.mxu0 %v6167_v5  ;;  %1700 = vmatpush1.bf16.msra.mxu1 %v6170_v36 }
 0x4e6   :  { %1658 = vmatprep.subr.bf16.mxu0 %v6173_v37  ;;  %1701 = vmatprep.subr.bf16.mxu1 %v6176_v38 }
 0x4e9   :  { %1659 = vmatpush1.bf16.msra.mxu0 %v6179_v39  ;;  %1702 = vmatpush1.bf16.msra.mxu1 %v6182_v40 }
 0x4ea   :  { %1660 = vmatprep.subr.bf16.mxu0 %v6185_v41  ;;  %1703 = vmatprep.subr.bf16.mxu1 %v6188_v42 }
 0x4ed   :  { %1661 = vmatpush1.bf16.msra.mxu0 %v6191_v44  ;;  %1704 = vmatpush1.bf16.msra.mxu1 %v6194_v45 }
 0x4ee   :  { %1662 = vmatprep.subr.bf16.mxu0 %v6197_v46  ;;  %1705 = vmatprep.subr.bf16.mxu1 %v6200_v47 }
 0x4f1   :  { %1663 = vmatpush1.bf16.msra.mxu0 %v6203_v20  ;;  %1706 = vmatpush1.bf16.msra.mxu1 %v6206_v33 }
 0x4f2   :  { %1664 = vmatprep.subr.bf16.mxu0 %v6209_v26  ;;  %1707 = vmatprep.subr.bf16.mxu1 %v6212_v24 }
 0x4f5   :  { %1665 = vmatpush1.bf16.msra.mxu0 %v6215_v23  ;;  %1708 = vmatpush1.bf16.msra.mxu1 %v6218_v35 }
 0x4f6   :  { %1804 = vmatprep.subr.bf16.mxu0 %v6125_v48  ;;  %1847 = vmatprep.subr.bf16.mxu1 %v6128_v49 }
 0x5ab   :  { %v1530_v11 = vpop.f32.mrb[16].mxu0  ;;  %v1573_v52 = vpop.f32.mrb[16].mxu1 }
 0x5ac   :  { %v4457_v50 = vadd.f32 %v1530_v11, %v5929_v16  ;;  %v1532_v51 = vpop.f32.mrb[17].mxu0  ;;  %v1575_v53 = vpop.f32.mrb[17].mxu1  ;;  %v4489_v11 = vadd.f32 %v1573_v52, %v5942_v32 }
 0x5ad   :  { %v4458_v54 = vadd.f32 %v1532_v51, %v5933_v17  ;;  %v1534_v55 = vpop.f32.mrb[18].mxu0  ;;  %v1577_v56 = vpop.f32.mrb[18].mxu1  ;;  %v4490_v51 = vadd.f32 %v1575_v53, %v5947_v6 }
 0x5ae   :  { %v4266_v58 = vmul.f32 -1.442695, %v4457_v50  ;;  %v4459_v59 = vadd.f32 %v1534_v55, %v5929_v16  ;;  %v1536_v62 = vpop.f32.mrb[19].mxu0  ;;  %v1579_v63 = vpop.f32.mrb[19].mxu1  ;;  %v4491_v19 = vadd.f32 %v1577_v56, %v5942_v32  ;;  %v4268_v50 = vmul.f32 -1.442695, %v4489_v11 }
 0x5af   :  { %v4267_v1 = vmul.f32 -1.442695, %v4458_v54  ;;  %v4460_v2 = vadd.f32 %v1536_v62, %v5933_v17  ;;  %v4492_v54 = vadd.f32 %v1579_v63, %v5947_v6 }
 0x5b0   :  { %5049 = vpow2.f32 %v4266_v58  ;;  %v4269_v25 = vmul.f32 -1.442695, %v4459_v59  ;;  %v4271_v15 = vmul.f32 -1.442695, %v4491_v19 }
 0x5b1   :  { %v4270_v3 = vmul.f32 -1.442695, %v4460_v2  ;;  %5051 = vpow2.f32 %v4267_v1 }
 0x5b2   :  { %5053 = vpow2.f32 %v4269_v25 }
 0x5b3   :  { %5055 = vpow2.f32 %v4270_v3 }
 0x5b4   :  { %5057 = vtanh.f32 %v4490_v51 }
 0x5b5   :  { %5059 = vpow2.f32 %v4268_v50 }
 0x5b6   :  { %5061 = vpow2.f32 %v4271_v15 }
 0x5ba   :  { %v5050_v55 = vpop.eup %5049 }
 0x5bb   :  { %v1608_v13 = vadd.f32 1.0, %v5050_v55  ;;  %v5052_v58 = vpop.eup %5051 }
 0x5bc   :  { %v5054_v59 = vpop.eup %5053  ;;  %v1609_v62 = vadd.f32 1.0, %v5052_v58 }
 0x5bd   :  { %5063 = vrcp.f32 %v1608_v13  ;;  %v1611_v52 = vadd.f32 1.0, %v5054_v59  ;;  %v5056_v1 = vpop.eup %5055 }
 0x5be   :  { %5065 = vtanh.f32 %v4492_v54  ;;  %v1612_v56 = vadd.f32 1.0, %v5056_v1  ;;  %v5058_v53 = vpop.eup %5057 }
 0x5bf   :  { %5067 = vrcp.f32 %v1609_v62  ;;  %v5060_v19 = vpop.eup %5059 }
 0x5c0   :  { %5069 = vrcp.f32 %v1611_v52  ;;  %v5062_v2 = vpop.eup %5061  ;;  %v1610_v50 = vadd.f32 1.0, %v5060_v19 }
 0x5c1   :  { %5071 = vrcp.f32 %v1612_v56  ;;  %v1613_v54 = vadd.f32 1.0, %v5062_v2 }
 0x5c2   :  { %5073 = vrcp.f32 %v1610_v50 }
 0x5c7   :  { %v5064_v25 = vpop.eup %5063 }
 0x5c8   :  { %v5066_v3 = vpop.eup %5065  ;;  %v1630_v63 = vmul.f32 %v5064_v25, %v5058_v53 }
 0x5c9   :  { %v5068_v11 = vpop.eup %5067 }
 0x5ca   :  { %v5070_v51 = vpop.eup %5069  ;;  %v1628_v15 = vmul.f32 %v5068_v11, %v6140_v57 }
 0x5cb   :  { %v1631_v13 = vmul.f32 %v5070_v51, %v5066_v3  ;;  %v5072_v55 = vpop.eup %5071 }
 0x5cc   :  { %v6232_v58 = vadd.f32 %v1630_v63, %v1628_v15  ;;  %v1629_v59 = vmul.f32 %v5072_v55, %v6144_v60  ;;  %v5074_v52 = vpop.eup %5073 }
 0x5ce   :  { %5075 = vtanh.f32 %v6232_v58  ;;  %v6236_v62 = vadd.f32 %v1631_v13, %v1629_v59 }
 0x5cf   :  { %5077 = vrcp.f32 %v1613_v54 }
 0x5d0   :  { %5079 = vtanh.f32 %v6236_v62 }
 0x5d8   :  { %v5076_v1 = vpop.eup %5075 }
 0x5d9   :  { %v5078_v56 = vpop.eup %5077  ;;  %v1636_v57 = vmul.f32 %v5076_v1, %v5074_v52 }
 0x5da   :  { %v5080_v53 = vpop.eup %5079 }
 0x5db   :  { %v1637_v19 = vmul.f32 %v5080_v53, %v5078_v56 }
 0x5dd   :  { %v6239_v25 = vpack.c.bf16 %v1637_v19, %v1636_v57 }
 0x5df   :  { %1683 = vmatmul.mubr.bf16.vlgmr.msra.gmra.mrb[20].mxu0 %v6239_v25  ;;  %1726 = vmatmul.mubr.bf16.vlgmr.msra.gmra.mrb[20].mxu1 %v6239_v25 }
 0x5e0   :  { %1805 = vmatpush1.bf16.msra.mxu0 %v6071_v22  ;;  %1848 = vmatpush1.bf16.msra.mxu1 %v6074_v28 }
 0x5e1   :  { %1806 = vmatprep.subr.bf16.mxu0 %v6077_v8  ;;  %1849 = vmatprep.subr.bf16.mxu1 %v6080_v7 }
 0x5e2   :  { %1836 = vmatprep.mubr.bf16.mxu0 %v5646_v0  ;;  %1879 = vmatprep.mubr.bf16.mxu1 %v5646_v0 }
 0x5e4   :  { %1807 = vmatpush1.bf16.msra.mxu0 %v6085_v18  ;;  %1850 = vmatpush1.bf16.msra.mxu1 %v6088_v43 }
 0x5e5   :  { %1808 = vmatprep.subr.bf16.mxu0 %v6091_v14  ;;  %1851 = vmatprep.subr.bf16.mxu1 %v6094_v9 }
 0x5e8   :  { %1809 = vmatpush1.bf16.msra.mxu0 %v6097_v61  ;;  %1852 = vmatpush1.bf16.msra.mxu1 %v6100_v21 }
 0x5e9   :  { %1810 = vmatprep.subr.bf16.mxu0 %v6103_v27  ;;  %1853 = vmatprep.subr.bf16.mxu1 %v6164_v34 }
 0x5ec   :  { %1811 = vmatpush1.bf16.msra.mxu0 %v6167_v5  ;;  %1854 = vmatpush1.bf16.msra.mxu1 %v6170_v36 }
 0x5ed   :  { %1812 = vmatprep.subr.bf16.mxu0 %v6173_v37  ;;  %1855 = vmatprep.subr.bf16.mxu1 %v6176_v38 }
 0x5f0   :  { %1813 = vmatpush1.bf16.msra.mxu0 %v6179_v39  ;;  %1856 = vmatpush1.bf16.msra.mxu1 %v6182_v40 }
 0x5f1   :  { %1814 = vmatprep.subr.bf16.mxu0 %v6185_v41  ;;  %1857 = vmatprep.subr.bf16.mxu1 %v6188_v42 }
 0x5f4   :  { %1815 = vmatpush1.bf16.msra.mxu0 %v6191_v44  ;;  %1858 = vmatpush1.bf16.msra.mxu1 %v6194_v45 }
 0x5f5   :  { %1816 = vmatprep.subr.bf16.mxu0 %v6197_v46  ;;  %1859 = vmatprep.subr.bf16.mxu1 %v6200_v47 }
 0x5f8   :  { %1817 = vmatpush1.bf16.msra.mxu0 %v6203_v20  ;;  %1860 = vmatpush1.bf16.msra.mxu1 %v6206_v33 }
 0x5f9   :  { %1818 = vmatprep.subr.bf16.mxu0 %v6209_v26  ;;  %1861 = vmatprep.subr.bf16.mxu1 %v6212_v24 }
 0x5fc   :  { %1819 = vmatpush1.bf16.msra.mxu0 %v6215_v23  ;;  %1862 = vmatpush1.bf16.msra.mxu1 %v6218_v35 }
 0x5fd   :  { %1958 = vmatprep.subr.bf16.mxu0 %v6125_v48  ;;  %2001 = vmatprep.subr.bf16.mxu1 %v6128_v49 }
 0x6b2   :  { %v1684_v60 = vpop.f32.mrb[20].mxu0  ;;  %v1727_v2 = vpop.f32.mrb[20].mxu1 }
 0x6b3   :  { %v4461_v3 = vadd.f32 %v1684_v60, %v5929_v16  ;;  %v1686_v63 = vpop.f32.mrb[21].mxu0  ;;  %v1729_v11 = vpop.f32.mrb[21].mxu1  ;;  %v4493_v56 = vadd.f32 %v1727_v2, %v5942_v32 }
 0x6b4   :  { %v4462_v51 = vadd.f32 %v1686_v63, %v5933_v17  ;;  %v1688_v50 = vpop.f32.mrb[22].mxu0  ;;  %v1731_v15 = vpop.f32.mrb[22].mxu1  ;;  %v4494_v57 = vadd.f32 %v1729_v11, %v5947_v6 }
 0x6b5   :  { %v4272_v13 = vmul.f32 -1.442695, %v4461_v3  ;;  %v4463_v55 = vadd.f32 %v1688_v50, %v5929_v16  ;;  %v1690_v54 = vpop.f32.mrb[23].mxu0  ;;  %v1733_v59 = vpop.f32.mrb[23].mxu1  ;;  %v4495_v53 = vadd.f32 %v1731_v15, %v5942_v32  ;;  %v4274_v19 = vmul.f32 -1.442695, %v4493_v56 }
 0x6b6   :  { %v4273_v52 = vmul.f32 -1.442695, %v4462_v51  ;;  %v4464_v48 = vadd.f32 %v1690_v54, %v5933_v17  ;;  %v4496_v63 = vadd.f32 %v1733_v59, %v5947_v6 }
 0x6b7   :  { %5081 = vpow2.f32 %v4272_v13  ;;  %v4275_v49 = vmul.f32 -1.442695, %v4463_v55  ;;  %v4277_v60 = vmul.f32 -1.442695, %v4495_v53 }
 0x6b8   :  { %v4276_v1 = vmul.f32 -1.442695, %v4464_v48  ;;  %5083 = vpow2.f32 %v4273_v52 }
 0x6b9   :  { %5085 = vpow2.f32 %v4275_v49 }
 0x6ba   :  { %5087 = vpow2.f32 %v4276_v1 }
 0x6bb   :  { %5089 = vtanh.f32 %v4494_v57 }
 0x6bc   :  { %5091 = vpow2.f32 %v4274_v19 }
 0x6bd   :  { %5093 = vpow2.f32 %v4277_v60 }
 0x6c1   :  { %v5082_v3 = vpop.eup %5081 }
 0x6c2   :  { %v1762_v51 = vadd.f32 1.0, %v5082_v3  ;;  %v5084_v50 = vpop.eup %5083 }
 0x6c3   :  { %v5086_v13 = vpop.eup %5085  ;;  %v1763_v55 = vadd.f32 1.0, %v5084_v50 }
 0x6c4   :  { %5095 = vrcp.f32 %v1762_v51  ;;  %v1765_v2 = vadd.f32 1.0, %v5086_v13  ;;  %v5088_v54 = vpop.eup %5087 }
 0x6c5   :  { %5097 = vtanh.f32 %v4496_v63  ;;  %v1766_v15 = vadd.f32 1.0, %v5088_v54  ;;  %v5090_v11 = vpop.eup %5089 }
 0x6c6   :  { %5099 = vrcp.f32 %v1763_v55  ;;  %v5092_v52 = vpop.eup %5091 }
 0x6c7   :  { %5101 = vrcp.f32 %v1765_v2  ;;  %v5094_v48 = vpop.eup %5093  ;;  %v1764_v57 = vadd.f32 1.0, %v5092_v52 }
 0x6c8   :  { %5103 = vrcp.f32 %v1766_v15  ;;  %v1767_v63 = vadd.f32 1.0, %v5094_v48 }
 0x6c9   :  { %5105 = vrcp.f32 %v1764_v57 }
 0x6ce   :  { %v5096_v49 = vpop.eup %5095 }
 0x6cf   :  { %v5098_v1 = vpop.eup %5097  ;;  %v1784_v59 = vmul.f32 %v5096_v49, %v5090_v11 }
 0x6d0   :  { %v5100_v56 = vpop.eup %5099 }
 0x6d1   :  { %v5102_v53 = vpop.eup %5101  ;;  %v1782_v19 = vmul.f32 %v5100_v56, %v6232_v58 }
 0x6d2   :  { %v1785_v60 = vmul.f32 %v5102_v53, %v5098_v1  ;;  %v5104_v3 = vpop.eup %5103 }
 0x6d3   :  { %v6286_v51 = vadd.f32 %v1784_v59, %v1782_v19  ;;  %v1783_v50 = vmul.f32 %v5104_v3, %v6236_v62  ;;  %v5106_v55 = vpop.eup %5105 }
 0x6d5   :  { %5107 = vtanh.f32 %v6286_v51  ;;  %v6290_v13 = vadd.f32 %v1785_v60, %v1783_v50 }
 0x6d6   :  { %5109 = vrcp.f32 %v1767_v63 }
 0x6d7   :  { %5111 = vtanh.f32 %v6290_v13 }
 0x6df   :  { %v5108_v2 = vpop.eup %5107 }
 0x6e0   :  { %v5110_v54 = vpop.eup %5109  ;;  %v1790_v58 = vmul.f32 %v5108_v2, %v5106_v55 }
 0x6e1   :  { %v5112_v15 = vpop.eup %5111 }
 0x6e2   :  { %v1791_v11 = vmul.f32 %v5112_v15, %v5110_v54 }
 0x6e4   :  { %v6293_v52 = vpack.c.bf16 %v1791_v11, %v1790_v58 }
 0x6e6   :  { %1837 = vmatmul.mubr.bf16.vlgmr.msra.gmra.mrb[24].mxu0 %v6293_v52  ;;  %1880 = vmatmul.mubr.bf16.vlgmr.msra.gmra.mrb[24].mxu1 %v6293_v52 }
 0x6e7   :  { %1959 = vmatpush1.bf16.msra.mxu0 %v6071_v22  ;;  %2002 = vmatpush1.bf16.msra.mxu1 %v6074_v28  ;;  %v4819_v22 = vld [vmem:[#allocation11 + $0x4] ss:$16 sps:$4 sm:$0xff]   ;;  %v4822_v28 = vld [vmem:[#allocation11 + $0xc] ss:$16 sps:$4 sm:$0xff]  }
 0x6e8   :  { %1960 = vmatprep.subr.bf16.mxu0 %v6077_v8  ;;  %2003 = vmatprep.subr.bf16.mxu1 %v6080_v7 }
 0x6e9   :  { %1990 = vmatprep.mubr.bf16.mxu0 %v5646_v0  ;;  %2033 = vmatprep.mubr.bf16.mxu1 %v5646_v0 }
 0x6eb   :  { %1961 = vmatpush1.bf16.msra.mxu0 %v6085_v18  ;;  %2004 = vmatpush1.bf16.msra.mxu1 %v6088_v43 }
 0x6ec   :  { %1962 = vmatprep.subr.bf16.mxu0 %v6091_v14  ;;  %2005 = vmatprep.subr.bf16.mxu1 %v6094_v9 }
 0x6ef   :  { %1963 = vmatpush1.bf16.msra.mxu0 %v6097_v61  ;;  %2006 = vmatpush1.bf16.msra.mxu1 %v6100_v21 }
 0x6f0   :  { %1964 = vmatprep.subr.bf16.mxu0 %v6103_v27  ;;  %2007 = vmatprep.subr.bf16.mxu1 %v6164_v34 }
 0x6f3   :  { %1965 = vmatpush1.bf16.msra.mxu0 %v6167_v5  ;;  %2008 = vmatpush1.bf16.msra.mxu1 %v6170_v36 }
 0x6f4   :  { %1966 = vmatprep.subr.bf16.mxu0 %v6173_v37  ;;  %2009 = vmatprep.subr.bf16.mxu1 %v6176_v38 }
 0x6f7   :  { %1967 = vmatpush1.bf16.msra.mxu0 %v6179_v39  ;;  %2010 = vmatpush1.bf16.msra.mxu1 %v6182_v40 }
 0x6f8   :  { %1968 = vmatprep.subr.bf16.mxu0 %v6185_v41  ;;  %2011 = vmatprep.subr.bf16.mxu1 %v6188_v42 }
 0x6fb   :  { %1969 = vmatpush1.bf16.msra.mxu0 %v6191_v44  ;;  %2012 = vmatpush1.bf16.msra.mxu1 %v6194_v45 }
 0x6fc   :  { %1970 = vmatprep.subr.bf16.mxu0 %v6197_v46  ;;  %2013 = vmatprep.subr.bf16.mxu1 %v6200_v47 }
 0x6ff   :  { %1971 = vmatpush1.bf16.msra.mxu0 %v6203_v20  ;;  %2014 = vmatpush1.bf16.msra.mxu1 %v6206_v33 }
 0x700   :  { %1972 = vmatprep.subr.bf16.mxu0 %v6209_v26  ;;  %2015 = vmatprep.subr.bf16.mxu1 %v6212_v24 }
 0x703   :  { %1973 = vmatpush1.bf16.msra.mxu0 %v6215_v23  ;;  %2016 = vmatpush1.bf16.msra.mxu1 %v6218_v35 }
 0x704   :  { %2330 = vmatprep.subr.bf16.mxu0 %v4819_v22  ;;  %2443 = vmatprep.subr.bf16.mxu1 %v4822_v28 }
 0x7b9   :  { %v1838_v8 = vpop.f32.mrb[24].mxu0  ;;  %v1881_v7 = vpop.f32.mrb[24].mxu1 }
 0x7ba   :  { %v4465_v18 = vadd.f32 %v1838_v8, %v5929_v16  ;;  %v1840_v43 = vpop.f32.mrb[25].mxu0  ;;  %v1883_v14 = vpop.f32.mrb[25].mxu1  ;;  %v4497_v41 = vadd.f32 %v1881_v7, %v5942_v32 }
 0x7bb   :  { %v4466_v9 = vadd.f32 %v1840_v43, %v5933_v17  ;;  %v1842_v61 = vpop.f32.mrb[26].mxu0  ;;  %v1885_v21 = vpop.f32.mrb[26].mxu1  ;;  %v4498_v44 = vadd.f32 %v1883_v14, %v5947_v6  ;;  %v4820_v43 = vld [vmem:[#allocation11 + $0x8] ss:$16 sps:$4 sm:$0xff]  }
 0x7bc   :  { %v4278_v27 = vmul.f32 -1.442695, %v4465_v18  ;;  %v4467_v34 = vadd.f32 %v1842_v61, %v5929_v16  ;;  %v1844_v5 = vpop.f32.mrb[27].mxu0  ;;  %v1887_v36 = vpop.f32.mrb[27].mxu1  ;;  %v4499_v42 = vadd.f32 %v1885_v21, %v5942_v32  ;;  %v4280_v45 = vmul.f32 -1.442695, %v4497_v41 }
 0x7bd   :  { %v4279_v37 = vmul.f32 -1.442695, %v4466_v9  ;;  %v4468_v38 = vadd.f32 %v1844_v5, %v5933_v17  ;;  %v4500_v20 = vadd.f32 %v1887_v36, %v5947_v6  ;;  %v4817_v18 = vld [vmem:[#allocation11] ss:$16 sps:$4 sm:$0xff]   ;;  %v4825_v9 = vld [vmem:[#allocation11 + $0x24] ss:$16 sps:$4 sm:$0xff]  }
 0x7be   :  { %5113 = vpow2.f32 %v4278_v27  ;;  %v4281_v39 = vmul.f32 -1.442695, %v4467_v34  ;;  %v4283_v46 = vmul.f32 -1.442695, %v4499_v42  ;;  %v4823_v61 = vld [vmem:[#allocation11 + $0x20] ss:$16 sps:$4 sm:$0xff]  }
 0x7bf   :  { %v4282_v40 = vmul.f32 -1.442695, %v4468_v38  ;;  %5115 = vpow2.f32 %v4279_v37  ;;  %v4826_v21 = vld [vmem:[#allocation11 + $0x28] ss:$16 sps:$4 sm:$0xff]   ;;  %v4831_v27 = vld [vmem:[#allocation11 + $0x44] ss:$16 sps:$4 sm:$0xff]  }
 0x7c0   :  { %5117 = vpow2.f32 %v4281_v39  ;;  %v4834_v34 = vld [vmem:[#allocation11 + $0x4c] ss:$16 sps:$4 sm:$0xff]   ;;  %v4829_v5 = vld [vmem:[#allocation11 + $0x40] ss:$16 sps:$4 sm:$0xff]   ;;  %v4832_v36 = vld [vmem:[#allocation11 + $0x48] ss:$16 sps:$4 sm:$0xff]  }
 0x7c1   :  { %5119 = vpow2.f32 %v4282_v40  ;;  %v4837_v37 = vld [vmem:[#allocation11 + $0x64] ss:$16 sps:$4 sm:$0xff]   ;;  %v4840_v38 = vld [vmem:[#allocation11 + $0x6c] ss:$16 sps:$4 sm:$0xff]   ;;  %v4835_v39 = vld [vmem:[#allocation11 + $0x60] ss:$16 sps:$4 sm:$0xff]  }
 0x7c2   :  { %5121 = vtanh.f32 %v4498_v44  ;;  %v4838_v40 = vld [vmem:[#allocation11 + $0x68] ss:$16 sps:$4 sm:$0xff]   ;;  %v4843_v41 = vld [vmem:[#allocation11 + $0x84] ss:$16 sps:$4 sm:$0xff]   ;;  %v4846_v42 = vld [vmem:[#allocation11 + $0x8c] ss:$16 sps:$4 sm:$0xff]  }
 0x7c3   :  { %5123 = vpow2.f32 %v4280_v45  ;;  %v4841_v44 = vld [vmem:[#allocation11 + $0x80] ss:$16 sps:$4 sm:$0xff]   ;;  %v4844_v45 = vld [vmem:[#allocation11 + $0x88] ss:$16 sps:$4 sm:$0xff]  }
 0x7c4   :  { %5125 = vpow2.f32 %v4283_v46  ;;  %v4849_v46 = vld [vmem:[#allocation11 + $0xa4] ss:$16 sps:$4 sm:$0xff]  }
 0x7c8   :  { %v5114_v47 = vpop.eup %5113 }
 0x7c9   :  { %v1916_v33 = vadd.f32 1.0, %v5114_v47  ;;  %v5116_v26 = vpop.eup %5115  ;;  %v4852_v47 = vld [vmem:[#allocation11 + $0xac] ss:$16 sps:$4 sm:$0xff]  }
 0x7ca   :  { %v5118_v24 = vpop.eup %5117  ;;  %v1917_v23 = vadd.f32 1.0, %v5116_v26  ;;  %v4855_v26 = vld [vmem:[#allocation11 + $0xc4] ss:$16 sps:$4 sm:$0xff]  }
 0x7cb   :  { %5127 = vrcp.f32 %v1916_v33  ;;  %v1919_v35 = vadd.f32 1.0, %v5118_v24  ;;  %v5120_v62 = vpop.eup %5119  ;;  %v4850_v33 = vld [vmem:[#allocation11 + $0xa8] ss:$16 sps:$4 sm:$0xff]   ;;  %v4858_v24 = vld [vmem:[#allocation11 + $0xcc] ss:$16 sps:$4 sm:$0xff]  }
 0x7cc   :  { %5129 = vtanh.f32 %v4500_v20  ;;  %v1920_v48 = vadd.f32 1.0, %v5120_v62  ;;  %v5122_v49 = vpop.eup %5121  ;;  %v4847_v20 = vld [vmem:[#allocation11 + $0xa0] ss:$16 sps:$4 sm:$0xff]   ;;  %v4861_v62 = vld [vmem:[#allocation11 + $0xe4] ss:$16 sps:$4 sm:$0xff]  }
 0x7cd   :  { %5131 = vrcp.f32 %v1917_v23  ;;  %v5124_v1 = vpop.eup %5123  ;;  %v4853_v23 = vld [vmem:[#allocation11 + $0xc0] ss:$16 sps:$4 sm:$0xff]  }
 0x7ce   :  { %5133 = vrcp.f32 %v1919_v35  ;;  %v5126_v59 = vpop.eup %5125  ;;  %v1918_v3 = vadd.f32 1.0, %v5124_v1  ;;  %v4856_v35 = vld [vmem:[#allocation11 + $0xc8] ss:$16 sps:$4 sm:$0xff]  }
 0x7cf   :  { %5135 = vrcp.f32 %v1920_v48  ;;  %v1921_v54 = vadd.f32 1.0, %v5126_v59  ;;  %v4864_v48 = vld [vmem:[#allocation11 + $0xec] ss:$16 sps:$4 sm:$0xff]   ;;  %v4862_v1 = vld [vmem:[#allocation11 + $0xe8] ss:$16 sps:$4 sm:$0xff]  }
 0x7d0   :  { %5137 = vrcp.f32 %v1918_v3  ;;  %v6351_v59 = vld [vmem:[#allocation12 + $0x104] ss:$16 sps:$4 sm:$0xff]   ;;  %v6412_v3 = vld [vmem:[#allocation12 + $0x148] ss:$16 sps:$4 sm:$0xff]  }
 0x7d5   :  { %v5128_v56 = vpop.eup %5127 }
 0x7d6   :  { %v5130_v53 = vpop.eup %5129  ;;  %v1938_v57 = vmul.f32 %v5128_v56, %v5122_v49  ;;  %v4859_v49 = vld [vmem:[#allocation11 + $0xe0] ss:$16 sps:$4 sm:$0xff]  }
 0x7d7   :  { %v5132_v19 = vpop.eup %5131  ;;  %v6354_v56 = vld [vmem:[#allocation12 + $0x100] ss:$16 sps:$4 sm:$0xff]  }
 0x7d8   :  { %v5134_v60 = vpop.eup %5133  ;;  %v1936_v63 = vmul.f32 %v5132_v19, %v6286_v51  ;;  %v6407_v19 = vld [vmem:[#allocation12 + $0x164] ss:$16 sps:$4 sm:$0xff]  }
 0x7d9   :  { %v1939_v50 = vmul.f32 %v5134_v60, %v5130_v53  ;;  %v5136_v55 = vpop.eup %5135  ;;  %v6403_v53 = vld [vmem:[#allocation12 + $0x144] ss:$16 sps:$4 sm:$0xff]   ;;  %v6409_v60 = vld [vmem:[#allocation12 + $0x14c] ss:$16 sps:$4 sm:$0xff]  }
 0x7da   :  { %v6338_v2 = vadd.f32 %v1938_v57, %v1936_v63  ;;  %v1937_v15 = vmul.f32 %v5136_v55, %v6290_v13  ;;  %v5138_v11 = vpop.eup %5137  ;;  %v4828_v13 = vld [vmem:[#allocation11 + $0x2c] ss:$16 sps:$4 sm:$0xff]   ;;  %v6405_v57 = vld [vmem:[#allocation12 + $0x140] ss:$16 sps:$4 sm:$0xff]   ;;  %v6421_v55 = vld [vmem:[#allocation12 + $0x184] ss:$16 sps:$4 sm:$0xff]  }
 0x7db   :  { %v6414_v63 = vld [vmem:[#allocation12 + $0x16c] ss:$16 sps:$4 sm:$0xff]  }
 0x7dc   :  { %5139 = vtanh.f32 %v6338_v2  ;;  %v6342_v58 = vadd.f32 %v1939_v50, %v1937_v15  ;;  %v6417_v50 = vld [vmem:[#allocation12 + $0x160] ss:$16 sps:$4 sm:$0xff]   ;;  %v6427_v15 = vld [vmem:[#allocation12 + $0x18c] ss:$16 sps:$4 sm:$0xff]  }
 0x7dd   :  { %5141 = vrcp.f32 %v1921_v54  ;;  %v6424_v54 = vld [vmem:[#allocation12 + $0x168] ss:$16 sps:$4 sm:$0xff]  }
 0x7de   :  { %5143 = vtanh.f32 %v6342_v58 }
 0x7e6   :  { %v5140_v22 = vpop.eup %5139 }
 0x7e7   :  { %v5142_v28 = vpop.eup %5141  ;;  %v1944_v51 = vmul.f32 %v5140_v22, %v5138_v11  ;;  %v6430_v11 = vld [vmem:[#allocation12 + $0x180] ss:$16 sps:$4 sm:$0xff]   ;;  %v6433_v22 = vld [vmem:[#allocation12 + $0x1a4] ss:$16 sps:$4 sm:$0xff]  }
 0x7e8   :  { %v5144_v8 = vpop.eup %5143 }
 0x7e9   :  { %v1945_v7 = vmul.f32 %v5144_v8, %v5142_v28  ;;  %v6436_v28 = vld [vmem:[#allocation12 + $0x188] ss:$16 sps:$4 sm:$0xff]   ;;  %v6439_v8 = vld [vmem:[#allocation12 + $0x1ac] ss:$16 sps:$4 sm:$0xff]  }
 0x7eb   :  { %v6345_v14 = vpack.c.bf16 %v1945_v7, %v1944_v51  ;;  %v6442_v51 = vld [vmem:[#allocation12 + $0x1a0] ss:$16 sps:$4 sm:$0xff]   ;;  %v6445_v7 = vld [vmem:[#allocation12 + $0x1c4] ss:$16 sps:$4 sm:$0xff]  }
 0x7ed   :  { %1991 = vmatmul.mubr.bf16.vlgmr.msra.gmra.mrb[28].mxu0 %v6345_v14  ;;  %2034 = vmatmul.mubr.bf16.vlgmr.msra.gmra.mrb[28].mxu1 %v6345_v14 }
 0x7ee   :  { %2331 = vmatpush1.bf16.msra.mxu0 %v4817_v18  ;;  %2444 = vmatpush1.bf16.msra.mxu1 %v4820_v43  ;;  %v6448_v18 = vld [vmem:[#allocation12 + $0x1a8] ss:$16 sps:$4 sm:$0xff]   ;;  %v6452_v43 = vld [vmem:[#allocation12 + $0x1c0] ss:$16 sps:$4 sm:$0xff]  }
 0x7ef   :  { %2332 = vmatprep.subr.bf16.mxu0 %v4825_v9  ;;  %2445 = vmatprep.subr.bf16.mxu1 %v4828_v13  ;;  %v6458_v9 = vld [vmem:[#allocation12 + $0x1e4] ss:$16 sps:$4 sm:$0xff]   ;;  %v6460_v13 = vld [vmem:[#allocation12 + $0x1c8] ss:$16 sps:$4 sm:$0xff]  }
 0x7f0   :  { %2362 = vmatprep.mubr.bf16.mxu0 %v5646_v0  ;;  %2475 = vmatprep.mubr.bf16.mxu1 %v5646_v0 }
 0x7f2   :  { %2333 = vmatpush1.bf16.msra.mxu0 %v4823_v61  ;;  %2446 = vmatpush1.bf16.msra.mxu1 %v4826_v21  ;;  %v6463_v61 = vld [vmem:[#allocation12 + $0x1ec] ss:$16 sps:$4 sm:$0xff]   ;;  %v6466_v21 = vld [vmem:[#allocation12 + $0x1e0] ss:$16 sps:$4 sm:$0xff]  }
 0x7f3   :  { %2334 = vmatprep.subr.bf16.mxu0 %v4831_v27  ;;  %2447 = vmatprep.subr.bf16.mxu1 %v4834_v34  ;;  %v6470_v27 = vld [vmem:[#allocation12 + $0x1e8] ss:$16 sps:$4 sm:$0xff]  }
 0x7f6   :  { %2335 = vmatpush1.bf16.msra.mxu0 %v4829_v5  ;;  %2448 = vmatpush1.bf16.msra.mxu1 %v4832_v36 }
 0x7f7   :  { %2336 = vmatprep.subr.bf16.mxu0 %v4837_v37  ;;  %2449 = vmatprep.subr.bf16.mxu1 %v4840_v38 }
 0x7fa   :  { %2337 = vmatpush1.bf16.msra.mxu0 %v4835_v39  ;;  %2450 = vmatpush1.bf16.msra.mxu1 %v4838_v40 }
 0x7fb   :  { %2338 = vmatprep.subr.bf16.mxu0 %v4843_v41  ;;  %2451 = vmatprep.subr.bf16.mxu1 %v4846_v42 }
 0x7fe   :  { %2339 = vmatpush1.bf16.msra.mxu0 %v4841_v44  ;;  %2452 = vmatpush1.bf16.msra.mxu1 %v4844_v45 }
 0x7ff   :  { %2340 = vmatprep.subr.bf16.mxu0 %v4849_v46  ;;  %2453 = vmatprep.subr.bf16.mxu1 %v4852_v47 }
 0x802   :  { %2341 = vmatpush1.bf16.msra.mxu0 %v4847_v20  ;;  %2454 = vmatpush1.bf16.msra.mxu1 %v4850_v33 }
 0x803   :  { %2342 = vmatprep.subr.bf16.mxu0 %v4855_v26  ;;  %2455 = vmatprep.subr.bf16.mxu1 %v4858_v24 }
 0x806   :  { %2343 = vmatpush1.bf16.msra.mxu0 %v4853_v23  ;;  %2456 = vmatpush1.bf16.msra.mxu1 %v4856_v35 }
 0x807   :  { %2344 = vmatprep.subr.bf16.mxu0 %v4861_v62  ;;  %2457 = vmatprep.subr.bf16.mxu1 %v4864_v48 }
 0x80a   :  { %2345 = vmatpush1.bf16.msra.mxu0 %v4859_v49  ;;  %2458 = vmatpush1.bf16.msra.mxu1 %v4862_v1 }
 0x80b   :  { %2828 = vmatprep.subr.bf16.mxu0 %v6351_v59 }
 0x80d   :  { %2363 = vmatmul.mubr.bf16.vlgmr.msra.gmra.mrb[32].mxu0 %v5959_v30  ;;  %2476 = vmatmul.mubr.bf16.vlgmr.msra.gmra.mrb[32].mxu1 %v5959_v30  ;;  %v6385_v30 = vld [vmem:[#allocation12 + $0x10c] ss:$16 sps:$4 sm:$0xff]  }
 0x80e   :  { %2372 = vmatprep.mubr.bf16.mxu0 %v5646_v0  ;;  %2485 = vmatprep.mubr.bf16.mxu1 %v5646_v0 }
 0x80f   :  { %2829 = vmatpush1.bf16.msra.mxu0 %v6354_v56  ;;  %2871 = vmatprep.subr.bf16.mxu1 %v6385_v30 }
 0x815   :  { %2373 = vmatmul.mubr.bf16.gmra.mrb[36].mxu0 %v6013_v29  ;;  %2486 = vmatmul.mubr.bf16.gmra.mrb[36].mxu1 %v6013_v29  ;;  %v6387_v29 = vld [vmem:[#allocation12 + $0x108] ss:$16 sps:$4 sm:$0xff]  }
 0x816   :  { %2382 = vmatprep.mubr.bf16.mxu0 %v5646_v0  ;;  %2495 = vmatprep.mubr.bf16.mxu1 %v5646_v0 }
 0x817   :  { %2872 = vmatpush1.bf16.msra.mxu1 %v6387_v29 }
 0x81d   :  { %2383 = vmatmul.mubr.bf16.gmra.mrb[40].mxu0 %v6067_v31  ;;  %2496 = vmatmul.mubr.bf16.gmra.mrb[40].mxu1 %v6067_v31  ;;  %v6391_v31 = vld [vmem:[#allocation12 + $0x124] ss:$16 sps:$4 sm:$0xff]  }
 0x81e   :  { %2392 = vmatprep.mubr.bf16.mxu0 %v5646_v0  ;;  %2505 = vmatprep.mubr.bf16.mxu1 %v5646_v0 }
 0x81f   :  { %2830 = vmatprep.subr.bf16.mxu0 %v6391_v31 }
 0x825   :  { %2393 = vmatmul.mubr.bf16.gmra.mrb[44].mxu0 %v6147_v4  ;;  %2506 = vmatmul.mubr.bf16.gmra.mrb[44].mxu1 %v6147_v4  ;;  %v6393_v4 = vld [vmem:[#allocation12 + $0x12c] ss:$16 sps:$4 sm:$0xff]  }
 0x826   :  { %2402 = vmatprep.mubr.bf16.mxu0 %v5646_v0  ;;  %2515 = vmatprep.mubr.bf16.mxu1 %v5646_v0 }
 0x827   :  { %2873 = vmatprep.subr.bf16.mxu1 %v6393_v4 }
 0x82d   :  { %2403 = vmatmul.mubr.bf16.gmra.mrb[48].mxu0 %v6239_v25  ;;  %2516 = vmatmul.mubr.bf16.gmra.mrb[48].mxu1 %v6239_v25  ;;  %v6395_v25 = vld [vmem:[#allocation12 + $0x120] ss:$16 sps:$4 sm:$0xff]  }
 0x82e   :  { %2412 = vmatprep.mubr.bf16.mxu0 %v5646_v0  ;;  %2525 = vmatprep.mubr.bf16.mxu1 %v5646_v0 }
 0x82f   :  { %2831 = vmatpush1.bf16.msra.mxu0 %v6395_v25 }
 0x830   :  { %2832 = vmatprep.subr.bf16.mxu0 %v6403_v53 }
 0x833   :  { %2833 = vmatpush1.bf16.msra.mxu0 %v6405_v57 }
 0x834   :  { %2834 = vmatprep.subr.bf16.mxu0 %v6407_v19 }
 0x835   :  { %2413 = vmatmul.mubr.bf16.gmra.mrb[52].mxu0 %v6293_v52  ;;  %2526 = vmatmul.mubr.bf16.gmra.mrb[52].mxu1 %v6293_v52  ;;  %v6397_v52 = vld [vmem:[#allocation12 + $0x128] ss:$16 sps:$4 sm:$0xff]  }
 0x836   :  { %2422 = vmatprep.mubr.bf16.mxu0 %v5646_v0  ;;  %2535 = vmatprep.mubr.bf16.mxu1 %v5646_v0 }
 0x837   :  { %2874 = vmatpush1.bf16.msra.mxu1 %v6397_v52  ;;  %2835 = vmatpush1.bf16.msra.mxu0 %v6417_v50 }
 0x838   :  { %2875 = vmatprep.subr.bf16.mxu1 %v6409_v60  ;;  %2836 = vmatprep.subr.bf16.mxu0 %v6421_v55 }
 0x83b   :  { %2876 = vmatpush1.bf16.msra.mxu1 %v6412_v3  ;;  %2837 = vmatpush1.bf16.msra.mxu0 %v6430_v11 }
 0x83c   :  { %2877 = vmatprep.subr.bf16.mxu1 %v6414_v63  ;;  %2838 = vmatprep.subr.bf16.mxu0 %v6433_v22 }
 0x83d   :  { %2423 = vmatmul.mubr.bf16.gmra.mrb[56].mxu0 %v6345_v14  ;;  %2536 = vmatmul.mubr.bf16.gmra.mrb[56].mxu1 %v6345_v14  ;;  %v6454_v14 = vld [vmem:[#allocation12 + $0x1cc] ss:$16 sps:$4 sm:$0xff]  }
 0x83e   :  { %2432 = vmatprep.mubr.bf16.mxu0 %v5646_v0  ;;  %2545 = vmatprep.mubr.bf16.mxu1 %v5646_v0 }
 0x83f   :  { %2878 = vmatpush1.bf16.msra.mxu1 %v6424_v54  ;;  %2839 = vmatpush1.bf16.msra.mxu0 %v6442_v51 }
 0x840   :  { %2879 = vmatprep.subr.bf16.mxu1 %v6427_v15  ;;  %2840 = vmatprep.subr.bf16.mxu0 %v6445_v7 }
 0x843   :  { %2880 = vmatpush1.bf16.msra.mxu1 %v6436_v28  ;;  %2841 = vmatpush1.bf16.msra.mxu0 %v6452_v43 }
 0x844   :  { %2881 = vmatprep.subr.bf16.mxu1 %v6439_v8  ;;  %2842 = vmatprep.subr.bf16.mxu0 %v6458_v9 }
 0x847   :  { %2882 = vmatpush1.bf16.msra.mxu1 %v6448_v18  ;;  %2843 = vmatpush1.bf16.msra.mxu0 %v6466_v21 }
 0x848   :  { %2883 = vmatprep.subr.bf16.mxu1 %v6454_v14  ;;  %2979 = vmatprep.subr.bf16.mxu0 %v6351_v59 }
 0x84b   :  { %2884 = vmatpush1.bf16.msra.mxu1 %v6460_v13 }
 0x84c   :  { %2885 = vmatprep.subr.bf16.mxu1 %v6463_v61 }
 0x84f   :  { %2886 = vmatpush1.bf16.msra.mxu1 %v6470_v27 }
 0x850   :  { %3022 = vmatprep.subr.bf16.mxu1 %v6385_v30 }
 0x8c0   :  { %v1992_v34 = vpop.f32.mrb[28].mxu0  ;;  %v2035_v5 = vpop.f32.mrb[28].mxu1 }
 0x8c1   :  { %v4469_v36 = vadd.f32 %v1992_v34, %v5929_v16  ;;  %v1994_v37 = vpop.f32.mrb[29].mxu0  ;;  %v2037_v38 = vpop.f32.mrb[29].mxu1  ;;  %v4501_v24 = vadd.f32 %v2035_v5, %v5942_v32 }
 0x8c2   :  { %v4470_v39 = vadd.f32 %v1994_v37, %v5933_v17  ;;  %v1996_v40 = vpop.f32.mrb[30].mxu0  ;;  %v2039_v41 = vpop.f32.mrb[30].mxu1  ;;  %v4502_v35 = vadd.f32 %v2037_v38, %v5947_v6 }
 0x8c3   :  { %v4284_v42 = vmul.f32 -1.442695, %v4469_v36  ;;  %v4471_v44 = vadd.f32 %v1996_v40, %v5929_v16  ;;  %v1998_v45 = vpop.f32.mrb[31].mxu0  ;;  %v2041_v46 = vpop.f32.mrb[31].mxu1  ;;  %v4503_v23 = vadd.f32 %v2039_v41, %v5942_v32  ;;  %v4286_v62 = vmul.f32 -1.442695, %v4501_v24 }
 0x8c4   :  { %v4285_v47 = vmul.f32 -1.442695, %v4470_v39  ;;  %v4472_v20 = vadd.f32 %v1998_v45, %v5933_v17  ;;  %v4504_v49 = vadd.f32 %v2041_v46, %v5947_v6 }
 0x8c5   :  { %5145 = vpow2.f32 %v4284_v42  ;;  %v4287_v33 = vmul.f32 -1.442695, %v4471_v44  ;;  %v4289_v48 = vmul.f32 -1.442695, %v4503_v23 }
 0x8c6   :  { %v4288_v26 = vmul.f32 -1.442695, %v4472_v20  ;;  %5147 = vpow2.f32 %v4285_v47 }
 0x8c7   :  { %5149 = vpow2.f32 %v4287_v33 }
 0x8c8   :  { %5151 = vpow2.f32 %v4288_v26 }
 0x8c9   :  { %5153 = vtanh.f32 %v4502_v35 }
 0x8ca   :  { %5155 = vpow2.f32 %v4286_v62 }
 0x8cb   :  { %5157 = vpow2.f32 %v4289_v48 }
 0x8cf   :  { %v5146_v16 = vpop.eup %5145 }
 0x8d0   :  { %v2070_v1 = vadd.f32 1.0, %v5146_v16  ;;  %v5148_v17 = vpop.eup %5147 }
 0x8d1   :  { %v5150_v34 = vpop.eup %5149  ;;  %v2071_v36 = vadd.f32 1.0, %v5148_v17 }
 0x8d2   :  { %5159 = vrcp.f32 %v2070_v1  ;;  %v2073_v5 = vadd.f32 1.0, %v5150_v34  ;;  %v5152_v37 = vpop.eup %5151 }
 0x8d3   :  { %5161 = vtanh.f32 %v4504_v49  ;;  %v2074_v32 = vadd.f32 1.0, %v5152_v37  ;;  %v5154_v38 = vpop.eup %5153 }
 0x8d4   :  { %5163 = vrcp.f32 %v2071_v36  ;;  %v5156_v39 = vpop.eup %5155  ;;  %v6958_v36 = vsub.s32 1, %v5920_v12 }
 0x8d5   :  { %5165 = vrcp.f32 %v2073_v5  ;;  %v5158_v40 = vpop.eup %5157  ;;  %v2072_v45 = vadd.f32 1.0, %v5156_v39 }
 0x8d6   :  { %5167 = vrcp.f32 %v2074_v32  ;;  %v2075_v24 = vadd.f32 1.0, %v5158_v40 }
 0x8d7   :  { %5169 = vrcp.f32 %v2072_v45 }
 0x8dc   :  { %v5160_v41 = vpop.eup %5159 }
 0x8dd   :  { %v5162_v42 = vpop.eup %5161  ;;  %v2092_v6 = vmul.f32 %v5160_v41, %v5154_v38 }
 0x8de   :  { %v5164_v44 = vpop.eup %5163 }
 0x8df   :  { %v5166_v46 = vpop.eup %5165  ;;  %v2090_v47 = vmul.f32 %v5164_v44, %v6338_v2  ;;  %v6957_v2 = vsub.s32 0, %v5920_v12 }
 0x8e0   :  { %v2093_v20 = vmul.f32 %v5166_v46, %v5162_v42  ;;  %v5168_v33 = vpop.eup %5167 }
 0x8e1   :  { %v2094_v26 = vadd.f32 %v2092_v6, %v2090_v47  ;;  %v2091_v23 = vmul.f32 %v5168_v33, %v6342_v58  ;;  %v5170_v62 = vpop.eup %5169 }
 0x8e3   :  { %5171 = vtanh.f32 %v2094_v26  ;;  %v2095_v35 = vadd.f32 %v2093_v20, %v2091_v23  ;;  %v6959_v20 = vsub.s32 2, %v5920_v12 }
 0x8e4   :  { %5173 = vrcp.f32 %v2075_v24 }
 0x8e5   :  { %5175 = vtanh.f32 %v2095_v35 }
 0x8ed   :  { %v5172_v48 = vpop.eup %5171 }
 0x8ee   :  { %v2098_v16 = vmul.f32 %v5172_v48, %v5170_v62  ;;  %v5174_v49 = vpop.eup %5173  ;;  %v6960_v62 = vsub.s32 3, %v5920_v12 }
 0x8ef   :  { %v5176_v1 = vpop.eup %5175 }
 0x8f0   :  { %v2099_v17 = vmul.f32 %v5176_v1, %v5174_v49 }
 0x8f2   :  { %v2100_v34 = vpack.c.bf16 %v2099_v17, %v2098_v16 }
 0x8f4   :  { %2433 = vmatmul.mubr.bf16.gmra.mrb[60].mxu0 %v2100_v34  ;;  %2546 = vmatmul.mubr.bf16.gmra.mrb[60].mxu1 %v2100_v34 }
 0x8f5   :  { %2860 = vmatprep.mubr.bf16.mxu0 %v5646_v0  ;;  %2903 = vmatprep.mubr.bf16.mxu1 %v5646_v0 }
 0x8fc   :  { %2861 = vmatmul.mubr.bf16.vlgmr.msra.gmra.mrb[32].mxu0 %v5647_v10  ;;  %2904 = vmatmul.mubr.bf16.vlgmr.msra.gmra.mrb[32].mxu1 %v5647_v10  ;;  %v4290_v10 = vld [vmem:[%s6949_s4 + $0x4] sm:$0xf] }
 0x8fd   :  { %2980 = vmatpush1.bf16.msra.mxu0 %v6354_v56  ;;  %3023 = vmatpush1.bf16.msra.mxu1 %v6387_v29  ;;  %v6530_v58 = vrot.slane %v4290_v10, %v6957_v2  ;;  %v6534_v5 = vrot.slane %v4290_v10, %v6958_v36  ;;  %v6541_v33 = vrot.slane %v4290_v10, %v6959_v20 }
 0x8fe   :  { %2981 = vmatprep.subr.bf16.mxu0 %v6391_v31  ;;  %3024 = vmatprep.subr.bf16.mxu1 %v6393_v4  ;;  %v6546_v48 = vrot.slane %v4290_v10, %v6960_v62 }
 0x8ff   :  { %3011 = vmatprep.mubr.bf16.mxu0 %v5646_v0  ;;  %3054 = vmatprep.mubr.bf16.mxu1 %v5646_v0 }
 0x901   :  { %2982 = vmatpush1.bf16.msra.mxu0 %v6395_v25  ;;  %3025 = vmatpush1.bf16.msra.mxu1 %v6397_v52 }
 0x902   :  { %2983 = vmatprep.subr.bf16.mxu0 %v6403_v53  ;;  %3026 = vmatprep.subr.bf16.mxu1 %v6409_v60 }
 0x905   :  { %2984 = vmatpush1.bf16.msra.mxu0 %v6405_v57  ;;  %3027 = vmatpush1.bf16.msra.mxu1 %v6412_v3 }
 0x906   :  { %2985 = vmatprep.subr.bf16.mxu0 %v6407_v19  ;;  %3028 = vmatprep.subr.bf16.mxu1 %v6414_v63 }
 0x909   :  { %2986 = vmatpush1.bf16.msra.mxu0 %v6417_v50  ;;  %3029 = vmatpush1.bf16.msra.mxu1 %v6424_v54 }
 0x90a   :  { %2987 = vmatprep.subr.bf16.mxu0 %v6421_v55  ;;  %3030 = vmatprep.subr.bf16.mxu1 %v6427_v15 }
 0x90d   :  { %2988 = vmatpush1.bf16.msra.mxu0 %v6430_v11  ;;  %3031 = vmatpush1.bf16.msra.mxu1 %v6436_v28 }
 0x90e   :  { %2989 = vmatprep.subr.bf16.mxu0 %v6433_v22  ;;  %3032 = vmatprep.subr.bf16.mxu1 %v6439_v8 }
 0x911   :  { %2990 = vmatpush1.bf16.msra.mxu0 %v6442_v51  ;;  %3033 = vmatpush1.bf16.msra.mxu1 %v6448_v18 }
 0x912   :  { %2991 = vmatprep.subr.bf16.mxu0 %v6445_v7  ;;  %3034 = vmatprep.subr.bf16.mxu1 %v6454_v14 }
 0x915   :  { %2992 = vmatpush1.bf16.msra.mxu0 %v6452_v43  ;;  %3035 = vmatpush1.bf16.msra.mxu1 %v6460_v13 }
 0x916   :  { %2993 = vmatprep.subr.bf16.mxu0 %v6458_v9  ;;  %3036 = vmatprep.subr.bf16.mxu1 %v6463_v61 }
 0x919   :  { %2994 = vmatpush1.bf16.msra.mxu0 %v6466_v21  ;;  %3037 = vmatpush1.bf16.msra.mxu1 %v6470_v27 }
 0x91a   :  { %3130 = vmatprep.subr.bf16.mxu0 %v6351_v59  ;;  %3173 = vmatprep.subr.bf16.mxu1 %v6385_v30 }
 0x9cf   :  { %v2862_v37 = vpop.f32.mrb[32].mxu0  ;;  %v2905_v32 = vpop.f32.mrb[32].mxu1 }
 0x9d0   :  { %v4505_v38 = vadd.f32 %v2862_v37, %v6530_v58  ;;  %v2864_v39 = vpop.f32.mrb[33].mxu0  ;;  %v2907_v40 = vpop.f32.mrb[33].mxu1  ;;  %v4537_v16 = vadd.f32 %v2905_v32, %v6541_v33 }
 0x9d1   :  { %v4506_v41 = vadd.f32 %v2864_v39, %v6534_v5  ;;  %v2866_v42 = vpop.f32.mrb[34].mxu0  ;;  %v2909_v6 = vpop.f32.mrb[34].mxu1  ;;  %v4538_v1 = vadd.f32 %v2907_v40, %v6546_v48 }
 0x9d2   :  { %v4355_v44 = vmul.f32 -1.442695, %v4505_v38  ;;  %v4507_v45 = vadd.f32 %v2866_v42, %v6530_v58  ;;  %v2868_v46 = vpop.f32.mrb[35].mxu0  ;;  %v2911_v47 = vpop.f32.mrb[35].mxu1  ;;  %v4539_v49 = vadd.f32 %v2909_v6, %v6541_v33  ;;  %v4357_v17 = vmul.f32 -1.442695, %v4537_v16 }
 0x9d3   :  { %v4356_v26 = vmul.f32 -1.442695, %v4506_v41  ;;  %v4508_v24 = vadd.f32 %v2868_v46, %v6534_v5  ;;  %v4540_v36 = vadd.f32 %v2911_v47, %v6546_v48 }
 0x9d4   :  { %5177 = vpow2.f32 %v4355_v44  ;;  %v4358_v23 = vmul.f32 -1.442695, %v4507_v45  ;;  %v4360_v34 = vmul.f32 -1.442695, %v4539_v49 }
 0x9d5   :  { %v4359_v35 = vmul.f32 -1.442695, %v4508_v24  ;;  %5179 = vpow2.f32 %v4356_v26 }
 0x9d6   :  { %5181 = vpow2.f32 %v4358_v23 }
 0x9d7   :  { %5183 = vpow2.f32 %v4359_v35 }
 0x9d8   :  { %5185 = vtanh.f32 %v4538_v1 }
 0x9d9   :  { %5187 = vpow2.f32 %v4357_v17 }
 0x9da   :  { %5189 = vpow2.f32 %v4360_v34 }
 0x9de   :  { %v5178_v2 = vpop.eup %5177 }
 0x9df   :  { %v2940_v37 = vadd.f32 1.0, %v5178_v2  ;;  %v5180_v38 = vpop.eup %5179 }
 0x9e0   :  { %v5182_v12 = vpop.eup %5181  ;;  %v2941_v10 = vadd.f32 1.0, %v5180_v38 }
 0x9e1   :  { %5191 = vrcp.f32 %v2940_v37  ;;  %v2943_v32 = vadd.f32 1.0, %v5182_v12  ;;  %v5184_v39 = vpop.eup %5183 }
 0x9e2   :  { %5193 = vtanh.f32 %v4540_v36  ;;  %v2944_v41 = vadd.f32 1.0, %v5184_v39  ;;  %v5186_v40 = vpop.eup %5185 }
 0x9e3   :  { %5195 = vrcp.f32 %v2941_v10  ;;  %v5188_v42 = vpop.eup %5187 }
 0x9e4   :  { %5197 = vrcp.f32 %v2943_v32  ;;  %v5190_v6 = vpop.eup %5189  ;;  %v2942_v26 = vadd.f32 1.0, %v5188_v42 }
 0x9e5   :  { %5199 = vrcp.f32 %v2944_v41  ;;  %v2945_v16 = vadd.f32 1.0, %v5190_v6 }
 0x9e6   :  { %5201 = vrcp.f32 %v2942_v26 }
 0x9eb   :  { %v5192_v44 = vpop.eup %5191 }
 0x9ec   :  { %v5194_v45 = vpop.eup %5193  ;;  %v2962_v46 = vmul.f32 %v5192_v44, %v5186_v40 }
 0x9ed   :  { %v5196_v47 = vpop.eup %5195 }
 0x9ee   :  { %v5198_v20 = vpop.eup %5197  ;;  %v2960_v24 = vmul.f32 0.0, %v5196_v47 }
 0x9ef   :  { %v2963_v23 = vmul.f32 %v5198_v20, %v5194_v45  ;;  %v5200_v35 = vpop.eup %5199 }
 0x9f0   :  { %v6552_v62 = vadd.f32 %v2962_v46, %v2960_v24  ;;  %v2961_v49 = vmul.f32 0.0, %v5200_v35  ;;  %v5202_v17 = vpop.eup %5201 }
 0x9f2   :  { %5203 = vtanh.f32 %v6552_v62  ;;  %v6555_v1 = vadd.f32 %v2963_v23, %v2961_v49 }
 0x9f3   :  { %5205 = vrcp.f32 %v2945_v16 }
 0x9f4   :  { %5207 = vtanh.f32 %v6555_v1 }
 0x9fc   :  { %v5204_v34 = vpop.eup %5203 }
 0x9fd   :  { %v5206_v2 = vpop.eup %5205  ;;  %v2968_v37 = vmul.f32 %v5204_v34, %v5202_v17 }
 0x9fe   :  { %v5208_v36 = vpop.eup %5207 }
 0x9ff   :  { %v2969_v38 = vmul.f32 %v5208_v36, %v5206_v2 }
 0xa01   :  { %v2978_v12 = vpack.c.bf16 %v2969_v38, %v2968_v37 }
 0xa03   :  { %3012 = vmatmul.mubr.bf16.vlgmr.msra.gmra.mrb[36].mxu0 %v2978_v12  ;;  %3055 = vmatmul.mubr.bf16.vlgmr.msra.gmra.mrb[36].mxu1 %v2978_v12 }
 0xa04   :  { %3131 = vmatpush1.bf16.msra.mxu0 %v6354_v56  ;;  %3174 = vmatpush1.bf16.msra.mxu1 %v6387_v29 }
 0xa05   :  { %3132 = vmatprep.subr.bf16.mxu0 %v6391_v31  ;;  %3175 = vmatprep.subr.bf16.mxu1 %v6393_v4 }
 0xa06   :  { %3162 = vmatprep.mubr.bf16.mxu0 %v5646_v0  ;;  %3205 = vmatprep.mubr.bf16.mxu1 %v5646_v0 }
 0xa08   :  { %3133 = vmatpush1.bf16.msra.mxu0 %v6395_v25  ;;  %3176 = vmatpush1.bf16.msra.mxu1 %v6397_v52 }
 0xa09   :  { %3134 = vmatprep.subr.bf16.mxu0 %v6403_v53  ;;  %3177 = vmatprep.subr.bf16.mxu1 %v6409_v60 }
 0xa0c   :  { %3135 = vmatpush1.bf16.msra.mxu0 %v6405_v57  ;;  %3178 = vmatpush1.bf16.msra.mxu1 %v6412_v3 }
 0xa0d   :  { %3136 = vmatprep.subr.bf16.mxu0 %v6407_v19  ;;  %3179 = vmatprep.subr.bf16.mxu1 %v6414_v63 }
 0xa10   :  { %3137 = vmatpush1.bf16.msra.mxu0 %v6417_v50  ;;  %3180 = vmatpush1.bf16.msra.mxu1 %v6424_v54 }
 0xa11   :  { %3138 = vmatprep.subr.bf16.mxu0 %v6421_v55  ;;  %3181 = vmatprep.subr.bf16.mxu1 %v6427_v15 }
 0xa14   :  { %3139 = vmatpush1.bf16.msra.mxu0 %v6430_v11  ;;  %3182 = vmatpush1.bf16.msra.mxu1 %v6436_v28 }
 0xa15   :  { %3140 = vmatprep.subr.bf16.mxu0 %v6433_v22  ;;  %3183 = vmatprep.subr.bf16.mxu1 %v6439_v8 }
 0xa18   :  { %3141 = vmatpush1.bf16.msra.mxu0 %v6442_v51  ;;  %3184 = vmatpush1.bf16.msra.mxu1 %v6448_v18 }
 0xa19   :  { %3142 = vmatprep.subr.bf16.mxu0 %v6445_v7  ;;  %3185 = vmatprep.subr.bf16.mxu1 %v6454_v14 }
 0xa1c   :  { %3143 = vmatpush1.bf16.msra.mxu0 %v6452_v43  ;;  %3186 = vmatpush1.bf16.msra.mxu1 %v6460_v13 }
 0xa1d   :  { %3144 = vmatprep.subr.bf16.mxu0 %v6458_v9  ;;  %3187 = vmatprep.subr.bf16.mxu1 %v6463_v61 }
 0xa20   :  { %3145 = vmatpush1.bf16.msra.mxu0 %v6466_v21  ;;  %3188 = vmatpush1.bf16.msra.mxu1 %v6470_v27 }
 0xa21   :  { %3281 = vmatprep.subr.bf16.mxu0 %v6351_v59  ;;  %3324 = vmatprep.subr.bf16.mxu1 %v6385_v30 }
 0xad6   :  { %v3013_v10 = vpop.f32.mrb[36].mxu0  ;;  %v3056_v32 = vpop.f32.mrb[36].mxu1 }
 0xad7   :  { %v4509_v39 = vadd.f32 %v3013_v10, %v6530_v58  ;;  %v3015_v41 = vpop.f32.mrb[37].mxu0  ;;  %v3058_v40 = vpop.f32.mrb[37].mxu1  ;;  %v4541_v16 = vadd.f32 %v3056_v32, %v6541_v33 }
 0xad8   :  { %v4510_v42 = vadd.f32 %v3015_v41, %v6534_v5  ;;  %v3017_v6 = vpop.f32.mrb[38].mxu0  ;;  %v3060_v44 = vpop.f32.mrb[38].mxu1  ;;  %v4542_v17 = vadd.f32 %v3058_v40, %v6546_v48 }
 0xad9   :  { %v4361_v45 = vmul.f32 -1.442695, %v4509_v39  ;;  %v4511_v46 = vadd.f32 %v3017_v6, %v6530_v58  ;;  %v3019_v47 = vpop.f32.mrb[39].mxu0  ;;  %v3062_v20 = vpop.f32.mrb[39].mxu1  ;;  %v4543_v49 = vadd.f32 %v3060_v44, %v6541_v33  ;;  %v4363_v34 = vmul.f32 -1.442695, %v4541_v16 }
 0xada   :  { %v4362_v26 = vmul.f32 -1.442695, %v4510_v42  ;;  %v4512_v24 = vadd.f32 %v3019_v47, %v6534_v5  ;;  %v4544_v37 = vadd.f32 %v3062_v20, %v6546_v48 }
 0xadb   :  { %5209 = vpow2.f32 %v4361_v45  ;;  %v4364_v23 = vmul.f32 -1.442695, %v4511_v46  ;;  %v4366_v2 = vmul.f32 -1.442695, %v4543_v49 }
 0xadc   :  { %v4365_v35 = vmul.f32 -1.442695, %v4512_v24  ;;  %5211 = vpow2.f32 %v4362_v26 }
 0xadd   :  { %5213 = vpow2.f32 %v4364_v23 }
 0xade   :  { %5215 = vpow2.f32 %v4365_v35 }
 0xadf   :  { %5217 = vtanh.f32 %v4542_v17 }
 0xae0   :  { %5219 = vpow2.f32 %v4363_v34 }
 0xae1   :  { %5221 = vpow2.f32 %v4366_v2 }
 0xae5   :  { %v5210_v36 = vpop.eup %5209 }
 0xae6   :  { %v3091_v38 = vadd.f32 1.0, %v5210_v36  ;;  %v5212_v12 = vpop.eup %5211 }
 0xae7   :  { %v5214_v10 = vpop.eup %5213  ;;  %v3092_v39 = vadd.f32 1.0, %v5212_v12 }
 0xae8   :  { %5223 = vrcp.f32 %v3091_v38  ;;  %v3094_v32 = vadd.f32 1.0, %v5214_v10  ;;  %v5216_v41 = vpop.eup %5215 }
 0xae9   :  { %5225 = vtanh.f32 %v4544_v37  ;;  %v3095_v42 = vadd.f32 1.0, %v5216_v41  ;;  %v5218_v40 = vpop.eup %5217 }
 0xaea   :  { %5227 = vrcp.f32 %v3092_v39  ;;  %v5220_v6 = vpop.eup %5219 }
 0xaeb   :  { %5229 = vrcp.f32 %v3094_v32  ;;  %v5222_v44 = vpop.eup %5221  ;;  %v3093_v24 = vadd.f32 1.0, %v5220_v6 }
 0xaec   :  { %5231 = vrcp.f32 %v3095_v42  ;;  %v3096_v17 = vadd.f32 1.0, %v5222_v44 }
 0xaed   :  { %5233 = vrcp.f32 %v3093_v24 }
 0xaf2   :  { %v5224_v45 = vpop.eup %5223 }
 0xaf3   :  { %v5226_v46 = vpop.eup %5225  ;;  %v3113_v47 = vmul.f32 %v5224_v45, %v5218_v40 }
 0xaf4   :  { %v5228_v20 = vpop.eup %5227 }
 0xaf5   :  { %v5230_v26 = vpop.eup %5229  ;;  %v3111_v23 = vmul.f32 %v5228_v20, %v6552_v62 }
 0xaf6   :  { %v3114_v35 = vmul.f32 %v5230_v26, %v5226_v46  ;;  %v5232_v16 = vpop.eup %5231 }
 0xaf7   :  { %v6601_v49 = vadd.f32 %v3113_v47, %v3111_v23  ;;  %v3112_v34 = vmul.f32 %v5232_v16, %v6555_v1  ;;  %v5234_v36 = vpop.eup %5233 }
 0xaf9   :  { %5235 = vtanh.f32 %v6601_v49  ;;  %v6605_v2 = vadd.f32 %v3114_v35, %v3112_v34 }
 0xafa   :  { %5237 = vrcp.f32 %v3096_v17 }
 0xafb   :  { %5239 = vtanh.f32 %v6605_v2 }
 0xb03   :  { %v5236_v37 = vpop.eup %5235 }
 0xb04   :  { %v5238_v38 = vpop.eup %5237  ;;  %v3119_v62 = vmul.f32 %v5236_v37, %v5234_v36 }
 0xb05   :  { %v5240_v12 = vpop.eup %5239 }
 0xb06   :  { %v3120_v10 = vmul.f32 %v5240_v12, %v5238_v38 }
 0xb08   :  { %v3129_v39 = vpack.c.bf16 %v3120_v10, %v3119_v62 }
 0xb0a   :  { %3163 = vmatmul.mubr.bf16.vlgmr.msra.gmra.mrb[40].mxu0 %v3129_v39  ;;  %3206 = vmatmul.mubr.bf16.vlgmr.msra.gmra.mrb[40].mxu1 %v3129_v39 }
 0xb0b   :  { %3282 = vmatpush1.bf16.msra.mxu0 %v6354_v56  ;;  %3325 = vmatpush1.bf16.msra.mxu1 %v6387_v29 }
 0xb0c   :  { %3283 = vmatprep.subr.bf16.mxu0 %v6391_v31  ;;  %3326 = vmatprep.subr.bf16.mxu1 %v6393_v4 }
 0xb0d   :  { %3313 = vmatprep.mubr.bf16.mxu0 %v5646_v0  ;;  %3356 = vmatprep.mubr.bf16.mxu1 %v5646_v0 }
 0xb0f   :  { %3284 = vmatpush1.bf16.msra.mxu0 %v6395_v25  ;;  %3327 = vmatpush1.bf16.msra.mxu1 %v6397_v52 }
 0xb10   :  { %3285 = vmatprep.subr.bf16.mxu0 %v6403_v53  ;;  %3328 = vmatprep.subr.bf16.mxu1 %v6409_v60 }
 0xb13   :  { %3286 = vmatpush1.bf16.msra.mxu0 %v6405_v57  ;;  %3329 = vmatpush1.bf16.msra.mxu1 %v6412_v3 }
 0xb14   :  { %3287 = vmatprep.subr.bf16.mxu0 %v6407_v19  ;;  %3330 = vmatprep.subr.bf16.mxu1 %v6414_v63 }
 0xb17   :  { %3288 = vmatpush1.bf16.msra.mxu0 %v6417_v50  ;;  %3331 = vmatpush1.bf16.msra.mxu1 %v6424_v54 }
 0xb18   :  { %3289 = vmatprep.subr.bf16.mxu0 %v6421_v55  ;;  %3332 = vmatprep.subr.bf16.mxu1 %v6427_v15 }
 0xb1b   :  { %3290 = vmatpush1.bf16.msra.mxu0 %v6430_v11  ;;  %3333 = vmatpush1.bf16.msra.mxu1 %v6436_v28 }
 0xb1c   :  { %3291 = vmatprep.subr.bf16.mxu0 %v6433_v22  ;;  %3334 = vmatprep.subr.bf16.mxu1 %v6439_v8 }
 0xb1f   :  { %3292 = vmatpush1.bf16.msra.mxu0 %v6442_v51  ;;  %3335 = vmatpush1.bf16.msra.mxu1 %v6448_v18 }
 0xb20   :  { %3293 = vmatprep.subr.bf16.mxu0 %v6445_v7  ;;  %3336 = vmatprep.subr.bf16.mxu1 %v6454_v14 }
 0xb23   :  { %3294 = vmatpush1.bf16.msra.mxu0 %v6452_v43  ;;  %3337 = vmatpush1.bf16.msra.mxu1 %v6460_v13 }
 0xb24   :  { %3295 = vmatprep.subr.bf16.mxu0 %v6458_v9  ;;  %3338 = vmatprep.subr.bf16.mxu1 %v6463_v61 }
 0xb27   :  { %3296 = vmatpush1.bf16.msra.mxu0 %v6466_v21  ;;  %3339 = vmatpush1.bf16.msra.mxu1 %v6470_v27 }
 0xb28   :  { %3432 = vmatprep.subr.bf16.mxu0 %v6351_v59  ;;  %3475 = vmatprep.subr.bf16.mxu1 %v6385_v30 }
 0xbdd   :  { %v3164_v1 = vpop.f32.mrb[40].mxu0  ;;  %v3207_v32 = vpop.f32.mrb[40].mxu1 }
 0xbde   :  { %v4513_v41 = vadd.f32 %v3164_v1, %v6530_v58  ;;  %v3166_v42 = vpop.f32.mrb[41].mxu0  ;;  %v3209_v40 = vpop.f32.mrb[41].mxu1  ;;  %v4545_v16 = vadd.f32 %v3207_v32, %v6541_v33 }
 0xbdf   :  { %v4514_v6 = vadd.f32 %v3166_v42, %v6534_v5  ;;  %v3168_v44 = vpop.f32.mrb[42].mxu0  ;;  %v3211_v45 = vpop.f32.mrb[42].mxu1  ;;  %v4546_v34 = vadd.f32 %v3209_v40, %v6546_v48 }
 0xbe0   :  { %v4367_v46 = vmul.f32 -1.442695, %v4513_v41  ;;  %v4515_v47 = vadd.f32 %v3168_v44, %v6530_v58  ;;  %v3170_v20 = vpop.f32.mrb[43].mxu0  ;;  %v3213_v26 = vpop.f32.mrb[43].mxu1  ;;  %v4547_v17 = vadd.f32 %v3211_v45, %v6541_v33  ;;  %v4369_v36 = vmul.f32 -1.442695, %v4545_v16 }
 0xbe1   :  { %v4368_v24 = vmul.f32 -1.442695, %v4514_v6  ;;  %v4516_v59 = vadd.f32 %v3170_v20, %v6534_v5  ;;  %v4548_v12 = vadd.f32 %v3213_v26, %v6546_v48 }
 0xbe2   :  { %5241 = vpow2.f32 %v4367_v46  ;;  %v4370_v23 = vmul.f32 -1.442695, %v4515_v47  ;;  %v4372_v37 = vmul.f32 -1.442695, %v4547_v17 }
 0xbe3   :  { %v4371_v35 = vmul.f32 -1.442695, %v4516_v59  ;;  %5243 = vpow2.f32 %v4368_v24 }
 0xbe4   :  { %5245 = vpow2.f32 %v4370_v23 }
 0xbe5   :  { %5247 = vpow2.f32 %v4371_v35 }
 0xbe6   :  { %5249 = vtanh.f32 %v4546_v34 }
 0xbe7   :  { %5251 = vpow2.f32 %v4369_v36 }
 0xbe8   :  { %5253 = vpow2.f32 %v4372_v37 }
 0xbec   :  { %v5242_v38 = vpop.eup %5241 }
 0xbed   :  { %v3242_v62 = vadd.f32 1.0, %v5242_v38  ;;  %v5244_v10 = vpop.eup %5243 }
 0xbee   :  { %v5246_v39 = vpop.eup %5245  ;;  %v3243_v1 = vadd.f32 1.0, %v5244_v10 }
 0xbef   :  { %5255 = vrcp.f32 %v3242_v62  ;;  %v3245_v32 = vadd.f32 1.0, %v5246_v39  ;;  %v5248_v41 = vpop.eup %5247 }
 0xbf0   :  { %5257 = vtanh.f32 %v4548_v12  ;;  %v3246_v42 = vadd.f32 1.0, %v5248_v41  ;;  %v5250_v40 = vpop.eup %5249 }
 0xbf1   :  { %5259 = vrcp.f32 %v3243_v1  ;;  %v5252_v6 = vpop.eup %5251 }
 0xbf2   :  { %5261 = vrcp.f32 %v3245_v32  ;;  %v5254_v44 = vpop.eup %5253  ;;  %v3244_v24 = vadd.f32 1.0, %v5252_v6 }
 0xbf3   :  { %5263 = vrcp.f32 %v3246_v42  ;;  %v3247_v17 = vadd.f32 1.0, %v5254_v44 }
 0xbf4   :  { %5265 = vrcp.f32 %v3244_v24 }
 0xbf9   :  { %v5256_v45 = vpop.eup %5255 }
 0xbfa   :  { %v5258_v46 = vpop.eup %5257  ;;  %v3264_v47 = vmul.f32 %v5256_v45, %v5250_v40 }
 0xbfb   :  { %v5260_v20 = vpop.eup %5259 }
 0xbfc   :  { %v5262_v26 = vpop.eup %5261  ;;  %v3262_v59 = vmul.f32 %v5260_v20, %v6601_v49 }
 0xbfd   :  { %v3265_v23 = vmul.f32 %v5262_v26, %v5258_v46  ;;  %v5264_v35 = vpop.eup %5263 }
 0xbfe   :  { %v6651_v16 = vadd.f32 %v3264_v47, %v3262_v59  ;;  %v3263_v34 = vmul.f32 %v5264_v35, %v6605_v2  ;;  %v5266_v37 = vpop.eup %5265 }
 0xc00   :  { %5267 = vtanh.f32 %v6651_v16  ;;  %v6655_v36 = vadd.f32 %v3265_v23, %v3263_v34 }
 0xc01   :  { %5269 = vrcp.f32 %v3247_v17 }
 0xc02   :  { %5271 = vtanh.f32 %v6655_v36 }
 0xc0a   :  { %v5268_v38 = vpop.eup %5267 }
 0xc0b   :  { %v5270_v12 = vpop.eup %5269  ;;  %v3270_v49 = vmul.f32 %v5268_v38, %v5266_v37 }
 0xc0c   :  { %v5272_v62 = vpop.eup %5271 }
 0xc0d   :  { %v3271_v10 = vmul.f32 %v5272_v62, %v5270_v12  ;;  %v6710_v62 = vld [vmem:[#allocation12 + $0x100] ss:$16 sps:$4 sm:$0xff]  }
 0xc0f   :  { %v3280_v39 = vpack.c.bf16 %v3271_v10, %v3270_v49  ;;  %v6716_v49 = vld [vmem:[#allocation12 + $0x124] ss:$16 sps:$4 sm:$0xff]   ;;  %v6719_v10 = vld [vmem:[#allocation12 + $0x12c] ss:$16 sps:$4 sm:$0xff]  }
 0xc11   :  { %3314 = vmatmul.mubr.bf16.vlgmr.msra.gmra.mrb[44].mxu0 %v3280_v39  ;;  %3357 = vmatmul.mubr.bf16.vlgmr.msra.gmra.mrb[44].mxu1 %v3280_v39  ;;  %v6724_v39 = vld [vmem:[#allocation12 + $0x120] ss:$16 sps:$4 sm:$0xff]  }
 0xc12   :  { %3433 = vmatpush1.bf16.msra.mxu0 %v6354_v56  ;;  %3476 = vmatpush1.bf16.msra.mxu1 %v6387_v29  ;;  %v6690_v56 = vld [vmem:[#allocation12 + $0x104] ss:$16 sps:$4 sm:$0xff]  }
 0xc13   :  { %3434 = vmatprep.subr.bf16.mxu0 %v6391_v31  ;;  %3477 = vmatprep.subr.bf16.mxu1 %v6393_v4 }
 0xc14   :  { %3464 = vmatprep.mubr.bf16.mxu0 %v5646_v0  ;;  %3507 = vmatprep.mubr.bf16.mxu1 %v5646_v0 }
 0xc16   :  { %3435 = vmatpush1.bf16.msra.mxu0 %v6395_v25  ;;  %3478 = vmatpush1.bf16.msra.mxu1 %v6397_v52 }
 0xc17   :  { %3436 = vmatprep.subr.bf16.mxu0 %v6403_v53  ;;  %3479 = vmatprep.subr.bf16.mxu1 %v6409_v60 }
 0xc1a   :  { %3437 = vmatpush1.bf16.msra.mxu0 %v6405_v57  ;;  %3480 = vmatpush1.bf16.msra.mxu1 %v6412_v3 }
 0xc1b   :  { %3438 = vmatprep.subr.bf16.mxu0 %v6407_v19  ;;  %3481 = vmatprep.subr.bf16.mxu1 %v6414_v63 }
 0xc1e   :  { %3439 = vmatpush1.bf16.msra.mxu0 %v6417_v50  ;;  %3482 = vmatpush1.bf16.msra.mxu1 %v6424_v54 }
 0xc1f   :  { %3440 = vmatprep.subr.bf16.mxu0 %v6421_v55  ;;  %3483 = vmatprep.subr.bf16.mxu1 %v6427_v15 }
 0xc22   :  { %3441 = vmatpush1.bf16.msra.mxu0 %v6430_v11  ;;  %3484 = vmatpush1.bf16.msra.mxu1 %v6436_v28 }
 0xc23   :  { %3442 = vmatprep.subr.bf16.mxu0 %v6433_v22  ;;  %3485 = vmatprep.subr.bf16.mxu1 %v6439_v8 }
 0xc26   :  { %3443 = vmatpush1.bf16.msra.mxu0 %v6442_v51  ;;  %3486 = vmatpush1.bf16.msra.mxu1 %v6448_v18 }
 0xc27   :  { %3444 = vmatprep.subr.bf16.mxu0 %v6445_v7  ;;  %3487 = vmatprep.subr.bf16.mxu1 %v6454_v14 }
 0xc2a   :  { %3445 = vmatpush1.bf16.msra.mxu0 %v6452_v43  ;;  %3488 = vmatpush1.bf16.msra.mxu1 %v6460_v13 }
 0xc2b   :  { %3446 = vmatprep.subr.bf16.mxu0 %v6458_v9  ;;  %3489 = vmatprep.subr.bf16.mxu1 %v6463_v61 }
 0xc2e   :  { %3447 = vmatpush1.bf16.msra.mxu0 %v6466_v21  ;;  %3490 = vmatpush1.bf16.msra.mxu1 %v6470_v27 }
 0xc2f   :  { %3583 = vmatprep.subr.bf16.mxu0 %v6690_v56  ;;  %3626 = vmatprep.subr.bf16.mxu1 %v6385_v30 }
 0xce4   :  { %v3315_v29 = vpop.f32.mrb[44].mxu0  ;;  %v3358_v31 = vpop.f32.mrb[44].mxu1 }
 0xce5   :  { %v4517_v4 = vadd.f32 %v3315_v29, %v6530_v58  ;;  %v3317_v25 = vpop.f32.mrb[45].mxu0  ;;  %v3360_v52 = vpop.f32.mrb[45].mxu1  ;;  %v4549_v11 = vadd.f32 %v3358_v31, %v6541_v33  ;;  %v6727_v29 = vld [vmem:[#allocation12 + $0x128] ss:$16 sps:$4 sm:$0xff]   ;;  %v6730_v31 = vld [vmem:[#allocation12 + $0x144] ss:$16 sps:$4 sm:$0xff]  }
 0xce6   :  { %v4518_v53 = vadd.f32 %v3317_v25, %v6534_v5  ;;  %v3319_v57 = vpop.f32.mrb[46].mxu0  ;;  %v3362_v19 = vpop.f32.mrb[46].mxu1  ;;  %v4550_v28 = vadd.f32 %v3360_v52, %v6546_v48  ;;  %v6736_v25 = vld [vmem:[#allocation12 + $0x140] ss:$16 sps:$4 sm:$0xff]   ;;  %v6739_v52 = vld [vmem:[#allocation12 + $0x148] ss:$16 sps:$4 sm:$0xff]  }
 0xce7   :  { %v4373_v60 = vmul.f32 -1.442695, %v4517_v4  ;;  %v4519_v3 = vadd.f32 %v3319_v57, %v6530_v58  ;;  %v3321_v63 = vpop.f32.mrb[47].mxu0  ;;  %v3364_v50 = vpop.f32.mrb[47].mxu1  ;;  %v4551_v22 = vadd.f32 %v3362_v19, %v6541_v33  ;;  %v4375_v8 = vmul.f32 -1.442695, %v4549_v11 }
 0xce8   :  { %v4374_v55 = vmul.f32 -1.442695, %v4518_v53  ;;  %v4520_v54 = vadd.f32 %v3321_v63, %v6534_v5  ;;  %v4552_v18 = vadd.f32 %v3364_v50, %v6546_v48  ;;  %v6733_v4 = vld [vmem:[#allocation12 + $0x14c] ss:$16 sps:$4 sm:$0xff]   ;;  %v6742_v53 = vld [vmem:[#allocation12 + $0x164] ss:$16 sps:$4 sm:$0xff]  }
 0xce9   :  { %5273 = vpow2.f32 %v4373_v60  ;;  %v4376_v30 = vmul.f32 -1.442695, %v4519_v3  ;;  %v4378_v51 = vmul.f32 -1.442695, %v4551_v22  ;;  %v6745_v57 = vld [vmem:[#allocation12 + $0x16c] ss:$16 sps:$4 sm:$0xff]  }
 0xcea   :  { %v4377_v15 = vmul.f32 -1.442695, %v4520_v54  ;;  %5275 = vpow2.f32 %v4374_v55  ;;  %v6748_v19 = vld [vmem:[#allocation12 + $0x160] ss:$16 sps:$4 sm:$0xff]   ;;  %v6751_v60 = vld [vmem:[#allocation12 + $0x168] ss:$16 sps:$4 sm:$0xff]  }
 0xceb   :  { %5277 = vpow2.f32 %v4376_v30  ;;  %v6754_v3 = vld [vmem:[#allocation12 + $0x184] ss:$16 sps:$4 sm:$0xff]   ;;  %v6757_v63 = vld [vmem:[#allocation12 + $0x18c] ss:$16 sps:$4 sm:$0xff]   ;;  %v6760_v50 = vld [vmem:[#allocation12 + $0x180] ss:$16 sps:$4 sm:$0xff]  }
 0xcec   :  { %5279 = vpow2.f32 %v4377_v15  ;;  %v6763_v55 = vld [vmem:[#allocation12 + $0x188] ss:$16 sps:$4 sm:$0xff]   ;;  %v6766_v54 = vld [vmem:[#allocation12 + $0x1a4] ss:$16 sps:$4 sm:$0xff]   ;;  %v6769_v30 = vld [vmem:[#allocation12 + $0x1ac] ss:$16 sps:$4 sm:$0xff]  }
 0xced   :  { %5281 = vtanh.f32 %v4550_v28  ;;  %v6772_v15 = vld [vmem:[#allocation12 + $0x1a0] ss:$16 sps:$4 sm:$0xff]   ;;  %v6775_v11 = vld [vmem:[#allocation12 + $0x1a8] ss:$16 sps:$4 sm:$0xff]   ;;  %v6778_v22 = vld [vmem:[#allocation12 + $0x1c4] ss:$16 sps:$4 sm:$0xff]  }
 0xcee   :  { %5283 = vpow2.f32 %v4375_v8  ;;  %v6781_v28 = vld [vmem:[#allocation12 + $0x1cc] ss:$16 sps:$4 sm:$0xff]   ;;  %v6784_v8 = vld [vmem:[#allocation12 + $0x1c0] ss:$16 sps:$4 sm:$0xff]  }
 0xcef   :  { %5285 = vpow2.f32 %v4378_v51  ;;  %v6787_v51 = vld [vmem:[#allocation12 + $0x1c8] ss:$16 sps:$4 sm:$0xff]  }
 0xcf3   :  { %v5274_v7 = vpop.eup %5273 }
 0xcf4   :  { %v3393_v43 = vadd.f32 1.0, %v5274_v7  ;;  %v5276_v14 = vpop.eup %5275  ;;  %v6790_v7 = vld [vmem:[#allocation12 + $0x1e4] ss:$16 sps:$4 sm:$0xff]  }
 0xcf5   :  { %v5278_v9 = vpop.eup %5277  ;;  %v3394_v13 = vadd.f32 1.0, %v5276_v14  ;;  %v6799_v14 = vld [vmem:[#allocation12 + $0x1e8] ss:$16 sps:$4 sm:$0xff]  }
 0xcf6   :  { %5287 = vrcp.f32 %v3393_v43  ;;  %v3396_v61 = vadd.f32 1.0, %v5278_v9  ;;  %v5280_v21 = vpop.eup %5279  ;;  %v6796_v43 = vld [vmem:[#allocation12 + $0x1e0] ss:$16 sps:$4 sm:$0xff]   ;;  %v6803_v9 = vld [vmem:[#allocation12 + $0x10c] ss:$16 sps:$4 sm:$0xff]  }
 0xcf7   :  { %5289 = vtanh.f32 %v4552_v18  ;;  %v3397_v27 = vadd.f32 1.0, %v5280_v21  ;;  %v5282_v2 = vpop.eup %5281  ;;  %v6793_v18 = vld [vmem:[#allocation12 + $0x1ec] ss:$16 sps:$4 sm:$0xff]  }
 0xcf8   :  { %5291 = vrcp.f32 %v3394_v13  ;;  %v5284_v1 = vpop.eup %5283 }
 0xcf9   :  { %5293 = vrcp.f32 %v3396_v61  ;;  %v5286_v32 = vpop.eup %5285  ;;  %v3395_v45 = vadd.f32 1.0, %v5284_v1 }
 0xcfa   :  { %5295 = vrcp.f32 %v3397_v27  ;;  %v3398_v24 = vadd.f32 1.0, %v5286_v32 }
 0xcfb   :  { %5297 = vrcp.f32 %v3395_v45 }
 0xd00   :  { %v5288_v41 = vpop.eup %5287 }
 0xd01   :  { %v5290_v42 = vpop.eup %5289  ;;  %v3415_v40 = vmul.f32 %v5288_v41, %v5282_v2 }
 0xd02   :  { %v5292_v6 = vpop.eup %5291 }
 0xd03   :  { %v5294_v44 = vpop.eup %5293  ;;  %v3413_v46 = vmul.f32 %v5292_v6, %v6651_v16 }
 0xd04   :  { %v3416_v47 = vmul.f32 %v5294_v44, %v5290_v42  ;;  %v5296_v20 = vpop.eup %5295 }
 0xd05   :  { %v6703_v26 = vadd.f32 %v3415_v40, %v3413_v46  ;;  %v3414_v59 = vmul.f32 %v5296_v20, %v6655_v36  ;;  %v5298_v35 = vpop.eup %5297  ;;  %v6713_v36 = vld [vmem:[#allocation12 + $0x108] ss:$16 sps:$4 sm:$0xff]  }
 0xd07   :  { %5299 = vtanh.f32 %v6703_v26  ;;  %v6707_v23 = vadd.f32 %v3416_v47, %v3414_v59 }
 0xd08   :  { %5301 = vrcp.f32 %v3398_v24 }
 0xd09   :  { %5303 = vtanh.f32 %v6707_v23 }
 0xd11   :  { %v5300_v17 = vpop.eup %5299 }
 0xd12   :  { %v5302_v34 = vpop.eup %5301  ;;  %v3421_v16 = vmul.f32 %v5300_v17, %v5298_v35 }
 0xd13   :  { %v5304_v37 = vpop.eup %5303 }
 0xd14   :  { %v3422_v38 = vmul.f32 %v5304_v37, %v5302_v34 }
 0xd16   :  { %v3431_v12 = vpack.c.bf16 %v3422_v38, %v3421_v16 }
 0xd18   :  { %3465 = vmatmul.mubr.bf16.vlgmr.msra.gmra.mrb[48].mxu0 %v3431_v12  ;;  %3508 = vmatmul.mubr.bf16.vlgmr.msra.gmra.mrb[48].mxu1 %v3431_v12 }
 0xd19   :  { %3584 = vmatpush1.bf16.msra.mxu0 %v6710_v62  ;;  %3627 = vmatpush1.bf16.msra.mxu1 %v6713_v36 }
 0xd1a   :  { %3585 = vmatprep.subr.bf16.mxu0 %v6716_v49  ;;  %3628 = vmatprep.subr.bf16.mxu1 %v6719_v10 }
 0xd1b   :  { %3615 = vmatprep.mubr.bf16.mxu0 %v5646_v0  ;;  %3658 = vmatprep.mubr.bf16.mxu1 %v5646_v0 }
 0xd1d   :  { %3586 = vmatpush1.bf16.msra.mxu0 %v6724_v39  ;;  %3629 = vmatpush1.bf16.msra.mxu1 %v6727_v29 }
 0xd1e   :  { %3587 = vmatprep.subr.bf16.mxu0 %v6730_v31  ;;  %3630 = vmatprep.subr.bf16.mxu1 %v6733_v4 }
 0xd21   :  { %3588 = vmatpush1.bf16.msra.mxu0 %v6736_v25  ;;  %3631 = vmatpush1.bf16.msra.mxu1 %v6739_v52 }
 0xd22   :  { %3589 = vmatprep.subr.bf16.mxu0 %v6742_v53  ;;  %3632 = vmatprep.subr.bf16.mxu1 %v6745_v57 }
 0xd25   :  { %3590 = vmatpush1.bf16.msra.mxu0 %v6748_v19  ;;  %3633 = vmatpush1.bf16.msra.mxu1 %v6751_v60 }
 0xd26   :  { %3591 = vmatprep.subr.bf16.mxu0 %v6754_v3  ;;  %3634 = vmatprep.subr.bf16.mxu1 %v6757_v63 }
 0xd29   :  { %3592 = vmatpush1.bf16.msra.mxu0 %v6760_v50  ;;  %3635 = vmatpush1.bf16.msra.mxu1 %v6763_v55 }
 0xd2a   :  { %3593 = vmatprep.subr.bf16.mxu0 %v6766_v54  ;;  %3636 = vmatprep.subr.bf16.mxu1 %v6769_v30 }
 0xd2d   :  { %3594 = vmatpush1.bf16.msra.mxu0 %v6772_v15  ;;  %3637 = vmatpush1.bf16.msra.mxu1 %v6775_v11 }
 0xd2e   :  { %3595 = vmatprep.subr.bf16.mxu0 %v6778_v22  ;;  %3638 = vmatprep.subr.bf16.mxu1 %v6781_v28 }
 0xd31   :  { %3596 = vmatpush1.bf16.msra.mxu0 %v6784_v8  ;;  %3639 = vmatpush1.bf16.msra.mxu1 %v6787_v51 }
 0xd32   :  { %3597 = vmatprep.subr.bf16.mxu0 %v6790_v7  ;;  %3640 = vmatprep.subr.bf16.mxu1 %v6793_v18 }
 0xd35   :  { %3598 = vmatpush1.bf16.msra.mxu0 %v6796_v43  ;;  %3641 = vmatpush1.bf16.msra.mxu1 %v6799_v14 }
 0xd36   :  { %3734 = vmatprep.subr.bf16.mxu0 %v6690_v56  ;;  %3777 = vmatprep.subr.bf16.mxu1 %v6803_v9 }
 0xdeb   :  { %v3466_v13 = vpop.f32.mrb[48].mxu0  ;;  %v3509_v61 = vpop.f32.mrb[48].mxu1 }
 0xdec   :  { %v4521_v21 = vadd.f32 %v3466_v13, %v6530_v58  ;;  %v3468_v27 = vpop.f32.mrb[49].mxu0  ;;  %v3511_v2 = vpop.f32.mrb[49].mxu1  ;;  %v4553_v24 = vadd.f32 %v3509_v61, %v6541_v33 }
 0xded   :  { %v4522_v1 = vadd.f32 %v3468_v27, %v6534_v5  ;;  %v3470_v32 = vpop.f32.mrb[50].mxu0  ;;  %v3513_v41 = vpop.f32.mrb[50].mxu1  ;;  %v4554_v35 = vadd.f32 %v3511_v2, %v6546_v48 }
 0xdee   :  { %v4379_v42 = vmul.f32 -1.442695, %v4521_v21  ;;  %v4523_v40 = vadd.f32 %v3470_v32, %v6530_v58  ;;  %v3472_v6 = vpop.f32.mrb[51].mxu0  ;;  %v3515_v44 = vpop.f32.mrb[51].mxu1  ;;  %v4555_v59 = vadd.f32 %v3513_v41, %v6541_v33  ;;  %v4381_v17 = vmul.f32 -1.442695, %v4553_v24 }
 0xdef   :  { %v4380_v45 = vmul.f32 -1.442695, %v4522_v1  ;;  %v4524_v46 = vadd.f32 %v3472_v6, %v6534_v5  ;;  %v4556_v16 = vadd.f32 %v3515_v44, %v6546_v48 }
 0xdf0   :  { %5305 = vpow2.f32 %v4379_v42  ;;  %v4382_v47 = vmul.f32 -1.442695, %v4523_v40  ;;  %v4384_v34 = vmul.f32 -1.442695, %v4555_v59 }
 0xdf1   :  { %v4383_v20 = vmul.f32 -1.442695, %v4524_v46  ;;  %5307 = vpow2.f32 %v4380_v45 }
 0xdf2   :  { %5309 = vpow2.f32 %v4382_v47 }
 0xdf3   :  { %5311 = vpow2.f32 %v4383_v20 }
 0xdf4   :  { %5313 = vtanh.f32 %v4554_v35 }
 0xdf5   :  { %5315 = vpow2.f32 %v4381_v17 }
 0xdf6   :  { %5317 = vpow2.f32 %v4384_v34 }
 0xdfa   :  { %v5306_v37 = vpop.eup %5305 }
 0xdfb   :  { %v3544_v38 = vadd.f32 1.0, %v5306_v37  ;;  %v5308_v12 = vpop.eup %5307 }
 0xdfc   :  { %v5310_v13 = vpop.eup %5309  ;;  %v3545_v21 = vadd.f32 1.0, %v5308_v12 }
 0xdfd   :  { %5319 = vrcp.f32 %v3544_v38  ;;  %v3547_v61 = vadd.f32 1.0, %v5310_v13  ;;  %v5312_v27 = vpop.eup %5311 }
 0xdfe   :  { %5321 = vtanh.f32 %v4556_v16  ;;  %v3548_v1 = vadd.f32 1.0, %v5312_v27  ;;  %v5314_v2 = vpop.eup %5313 }
 0xdff   :  { %5323 = vrcp.f32 %v3545_v21  ;;  %v5316_v32 = vpop.eup %5315 }
 0xe00   :  { %5325 = vrcp.f32 %v3547_v61  ;;  %v5318_v41 = vpop.eup %5317  ;;  %v3546_v46 = vadd.f32 1.0, %v5316_v32 }
 0xe01   :  { %5327 = vrcp.f32 %v3548_v1  ;;  %v3549_v35 = vadd.f32 1.0, %v5318_v41 }
 0xe02   :  { %5329 = vrcp.f32 %v3546_v46 }
 0xe07   :  { %v5320_v42 = vpop.eup %5319 }
 0xe08   :  { %v5322_v40 = vpop.eup %5321  ;;  %v3566_v6 = vmul.f32 %v5320_v42, %v5314_v2 }
 0xe09   :  { %v5324_v44 = vpop.eup %5323 }
 0xe0a   :  { %v5326_v45 = vpop.eup %5325  ;;  %v3564_v47 = vmul.f32 %v5324_v44, %v6703_v26 }
 0xe0b   :  { %v3567_v20 = vmul.f32 %v5326_v45, %v5322_v40  ;;  %v5328_v24 = vpop.eup %5327 }
 0xe0c   :  { %v6815_v59 = vadd.f32 %v3566_v6, %v3564_v47  ;;  %v3565_v17 = vmul.f32 %v5328_v24, %v6707_v23  ;;  %v5330_v37 = vpop.eup %5329 }
 0xe0e   :  { %5331 = vtanh.f32 %v6815_v59  ;;  %v6819_v34 = vadd.f32 %v3567_v20, %v3565_v17 }
 0xe0f   :  { %5333 = vrcp.f32 %v3549_v35 }
 0xe10   :  { %5335 = vtanh.f32 %v6819_v34 }
 0xe18   :  { %v5332_v16 = vpop.eup %5331 }
 0xe19   :  { %v5334_v38 = vpop.eup %5333  ;;  %v3572_v26 = vmul.f32 %v5332_v16, %v5330_v37 }
 0xe1a   :  { %v5336_v12 = vpop.eup %5335 }
 0xe1b   :  { %v3573_v13 = vmul.f32 %v5336_v12, %v5334_v38 }
 0xe1d   :  { %v3582_v21 = vpack.c.bf16 %v3573_v13, %v3572_v26 }
 0xe1f   :  { %3616 = vmatmul.mubr.bf16.vlgmr.msra.gmra.mrb[52].mxu0 %v3582_v21  ;;  %3659 = vmatmul.mubr.bf16.vlgmr.msra.gmra.mrb[52].mxu1 %v3582_v21 }
 0xe20   :  { %3735 = vmatpush1.bf16.msra.mxu0 %v6710_v62  ;;  %3778 = vmatpush1.bf16.msra.mxu1 %v6713_v36 }
 0xe21   :  { %3736 = vmatprep.subr.bf16.mxu0 %v6716_v49  ;;  %3779 = vmatprep.subr.bf16.mxu1 %v6719_v10 }
 0xe22   :  { %3766 = vmatprep.mubr.bf16.mxu0 %v5646_v0  ;;  %3809 = vmatprep.mubr.bf16.mxu1 %v5646_v0 }
 0xe24   :  { %3737 = vmatpush1.bf16.msra.mxu0 %v6724_v39  ;;  %3780 = vmatpush1.bf16.msra.mxu1 %v6727_v29 }
 0xe25   :  { %3738 = vmatprep.subr.bf16.mxu0 %v6730_v31  ;;  %3781 = vmatprep.subr.bf16.mxu1 %v6733_v4 }
 0xe28   :  { %3739 = vmatpush1.bf16.msra.mxu0 %v6736_v25  ;;  %3782 = vmatpush1.bf16.msra.mxu1 %v6739_v52 }
 0xe29   :  { %3740 = vmatprep.subr.bf16.mxu0 %v6742_v53  ;;  %3783 = vmatprep.subr.bf16.mxu1 %v6745_v57 }
 0xe2c   :  { %3741 = vmatpush1.bf16.msra.mxu0 %v6748_v19  ;;  %3784 = vmatpush1.bf16.msra.mxu1 %v6751_v60 }
 0xe2d   :  { %3742 = vmatprep.subr.bf16.mxu0 %v6754_v3  ;;  %3785 = vmatprep.subr.bf16.mxu1 %v6757_v63 }
 0xe30   :  { %3743 = vmatpush1.bf16.msra.mxu0 %v6760_v50  ;;  %3786 = vmatpush1.bf16.msra.mxu1 %v6763_v55 }
 0xe31   :  { %3744 = vmatprep.subr.bf16.mxu0 %v6766_v54  ;;  %3787 = vmatprep.subr.bf16.mxu1 %v6769_v30 }
 0xe34   :  { %3745 = vmatpush1.bf16.msra.mxu0 %v6772_v15  ;;  %3788 = vmatpush1.bf16.msra.mxu1 %v6775_v11 }
 0xe35   :  { %3746 = vmatprep.subr.bf16.mxu0 %v6778_v22  ;;  %3789 = vmatprep.subr.bf16.mxu1 %v6781_v28 }
 0xe38   :  { %3747 = vmatpush1.bf16.msra.mxu0 %v6784_v8  ;;  %3790 = vmatpush1.bf16.msra.mxu1 %v6787_v51 }
 0xe39   :  { %3748 = vmatprep.subr.bf16.mxu0 %v6790_v7  ;;  %3791 = vmatprep.subr.bf16.mxu1 %v6793_v18 }
 0xe3c   :  { %3749 = vmatpush1.bf16.msra.mxu0 %v6796_v43  ;;  %3792 = vmatpush1.bf16.msra.mxu1 %v6799_v14 }
 0xe3d   :  { %3885 = vmatprep.subr.bf16.mxu0 %v6690_v56  ;;  %3928 = vmatprep.subr.bf16.mxu1 %v6803_v9 }
 0xef2   :  { %v3617_v23 = vpop.f32.mrb[52].mxu0  ;;  %v3660_v61 = vpop.f32.mrb[52].mxu1 }
 0xef3   :  { %v4525_v27 = vadd.f32 %v3617_v23, %v6530_v58  ;;  %v3619_v1 = vpop.f32.mrb[53].mxu0  ;;  %v3662_v2 = vpop.f32.mrb[53].mxu1  ;;  %v4557_v20 = vadd.f32 %v3660_v61, %v6541_v33 }
 0xef4   :  { %v4526_v32 = vadd.f32 %v3619_v1, %v6534_v5  ;;  %v3621_v41 = vpop.f32.mrb[54].mxu0  ;;  %v3664_v42 = vpop.f32.mrb[54].mxu1  ;;  %v4558_v35 = vadd.f32 %v3662_v2, %v6546_v48 }
 0xef5   :  { %v4385_v40 = vmul.f32 -1.442695, %v4525_v27  ;;  %v4527_v6 = vadd.f32 %v3621_v41, %v6530_v58  ;;  %v3623_v44 = vpop.f32.mrb[55].mxu0  ;;  %v3666_v45 = vpop.f32.mrb[55].mxu1  ;;  %v4559_v24 = vadd.f32 %v3664_v42, %v6541_v33  ;;  %v4387_v17 = vmul.f32 -1.442695, %v4557_v20 }
 0xef6   :  { %v4386_v46 = vmul.f32 -1.442695, %v4526_v32  ;;  %v4528_v56 = vadd.f32 %v3623_v44, %v6534_v5  ;;  %v4560_v38 = vadd.f32 %v3666_v45, %v6546_v48 }
 0xef7   :  { %5337 = vpow2.f32 %v4385_v40  ;;  %v4388_v9 = vmul.f32 -1.442695, %v4527_v6  ;;  %v4390_v37 = vmul.f32 -1.442695, %v4559_v24 }
 0xef8   :  { %v4389_v47 = vmul.f32 -1.442695, %v4528_v56  ;;  %5339 = vpow2.f32 %v4386_v46 }
 0xef9   :  { %5341 = vpow2.f32 %v4388_v9 }
 0xefa   :  { %5343 = vpow2.f32 %v4389_v47 }
 0xefb   :  { %5345 = vtanh.f32 %v4558_v35 }
 0xefc   :  { %5347 = vpow2.f32 %v4387_v17 }
 0xefd   :  { %5349 = vpow2.f32 %v4390_v37 }
 0xf01   :  { %v5338_v16 = vpop.eup %5337 }
 0xf02   :  { %v3695_v12 = vadd.f32 1.0, %v5338_v16  ;;  %v5340_v26 = vpop.eup %5339 }
 0xf03   :  { %v5342_v13 = vpop.eup %5341  ;;  %v3696_v21 = vadd.f32 1.0, %v5340_v26 }
 0xf04   :  { %5351 = vrcp.f32 %v3695_v12  ;;  %v3698_v23 = vadd.f32 1.0, %v5342_v13  ;;  %v5344_v61 = vpop.eup %5343 }
 0xf05   :  { %5353 = vtanh.f32 %v4560_v38  ;;  %v3699_v27 = vadd.f32 1.0, %v5344_v61  ;;  %v5346_v1 = vpop.eup %5345 }
 0xf06   :  { %5355 = vrcp.f32 %v3696_v21  ;;  %v5348_v2 = vpop.eup %5347 }
 0xf07   :  { %5357 = vrcp.f32 %v3698_v23  ;;  %v5350_v32 = vpop.eup %5349  ;;  %v3697_v45 = vadd.f32 1.0, %v5348_v2 }
 0xf08   :  { %5359 = vrcp.f32 %v3699_v27  ;;  %v3700_v20 = vadd.f32 1.0, %v5350_v32 }
 0xf09   :  { %5361 = vrcp.f32 %v3697_v45 }
 0xf0e   :  { %v5352_v41 = vpop.eup %5351 }
 0xf0f   :  { %v5354_v42 = vpop.eup %5353  ;;  %v3717_v40 = vmul.f32 %v5352_v41, %v5346_v1 }
 0xf10   :  { %v5356_v6 = vpop.eup %5355 }
 0xf11   :  { %v5358_v44 = vpop.eup %5357  ;;  %v3715_v46 = vmul.f32 %v5356_v6, %v6815_v59 }
 0xf12   :  { %v3718_v56 = vmul.f32 %v5358_v44, %v5354_v42  ;;  %v5360_v9 = vpop.eup %5359 }
 0xf13   :  { %v6865_v47 = vadd.f32 %v3717_v40, %v3715_v46  ;;  %v3716_v24 = vmul.f32 %v5360_v9, %v6819_v34  ;;  %v5362_v17 = vpop.eup %5361 }
 0xf15   :  { %5363 = vtanh.f32 %v6865_v47  ;;  %v6869_v35 = vadd.f32 %v3718_v56, %v3716_v24 }
 0xf16   :  { %5365 = vrcp.f32 %v3700_v20 }
 0xf17   :  { %5367 = vtanh.f32 %v6869_v35 }
 0xf1f   :  { %v5364_v37 = vpop.eup %5363 }
 0xf20   :  { %v5366_v16 = vpop.eup %5365  ;;  %v3723_v59 = vmul.f32 %v5364_v37, %v5362_v17  ;;  %v4913_v37 = vld [vmem:[#allocation14] sm:$0xff]  }
 0xf21   :  { %v5368_v38 = vpop.eup %5367 }
 0xf22   :  { %v3724_v12 = vmul.f32 %v5368_v38, %v5366_v16  ;;  %v5648_v16 = vmov 0.0   ;;  %v4915_v38 = vld [vmem:[#allocation14 + $0x10] sm:$0xff]  }
 0xf24   :  { %v3733_v26 = vpack.c.bf16 %v3724_v12, %v3723_v59  ;;  %v4916_v59 = vld [vmem:[#allocation14 + $0x18] sm:$0xff]   ;;  %v4917_v12 = vld [vmem:[#allocation14 + $0x20] sm:$0xff]  }
 0xf26   :  { %3767 = vmatmul.mubr.bf16.vlgmr.msra.gmra.mrb[56].mxu0 %v3733_v26  ;;  %3810 = vmatmul.mubr.bf16.vlgmr.msra.gmra.mrb[56].mxu1 %v3733_v26  ;;  %v4918_v26 = vld [vmem:[#allocation14 + $0x28] sm:$0xff]  }
 0xf27   :  { %3886 = vmatpush1.bf16.msra.mxu0 %v6710_v62  ;;  %3929 = vmatpush1.bf16.msra.mxu1 %v6713_v36 }
 0xf28   :  { %3887 = vmatprep.subr.bf16.mxu0 %v6716_v49  ;;  %3930 = vmatprep.subr.bf16.mxu1 %v6719_v10 }
 0xf29   :  { %3917 = vmatprep.mubr.bf16.mxu0 %v5646_v0  ;;  %3960 = vmatprep.mubr.bf16.mxu1 %v5646_v0 }
 0xf2b   :  { %3888 = vmatpush1.bf16.msra.mxu0 %v6724_v39  ;;  %3931 = vmatpush1.bf16.msra.mxu1 %v6727_v29 }
 0xf2c   :  { %3889 = vmatprep.subr.bf16.mxu0 %v6730_v31  ;;  %3932 = vmatprep.subr.bf16.mxu1 %v6733_v4 }
 0xf2f   :  { %3890 = vmatpush1.bf16.msra.mxu0 %v6736_v25  ;;  %3933 = vmatpush1.bf16.msra.mxu1 %v6739_v52 }
 0xf30   :  { %3891 = vmatprep.subr.bf16.mxu0 %v6742_v53  ;;  %3934 = vmatprep.subr.bf16.mxu1 %v6745_v57 }
 0xf33   :  { %3892 = vmatpush1.bf16.msra.mxu0 %v6748_v19  ;;  %3935 = vmatpush1.bf16.msra.mxu1 %v6751_v60 }
 0xf34   :  { %3893 = vmatprep.subr.bf16.mxu0 %v6754_v3  ;;  %3936 = vmatprep.subr.bf16.mxu1 %v6757_v63 }
 0xf37   :  { %3894 = vmatpush1.bf16.msra.mxu0 %v6760_v50  ;;  %3937 = vmatpush1.bf16.msra.mxu1 %v6763_v55 }
 0xf38   :  { %3895 = vmatprep.subr.bf16.mxu0 %v6766_v54  ;;  %3938 = vmatprep.subr.bf16.mxu1 %v6769_v30 }
 0xf3b   :  { %3896 = vmatpush1.bf16.msra.mxu0 %v6772_v15  ;;  %3939 = vmatpush1.bf16.msra.mxu1 %v6775_v11 }
 0xf3c   :  { %3897 = vmatprep.subr.bf16.mxu0 %v6778_v22  ;;  %3940 = vmatprep.subr.bf16.mxu1 %v6781_v28 }
 0xf3f   :  { %3898 = vmatpush1.bf16.msra.mxu0 %v6784_v8  ;;  %3941 = vmatpush1.bf16.msra.mxu1 %v6787_v51 }
 0xf40   :  { %3899 = vmatprep.subr.bf16.mxu0 %v6790_v7  ;;  %3942 = vmatprep.subr.bf16.mxu1 %v6793_v18 }
 0xf43   :  { %3900 = vmatpush1.bf16.msra.mxu0 %v6796_v43  ;;  %3943 = vmatpush1.bf16.msra.mxu1 %v6799_v14 }
 0xf44   :  { %4421 = vmatprep.subr.bf16.mxu0 %v5648_v16 }
 0xff9   :  { %v3768_v0 = vpop.f32.mrb[56].mxu0  ;;  %v3811_v62 = vpop.f32.mrb[56].mxu1 }
 0xffa   :  { %v4529_v36 = vadd.f32 %v3768_v0, %v6530_v58  ;;  %v3770_v49 = vpop.f32.mrb[57].mxu0  ;;  %v3813_v10 = vpop.f32.mrb[57].mxu1  ;;  %v4561_v63 = vadd.f32 %v3811_v62, %v6541_v33  ;;  %v4919_v0 = vld [vmem:[#allocation14 + $0x30] sm:$0xff]   ;;  %v4920_v62 = vld [vmem:[#allocation14 + $0x38] sm:$0xff]  }
 0xffb   :  { %v4530_v39 = vadd.f32 %v3770_v49, %v6534_v5  ;;  %v3772_v29 = vpop.f32.mrb[58].mxu0  ;;  %v3815_v31 = vpop.f32.mrb[58].mxu1  ;;  %v4562_v55 = vadd.f32 %v3813_v10, %v6546_v48 }
 0xffc   :  { %v4391_v4 = vmul.f32 -1.442695, %v4529_v36  ;;  %v4531_v25 = vadd.f32 %v3772_v29, %v6530_v58  ;;  %v3774_v52 = vpop.f32.mrb[59].mxu0  ;;  %v3817_v53 = vpop.f32.mrb[59].mxu1  ;;  %v4563_v50 = vadd.f32 %v3815_v31, %v6541_v33  ;;  %v4393_v54 = vmul.f32 -1.442695, %v4561_v63 }
 0xffd   :  { %v4392_v57 = vmul.f32 -1.442695, %v4530_v39  ;;  %v4532_v19 = vadd.f32 %v3774_v52, %v6534_v5  ;;  %v4564_v11 = vadd.f32 %v3817_v53, %v6546_v48 }
 0xffe   :  { %5369 = vpow2.f32 %v4391_v4  ;;  %v4394_v60 = vmul.f32 -1.442695, %v4531_v25  ;;  %v4396_v30 = vmul.f32 -1.442695, %v4563_v50 }
 0xfff   :  { %v4395_v3 = vmul.f32 -1.442695, %v4532_v19  ;;  %5371 = vpow2.f32 %v4392_v57 }
0x1000   :  { %5373 = vpow2.f32 %v4394_v60 }
0x1001   :  { %5375 = vpow2.f32 %v4395_v3 }
0x1002   :  { %5377 = vtanh.f32 %v4562_v55 }
0x1003   :  { %5379 = vpow2.f32 %v4393_v54 }
0x1004   :  { %5381 = vpow2.f32 %v4396_v30 }
0x1008   :  { %v5370_v15 = vpop.eup %5369 }
0x1009   :  { %v3846_v22 = vadd.f32 1.0, %v5370_v15  ;;  %v5372_v28 = vpop.eup %5371 }
0x100a   :  { %v5374_v8 = vpop.eup %5373  ;;  %v3847_v51 = vadd.f32 1.0, %v5372_v28 }
0x100b   :  { %5383 = vrcp.f32 %v3846_v22  ;;  %v3849_v7 = vadd.f32 1.0, %v5374_v8  ;;  %v5376_v18 = vpop.eup %5375 }
0x100c   :  { %5385 = vtanh.f32 %v4564_v11  ;;  %v3850_v43 = vadd.f32 1.0, %v5376_v18  ;;  %v5378_v14 = vpop.eup %5377 }
0x100d   :  { %5387 = vrcp.f32 %v3847_v51  ;;  %v5380_v34 = vpop.eup %5379 }
0x100e   :  { %5389 = vrcp.f32 %v3849_v7  ;;  %v5382_v13 = vpop.eup %5381  ;;  %v3848_v2 = vadd.f32 1.0, %v5380_v34 }
0x100f   :  { %5391 = vrcp.f32 %v3850_v43  ;;  %v3851_v6 = vadd.f32 1.0, %v5382_v13 }
0x1010   :  { %5393 = vrcp.f32 %v3848_v2 }
0x1015   :  { %v5384_v21 = vpop.eup %5383 }
0x1016   :  { %v5386_v23 = vpop.eup %5385  ;;  %v3868_v61 = vmul.f32 %v5384_v21, %v5378_v14 }
0x1017   :  { %v5388_v27 = vpop.eup %5387 }
0x1018   :  { %v5390_v1 = vpop.eup %5389  ;;  %v3866_v32 = vmul.f32 %v5388_v27, %v6865_v47 }
0x1019   :  { %v3869_v41 = vmul.f32 %v5390_v1, %v5386_v23  ;;  %v5392_v42 = vpop.eup %5391 }
0x101a   :  { %v6913_v40 = vadd.f32 %v3868_v61, %v3866_v32  ;;  %v3867_v44 = vmul.f32 %v5392_v42, %v6869_v35  ;;  %v5394_v46 = vpop.eup %5393  ;;  %v4914_v35 = vld [vmem:[#allocation14 + $0x8] sm:$0xff]  }
0x101c   :  { %5395 = vtanh.f32 %v6913_v40  ;;  %v6917_v45 = vadd.f32 %v3869_v41, %v3867_v44 }
0x101d   :  { %5397 = vrcp.f32 %v3851_v6 }
0x101e   :  { %5399 = vtanh.f32 %v6917_v45 }
0x1026   :  { %v5396_v56 = vpop.eup %5395 }
0x1027   :  { %v5398_v9 = vpop.eup %5397  ;;  %v3874_v47 = vmul.f32 %v5396_v56, %v5394_v46 }
0x1028   :  { %v5400_v20 = vpop.eup %5399 }
0x1029   :  { %v3875_v24 = vmul.f32 %v5400_v20, %v5398_v9 }
0x102b   :  { %v3884_v17 = vpack.c.bf16 %v3875_v24, %v3874_v47 }
0x102d   :  { %3918 = vmatmul.mubr.bf16.vlgmr.msra.gmra.mrb[60].mxu0 %v3884_v17  ;;  %3961 = vmatmul.mubr.bf16.vlgmr.msra.gmra.mrb[60].mxu1 %v3884_v17 }
0x102e   :  { %4422 = vmatpush3.bf16.msra.mxu0 %v4913_v37  ;;  %4437 = vmatprep.mubr.msk.bf16.mxu0 %vm5649_vm0, %v5648_v16 }
0x102f   :  { %4423 = vmatprep.subr.bf16.mxu0 %v5648_v16 }
0x1032   :  { %4424 = vmatpush3.bf16.msra.mxu0 %v4914_v35 }
0x1033   :  { %4425 = vmatprep.subr.bf16.mxu0 %v5648_v16 }
0x1036   :  { %4426 = vmatpush3.bf16.msra.mxu0 %v4915_v38 }
0x1037   :  { %4427 = vmatprep.subr.bf16.mxu0 %v5648_v16 }
0x103a   :  { %4428 = vmatpush3.bf16.msra.mxu0 %v4916_v59 }
0x103b   :  { %4429 = vmatprep.subr.bf16.mxu0 %v5648_v16 }
0x103e   :  { %4430 = vmatpush3.bf16.msra.mxu0 %v4917_v12 }
0x103f   :  { %4431 = vmatprep.subr.bf16.mxu0 %v5648_v16 }
0x1042   :  { %4432 = vmatpush3.bf16.msra.mxu0 %v4918_v26 }
0x1043   :  { %4433 = vmatprep.subr.bf16.mxu0 %v5648_v16 }
0x1046   :  { %4434 = vmatpush3.bf16.msra.mxu0 %v4919_v0 }
0x1047   :  { %4435 = vmatprep.subr.bf16.mxu0 %v5648_v16 }
0x104a   :  { %4436 = vmatpush3.bf16.msra.mxu0 %v4920_v62 }
0x1100   :  { %v3919_v36 = vpop.f32.mrb[60].mxu0  ;;  %v3962_v49 = vpop.f32.mrb[60].mxu1 }
0x1101   :  { %v4533_v10 = vadd.f32 %v3919_v36, %v6530_v58  ;;  %v3921_v39 = vpop.f32.mrb[61].mxu0  ;;  %v3964_v29 = vpop.f32.mrb[61].mxu1  ;;  %v4565_v55 = vadd.f32 %v3962_v49, %v6541_v33 }
0x1102   :  { %v4534_v31 = vadd.f32 %v3921_v39, %v6534_v5  ;;  %v3923_v4 = vpop.f32.mrb[62].mxu0  ;;  %v3966_v25 = vpop.f32.mrb[62].mxu1  ;;  %v4566_v30 = vadd.f32 %v3964_v29, %v6546_v48 }
0x1103   :  { %v4397_v52 = vmul.f32 -1.442695, %v4533_v10  ;;  %v4535_v53 = vadd.f32 %v3923_v4, %v6530_v58  ;;  %v3925_v57 = vpop.f32.mrb[63].mxu0  ;;  %v3968_v19 = vpop.f32.mrb[63].mxu1  ;;  %v4567_v54 = vadd.f32 %v3966_v25, %v6541_v33  ;;  %v4399_v15 = vmul.f32 -1.442695, %v4565_v55 }
0x1104   :  { %v4398_v60 = vmul.f32 -1.442695, %v4534_v31  ;;  %v4536_v3 = vadd.f32 %v3925_v57, %v6534_v5  ;;  %v4568_v22 = vadd.f32 %v3968_v19, %v6546_v48 }
0x1105   :  { %5401 = vpow2.f32 %v4397_v52  ;;  %v4400_v63 = vmul.f32 -1.442695, %v4535_v53  ;;  %v4402_v11 = vmul.f32 -1.442695, %v4567_v54 }
0x1106   :  { %v4401_v50 = vmul.f32 -1.442695, %v4536_v3  ;;  %5403 = vpow2.f32 %v4398_v60 }
0x1107   :  { %5405 = vpow2.f32 %v4400_v63 }
0x1108   :  { %5407 = vpow2.f32 %v4401_v50 }
0x1109   :  { %5409 = vtanh.f32 %v4566_v30 }
0x110a   :  { %5411 = vpow2.f32 %v4399_v15 }
0x110b   :  { %5413 = vpow2.f32 %v4402_v11 }
0x110f   :  { %v5402_v58 = vpop.eup %5401 }
0x1110   :  { %v3997_v28 = vadd.f32 1.0, %v5402_v58  ;;  %v5404_v5 = vpop.eup %5403 }
0x1111   :  { %v5406_v8 = vpop.eup %5405  ;;  %v3998_v51 = vadd.f32 1.0, %v5404_v5 }
0x1112   :  { %5415 = vrcp.f32 %v3997_v28  ;;  %v4000_v7 = vadd.f32 1.0, %v5406_v8  ;;  %v5408_v18 = vpop.eup %5407 }
0x1113   :  { %5417 = vtanh.f32 %v4568_v22  ;;  %v4001_v33 = vadd.f32 1.0, %v5408_v18  ;;  %v5410_v43 = vpop.eup %5409 }
0x1114   :  { %5419 = vrcp.f32 %v3998_v51  ;;  %v5412_v14 = vpop.eup %5411 }
0x1115   :  { %5421 = vrcp.f32 %v4000_v7  ;;  %v5414_v34 = vpop.eup %5413  ;;  %v3999_v61 = vadd.f32 1.0, %v5412_v14 }
0x1116   :  { %5423 = vrcp.f32 %v4001_v33  ;;  %v4002_v42 = vadd.f32 1.0, %v5414_v34 }
0x1117   :  { %5425 = vrcp.f32 %v3999_v61 }
0x111c   :  { %v5416_v13 = vpop.eup %5415 }
0x111d   :  { %v5418_v21 = vpop.eup %5417  ;;  %v4019_v48 = vmul.f32 %v5416_v13, %v5410_v43 }
0x111e   :  { %v5420_v23 = vpop.eup %5419 }
0x111f   :  { %v5422_v27 = vpop.eup %5421  ;;  %v4017_v1 = vmul.f32 %v5420_v23, %v6913_v40  ;;  %v4403_v40 = vld [vmem:[%s6951_s6] ss:$0 sm:$0xff] }
0x1120   :  { %v4020_v2 = vmul.f32 %v5422_v27, %v5418_v21  ;;  %v5424_v32 = vpop.eup %5423 }
0x1121   :  { %v4021_v41 = vadd.f32 %v4019_v48, %v4017_v1  ;;  %v4018_v6 = vmul.f32 %v5424_v32, %v6917_v45  ;;  %v5426_v46 = vpop.eup %5425 }
0x1123   :  { %5427 = vtanh.f32 %v4021_v41  ;;  %v4022_v44 = vadd.f32 %v4020_v2, %v4018_v6 }
0x1124   :  { %5429 = vrcp.f32 %v4002_v42 }
0x1125   :  { %5431 = vtanh.f32 %v4022_v44 }
0x112d   :  { %v5428_v56 = vpop.eup %5427 }
0x112e   :  { %v4025_v9 = vmul.f32 %v5428_v56, %v5426_v46  ;;  %v5430_v20 = vpop.eup %5429 }
0x112f   :  { %v5432_v47 = vpop.eup %5431 }
0x1130   :  { %v4026_v24 = vmul.f32 %v5432_v47, %v5430_v20 }
0x1132   :  { %v4036_v17 = vpack.c.bf16 %v4026_v24, %v4025_v9 }
0x1134   :  { %4438 = vmatmul.mubr.bf16.vlgmr.msra.gmra.mrb[64].mxu0 %v4036_v17 }
0x1207   :  { %v4142_v37 = vpop.f32.mrb[64].mxu0 }
0x1208   :  { %v4143_v45 = vadd.f32 %v4403_v40, %v4142_v37  ;;  %v4439_v16 = vpop.f32.mrb[65].mxu0 }
0x1209   :  { %v4145_v35 = vpop.f32.mrb[66].mxu0 }
0x120a   :  { %4149 = vst [vmem:[#allocation15] sm:$0xff] %v4143_v45  ;;  %v4146_v38 = vadd.f32 %v4403_v40, %v4145_v35  ;;  %v4440_v59 = vpop.f32.mrb[67].mxu0 }
0x120c   :  { %4150 = vst [vmem:[#allocation15 + $0x8] sm:$0xff] %v4146_v38 }
0x120d   :  { %5618 = shalt.err (!%p5615_p2)
}
0x120e   :  { %s5619_s24 = scalar_lea.hbm %s6952_s7, 256 }
0x120f   :  { %p5620_p3 = scmp.ne.s32.totalorder %s6952_s7, %s5619_s24  ;;  %p5623_p4 = scmp.lt.u32.totalorder %s5619_s24, %s6952_s7 }
0x1211   :  { %p5625_p5 = pnand %p5623_p4, %p5620_p3 }
0x1213   :  { %5628 = shalt.err (!%p5625_p5)
}
0x1214   :  { %s5651_s28 = smov 128   ;;  %s5652_s0 = smov 8  }
0x1215   :  { %4162 = dma.vmem_to_hbm [thread:$0]  %s4157_s21, 256, %s6952_s7, [#allocation8], %s5651_s28, %s5651_s28, %s5652_s0  }
0x1216   :  { %5635 = dma.done.wait [#allocation8], 256  }
0x1217   :  { %5636 = vsyncadd [#allocation8], 4294967040 }
0x1218   :  { %4166 = vsyncpa [#allocation7], 1 }
0x1219   :  { %4167 = vsyncpa [#allocation10], 1 }
0x121a   :  { %4168 = vsyncpa [#allocation13], 1 }
0x121b   :  { %4169 = vsyncpa [#allocation8], 1 }

</bundles_post_ra>
